<compile_context>
chip_gen: v6e
topology: v6e:2x2x1
jax: 0.10.0
libtpu: 0.0.40
codegen_flags: <defaults>
</compile_context>

<pallas_src>
import functools

import jax
import jax.numpy as jnp
from jax.experimental import pallas as pl
from jax.experimental.pallas import tpu as pltpu

_EPS = 1e-5
_LANES = 128
_VMEM_LIMIT = 32 * 1024 * 1024  # safe scoped-VMEM budget on v5e/v6e/v7x


def _round_up(x, m):
    return (x + m - 1) // m * m


def _row_block(rows, max_rows=1024):
    """Largest multiple-of-8 divisor of `rows` not exceeding max_rows."""
    tr = min(rows, max_rows)
    tr -= tr % 8
    while tr >= 8:
        if rows % tr == 0:
            return tr
        tr -= 8
    return rows  # fall back to the full (untiled) extent


# --------------------------------------------------------------------------
# Pass 1: conv1 over the extended (H+2, W+2) region + masked BN1 partials.
# --------------------------------------------------------------------------
def _conv1_kernel(x_ref, w_ref, b_ref, mask_ref, y_ref, s_ref, q_ref):
    """x_ref:(1,H+4,W+4,Cpi)  w_ref:(9*Cpi,Cpo)  b_ref:(1,Cpo)
    mask_ref:((H+2)*(W+2),1)  y_ref:(1,(H+2)*(W+2),Cpo)  s/q_ref:(1,1,Cpo)."""
    _, hp4, wp4, cpi = x_ref.shape
    he, we = hp4 - 2, wp4 - 2                  # extended output region H+2,W+2
    x = x_ref[0]                               # (H+4, W+4, Cpi)
    # im2col: 9 shifted views concatenated along the (lane-dense) channel axis,
    # then ONE reshape + ONE big MXU matmul with K = 9*Cpi.
    cols = [x[dy:dy + he, dx:dx + we, :]
            for dy in range(3) for dx in range(3)]
    patches = jnp.concatenate(cols, axis=-1).reshape(he * we, 9 * cpi)
    acc = jnp.dot(patches, w_ref[...],
                  preferred_element_type=jnp.float32) + b_ref[...]
    m = mask_ref[...]                          # 1.0 interior / 0.0 border
    am = acc * m
    y_ref[0] = acc                             # raw conv1 (pre-BN), flat rows
    s_ref[0] = jnp.sum(am, axis=0, keepdims=True)           # masked sum
    q_ref[0] = jnp.sum(am * acc, axis=0, keepdims=True)     # masked sum of sq


# --------------------------------------------------------------------------
# Pass 2: apply BN1 (precomputed affine) + ReLU + conv2 + BN2 partials.
# --------------------------------------------------------------------------
def _conv2_kernel(y1_ref, sc_ref, sh_ref, mask_ref, w_ref, b_ref,
                  y2_ref, s_ref, q_ref, *, height, width):
    cpo = y1_ref.shape[-1]
    he, we = height + 2, width + 2
    y1 = y1_ref[0]                                           # (He*We, Cpo)
    # BN1 as y*scale+shift, ReLU, then the interior mask zeroes the 1-pixel
    # border -- exactly conv2's zero padding (no padded scratch buffer).
    act = jnp.maximum(y1 * sc_ref[...] + sh_ref[...], 0.0) * mask_ref[...]
    act = act.reshape(he, we, cpo)
    cols = [act[dy:dy + height, dx:dx + width, :]
            for dy in range(3) for dx in range(3)]
    patches = jnp.concatenate(cols, axis=-1).reshape(height * width, 9 * cpo)
    acc = jnp.dot(patches, w_ref[...],
                  preferred_element_type=jnp.float32) + b_ref[...]
    y2_ref[0] = acc
    s_ref[0] = jnp.sum(acc, axis=0, keepdims=True)
    q_ref[0] = jnp.sum(acc * acc, axis=0, keepdims=True)


# --------------------------------------------------------------------------
# Pass 3: apply BN2 + ReLU, tiled over (image, row block).
# --------------------------------------------------------------------------
def _bn_relu_kernel(y_ref, sc_ref, sh_ref, o_ref):
    o_ref[0] = jnp.maximum(y_ref[0] * sc_ref[...] + sh_ref[...], 0.0)


@jax.jit
def double_conv(x_nchw, w1, b1, g1, be1, w2, b2, g2, be2):
    """PyTorch-equivalent DoubleConv forward.  x_nchw: (N, Cin, H, W) f32.
    w1: (3,3,Cin,Cout) HWIO, w2: (3,3,Cout,Cout) HWIO.  Returns NCHW."""
    n, cin, h, w = x_nchw.shape
    cout = w1.shape[-1]
    cpi = _round_up(cin, _LANES)
    cpo = _round_up(cout, _LANES)
    he, we = h + 2, w + 2
    r1, r2 = he * we, h * w
    count = float(n * h * w)

    # ---- XLA-side layout prep: NCHW->NHWC, lane-dense channel pad, spatial
    # ---- pad by 2, im2col weight matrices, interior mask.
    x = jnp.transpose(x_nchw, (0, 2, 3, 1))
    x = jnp.pad(x, ((0, 0), (2, 2), (2, 2), (0, cpi - cin)))

    w1m = jnp.pad(w1, ((0, 0), (0, 0), (0, cpi - cin), (0, cpo - cout)))
    w1m = w1m.reshape(9 * cpi, cpo)
    w2m = jnp.pad(w2, ((0, 0), (0, 0), (0, cpo - cout), (0, cpo - cout)))
    w2m = w2m.reshape(9 * cpo, cpo)
    b1p = jnp.pad(b1, (0, cpo - cout)).reshape(1, cpo)
    b2p = jnp.pad(b2, (0, cpo - cout)).reshape(1, cpo)
    g1p = jnp.pad(g1, (0, cpo - cout)).reshape(1, cpo)
    be1p = jnp.pad(be1, (0, cpo - cout)).reshape(1, cpo)
    g2p = jnp.pad(g2, (0, cpo - cout)).reshape(1, cpo)
    be2p = jnp.pad(be2, (0, cpo - cout)).reshape(1, cpo)

    mask = jnp.pad(jnp.ones((h, w), jnp.float32), ((1, 1), (1, 1)))
    mask = mask.reshape(r1, 1)

    cparams = pltpu.CompilerParams(
        dimension_semantics=("parallel",), vmem_limit_bytes=_VMEM_LIMIT)

    # ---- pass 1: conv1 + BN1 partial stats (grid over images) ----
    y1, s1, q1 = pl.pallas_call(
        _conv1_kernel,
        out_shape=(jax.ShapeDtypeStruct((n, r1, cpo), jnp.float32),
                   jax.ShapeDtypeStruct((n, 1, cpo), jnp.float32),
                   jax.ShapeDtypeStruct((n, 1, cpo), jnp.float32)),
        grid=(n,),
        in_specs=[
            pl.BlockSpec((1, h + 4, w + 4, cpi), lambda i: (i, 0, 0, 0)),
            pl.BlockSpec((9 * cpi, cpo), lambda i: (0, 0)),
            pl.BlockSpec((1, cpo), lambda i: (0, 0)),
            pl.BlockSpec((r1, 1), lambda i: (0, 0)),
        ],
        out_specs=(
            pl.BlockSpec((1, r1, cpo), lambda i: (i, 0, 0)),
            pl.BlockSpec((1, 1, cpo), lambda i: (i, 0, 0)),
            pl.BlockSpec((1, 1, cpo), lambda i: (i, 0, 0)),
        ),
        compiler_params=cparams,
    )(x, w1m, b1p, mask)

    def _bn_affine(s, q, g, be):
        # Global batch stats from per-image partials (two-pass BN), then fold
        # gamma/beta/mean/var into a single per-channel affine.
        mean = jnp.sum(s, axis=0) / count                       # (1, Cpo)
        var = jnp.maximum(jnp.sum(q, axis=0) / count - mean * mean, 0.0)
        scale = g * jax.lax.rsqrt(var + _EPS)
        shift = be - mean * scale
        return scale, shift

    sc1, sh1 = _bn_affine(s1, q1, g1p, be1p)

    # ---- pass 2: BN1 apply + ReLU + conv2 + BN2 partial stats ----
    y2, s2, q2 = pl.pallas_call(
        functools.partial(_conv2_kernel, height=h, width=w),
        out_shape=(jax.ShapeDtypeStruct((n, r2, cpo), jnp.float32),
                   jax.ShapeDtypeStruct((n, 1, cpo), jnp.float32),
                   jax.ShapeDtypeStruct((n, 1, cpo), jnp.float32)),
        grid=(n,),
        in_specs=[
            pl.BlockSpec((1, r1, cpo), lambda i: (i, 0, 0)),
            pl.BlockSpec((1, cpo), lambda i: (0, 0)),
            pl.BlockSpec((1, cpo), lambda i: (0, 0)),
            pl.BlockSpec((r1, 1), lambda i: (0, 0)),
            pl.BlockSpec((9 * cpo, cpo), lambda i: (0, 0)),
            pl.BlockSpec((1, cpo), lambda i: (0, 0)),
        ],
        out_specs=(
            pl.BlockSpec((1, r2, cpo), lambda i: (i, 0, 0)),
            pl.BlockSpec((1, 1, cpo), lambda i: (i, 0, 0)),
            pl.BlockSpec((1, 1, cpo), lambda i: (i, 0, 0)),
        ),
        compiler_params=cparams,
    )(y1, sc1, sh1, mask, w2m, b2p)

    sc2, sh2 = _bn_affine(s2, q2, g2p, be2p)

    # ---- pass 3: BN2 apply + ReLU, tiled over (image, row block) ----
    tr = _row_block(r2)
    y3 = pl.pallas_call(
        _bn_relu_kernel,
        out_shape=jax.ShapeDtypeStruct((n, r2, cpo), jnp.float32),
        grid=(n, r2 // tr),
        in_specs=[
            pl.BlockSpec((1, tr, cpo), lambda i, j: (i, j, 0)),
            pl.BlockSpec((1, cpo), lambda i, j: (0, 0)),
            pl.BlockSpec((1, cpo), lambda i, j: (0, 0)),
        ],
        out_specs=pl.BlockSpec((1, tr, cpo), lambda i, j: (i, j, 0)),
        compiler_params=pltpu.CompilerParams(
            dimension_semantics=("parallel", "parallel"),
            vmem_limit_bytes=_VMEM_LIMIT),
    )(y2, sc2, sh2)

    out = y3.reshape(n, h, w, cpo)[..., :cout]
    return jnp.transpose(out, (0, 3, 1, 2))


def _reference(x_nchw, w1, b1, g1, be1, w2, b2, g2, be2):
    """Pure-JAX reference (NHWC conv + training-mode BN + ReLU)."""
    x = jnp.transpose(x_nchw, (0, 2, 3, 1))

    def conv(x, w, b):
        y = jax.lax.conv_general_dilated(
            x, w, window_strides=(1, 1), padding="SAME",
            dimension_numbers=("NHWC", "HWIO", "NHWC"))
        return y + b.reshape(1, 1, 1, -1)

    def bn_relu(y, g, be):
        mean = jnp.mean(y, axis=(0, 1, 2), keepdims=True)
        var = jnp.mean((y - mean) ** 2, axis=(0, 1, 2), keepdims=True)
        z = (y - mean) * jax.lax.rsqrt(var + _EPS)
        z = z * g.reshape(1, 1, 1, -1) + be.reshape(1, 1, 1, -1)
        return jnp.maximum(z, 0.0)

    y = bn_relu(conv(x, w1, b1), g1, be1)
    y = bn_relu(conv(y, w2, b2), g2, be2)
    return jnp.transpose(y, (0, 3, 1, 2))


if __name__ == "__main__":
    # Small shapes: batch=2, in_channels=4, out_channels=8, spatial=16x16.
    N, Cin, Cout, H, W = 2, 4, 8, 16, 16
    key = jax.random.PRNGKey(0)
    kx, kw1, kb1, kw2, kb2, kg1, kbe1, kg2, kbe2 = jax.random.split(key, 9)

    x = jax.random.normal(kx, (N, Cin, H, W), jnp.float32)

    # Conv weights generated in PyTorch OIHW layout then moved to HWIO.
    w1_oihw = jax.random.normal(kw1, (Cout, Cin, 3, 3), jnp.float32) * 0.1
    w2_oihw = jax.random.normal(kw2, (Cout, Cout, 3, 3), jnp.float32) * 0.1
    w1 = jnp.transpose(w1_oihw, (2, 3, 1, 0))   # (3, 3, Cin, Cout)
    w2 = jnp.transpose(w2_oihw, (2, 3, 1, 0))   # (3, 3, Cout, Cout)
    b1 = jax.random.normal(kb1, (Cout,), jnp.float32) * 0.1
    b2 = jax.random.normal(kb2, (Cout,), jnp.float32) * 0.1

    # BatchNorm affine params (gamma near 1, beta near 0).
    g1 = 1.0 + 0.1 * jax.random.normal(kg1, (Cout,), jnp.float32)
    be1 = 0.1 * jax.random.normal(kbe1, (Cout,), jnp.float32)
    g2 = 1.0 + 0.1 * jax.random.normal(kg2, (Cout,), jnp.float32)
    be2 = 0.1 * jax.random.normal(kbe2, (Cout,), jnp.float32)

    out = jax.block_until_ready(
        double_conv(x, w1, b1, g1, be1, w2, b2, g2, be2))
    ref = jax.block_until_ready(
        _reference(x, w1, b1, g1, be1, w2, b2, g2, be2))

    assert out.shape == (N, Cout, H, W), out.shape
    max_err = float(jnp.max(jnp.abs(out - ref)))
    assert jnp.allclose(out, ref, atol=2e-4, rtol=2e-4), max_err
    print("KERNEL_OK")
</pallas_src>

<mosaic_0001>
module attributes {stable_mosaic.version = 11 : i64} {
  func.func @_conv1_kernel(%arg0: i32, %arg1: memref<1x20x20x128xf32, #tpu.memory_space<vmem>>, %arg2: memref<1152x128xf32, #tpu.memory_space<vmem>>, %arg3: memref<1x128xf32, #tpu.memory_space<vmem>>, %arg4: memref<324x1xf32, #tpu.memory_space<vmem>>, %arg5: memref<1x324x128xf32, #tpu.memory_space<vmem>>, %arg6: memref<1x1x128xf32, #tpu.memory_space<vmem>>, %arg7: memref<1x1x128xf32, #tpu.memory_space<vmem>>) attributes {dimension_semantics = [#tpu.dimension_semantics<parallel>], iteration_bounds = array<i64: 2>, scalar_prefetch = 0 : i64, scratch_operands = 0 : i64, tpu.core_type = #tpu.core_type<tc>, window_params = [{transform_indices = @transform_0, window_bounds = array<i64: 1, 20, 20, 128>}, {pipeline_mode = #tpu.pipeline_mode<synchronous>, transform_indices = @transform_1, window_bounds = array<i64: 1152, 128>}, {pipeline_mode = #tpu.pipeline_mode<synchronous>, transform_indices = @transform_2, window_bounds = array<i64: 1, 128>}, {pipeline_mode = #tpu.pipeline_mode<synchronous>, transform_indices = @transform_3, window_bounds = array<i64: 324, 1>}, {transform_indices = @transform_4, window_bounds = array<i64: 1, 324, 128>}, {transform_indices = @transform_5, window_bounds = array<i64: 1, 1, 128>}, {transform_indices = @transform_6, window_bounds = array<i64: 1, 1, 128>}]} {
    %c0 = arith.constant 0 : index
    %c0_0 = arith.constant 0 : index
    %c0_1 = arith.constant 0 : index
    %c0_2 = arith.constant 0 : index
    %0 = vector.load %arg1[%c0, %c0_0, %c0_1, %c0_2] : memref<1x20x20x128xf32, #tpu.memory_space<vmem>>, vector<1x20x20x128xf32>
    %1 = vector.shape_cast %0 : vector<1x20x20x128xf32> to vector<20x20x128xf32>
    %2 = vector.extract_strided_slice %1 {offsets = [0, 0, 0], sizes = [18, 18, 128], strides = [1, 1, 1]} : vector<20x20x128xf32> to vector<18x18x128xf32>
    %3 = vector.extract_strided_slice %1 {offsets = [0, 1, 0], sizes = [18, 18, 128], strides = [1, 1, 1]} : vector<20x20x128xf32> to vector<18x18x128xf32>
    %4 = vector.extract_strided_slice %1 {offsets = [0, 2, 0], sizes = [18, 18, 128], strides = [1, 1, 1]} : vector<20x20x128xf32> to vector<18x18x128xf32>
    %5 = vector.extract_strided_slice %1 {offsets = [1, 0, 0], sizes = [18, 18, 128], strides = [1, 1, 1]} : vector<20x20x128xf32> to vector<18x18x128xf32>
    %6 = vector.extract_strided_slice %1 {offsets = [1, 1, 0], sizes = [18, 18, 128], strides = [1, 1, 1]} : vector<20x20x128xf32> to vector<18x18x128xf32>
    %7 = vector.extract_strided_slice %1 {offsets = [1, 2, 0], sizes = [18, 18, 128], strides = [1, 1, 1]} : vector<20x20x128xf32> to vector<18x18x128xf32>
    %8 = vector.extract_strided_slice %1 {offsets = [2, 0, 0], sizes = [18, 18, 128], strides = [1, 1, 1]} : vector<20x20x128xf32> to vector<18x18x128xf32>
    %9 = vector.extract_strided_slice %1 {offsets = [2, 1, 0], sizes = [18, 18, 128], strides = [1, 1, 1]} : vector<20x20x128xf32> to vector<18x18x128xf32>
    %10 = vector.extract_strided_slice %1 {offsets = [2, 2, 0], sizes = [18, 18, 128], strides = [1, 1, 1]} : vector<20x20x128xf32> to vector<18x18x128xf32>
    %11 = tpu.concatenate %2, %3, %4, %5, %6, %7, %8, %9, %10 in 2 : vector<18x18x128xf32>, vector<18x18x128xf32>, vector<18x18x128xf32>, vector<18x18x128xf32>, vector<18x18x128xf32>, vector<18x18x128xf32>, vector<18x18x128xf32>, vector<18x18x128xf32>, vector<18x18x128xf32> -> vector<18x18x1152xf32>
    %12 = vector.shape_cast %11 : vector<18x18x1152xf32> to vector<324x1152xf32>
    %c0_3 = arith.constant 0 : index
    %c0_4 = arith.constant 0 : index
    %13 = vector.load %arg2[%c0_3, %c0_4] : memref<1152x128xf32, #tpu.memory_space<vmem>>, vector<1152x128xf32>
    %cst = arith.constant dense<0.000000e+00> : vector<324x128xf32>
    %14 = tpu.matmul %12, %13, %cst {dimension_numbers = #tpu.dot_dimension_numbers<[1], [0], [0], [1], [0, 0, 1, 1], [], []>} : vector<324x1152xf32>, vector<1152x128xf32>, vector<324x128xf32> -> vector<324x128xf32>
    %c0_5 = arith.constant 0 : index
    %c0_6 = arith.constant 0 : index
    %15 = vector.load %arg3[%c0_5, %c0_6] : memref<1x128xf32, #tpu.memory_space<vmem>>, vector<1x128xf32>
    %16 = vector.broadcast %15 : vector<1x128xf32> to vector<324x128xf32>
    %17 = arith.addf %14, %16 : vector<324x128xf32>
    %c0_7 = arith.constant 0 : index
    %c0_8 = arith.constant 0 : index
    %18 = vector.load %arg4[%c0_7, %c0_8] : memref<324x1xf32, #tpu.memory_space<vmem>>, vector<324x1xf32>
    %19 = vector.broadcast %18 : vector<324x1xf32> to vector<324x128xf32>
    %20 = arith.mulf %17, %19 : vector<324x128xf32>
    %c0_9 = arith.constant 0 : index
    %c0_10 = arith.constant 0 : index
    %c0_11 = arith.constant 0 : index
    %21 = vector.load %arg5[%c0_9, %c0_10, %c0_11] : memref<1x324x128xf32, #tpu.memory_space<vmem>>, vector<1x324x128xf32>
    %22 = vector.shape_cast %21 : vector<1x324x128xf32> to vector<324x128xf32>
    %23 = vector.shape_cast %17 : vector<324x128xf32> to vector<1x324x128xf32>
    tpu.vector_store %arg5[%c0_9, %c0_10, %c0_11], %23 {strides = array<i32>} : memref<1x324x128xf32, #tpu.memory_space<vmem>>, vector<1x324x128xf32>,
    %cst_12 = arith.constant dense<0.000000e+00> : vector<128xf32>
    %24 = vector.multi_reduction <add>, %20, %cst_12 [0] : vector<324x128xf32> to vector<128xf32>
    %25 = vector.shape_cast %24 : vector<128xf32> to vector<1x128xf32>
    %c0_13 = arith.constant 0 : index
    %c0_14 = arith.constant 0 : index
    %c0_15 = arith.constant 0 : index
    %26 = vector.load %arg6[%c0_13, %c0_14, %c0_15] : memref<1x1x128xf32, #tpu.memory_space<vmem>>, vector<1x1x128xf32>
    %27 = vector.shape_cast %26 : vector<1x1x128xf32> to vector<1x128xf32>
    %28 = vector.shape_cast %25 : vector<1x128xf32> to vector<1x1x128xf32>
    tpu.vector_store %arg6[%c0_13, %c0_14, %c0_15], %28 {strides = array<i32>} : memref<1x1x128xf32, #tpu.memory_space<vmem>>, vector<1x1x128xf32>,
    %29 = arith.mulf %20, %17 : vector<324x128xf32>
    %cst_16 = arith.constant dense<0.000000e+00> : vector<128xf32>
    %30 = vector.multi_reduction <add>, %29, %cst_16 [0] : vector<324x128xf32> to vector<128xf32>
    %31 = vector.shape_cast %30 : vector<128xf32> to vector<1x128xf32>
    %c0_17 = arith.constant 0 : index
    %c0_18 = arith.constant 0 : index
    %c0_19 = arith.constant 0 : index
    %32 = vector.load %arg7[%c0_17, %c0_18, %c0_19] : memref<1x1x128xf32, #tpu.memory_space<vmem>>, vector<1x1x128xf32>
    %33 = vector.shape_cast %32 : vector<1x1x128xf32> to vector<1x128xf32>
    %34 = vector.shape_cast %31 : vector<1x128xf32> to vector<1x1x128xf32>
    tpu.vector_store %arg7[%c0_17, %c0_18, %c0_19], %34 {strides = array<i32>} : memref<1x1x128xf32, #tpu.memory_space<vmem>>, vector<1x1x128xf32>,
    return
  }
  func.func @transform_0(%arg0: i32) -> (i32, i32, i32, i32) {
    %c0_i32 = arith.constant 0 : i32
    %c0_i32_0 = arith.constant 0 : i32
    %c0_i32_1 = arith.constant 0 : i32
    %c0_i32_2 = arith.constant 0 : i32
    return %arg0, %c0_i32, %c0_i32_0, %c0_i32_1 : i32, i32, i32, i32
  }
  func.func @transform_1(%arg0: i32) -> (i32, i32) {
    %c0_i32 = arith.constant 0 : i32
    %c0_i32_0 = arith.constant 0 : i32
    %c0_i32_1 = arith.constant 0 : i32
    return %c0_i32, %c0_i32_0 : i32, i32
  }
  func.func @transform_2(%arg0: i32) -> (i32, i32) {
    %c0_i32 = arith.constant 0 : i32
    %c0_i32_0 = arith.constant 0 : i32
    %c0_i32_1 = arith.constant 0 : i32
    return %c0_i32, %c0_i32_0 : i32, i32
  }
  func.func @transform_3(%arg0: i32) -> (i32, i32) {
    %c0_i32 = arith.constant 0 : i32
    %c0_i32_0 = arith.constant 0 : i32
    %c0_i32_1 = arith.constant 0 : i32
    return %c0_i32, %c0_i32_0 : i32, i32
  }
  func.func @transform_4(%arg0: i32) -> (i32, i32, i32) {
    %c0_i32 = arith.constant 0 : i32
    %c0_i32_0 = arith.constant 0 : i32
    %c0_i32_1 = arith.constant 0 : i32
    return %arg0, %c0_i32, %c0_i32_0 : i32, i32, i32
  }
  func.func @transform_5(%arg0: i32) -> (i32, i32, i32) {
    %c0_i32 = arith.constant 0 : i32
    %c0_i32_0 = arith.constant 0 : i32
    %c0_i32_1 = arith.constant 0 : i32
    return %arg0, %c0_i32, %c0_i32_0 : i32, i32, i32
  }
  func.func @transform_6(%arg0: i32) -> (i32, i32, i32) {
    %c0_i32 = arith.constant 0 : i32
    %c0_i32_0 = arith.constant 0 : i32
    %c0_i32_1 = arith.constant 0 : i32
    return %arg0, %c0_i32, %c0_i32_0 : i32, i32, i32
  }
}

module attributes {stable_mosaic.version = 11 : i64} {
  func.func @_bn_relu_kernel(%arg0: i32, %arg1: i32, %arg2: memref<1x256x128xf32, #tpu.memory_space<vmem>>, %arg3: memref<1x128xf32, #tpu.memory_space<vmem>>, %arg4: memref<1x128xf32, #tpu.memory_space<vmem>>, %arg5: memref<1x256x128xf32, #tpu.memory_space<vmem>>) attributes {dimension_semantics = [#tpu.dimension_semantics<parallel>, #tpu.dimension_semantics<parallel>], iteration_bounds = array<i64: 2, 1>, scalar_prefetch = 0 : i64, scratch_operands = 0 : i64, tpu.core_type = #tpu.core_type<tc>, window_params = [{transform_indices = @transform_0, window_bounds = array<i64: 1, 256, 128>}, {pipeline_mode = #tpu.pipeline_mode<synchronous>, transform_indices = @transform_1, window_bounds = array<i64: 1, 128>}, {pipeline_mode = #tpu.pipeline_mode<synchronous>, transform_indices = @transform_2, window_bounds = array<i64: 1, 128>}, {transform_indices = @transform_3, window_bounds = array<i64: 1, 256, 128>}]} {
    %c0 = arith.constant 0 : index
    %c0_0 = arith.constant 0 : index
    %c0_1 = arith.constant 0 : index
    %0 = vector.load %arg2[%c0, %c0_0, %c0_1] : memref<1x256x128xf32, #tpu.memory_space<vmem>>, vector<1x256x128xf32>
    %1 = vector.shape_cast %0 : vector<1x256x128xf32> to vector<256x128xf32>
    %c0_2 = arith.constant 0 : index
    %c0_3 = arith.constant 0 : index
    %2 = vector.load %arg3[%c0_2, %c0_3] : memref<1x128xf32, #tpu.memory_space<vmem>>, vector<1x128xf32>
    %3 = vector.broadcast %2 : vector<1x128xf32> to vector<256x128xf32>
    %4 = arith.mulf %1, %3 : vector<256x128xf32>
    %c0_4 = arith.constant 0 : index
    %c0_5 = arith.constant 0 : index
    %5 = vector.load %arg4[%c0_4, %c0_5] : memref<1x128xf32, #tpu.memory_space<vmem>>, vector<1x128xf32>
    %6 = vector.broadcast %5 : vector<1x128xf32> to vector<256x128xf32>
    %7 = arith.addf %4, %6 : vector<256x128xf32>
    %cst = arith.constant 0.000000e+00 : f32
    %8 = vector.broadcast %cst : f32 to vector<256x128xf32>
    %9 = arith.maximumf %7, %8 : vector<256x128xf32>
    %c0_6 = arith.constant 0 : index
    %c0_7 = arith.constant 0 : index
    %c0_8 = arith.constant 0 : index
    %10 = vector.load %arg5[%c0_6, %c0_7, %c0_8] : memref<1x256x128xf32, #tpu.memory_space<vmem>>, vector<1x256x128xf32>
    %11 = vector.shape_cast %10 : vector<1x256x128xf32> to vector<256x128xf32>
    %12 = vector.shape_cast %9 : vector<256x128xf32> to vector<1x256x128xf32>
    tpu.vector_store %arg5[%c0_6, %c0_7, %c0_8], %12 {strides = array<i32>} : memref<1x256x128xf32, #tpu.memory_space<vmem>>, vector<1x256x128xf32>,
    return
  }
  func.func @transform_0(%arg0: i32, %arg1: i32) -> (i32, i32, i32) {
    %c0_i32 = arith.constant 0 : i32
    %c0_i32_0 = arith.constant 0 : i32
    return %arg0, %arg1, %c0_i32 : i32, i32, i32
  }
  func.func @transform_1(%arg0: i32, %arg1: i32) -> (i32, i32) {
    %c0_i32 = arith.constant 0 : i32
    %c0_i32_0 = arith.constant 0 : i32
    %c0_i32_1 = arith.constant 0 : i32
    return %c0_i32, %c0_i32_0 : i32, i32
  }
  func.func @transform_2(%arg0: i32, %arg1: i32) -> (i32, i32) {
    %c0_i32 = arith.constant 0 : i32
    %c0_i32_0 = arith.constant 0 : i32
    %c0_i32_1 = arith.constant 0 : i32
    return %c0_i32, %c0_i32_0 : i32, i32
  }
  func.func @transform_3(%arg0: i32, %arg1: i32) -> (i32, i32, i32) {
    %c0_i32 = arith.constant 0 : i32
    %c0_i32_0 = arith.constant 0 : i32
    return %arg0, %arg1, %c0_i32 : i32, i32, i32
  }
}

module attributes {stable_mosaic.version = 11 : i64} {
  func.func @_conv2_kernel(%arg0: i32, %arg1: memref<1x324x128xf32, #tpu.memory_space<vmem>>, %arg2: memref<1x128xf32, #tpu.memory_space<vmem>>, %arg3: memref<1x128xf32, #tpu.memory_space<vmem>>, %arg4: memref<324x1xf32, #tpu.memory_space<vmem>>, %arg5: memref<1152x128xf32, #tpu.memory_space<vmem>>, %arg6: memref<1x128xf32, #tpu.memory_space<vmem>>, %arg7: memref<1x256x128xf32, #tpu.memory_space<vmem>>, %arg8: memref<1x1x128xf32, #tpu.memory_space<vmem>>, %arg9: memref<1x1x128xf32, #tpu.memory_space<vmem>>) attributes {dimension_semantics = [#tpu.dimension_semantics<parallel>], iteration_bounds = array<i64: 2>, scalar_prefetch = 0 : i64, scratch_operands = 0 : i64, tpu.core_type = #tpu.core_type<tc>, window_params = [{transform_indices = @transform_0, window_bounds = array<i64: 1, 324, 128>}, {pipeline_mode = #tpu.pipeline_mode<synchronous>, transform_indices = @transform_1, window_bounds = array<i64: 1, 128>}, {pipeline_mode = #tpu.pipeline_mode<synchronous>, transform_indices = @transform_2, window_bounds = array<i64: 1, 128>}, {pipeline_mode = #tpu.pipeline_mode<synchronous>, transform_indices = @transform_3, window_bounds = array<i64: 324, 1>}, {pipeline_mode = #tpu.pipeline_mode<synchronous>, transform_indices = @transform_4, window_bounds = array<i64: 1152, 128>}, {pipeline_mode = #tpu.pipeline_mode<synchronous>, transform_indices = @transform_5, window_bounds = array<i64: 1, 128>}, {transform_indices = @transform_6, window_bounds = array<i64: 1, 256, 128>}, {transform_indices = @transform_7, window_bounds = array<i64: 1, 1, 128>}, {transform_indices = @transform_8, window_bounds = array<i64: 1, 1, 128>}]} {
    %c0 = arith.constant 0 : index
    %c0_0 = arith.constant 0 : index
    %c0_1 = arith.constant 0 : index
    %0 = vector.load %arg1[%c0, %c0_0, %c0_1] : memref<1x324x128xf32, #tpu.memory_space<vmem>>, vector<1x324x128xf32>
    %1 = vector.shape_cast %0 : vector<1x324x128xf32> to vector<324x128xf32>
    %c0_2 = arith.constant 0 : index
    %c0_3 = arith.constant 0 : index
    %2 = vector.load %arg2[%c0_2, %c0_3] : memref<1x128xf32, #tpu.memory_space<vmem>>, vector<1x128xf32>
    %3 = vector.broadcast %2 : vector<1x128xf32> to vector<324x128xf32>
    %4 = arith.mulf %1, %3 : vector<324x128xf32>
    %c0_4 = arith.constant 0 : index
    %c0_5 = arith.constant 0 : index
    %5 = vector.load %arg3[%c0_4, %c0_5] : memref<1x128xf32, #tpu.memory_space<vmem>>, vector<1x128xf32>
    %6 = vector.broadcast %5 : vector<1x128xf32> to vector<324x128xf32>
    %7 = arith.addf %4, %6 : vector<324x128xf32>
    %cst = arith.constant 0.000000e+00 : f32
    %8 = vector.broadcast %cst : f32 to vector<324x128xf32>
    %9 = arith.maximumf %7, %8 : vector<324x128xf32>
    %c0_6 = arith.constant 0 : index
    %c0_7 = arith.constant 0 : index
    %10 = vector.load %arg4[%c0_6, %c0_7] : memref<324x1xf32, #tpu.memory_space<vmem>>, vector<324x1xf32>
    %11 = vector.broadcast %10 : vector<324x1xf32> to vector<324x128xf32>
    %12 = arith.mulf %9, %11 : vector<324x128xf32>
    %13 = vector.shape_cast %12 : vector<324x128xf32> to vector<18x18x128xf32>
    %14 = vector.extract_strided_slice %13 {offsets = [0, 0, 0], sizes = [16, 16, 128], strides = [1, 1, 1]} : vector<18x18x128xf32> to vector<16x16x128xf32>
    %15 = vector.extract_strided_slice %13 {offsets = [0, 1, 0], sizes = [16, 16, 128], strides = [1, 1, 1]} : vector<18x18x128xf32> to vector<16x16x128xf32>
    %16 = vector.extract_strided_slice %13 {offsets = [0, 2, 0], sizes = [16, 16, 128], strides = [1, 1, 1]} : vector<18x18x128xf32> to vector<16x16x128xf32>
    %17 = vector.extract_strided_slice %13 {offsets = [1, 0, 0], sizes = [16, 16, 128], strides = [1, 1, 1]} : vector<18x18x128xf32> to vector<16x16x128xf32>
    %18 = vector.extract_strided_slice %13 {offsets = [1, 1, 0], sizes = [16, 16, 128], strides = [1, 1, 1]} : vector<18x18x128xf32> to vector<16x16x128xf32>
    %19 = vector.extract_strided_slice %13 {offsets = [1, 2, 0], sizes = [16, 16, 128], strides = [1, 1, 1]} : vector<18x18x128xf32> to vector<16x16x128xf32>
    %20 = vector.extract_strided_slice %13 {offsets = [2, 0, 0], sizes = [16, 16, 128], strides = [1, 1, 1]} : vector<18x18x128xf32> to vector<16x16x128xf32>
    %21 = vector.extract_strided_slice %13 {offsets = [2, 1, 0], sizes = [16, 16, 128], strides = [1, 1, 1]} : vector<18x18x128xf32> to vector<16x16x128xf32>
    %22 = vector.extract_strided_slice %13 {offsets = [2, 2, 0], sizes = [16, 16, 128], strides = [1, 1, 1]} : vector<18x18x128xf32> to vector<16x16x128xf32>
    %23 = tpu.concatenate %14, %15, %16, %17, %18, %19, %20, %21, %22 in 2 : vector<16x16x128xf32>, vector<16x16x128xf32>, vector<16x16x128xf32>, vector<16x16x128xf32>, vector<16x16x128xf32>, vector<16x16x128xf32>, vector<16x16x128xf32>, vector<16x16x128xf32>, vector<16x16x128xf32> -> vector<16x16x1152xf32>
    %24 = vector.shape_cast %23 : vector<16x16x1152xf32> to vector<256x1152xf32>
    %c0_8 = arith.constant 0 : index
    %c0_9 = arith.constant 0 : index
    %25 = vector.load %arg5[%c0_8, %c0_9] : memref<1152x128xf32, #tpu.memory_space<vmem>>, vector<1152x128xf32>
    %cst_10 = arith.constant dense<0.000000e+00> : vector<256x128xf32>
    %26 = tpu.matmul %24, %25, %cst_10 {dimension_numbers = #tpu.dot_dimension_numbers<[1], [0], [0], [1], [0, 0, 1, 1], [], []>} : vector<256x1152xf32>, vector<1152x128xf32>, vector<256x128xf32> -> vector<256x128xf32>
    %c0_11 = arith.constant 0 : index
    %c0_12 = arith.constant 0 : index
    %27 = vector.load %arg6[%c0_11, %c0_12] : memref<1x128xf32, #tpu.memory_space<vmem>>, vector<1x128xf32>
    %28 = vector.broadcast %27 : vector<1x128xf32> to vector<256x128xf32>
    %29 = arith.addf %26, %28 : vector<256x128xf32>
    %c0_13 = arith.constant 0 : index
    %c0_14 = arith.constant 0 : index
    %c0_15 = arith.constant 0 : index
    %30 = vector.load %arg7[%c0_13, %c0_14, %c0_15] : memref<1x256x128xf32, #tpu.memory_space<vmem>>, vector<1x256x128xf32>
    %31 = vector.shape_cast %30 : vector<1x256x128xf32> to vector<256x128xf32>
    %32 = vector.shape_cast %29 : vector<256x128xf32> to vector<1x256x128xf32>
    tpu.vector_store %arg7[%c0_13, %c0_14, %c0_15], %32 {strides = array<i32>} : memref<1x256x128xf32, #tpu.memory_space<vmem>>, vector<1x256x128xf32>,
    %cst_16 = arith.constant dense<0.000000e+00> : vector<128xf32>
    %33 = vector.multi_reduction <add>, %29, %cst_16 [0] : vector<256x128xf32> to vector<128xf32>
    %34 = vector.shape_cast %33 : vector<128xf32> to vector<1x128xf32>
    %c0_17 = arith.constant 0 : index
    %c0_18 = arith.constant 0 : index
    %c0_19 = arith.constant 0 : index
    %35 = vector.load %arg8[%c0_17, %c0_18, %c0_19] : memref<1x1x128xf32, #tpu.memory_space<vmem>>, vector<1x1x128xf32>
    %36 = vector.shape_cast %35 : vector<1x1x128xf32> to vector<1x128xf32>
    %37 = vector.shape_cast %34 : vector<1x128xf32> to vector<1x1x128xf32>
    tpu.vector_store %arg8[%c0_17, %c0_18, %c0_19], %37 {strides = array<i32>} : memref<1x1x128xf32, #tpu.memory_space<vmem>>, vector<1x1x128xf32>,
    %38 = arith.mulf %29, %29 : vector<256x128xf32>
    %cst_20 = arith.constant dense<0.000000e+00> : vector<128xf32>
    %39 = vector.multi_reduction <add>, %38, %cst_20 [0] : vector<256x128xf32> to vector<128xf32>
    %40 = vector.shape_cast %39 : vector<128xf32> to vector<1x128xf32>
    %c0_21 = arith.constant 0 : index
    %c0_22 = arith.constant 0 : index
    %c0_23 = arith.constant 0 : index
    %41 = vector.load %arg9[%c0_21, %c0_22, %c0_23] : memref<1x1x128xf32, #tpu.memory_space<vmem>>, vector<1x1x128xf32>
    %42 = vector.shape_cast %41 : vector<1x1x128xf32> to vector<1x128xf32>
    %43 = vector.shape_cast %40 : vector<1x128xf32> to vector<1x1x128xf32>
    tpu.vector_store %arg9[%c0_21, %c0_22, %c0_23], %43 {strides = array<i32>} : memref<1x1x128xf32, #tpu.memory_space<vmem>>, vector<1x1x128xf32>,
    return
  }
  func.func @transform_0(%arg0: i32) -> (i32, i32, i32) {
    %c0_i32 = arith.constant 0 : i32
    %c0_i32_0 = arith.constant 0 : i32
    %c0_i32_1 = arith.constant 0 : i32
    return %arg0, %c0_i32, %c0_i32_0 : i32, i32, i32
  }
  func.func @transform_1(%arg0: i32) -> (i32, i32) {
    %c0_i32 = arith.constant 0 : i32
    %c0_i32_0 = arith.constant 0 : i32
    %c0_i32_1 = arith.constant 0 : i32
    return %c0_i32, %c0_i32_0 : i32, i32
  }
  func.func @transform_2(%arg0: i32) -> (i32, i32) {
    %c0_i32 = arith.constant 0 : i32
    %c0_i32_0 = arith.constant 0 : i32
    %c0_i32_1 = arith.constant 0 : i32
    return %c0_i32, %c0_i32_0 : i32, i32
  }
  func.func @transform_3(%arg0: i32) -> (i32, i32) {
    %c0_i32 = arith.constant 0 : i32
    %c0_i32_0 = arith.constant 0 : i32
    %c0_i32_1 = arith.constant 0 : i32
    return %c0_i32, %c0_i32_0 : i32, i32
  }
  func.func @transform_4(%arg0: i32) -> (i32, i32) {
    %c0_i32 = arith.constant 0 : i32
    %c0_i32_0 = arith.constant 0 : i32
    %c0_i32_1 = arith.constant 0 : i32
    return %c0_i32, %c0_i32_0 : i32, i32
  }
  func.func @transform_5(%arg0: i32) -> (i32, i32) {
    %c0_i32 = arith.constant 0 : i32
    %c0_i32_0 = arith.constant 0 : i32
    %c0_i32_1 = arith.constant 0 : i32
    return %c0_i32, %c0_i32_0 : i32, i32
  }
  func.func @transform_6(%arg0: i32) -> (i32, i32, i32) {
    %c0_i32 = arith.constant 0 : i32
    %c0_i32_0 = arith.constant 0 : i32
    %c0_i32_1 = arith.constant 0 : i32
    return %arg0, %c0_i32, %c0_i32_0 : i32, i32, i32
  }
  func.func @transform_7(%arg0: i32) -> (i32, i32, i32) {
    %c0_i32 = arith.constant 0 : i32
    %c0_i32_0 = arith.constant 0 : i32
    %c0_i32_1 = arith.constant 0 : i32
    return %arg0, %c0_i32, %c0_i32_0 : i32, i32, i32
  }
  func.func @transform_8(%arg0: i32) -> (i32, i32, i32) {
    %c0_i32 = arith.constant 0 : i32
    %c0_i32_0 = arith.constant 0 : i32
    %c0_i32_1 = arith.constant 0 : i32
    return %arg0, %c0_i32, %c0_i32_0 : i32, i32, i32
  }
}

</mosaic_0001>

<bundles_post_ra>
// kernel: double_conv.5
= control target key start
LH: loop header
LB: loop body
LE: loop exit
PB: predicated region body
PF: predicated region fallthrough
CT: control target
= control target key end

     0   :  { %s554_s12 = smov 0   ;;  %s556_s13 = smov 0   ;;  %s729_s0 = inlined_call_operand.vmem [shape: f32[2,256,128], index: 0, kind: input, shape index: {}]   ;;  %s730_s1 = inlined_call_operand.vmem [shape: f32[1,128], index: 1, kind: input, shape index: {}]   ;;  %s731_s2 = inlined_call_operand.vmem [shape: f32[1,128], index: 2, kind: input, shape index: {}]   ;;  %s732_s3 = inlined_call_operand.vmem [shape: f32[2,256,128], index: 3, kind: output, shape index: {}]  }
   0x1   :  { %s558_s14 = smov 0  }
   0x2 LB: > { %s25_s15 = sadd.s32 1, %s528_s13  ;;  %p475_p0 = scmp.ge.s32.totalorder %s532_s14, 1  ;;  %s532_s14 = sphi %s558_s14, %s13_s14   ;;  %s528_s13 = sphi %s556_s13, %s734_s13   ;;  %s524_s12 = sphi %s554_s12, %s733_s12  }
   0x3   : > { %p27_p1 = scmp.ge.s32.totalorder %s25_s15, 2  ;;  %p158_p2 = scmp.lt.s32.totalorder %s532_s14, 3 }
   0x5   : > { %s736_s15 = smov (%p27_p1, %s25_s15), 0  ;;  %p159_p3 = pnand %p475_p0, %p158_p2 }
   0x6   : > { %p191_p4 = scmp.lt.s32.totalorder (!%p159_p3), %s524_s12, 1 }
   0x7   : > { %162 = sbr.rel (%p159_p3) target bundleno = 45 (0x2d), region = 32 }
   0xc   : > { %s738_s12 = smov (!%p191_p4, %s524_s12), 1  ;;  %v575_v0 = vld [vmem:[%s730_s1] ss:$0 sm:$0xff] }
   0xd   : > { %s484_s16 = sshll.u32 %s738_s12, 8  ;;  %v585_v1 = vld [vmem:[%s731_s2] ss:$0 sm:$0xff] }
   0xe   : > { %s580_s21 = scalar_lea.vmem %s729_s0, %s484_s16  ;;  %s608_s26 = scalar_lea.vmem %s732_s3, %s484_s16 }
   0xf   : > { %v210_v2 = vld [vmem:[%s580_s21] sm:$0xff]  ;;  %v211_v3 = vld [vmem:[%s580_s21 + $0x8] sm:$0xff]  ;;  %v212_v4 = vld [vmem:[%s580_s21 + $0x10] sm:$0xff] }
  0x10   : > { %v249_v5 = vmul.f32 %v575_v0, %v210_v2  ;;  %v250_v6 = vmul.f32 %v575_v0, %v211_v3  ;;  %v251_v7 = vmul.f32 %v575_v0, %v212_v4  ;;  %v213_v8 = vld [vmem:[%s580_s21 + $0x18] sm:$0xff]  ;;  %v214_v9 = vld [vmem:[%s580_s21 + $0x20] sm:$0xff]  ;;  %v215_v10 = vld [vmem:[%s580_s21 + $0x28] sm:$0xff] }
  0x11   : > { %v252_v11 = vmul.f32 %v575_v0, %v213_v8  ;;  %v253_v12 = vmul.f32 %v575_v0, %v214_v9  ;;  %v254_v13 = vmul.f32 %v575_v0, %v215_v10  ;;  %v216_v14 = vld [vmem:[%s580_s21 + $0x30] sm:$0xff]  ;;  %v217_v15 = vld [vmem:[%s580_s21 + $0x38] sm:$0xff]  ;;  %v218_v24 = vld [vmem:[%s580_s21 + $0x40] sm:$0xff] }
  0x12   : > { %v288_v16 = vadd.f32 %v585_v1, %v249_v5  ;;  %v289_v17 = vadd.f32 %v585_v1, %v250_v6  ;;  %v290_v18 = vadd.f32 %v585_v1, %v251_v7  ;;  %v255_v19 = vmul.f32 %v575_v0, %v216_v14  ;;  %v219_v25 = vld [vmem:[%s580_s21 + $0x48] sm:$0xff]  ;;  %v220_v26 = vld [vmem:[%s580_s21 + $0x50] sm:$0xff]  ;;  %v221_v31 = vld [vmem:[%s580_s21 + $0x58] sm:$0xff] }
  0x13   : > { %v291_v20 = vadd.f32 %v585_v1, %v252_v11  ;;  %v292_v21 = vadd.f32 %v585_v1, %v253_v12  ;;  %v293_v22 = vadd.f32 %v585_v1, %v254_v13  ;;  %v256_v23 = vmul.f32 %v575_v0, %v217_v15  ;;  %v222_v32 = vld [vmem:[%s580_s21 + $0x60] sm:$0xff]  ;;  %v223_v33 = vld [vmem:[%s580_s21 + $0x68] sm:$0xff]  ;;  %v224_v38 = vld [vmem:[%s580_s21 + $0x70] sm:$0xff] }
  0x14   : > { %v320_v27 = vmax.f32 %v288_v16, 0.0  ;;  %v321_v28 = vmax.f32 %v289_v17, 0.0  ;;  %v322_v29 = vmax.f32 %v290_v18, 0.0  ;;  %v294_v30 = vadd.f32 %v585_v1, %v255_v19  ;;  %v225_v43 = vld [vmem:[%s580_s21 + $0x78] sm:$0xff]  ;;  %v226_v56 = vld [vmem:[%s580_s21 + $0x80] sm:$0xff]  ;;  %v227_v57 = vld [vmem:[%s580_s21 + $0x88] sm:$0xff] }
  0x15   : > { %v323_v34 = vmax.f32 %v291_v20, 0.0  ;;  %v324_v35 = vmax.f32 %v292_v21, 0.0  ;;  %v325_v36 = vmax.f32 %v293_v22, 0.0  ;;  %v295_v37 = vadd.f32 %v585_v1, %v256_v23  ;;  %v228_v58 = vld [vmem:[%s580_s21 + $0x90] sm:$0xff]  ;;  %v229_v63 = vld [vmem:[%s580_s21 + $0x98] sm:$0xff]  ;;  %v230_v2 = vld [vmem:[%s580_s21 + $0xa0] sm:$0xff] }
  0x16   : > { %352 = vst [vmem:[%s608_s26] sm:$0xff] %v320_v27  ;;  %353 = vst [vmem:[%s608_s26 + $0x8] sm:$0xff] %v321_v28  ;;  %v326_v39 = vmax.f32 %v294_v30, 0.0  ;;  %v257_v40 = vmul.f32 %v575_v0, %v218_v24  ;;  %v258_v41 = vmul.f32 %v575_v0, %v219_v25  ;;  %v259_v42 = vmul.f32 %v575_v0, %v220_v26  ;;  %v231_v3 = vld [vmem:[%s580_s21 + $0xa8] sm:$0xff]  ;;  %v232_v8 = vld [vmem:[%s580_s21 + $0xb0] sm:$0xff] }
  0x17   : > { %354 = vst [vmem:[%s608_s26 + $0x10] sm:$0xff] %v322_v29  ;;  %355 = vst [vmem:[%s608_s26 + $0x18] sm:$0xff] %v323_v34  ;;  %v327_v44 = vmax.f32 %v295_v37, 0.0  ;;  %v260_v45 = vmul.f32 %v575_v0, %v221_v31  ;;  %v261_v46 = vmul.f32 %v575_v0, %v222_v32  ;;  %v262_v47 = vmul.f32 %v575_v0, %v223_v33  ;;  %v233_v13 = vld [vmem:[%s580_s21 + $0xb8] sm:$0xff]  ;;  %v234_v26 = vld [vmem:[%s580_s21 + $0xc0] sm:$0xff] }
  0x18   : > { %356 = vst [vmem:[%s608_s26 + $0x20] sm:$0xff] %v324_v35  ;;  %357 = vst [vmem:[%s608_s26 + $0x28] sm:$0xff] %v325_v36  ;;  %v296_v48 = vadd.f32 %v585_v1, %v257_v40  ;;  %v297_v49 = vadd.f32 %v585_v1, %v258_v41  ;;  %v298_v50 = vadd.f32 %v585_v1, %v259_v42  ;;  %v235_v27 = vld [vmem:[%s580_s21 + $0xc8] sm:$0xff]  ;;  %v236_v28 = vld [vmem:[%s580_s21 + $0xd0] sm:$0xff] }
  0x19   : > { %358 = vst [vmem:[%s608_s26 + $0x30] sm:$0xff] %v326_v39  ;;  %v263_v51 = vmul.f32 %v575_v0, %v224_v38  ;;  %359 = vst [vmem:[%s608_s26 + $0x38] sm:$0xff] %v327_v44  ;;  %v299_v52 = vadd.f32 %v585_v1, %v260_v45  ;;  %v300_v53 = vadd.f32 %v585_v1, %v261_v46  ;;  %v237_v33 = vld [vmem:[%s580_s21 + $0xd8] sm:$0xff]  ;;  %v238_v34 = vld [vmem:[%s580_s21 + $0xe0] sm:$0xff] }
  0x1a   : > { %v301_v54 = vadd.f32 %v585_v1, %v262_v47  ;;  %v264_v55 = vmul.f32 %v575_v0, %v225_v43  ;;  %v328_v59 = vmax.f32 %v296_v48, 0.0  ;;  %v329_v60 = vmax.f32 %v297_v49, 0.0  ;;  %v239_v35 = vld [vmem:[%s580_s21 + $0xe8] sm:$0xff]  ;;  %v240_v40 = vld [vmem:[%s580_s21 + $0xf0] sm:$0xff]  ;;  %v241_v45 = vld [vmem:[%s580_s21 + $0xf8] sm:$0xff] }
  0x1b   : > { %v330_v61 = vmax.f32 %v298_v50, 0.0  ;;  %v302_v62 = vadd.f32 %v585_v1, %v263_v51  ;;  %v331_v4 = vmax.f32 %v299_v52, 0.0  ;;  %v332_v5 = vmax.f32 %v300_v53, 0.0 }
  0x1c   : > { %v333_v6 = vmax.f32 %v301_v54, 0.0  ;;  %v303_v7 = vadd.f32 %v585_v1, %v264_v55  ;;  %360 = vst [vmem:[%s608_s26 + $0x40] sm:$0xff] %v328_v59  ;;  %361 = vst [vmem:[%s608_s26 + $0x48] sm:$0xff] %v329_v60  ;;  %v265_v10 = vmul.f32 %v575_v0, %v226_v56  ;;  %v266_v11 = vmul.f32 %v575_v0, %v227_v57 }
  0x1d   : > { %362 = vst [vmem:[%s608_s26 + $0x50] sm:$0xff] %v330_v61  ;;  %v334_v9 = vmax.f32 %v302_v62, 0.0  ;;  %v267_v12 = vmul.f32 %v575_v0, %v228_v58  ;;  %363 = vst [vmem:[%s608_s26 + $0x58] sm:$0xff] %v331_v4  ;;  %v268_v15 = vmul.f32 %v575_v0, %v229_v63  ;;  %v269_v16 = vmul.f32 %v575_v0, %v230_v2 }
  0x1e   : > { %364 = vst [vmem:[%s608_s26 + $0x60] sm:$0xff] %v332_v5  ;;  %365 = vst [vmem:[%s608_s26 + $0x68] sm:$0xff] %v333_v6  ;;  %v335_v14 = vmax.f32 %v303_v7, 0.0  ;;  %v270_v17 = vmul.f32 %v575_v0, %v231_v3  ;;  %v304_v18 = vadd.f32 %v585_v1, %v265_v10  ;;  %v305_v19 = vadd.f32 %v585_v1, %v266_v11 }
  0x1f   : > { %366 = vst [vmem:[%s608_s26 + $0x70] sm:$0xff] %v334_v9  ;;  %v306_v20 = vadd.f32 %v585_v1, %v267_v12  ;;  %v271_v21 = vmul.f32 %v575_v0, %v232_v8  ;;  %v307_v22 = vadd.f32 %v585_v1, %v268_v15  ;;  %v308_v23 = vadd.f32 %v585_v1, %v269_v16 }
  0x20   : > { %367 = vst [vmem:[%s608_s26 + $0x78] sm:$0xff] %v335_v14  ;;  %v309_v24 = vadd.f32 %v585_v1, %v270_v17  ;;  %v272_v25 = vmul.f32 %v575_v0, %v233_v13  ;;  %v336_v29 = vmax.f32 %v304_v18, 0.0  ;;  %v337_v30 = vmax.f32 %v305_v19, 0.0 }
  0x21   : > { %v338_v31 = vmax.f32 %v306_v20, 0.0  ;;  %v310_v32 = vadd.f32 %v585_v1, %v271_v21  ;;  %v339_v36 = vmax.f32 %v307_v22, 0.0  ;;  %v340_v37 = vmax.f32 %v308_v23, 0.0 }
  0x22   : > { %v341_v38 = vmax.f32 %v309_v24, 0.0  ;;  %v311_v39 = vadd.f32 %v585_v1, %v272_v25  ;;  %368 = vst [vmem:[%s608_s26 + $0x80] sm:$0xff] %v336_v29  ;;  %369 = vst [vmem:[%s608_s26 + $0x88] sm:$0xff] %v337_v30  ;;  %v273_v42 = vmul.f32 %v575_v0, %v234_v26  ;;  %v274_v43 = vmul.f32 %v575_v0, %v235_v27 }
  0x23   : > { %370 = vst [vmem:[%s608_s26 + $0x90] sm:$0xff] %v338_v31  ;;  %v342_v41 = vmax.f32 %v310_v32, 0.0  ;;  %v275_v44 = vmul.f32 %v575_v0, %v236_v28  ;;  %371 = vst [vmem:[%s608_s26 + $0x98] sm:$0xff] %v339_v36  ;;  %v276_v47 = vmul.f32 %v575_v0, %v237_v33  ;;  %v277_v48 = vmul.f32 %v575_v0, %v238_v34 }
  0x24   : > { %372 = vst [vmem:[%s608_s26 + $0xa0] sm:$0xff] %v340_v37  ;;  %373 = vst [vmem:[%s608_s26 + $0xa8] sm:$0xff] %v341_v38  ;;  %v343_v46 = vmax.f32 %v311_v39, 0.0  ;;  %v278_v49 = vmul.f32 %v575_v0, %v239_v35  ;;  %v312_v50 = vadd.f32 %v585_v1, %v273_v42  ;;  %v313_v51 = vadd.f32 %v585_v1, %v274_v43 }
  0x25   : > { %374 = vst [vmem:[%s608_s26 + $0xb0] sm:$0xff] %v342_v41  ;;  %v314_v52 = vadd.f32 %v585_v1, %v275_v44  ;;  %v279_v53 = vmul.f32 %v575_v0, %v240_v40  ;;  %v315_v54 = vadd.f32 %v585_v1, %v276_v47  ;;  %v316_v55 = vadd.f32 %v585_v1, %v277_v48 }
  0x26   : > { %375 = vst [vmem:[%s608_s26 + $0xb8] sm:$0xff] %v343_v46  ;;  %v317_v56 = vadd.f32 %v585_v1, %v278_v49  ;;  %v280_v57 = vmul.f32 %v575_v0, %v241_v45  ;;  %v344_v58 = vmax.f32 %v312_v50, 0.0  ;;  %v345_v59 = vmax.f32 %v313_v51, 0.0 }
  0x27   : > { %v346_v60 = vmax.f32 %v314_v52, 0.0  ;;  %v318_v61 = vadd.f32 %v585_v1, %v279_v53  ;;  %v347_v62 = vmax.f32 %v315_v54, 0.0  ;;  %v348_v63 = vmax.f32 %v316_v55, 0.0 }
  0x28   : > { %v349_v2 = vmax.f32 %v317_v56, 0.0  ;;  %v319_v3 = vadd.f32 %v585_v1, %v280_v57  ;;  %376 = vst [vmem:[%s608_s26 + $0xc0] sm:$0xff] %v344_v58  ;;  %377 = vst [vmem:[%s608_s26 + $0xc8] sm:$0xff] %v345_v59 }
  0x29   : > { %378 = vst [vmem:[%s608_s26 + $0xd0] sm:$0xff] %v346_v60  ;;  %v350_v4 = vmax.f32 %v318_v61, 0.0  ;;  %379 = vst [vmem:[%s608_s26 + $0xd8] sm:$0xff] %v347_v62 }
  0x2a   : > { %380 = vst [vmem:[%s608_s26 + $0xe0] sm:$0xff] %v348_v63  ;;  %381 = vst [vmem:[%s608_s26 + $0xe8] sm:$0xff] %v349_v2  ;;  %v351_v0 = vmax.f32 %v319_v3, 0.0 }
  0x2b   : > { %382 = vst [vmem:[%s608_s26 + $0xf0] sm:$0xff] %v350_v4 }
  0x2c   : > { %383 = vst [vmem:[%s608_s26 + $0xf8] sm:$0xff] %v351_v0 }
  0x2d PF: > { %s13_s14 = sadd.s32 1, %s532_s14   ;;  %s733_s12 = smov %s528_s13 }
  0x2e   : > { %p10_p5 = scmp.ge.s32.totalorder %s13_s14, 4   ;;  %s734_s13 = smov %s736_s15 }
  0x30   :  { %12 = sbr.rel (!%p10_p5) target bundleno = 2 (0x2), region = 62 }

// kernel: double_conv.3
= control target key start
LH: loop header
LB: loop body
LE: loop exit
PB: predicated region body
PF: predicated region fallthrough
CT: control target
= control target key end

     0   :  { %s10533_s21 = smov 0   ;;  %s15388_s0 = inlined_call_operand.vmem [shape: f32[2,20,20,128], index: 0, kind: input, shape index: {}]   ;;  %s15389_s1 = inlined_call_operand.vmem [shape: f32[1152,128], index: 1, kind: input, shape index: {}]   ;;  %s15390_s2 = inlined_call_operand.vmem [shape: f32[1,128], index: 2, kind: input, shape index: {}]   ;;  %s15391_s3 = inlined_call_operand.vmem [shape: f32[324,1], index: 3, kind: input, shape index: {}]   ;;  %s15392_s4 = inlined_call_operand.vmem [shape: f32[2,324,128], index: 4, kind: output, shape index: {0}]   ;;  %s15393_s5 = inlined_call_operand.vmem [shape: f32[2,1,128], index: 5, kind: output, shape index: {1}]   ;;  %s15394_s6 = inlined_call_operand.vmem [shape: f32[2,1,128], index: 6, kind: output, shape index: {2}]  }
   0x1 LB: > { %s9938_s22 = sadd.s32 4294967295, %s10492_s21   ;;  %p9942_p0 = scmp.ge.s32.totalorder %s10492_s21, 1  ;;  %s10492_s21 = sphi %s10533_s21, %s17_s21  }
   0x2   : > { %p217_p1 = scmp.lt.s32.totalorder %s10492_s21, 3 }
   0x4   : > { %p218_p2 = pnand %p9942_p0, %p217_p1 }
   0x6   : > { %221 = sbr.rel (%p218_p2) target bundleno = 868 (0x364), region = 36 }
   0xb   : > { %v3908_v0 = vld [vmem:[%s15389_s1 + $0x78] sm:$0xff]  ;;  %p253_p3 = scmp.lt.s32.totalorder %s9938_s22, 1  ;;  %v15397_v1 = vmov 0.0   ;;  %v3907_v2 = vld [vmem:[%s15389_s1 + $0x70] sm:$0xff]  ;;  %v3906_v3 = vld [vmem:[%s15389_s1 + $0x68] sm:$0xff]  ;;  %v598_v7 = vlaneseq  ;;  %vm383_vm0 = vcmask 1046528  }
   0xc   : > { %8017 = vmatprep.subr.mxu0 %v15397_v1  ;;  %10340 = vmatprep.subr.mxu1 %v15397_v1  ;;  %v3905_v4 = vld [vmem:[%s15389_s1 + $0x60] sm:$0xff]  ;;  %v10495_v5 = vmov 1983009808   ;;  %v3904_v8 = vld [vmem:[%s15389_s1 + $0x58] sm:$0xff]  ;;  %v3903_v9 = vld [vmem:[%s15389_s1 + $0x50] sm:$0xff]  ;;  %vm474_vm1 = vcmask 1045504  }
   0xd   : > { %8018 = vmatpush1.msra.mxu0 %v3908_v0  ;;  %10372 = vmatpush1.msra.mxu1 %v3908_v0  ;;  %s16569_s22 = smov (!%p253_p3, %s9938_s22), 1  ;;  %v596_v6 = vunpack.c.l.s4 %v10495_v5  ;;  %v3902_v10 = vld [vmem:[%s15389_s1 + $0x48] sm:$0xff]  ;;  %v599_v13 = vshrl.u32 %v598_v7, 7  ;;  %v3901_v21 = vld [vmem:[%s15389_s1 + $0x40] sm:$0xff]  ;;  %v3900_v29 = vld [vmem:[%s15389_s1 + $0x38] sm:$0xff]  ;;  %vm10497_vm2 = vmmov 0  }
   0xe   : > { %8019 = vmatprep.subr.mxu0 %v15397_v1  ;;  %10341 = vmatprep.subr.mxu1 %v15397_v1  ;;  %s10404_s29 = smul.u32 480, %s16569_s22  ;;  %v3899_v40 = vld [vmem:[%s15389_s1 + $0x30] sm:$0xff]  ;;  %v3898_v49 = vld [vmem:[%s15389_s1 + $0x28] sm:$0xff]  ;;  %v3897_v57 = vld [vmem:[%s15389_s1 + $0x20] sm:$0xff]  ;;  %vm9734_vm3 = vcmask 1043456   ;;  %s268_s8 = scalar_lea.vmem %s15394_s6, %s16569_s22 }
   0xf   : > { %8020 = vmatpush1.msra.mxu0 %v3907_v2  ;;  %10373 = vmatpush1.msra.mxu1 %v3907_v2  ;;  %v597_v12 = vunpack.c.0.s8 %v596_v6  ;;  %v3896_v2 = vld [vmem:[%s15389_s1 + $0x18] sm:$0xff]  ;;  %s10405_s23 = smul.u32 328, %s16569_s22 }
  0x10   : > { %8021 = vmatprep.subr.mxu0 %v15397_v1  ;;  %10342 = vmatprep.subr.mxu1 %v15397_v1  ;;  %s10570_s12 = scalar_lea.vmem %s15388_s0, %s10404_s29  ;;  %s265_s29 = scalar_lea.vmem %s15393_s5, %s16569_s22 }
  0x11   : > { %8022 = vmatpush1.msra.mxu0 %v3906_v3  ;;  %10374 = vmatpush1.msra.mxu1 %v3906_v3  ;;  %v269_v11 = vld [vmem:[%s10570_s12] sm:$0xff]  ;;  %v10584_v14 = vld [vmem:[%s10570_s12 + $0x8] sm:$0xff]  ;;  %v296_v16 = vld [vmem:[%s10570_s12 + $0xd8] sm:$0xff]  ;;  %v10603_v27 = vsub.s32 %v597_v12, %v599_v13  ;;  %s15294_s26 = scalar_lea.vmem %s15392_s4, %s10405_s23 }
  0x12   : > { %8023 = vmatprep.subr.mxu0 %v15397_v1  ;;  %10343 = vmatprep.subr.mxu1 %v15397_v1  ;;  %v384_v15 = vrot.slane %v269_v11, 1  ;;  %v297_v17 = vld [vmem:[%s10570_s12 + $0xe0] sm:$0xff]  ;;  %v385_v18 = vrot.slane %v10584_v14, 1  ;;  %v10590_v19 = vld [vmem:[%s10570_s12 + $0xe8] sm:$0xf]  ;;  %v429_v20 = vrot.slane %v296_v16, 1 }
  0x13   : > { %8024 = vmatpush1.msra.mxu0 %v3905_v4  ;;  %10375 = vmatpush1.msra.mxu1 %v3905_v4  ;;  %v430_v22 = vrot.slane %v297_v17, 1  ;;  %v10598_v23 = vrot.slane %v10590_v19, 1  ;;  %v520_v24 = vrot.slane %v296_v16, 2  ;;  %v521_v25 = vrot.slane %v297_v17, 2  ;;  %v10614_v32 = vld [vmem:[%s10570_s12 + $0xf0] sm:$0xff]  ;;  %v10623_v35 = vld [vmem:[%s10570_s12 + $0xf8] sm:$0xff] }
  0x14   : > { %8025 = vmatprep.subr.mxu0 %v15397_v1  ;;  %10344 = vmatprep.subr.mxu1 %v15397_v1  ;;  %v386_v26 = vsel %vm383_vm0, %v384_v15, %v385_v18  ;;  %v10606_v28 = vrot.slane %v10590_v19, 2  ;;  %v10620_v34 = vld [vmem:[%s10570_s12 + $0x10] sm:$0xf]  ;;  %v434_v39 = vrot.slane %v10614_v32, 1  ;;  %v435_v44 = vrot.slane %v10623_v35, 1  ;;  %v10675_v56 = vld [vmem:[%s10570_s12 + $0x18] sm:$0xff] }
  0x15   : > { %8026 = vmatpush1.msra.mxu0 %v3904_v8  ;;  %10376 = vmatpush1.msra.mxu1 %v3904_v8  ;;  %15857 = vst [vmem:[#allocation2_spill] sm:$0xff] %v10598_v23  ;;  %v591_v30 = vcombine.low %v269_v11, %v386_v26  ;;  %v592_v31 = vcombine.high %v269_v11, %v386_v26  ;;  %v387_v48 = vrot.slane %v10620_v34, 1  ;;  %v10689_v61 = vld [vmem:[%s10570_s12 + $0x20] sm:$0xff]  ;;  %v389_v6 = vrot.slane %v10675_v56, 1  ;;  %v3895_v11 = vld [vmem:[%s15389_s1 + $0x10] sm:$0xff] }
  0x16   : > { %8027 = vmatprep.subr.mxu0 %v15397_v1  ;;  %10345 = vmatprep.subr.mxu1 %v15397_v1  ;;  %15858 = vst [vmem:[#allocation3_spill] sm:$0xff] %v10606_v28  ;;  %v10617_v33 = vsel %vm383_vm0, %v429_v20, %v430_v22  ;;  %v10627_v36 = vsel %vm383_vm0, %v430_v22, %v10598_v23  ;;  %v480_v15 = vrot.slane %v10675_v56, 2  ;;  %v10739_v20 = vld [vmem:[%s10570_s12 + $0x100] sm:$0xf] }
  0x17   : > { %8028 = vmatpush1.msra.mxu0 %v3903_v9  ;;  %10377 = vmatpush1.msra.mxu1 %v3903_v9  ;;  %15859 = vst [vmem:[#allocation4_spill] sm:$0xff] %v10627_v36  ;;  %v10630_v37 = vsel %vm474_vm1, %v520_v24, %v521_v25  ;;  %v10634_v38 = vsel %vm474_vm1, %v521_v25, %v10606_v28 }
  0x18   : > { %8029 = vmatprep.subr.mxu0 %v15397_v1  ;;  %10346 = vmatprep.subr.mxu1 %v15397_v1  ;;  %15860 = vst [vmem:[#allocation5_spill] sm:$0xff] %v10630_v37  ;;  %15861 = vst [vmem:[#allocation6_spill] sm:$0xff] %v10634_v38  ;;  %v601_v41 = vrot.slane %v591_v30, %v10603_v27  ;;  %v608_v42 = vrot.slane %v592_v31, %v10603_v27  ;;  %v3893_v31 = vld [vmem:[%s15389_s1] sm:$0xff] }
  0x19   : > { %8030 = vmatpush1.msra.mxu0 %v3902_v10  ;;  %10378 = vmatpush1.msra.mxu1 %v3902_v10  ;;  %v1947_v43 = vcombine.high %v296_v16, %v10617_v33  ;;  %v2019_v45 = vcombine.low %v297_v17, %v10627_v36  ;;  %v2020_v46 = vcombine.high %v297_v17, %v10627_v36  ;;  %v390_v10 = vrot.slane %v10689_v61, 1 }
  0x1a   : > { %8031 = vmatprep.subr.mxu0 %v15397_v1  ;;  %10347 = vmatprep.subr.mxu1 %v15397_v1  ;;  %v2283_v47 = vcombine.high %v10630_v37, %v10614_v32  ;;  %v10657_v50 = vrot.slane %v601_v41, %v10603_v27  ;;  %v10660_v51 = vrot.slane %v608_v42, %v10603_v27  ;;  %v10776_v42 = vrot.slane %v10739_v20, 1 }
  0x1b   : > { %8032 = vmatpush1.msra.mxu0 %v3901_v21  ;;  %10379 = vmatpush1.msra.mxu1 %v3901_v21  ;;  %v10663_v52 = vrot.slane %v1947_v43, %v10603_v27  ;;  %v10666_v53 = vrot.slane %v2019_v45, %v10603_v27  ;;  %v10669_v54 = vrot.slane %v2020_v46, %v10603_v27  ;;  %v3894_v21 = vld [vmem:[%s15389_s1 + $0x8] sm:$0xff]  ;;  %v10785_v46 = vld [vmem:[%s10570_s12 + $0x30] sm:$0xff] }
  0x1c   : > { %8033 = vmatprep.subr.mxu0 %v15397_v1  ;;  %10348 = vmatprep.subr.mxu1 %v15397_v1  ;;  %v10672_v55 = vrot.slane %v2283_v47, %v10603_v27  ;;  %v2355_v59 = vcombine.low %v10634_v38, %v10623_v35  ;;  %v388_v63 = vsel %vm383_vm0, %v385_v18, %v387_v48  ;;  %v10779_v43 = vld [vmem:[%s10570_s12 + $0x28] sm:$0xf] }
  0x1d   : > { %8034 = vmatpush1.msra.mxu0 %v3900_v29  ;;  %10380 = vmatpush1.msra.mxu1 %v3900_v29  ;;  %15862 = vst [vmem:[#allocation7_spill] sm:$0xff] %v10663_v52  ;;  %15863 = vst [vmem:[#allocation8_spill] sm:$0xff] %v10666_v53  ;;  %v10701_v0 = vsel %vm383_vm0, %v434_v39, %v435_v44  ;;  %v680_v4 = vcombine.low %v10584_v14, %v388_v63 }
  0x1e   : > { %8035 = vmatprep.subr.mxu0 %v15397_v1  ;;  %10349 = vmatprep.subr.mxu1 %v15397_v1  ;;  %15864 = vst [vmem:[#allocation9_spill] sm:$0xff] %v10669_v54  ;;  %15865 = vst [vmem:[#allocation10_spill] sm:$0xff] %v10672_v55  ;;  %v2301_v62 = vcombine.high %v10663_v52, %v10672_v55  ;;  %v10709_v3 = vrot.slane %v2355_v59, %v10603_v27 }
  0x1f   : > { %8036 = vmatpush1.msra.mxu0 %v3899_v40  ;;  %10381 = vmatpush1.msra.mxu1 %v3899_v40  ;;  %15866 = vst [vmem:[#allocation11_spill] sm:$0xff] %v10701_v0  ;;  %v681_v5 = vcombine.high %v10584_v14, %v388_v63  ;;  %v2080_v8 = vcombine.low %v10590_v19, %v10598_v23  ;;  %v481_v19 = vrot.slane %v10689_v61, 2  ;;  %15870 = vst [vmem:[#allocation15_spill] sm:$0xff] %v10776_v42  ;;  %v11038_v23 = vld [vmem:[%s10570_s12 + $0x120] sm:$0xff] }
  0x20   : > { %8037 = vmatprep.subr.mxu0 %v15397_v1  ;;  %10350 = vmatprep.subr.mxu1 %v15397_v1  ;;  %15867 = vst [vmem:[#allocation12_spill] sm:$0xff] %v10709_v3  ;;  %v10034_v7 = vcombine.low %v2301_v62, %v10666_v53  ;;  %v2125_v9 = vcombine.low %v10614_v32, %v10701_v0 }
  0x21   : > { %8038 = vmatpush1.msra.mxu0 %v3898_v49  ;;  %10382 = vmatpush1.msra.mxu1 %v3898_v49  ;;  %v2372_v12 = vcombine.high %v10666_v53, %v10709_v3  ;;  %v690_v13 = vrot.slane %v680_v4, %v10603_v27  ;;  %v697_v14 = vrot.slane %v681_v5, %v10603_v27  ;;  %v10812_v4 = vrot.slane %v10779_v43, 1  ;;  %v3923_v5 = vld [vmem:[%s15389_s1 + $0xf0] sm:$0xff] }
  0x22   : > { %8039 = vmatprep.subr.mxu0 %v15397_v1  ;;  %10351 = vmatprep.subr.mxu1 %v15397_v1  ;;  %v10731_v16 = vrot.slane %v10034_v7, %v10603_v27  ;;  %v10734_v17 = vrot.slane %v2080_v8, %v10603_v27  ;;  %v2147_v18 = vrot.slane %v2125_v9, %v10603_v27 }
  0x23   : > { %8040 = vmatpush1.msra.mxu0 %v3897_v57  ;;  %10383 = vmatpush1.msra.mxu1 %v3897_v57  ;;  %v10036_v22 = vcombine.low %v2372_v12, %v10669_v54  ;;  %v10748_v24 = vrot.slane %v690_v13, %v10603_v27  ;;  %v10751_v25 = vrot.slane %v697_v14, %v10603_v27  ;;  %v3924_v57 = vld [vmem:[%s15389_s1 + $0xf8] sm:$0xff] }
  0x24   : > { %8041 = vmatprep.subr.mxu0 %v15397_v1  ;;  %10352 = vmatprep.subr.mxu1 %v15397_v1  ;;  %15868 = vst [vmem:[#allocation13_spill] sm:$0xff] %v10734_v17  ;;  %v2356_v26 = vcombine.high %v10634_v38, %v10623_v35  ;;  %v10756_v29 = vrot.slane %v2147_v18, %v10603_v27 }
  0x25   : > { %8042 = vmatpush1.msra.mxu0 %v3896_v2  ;;  %10384 = vmatpush1.msra.mxu1 %v3896_v2  ;;  %v10761_v30 = vsel %vm383_vm0, %v389_v6, %v390_v10  ;;  %v10769_v39 = vrot.slane %v10036_v22, %v10603_v27  ;;  %v10790_v47 = vsel %vm474_vm1, %v480_v15, %v481_v19  ;;  %v10845_v15 = vrot.slane %v10779_v43, 2  ;;  %v10858_v22 = vld [vmem:[%s10570_s12 + $0x108] sm:$0xff] }
  0x26   : > { %8043 = vmatprep.subr.mxu0 %v15397_v1  ;;  %10353 = vmatprep.subr.mxu1 %v15397_v1  ;;  %15869 = vst [vmem:[#allocation14_spill] sm:$0xff] %v10756_v29  ;;  %v10782_v45 = vrot.slane %v2356_v26, %v10603_v27  ;;  %v769_v49 = vcombine.low %v10620_v34, %v387_v48  ;;  %v3921_v26 = vld [vmem:[%s15389_s1 + $0xe0] sm:$0xff] }
  0x27   : > { %8044 = vmatpush1.msra.mxu0 %v3895_v11  ;;  %10385 = vmatpush1.msra.mxu1 %v3895_v11  ;;  %v810_v63 = vcombine.low %v10675_v56, %v10761_v30  ;;  %v811_v2 = vcombine.high %v10675_v56, %v10761_v30  ;;  %v812_v6 = vcombine.low %v10790_v47, %v10785_v46 }
  0x28   : > { %8045 = vmatprep.subr.mxu0 %v15397_v1  ;;  %10354 = vmatprep.subr.mxu1 %v15397_v1  ;;  %15871 = vst [vmem:[#allocation16_spill] sm:$0xff] %v10782_v45  ;;  %v2374_v34 = vcombine.high %v10669_v54, %v10782_v45  ;;  %v777_v48 = vrot.slane %v769_v49, %v10603_v27 }
  0x29   : > { %8046 = vmatpush1.msra.mxu0 %v3894_v21  ;;  %10386 = vmatpush1.msra.mxu1 %v3894_v21  ;;  %v820_v7 = vrot.slane %v810_v63, %v10603_v27  ;;  %v10826_v56 = vsel %vm383_vm0, %v435_v44, %v10776_v42  ;;  %v10830_v9 = vrot.slane %v811_v2, %v10603_v27  ;;  %v3922_v44 = vld [vmem:[%s15389_s1 + $0xe8] sm:$0xff]  ;;  %v3920_v2 = vld [vmem:[%s15389_s1 + $0xd8] sm:$0xff] }
  0x2a   : > { %8047 = vmatprep.subr.mxu0 %v15397_v1  ;;  %10355 = vmatprep.subr.mxu1 %v15397_v1  ;;  %15872 = vst [vmem:[#allocation17_spill] sm:$0xff] %v10826_v56  ;;  %v10042_v8 = vcombine.low %v2374_v34, %v10734_v17  ;;  %v2126_v11 = vcombine.high %v10614_v32, %v10701_v0  ;;  %v15879_v17 = vmov 0.0  }
  0x2b   : > { %8048 = vmatpush1.msra.mxu0 %v3893_v31  ;;  %10387 = vmatpush1.msra.mxu1 %v3893_v31  ;;  %v10840_v12 = vrot.slane %v812_v6, %v10603_v27  ;;  %v9946_v13 = vcombine.low %v777_v48, %v820_v7  ;;  %v2198_v14 = vcombine.low %v10623_v35, %v10826_v56 }
  0x2c   : > { %8049 = vmatprep.subr.mxu0 %v15397_v1  ;;  %10356 = vmatprep.subr.mxu1 %v15397_v1  ;;  %v10848_v32 = vrot.slane %v10042_v8, %v10603_v27  ;;  %v2154_v18 = vrot.slane %v2126_v11, %v10603_v27  ;;  %v10855_v21 = vsel %vm383_vm0, %v390_v10, %v10812_v4  ;;  %v10871_v10 = vld [vmem:[%s10570_s12 + $0x110] sm:$0xff]  ;;  %v439_v11 = vrot.slane %v10858_v22, 1 }
  0x2d   : > { %8050 = vmatpush2.msra.mxu0 %v3924_v57  ;;  %10388 = vmatpush2.msra.mxu1 %v3924_v57  ;;  %v843_v31 = vcombine.high %v820_v7, %v10840_v12  ;;  %v10867_v49 = vrot.slane %v9946_v13, %v10603_v27  ;;  %v2220_v57 = vrot.slane %v2198_v14, %v10603_v27  ;;  %v10890_v7 = vld [vmem:[%s10570_s12 + $0x38] sm:$0xff]  ;;  %v15885_v28 = vrot.slane %v10871_v10, 2 }
  0x2e   : > { %8051 = vmatprep.subr.mxu0 %v15397_v1  ;;  %10357 = vmatprep.subr.mxu1 %v15397_v1  ;;  %v10878_v48 = vrot.slane %v2154_v18, %v10603_v27  ;;  %v10896_v8 = vsel %vm474_vm1, %v481_v19, %v10845_v15  ;;  %v899_v13 = vcombine.low %v10689_v61, %v10855_v21  ;;  %v15396_v18 = vrot.slane %v10871_v10, 1  ;;  %v3919_v19 = vld [vmem:[%s15389_s1 + $0xd0] sm:$0xff] }
  0x2f   : > { %8052 = vmatpush2.msra.mxu0 %v3923_v5  ;;  %10389 = vmatpush2.msra.mxu1 %v3923_v5  ;;  %v9948_v5 = vcombine.low %v843_v31, %v10830_v9  ;;  %v10887_v6 = vrot.slane %v2220_v57, %v10603_v27  ;;  %v900_v14 = vcombine.high %v10689_v61, %v10855_v21  ;;  %v394_v61 = vrot.slane %v10785_v46, 1 }
  0x30   : > { %8053 = vmatprep.subr.mxu0 %v15397_v1  ;;  %10358 = vmatprep.subr.mxu1 %v15397_v1  ;;  %15873 = vst [vmem:[#allocation18_spill] sm:$0xff] %v10878_v48  ;;  %v901_v41 = vcombine.low %v10896_v8, %v10890_v7  ;;  %v15395_v63 = vrot.slane %v10890_v7, 1  ;;  %v10948_v62 = vsel %vm383_vm0, %v439_v11, %v15396_v18 }
  0x31   : > { %8054 = vmatpush2.msra.mxu0 %v3922_v44  ;;  %10390 = vmatpush2.msra.mxu1 %v3922_v44  ;;  %15874 = vst [vmem:[#allocation19_spill] sm:$0xff] %v10887_v6  ;;  %v813_v44 = vcombine.high %v10790_v47, %v10785_v46  ;;  %v10938_v31 = vrot.slane %v900_v14, %v10603_v27  ;;  %15875 = vst [vmem:[#allocation20_spill] sm:$0xff] %v10948_v62  ;;  %v3917_v14 = vld [vmem:[%s15389_s1 + $0xc0] sm:$0xff] }
  0x32   : > { %8055 = vmatprep.subr.mxu0 %v15397_v1  ;;  %10359 = vmatprep.subr.mxu1 %v15397_v1  ;;  %v10943_v40 = vrot.slane %v901_v41, %v10603_v27  ;;  %v2259_v41 = vcombine.low %v10739_v20, %v10776_v42  ;;  %v2304_v11 = vcombine.low %v10858_v22, %v10948_v62 }
  0x33   : > { %8056 = vmatpush2.msra.mxu0 %v3921_v26  ;;  %10391 = vmatpush2.msra.mxu1 %v3921_v26  ;;  %v10912_v26 = vrot.slane %v9948_v5, %v10603_v27  ;;  %v10920_v34 = vrot.slane %v813_v44, %v10603_v27  ;;  %v10925_v5 = vrot.slane %v899_v13, %v10603_v27  ;;  %v10951_v44 = vld [vmem:[%s10570_s12 + $0x118] sm:$0xf] }
  0x34   : > { %8057 = vmatprep.subr.mxu0 %v15397_v1  ;;  %10360 = vmatprep.subr.mxu1 %v15397_v1  ;;  %v10970_v59 = vsel %vm383_vm0, %v394_v61, %v15395_v63  ;;  %v10983_v58 = vrot.slane %v10951_v44, 1  ;;  %v2305_v3 = vcombine.high %v10858_v22, %v10948_v62 }
  0x35   : > { %8058 = vmatpush2.msra.mxu0 %v3920_v2  ;;  %10392 = vmatpush2.msra.mxu1 %v3920_v2  ;;  %v3918_v2 = vld [vmem:[%s15389_s1 + $0xc8] sm:$0xff]  ;;  %v845_v13 = vcombine.high %v10830_v9, %v10920_v34  ;;  %v932_v57 = vcombine.high %v10925_v5, %v10943_v40  ;;  %v629_v18 = vcombine.low %v10785_v46, %v10970_v59 }
  0x36   : > { %8059 = vmatprep.subr.mxu0 %v15397_v1  ;;  %10361 = vmatprep.subr.mxu1 %v15397_v1  ;;  %15877 = vst [vmem:[#allocation22_spill] sm:$0xff] %v10983_v58  ;;  %v630_v38 = vcombine.high %v10785_v46, %v10970_v59  ;;  %v3909_v46 = vld [vmem:[%s15389_s1 + $0x80] sm:$0xff] }
  0x37   : > { %8060 = vmatpush2.msra.mxu0 %v3919_v19  ;;  %10393 = vmatpush2.msra.mxu1 %v3919_v19  ;;  %v2199_v19 = vcombine.high %v10623_v35, %v10826_v56  ;;  %v9954_v60 = vcombine.low %v845_v13, %v10925_v5  ;;  %v3916_v35 = vld [vmem:[%s15389_s1 + $0xb8] sm:$0xff]  ;;  %v10980_v13 = vrot.slane %v2304_v11, %v10603_v27  ;;  %v11004_v11 = vld [vmem:[%s10570_s12 + $0x40] sm:$0xf]  ;;  %v3914_v56 = vld [vmem:[%s15389_s1 + $0xa8] sm:$0xff] }
  0x38   : > { %8061 = vmatprep.subr.mxu0 %v15397_v1  ;;  %10362 = vmatprep.subr.mxu1 %v15397_v1  ;;  %v9956_v61 = vcombine.low %v932_v57, %v10938_v31  ;;  %v530_v57 = vrot.slane %v10858_v22, 2  ;;  %v651_v42 = vrot.slane %v629_v18, %v10603_v27  ;;  %v15881_v18 = vrot.slane %v10871_v10, 1 }
  0x39   : > { %8062 = vmatpush2.msra.mxu0 %v3918_v2  ;;  %10394 = vmatpush2.msra.mxu1 %v3918_v2  ;;  %v2227_v20 = vrot.slane %v2199_v19, %v10603_v27  ;;  %v2273_v2 = vrot.slane %v2259_v41, %v10603_v27  ;;  %15876 = vst [vmem:[#allocation21_spill] sm:$0xff] %v10980_v13  ;;  %v3915_v19 = vld [vmem:[%s15389_s1 + $0xb0] sm:$0xff] }
  0x3a   : > { %8063 = vmatprep.subr.mxu0 %v15397_v1  ;;  %10363 = vmatprep.subr.mxu1 %v15397_v1  ;;  %v10987_v63 = vrot.slane %v9954_v60, %v10603_v27  ;;  %v902_v60 = vcombine.high %v10896_v8, %v10890_v7  ;;  %v11060_v45 = vsel %vm474_vm1, %v530_v57, %v15885_v28 }
  0x3b   : > { %8064 = vmatpush2.msra.mxu0 %v3917_v14  ;;  %10395 = vmatpush2.msra.mxu1 %v3917_v14  ;;  %v10997_v41 = vrot.slane %v2227_v20, %v10603_v27  ;;  %v10031_v14 = vcombine.low %v2273_v2, %v10980_v13  ;;  %v988_v20 = vcombine.low %v10779_v43, %v10812_v4 }
  0x3c   : > { %8065 = vmatprep.subr.mxu0 %v15397_v1  ;;  %10364 = vmatprep.subr.mxu1 %v15397_v1  ;;  %v11007_v1 = vrot.slane %v9956_v61, %v10603_v27  ;;  %v11022_v61 = vrot.slane %v902_v60, %v10603_v27  ;;  %v11028_v43 = vsel %vm383_vm0, %v15881_v18, %v10983_v58  ;;  %v11041_v60 = vrot.slane %v11004_v11, 1 }
  0x3d   : > { %15878 = vst [vmem:[#allocation23_spill] sm:$0xff] %v10997_v41  ;;  %8066 = vmatpush2.msra.mxu0 %v3916_v35  ;;  %10396 = vmatpush2.msra.mxu1 %v3916_v35  ;;  %v11019_v35 = vrot.slane %v10031_v14, %v10603_v27  ;;  %15882 = vst [vmem:[#allocation25_spill] sm:$0xff] %v11028_v43  ;;  %v11035_v14 = vrot.slane %v988_v20, %v10603_v27  ;;  %v3912_v20 = vld [vmem:[%s15389_s1 + $0x98] sm:$0xff]  ;;  %v15888_v18 = vrot.slane %v10890_v7, 1 }
  0x3e   : > { %8067 = vmatprep.subr.mxu0 %v15879_v17  ;;  %10365 = vmatprep.subr.mxu1 %v15879_v17  ;;  %v934_v0 = vcombine.high %v10938_v31, %v11022_v61  ;;  %v11055_v2 = vrot.slane %v651_v42, %v10603_v27  ;;  %15886 = vst [vmem:[#allocation28_spill] sm:$0xff] %v11060_v45 }
  0x3f   : > { %15880 = vst [vmem:[#allocation24_spill] sm:$0xff] %v11019_v35  ;;  %8068 = vmatpush2.msra.mxu0 %v3915_v19  ;;  %10397 = vmatpush2.msra.mxu1 %v3915_v19  ;;  %15883 = vst [vmem:[#allocation26_spill] sm:$0xff] %v11035_v14  ;;  %v3913_v19 = vld [vmem:[%s15389_s1 + $0xa0] sm:$0xff]  ;;  %v2377_v42 = vcombine.low %v10871_v10, %v11028_v43  ;;  %v2640_v28 = vcombine.low %v11060_v45, %v11038_v23 }
  0x40   : > { %8069 = vmatprep.subr.mxu0 %v15879_v17  ;;  %10366 = vmatprep.subr.mxu1 %v15879_v17  ;;  %15884 = vst [vmem:[#allocation27_spill] sm:$0xff] %v11055_v2  ;;  %v11075_v22 = vrot.slane %v2305_v3, %v10603_v27  ;;  %v2641_v57 = vcombine.high %v11060_v45, %v11038_v23 }
  0x41   : > { %8070 = vmatpush2.msra.mxu0 %v3914_v56  ;;  %10398 = vmatpush2.msra.mxu1 %v3914_v56  ;;  %v9962_v56 = vcombine.low %v934_v0, %v11035_v14  ;;  %v11083_v62 = vsel %vm383_vm0, %v15888_v18, %v11041_v60  ;;  %v3911_v0 = vld [vmem:[%s15389_s1 + $0x90] sm:$0xff]  ;;  %v11097_v45 = vrot.slane %v2640_v28, %v10603_v27  ;;  %v11100_v18 = vrot.slane %v10951_v44, 2 }
  0x42   : > { %8071 = vmatprep.subr.mxu0 %v15879_v17  ;;  %10367 = vmatprep.subr.mxu1 %v15879_v17  ;;  %15887 = vst [vmem:[#allocation29_spill] sm:$0xff] %v11075_v22  ;;  %v11103_v36 = vrot.slane %v2641_v57, %v10603_v27  ;;  %v11121_v57 = vld [vmem:[%s10570_s12 + $0x48] sm:$0xff]  ;;  %v658_v54 = vrot.slane %v630_v38, %v10603_v27  ;;  %v11128_v14 = vld [vmem:[%s10570_s12 + $0x50] sm:$0xff] }
  0x43   : > { %8072 = vmatpush2.msra.mxu0 %v3913_v19  ;;  %10399 = vmatpush2.msra.mxu1 %v3913_v19  ;;  %v11091_v3 = vrot.slane %v9962_v56, %v10603_v27  ;;  %v11094_v19 = vrot.slane %v2377_v42, %v10603_v27  ;;  %15890 = vst [vmem:[#allocation31_spill] sm:$0xff] %v11097_v45  ;;  %15891 = vst [vmem:[#allocation32_spill] sm:$0xff] %v11100_v18  ;;  %v3910_v42 = vld [vmem:[%s15389_s1 + $0x88] sm:$0xff] }
  0x44   : > { %8073 = vmatprep.subr.mxu0 %v15879_v17  ;;  %10368 = vmatprep.subr.mxu1 %v15879_v17  ;;  %15892 = vst [vmem:[#allocation33_spill] sm:$0xff] %v11103_v36  ;;  %v718_v56 = vcombine.low %v10890_v7, %v11083_v62  ;;  %v2657_v28 = vcombine.high %v10980_v13, %v11097_v45  ;;  %v15893_v45 = vrot.slane %v10871_v10, 2 }
  0x45   : > { %15889 = vst [vmem:[#allocation30_spill] sm:$0xff] %v11094_v19  ;;  %8074 = vmatpush2.msra.mxu0 %v3912_v20  ;;  %10400 = vmatpush2.msra.mxu1 %v3912_v20  ;;  %v2659_v55 = vcombine.high %v11075_v22, %v11103_v36  ;;  %v11149_v13 = vrot.slane %v658_v54, %v10603_v27 }
  0x46   : > { %8075 = vmatprep.subr.mxu0 %v15879_v17  ;;  %10369 = vmatprep.subr.mxu1 %v15879_v17  ;;  %v740_v53 = vrot.slane %v718_v56, %v10603_v27  ;;  %v10050_v20 = vcombine.low %v2657_v28, %v11075_v22  ;;  %v11143_v38 = vsel %vm474_vm1, %v15893_v45, %v11100_v18  ;;  %v399_v22 = vrot.slane %v11121_v57, 1 }
  0x47   : > { %8076 = vmatpush2.msra.mxu0 %v3911_v0  ;;  %10401 = vmatpush2.msra.mxu1 %v3911_v0  ;;  %v11137_v0 = vld [vmem:[%s10570_s12 + $0x128] sm:$0xff]  ;;  %15894 = vst [vmem:[#allocation34_spill] sm:$0xff] %v11143_v38  ;;  %v2378_v56 = vcombine.high %v10871_v10, %v11028_v43  ;;  %v10052_v36 = vcombine.low %v2659_v55, %v11094_v19  ;;  %15895 = vst [vmem:[#allocation35_spill] sm:$0xff] %v11149_v13 }
  0x48   : > { %8077 = vmatprep.subr.mxu0 %v15879_v17  ;;  %10370 = vmatprep.subr.mxu1 %v15879_v17  ;;  %v11152_v28 = vrot.slane %v740_v53, %v10603_v27  ;;  %v11158_v45 = vrot.slane %v10050_v20, %v10603_v27  ;;  %v2438_v54 = vcombine.low %v10951_v44, %v10983_v58  ;;  %v15910_v55 = vrot.slane %v11137_v0, 1 }
  0x49   : > { %8078 = vmatpush2.msra.mxu0 %v3910_v42  ;;  %10402 = vmatpush2.msra.mxu1 %v3910_v42  ;;  %v11161_v10 = vrot.slane %v2378_v56, %v10603_v27  ;;  %v11167_v53 = vrot.slane %v10052_v36, %v10603_v27  ;;  %v2713_v20 = vcombine.low %v11143_v38, %v11137_v0  ;;  %v444_v56 = vrot.slane %v11038_v23, 1  ;;  %v3972_v36 = vld [vmem:[%s15389_s1 + $0x278] sm:$0xff] }
  0x4a   : > { %15896 = vst [vmem:[#allocation36_spill] sm:$0xff] %v11152_v28  ;;  %8079 = vmatprep.subr.mxu0 %v15879_v17  ;;  %10371 = vmatprep.subr.mxu1 %v15879_v17  ;;  %v15898_v18 = vcombine.high %v10657_v50, %v10660_v51  ;;  %v15899_v44 = vcombine.high %v10731_v16, %v10769_v39 }
  0x4b   : > { %15897 = vst [vmem:[#allocation37_spill] sm:$0xff] %v11161_v10  ;;  %8080 = vmatpush2.msra.mxu0 %v3909_v46  ;;  %10403 = vmatpush2.msra.mxu1 %v3909_v46  ;;  %v11184_v46 = vrot.slane %v2438_v54, %v10603_v27  ;;  %v2714_v42 = vcombine.high %v11143_v38, %v11137_v0  ;;  %v3940_v54 = vld [vmem:[%s15389_s1 + $0x178] sm:$0xff]  ;;  %v490_v38 = vrot.slane %v11121_v57, 2 }
  0x4c   : > { %8081 = vmatprep.mubr.f32.mxu0 %v15898_v18  ;;  %8186 = vmatprep.mubr.f32.mxu1 %v15899_v44  ;;  %v11192_v18 = vld [vmem:[%s10570_s12 + $0x58] sm:$0xf]  ;;  %v15901_v44 = vcombine.low %v10657_v50, %v10660_v51  ;;  %v15902_v43 = vcombine.low %v10731_v16, %v10769_v39  ;;  %v11208_v58 = vrot.slane %v2713_v20, %v10603_v27  ;;  %v15905_v51 = vrot.slane %v11128_v14, 1  ;;  %v3971_v20 = vld [vmem:[%s15389_s1 + $0x270] sm:$0xff] }
  0x4d   : > { %15900 = vst [vmem:[#allocation38_spill] sm:$0xff] %v11184_v46  ;;  %8557 = vmatprep.subr.mxu0 %v15879_v17  ;;  %8287 = vmatprep.subr.mxu1 %v15879_v17  ;;  %v11213_v50 = vrot.slane %v2714_v42, %v10603_v27  ;;  %v719_v39 = vcombine.high %v10890_v7, %v11083_v62  ;;  %v11235_v7 = vrot.slane %v11192_v18, 1 }
  0x4e   : > { %8082 = vmatmul.mubr.f32.vlgmr.msra.gmra.mxu0 %v15901_v44  ;;  %8187 = vmatmul.mubr.f32.vlgmr.msra.gmra.mxu1 %v15902_v43  ;;  %15903 = vst [vmem:[#allocation39_spill] sm:$0xff] %v11208_v58  ;;  %v11218_v16 = vsel %vm383_vm0, %v399_v22, %v15905_v51  ;;  %v15907_v43 = vcombine.high %v10748_v24, %v10751_v25 }
  0x4f   : > { %15904 = vst [vmem:[#allocation40_spill] sm:$0xff] %v11213_v50  ;;  %15906 = vst [vmem:[#allocation41_spill] sm:$0xff] %v11218_v16  ;;  %8558 = vmatpush1.msra.mxu0 %v3972_v36  ;;  %v2730_v42 = vcombine.high %v11094_v19, %v11208_v58  ;;  %v787_v44 = vcombine.low %v11004_v11, %v11041_v60  ;;  %v848_v22 = vcombine.low %v11121_v57, %v11218_v16 }
  0x50   : > { %8086 = vmatprep.mubr.f32.mxu0 %v15907_v43  ;;  %15908 = vst [vmem:[#allocation42_spill] sm:$0xff] %v11235_v7  ;;  %v15909_v36 = vcombine.high %v10848_v32, %v10756_v29  ;;  %8288 = vmatpush1.msra.mxu1 %v3940_v54  ;;  %v2732_v51 = vcombine.high %v11161_v10, %v11213_v50  ;;  %v3939_v54 = vld [vmem:[%s15389_s1 + $0x170] sm:$0xff] }
  0x51   : > { %v747_v43 = vrot.slane %v719_v39, %v10603_v27  ;;  %v11246_v11 = vsel %vm383_vm0, %v444_v56, %v15910_v55  ;;  %8559 = vmatprep.subr.mxu0 %v15879_v17  ;;  %v15912_v58 = vcombine.low %v10748_v24, %v10751_v25  ;;  %v10058_v39 = vcombine.low %v2730_v42, %v11161_v10  ;;  %v3970_v42 = vld [vmem:[%s15389_s1 + $0x268] sm:$0xff]  ;;  %v11403_v10 = vld [vmem:[%s10570_s12 + $0x140] sm:$0xff] }
  0x52   : > { %8191 = vmatprep.mubr.f32.mxu1 %v15909_v36  ;;  %15911 = vst [vmem:[#allocation43_spill] sm:$0xff] %v11246_v11  ;;  %v801_v36 = vrot.slane %v787_v44, %v10603_v27  ;;  %v11259_v55 = vrot.slane %v848_v22, %v10603_v27  ;;  %v491_v56 = vrot.slane %v11128_v14, 2  ;;  %v15914_v50 = vcombine.low %v10848_v32, %v10756_v29  ;;  %v11283_v44 = vld [vmem:[%s10570_s12 + $0x130] sm:$0xf]  ;;  %v11310_v29 = vld [vmem:[%s10570_s12 + $0x60] sm:$0xff] }
  0x53   : > { %8087 = vmatmul.mubr.f32.gmra.mxu0 %v15912_v58  ;;  %v10060_v58 = vcombine.low %v2732_v51, %v11184_v46  ;;  %v11267_v24 = vrot.slane %v747_v43, %v10603_v27  ;;  %v2483_v25 = vcombine.low %v11038_v23, %v11246_v11  ;;  %8289 = vmatprep.subr.mxu1 %v15879_v17  ;;  %v3938_v51 = vld [vmem:[%s15389_s1 + $0x168] sm:$0xff] }
  0x54   : > { %15913 = vst [vmem:[#allocation44_spill] sm:$0xff] %v11259_v55  ;;  %8192 = vmatmul.mubr.f32.gmra.mxu1 %v15914_v50  ;;  %8560 = vmatpush1.msra.mxu0 %v3971_v20  ;;  %v11277_v32 = vrot.slane %v10058_v39, %v10603_v27  ;;  %v9951_v50 = vcombine.low %v801_v36, %v11259_v55  ;;  %v15917_v36 = vrot.slane %v11128_v14, 1 }
  0x55   : > { %15915 = vst [vmem:[#allocation45_spill] sm:$0xff] %v11267_v24  ;;  %8561 = vmatprep.subr.mxu0 %v15879_v17  ;;  %v2484_v20 = vcombine.high %v11038_v23, %v11246_v11  ;;  %8290 = vmatpush1.msra.mxu1 %v3939_v54  ;;  %v15916_v22 = vcombine.high %v10867_v49, %v10912_v26  ;;  %v11383_v11 = vld [vmem:[%s10570_s12 + $0x138] sm:$0xff] }
  0x56   : > { %v11292_v43 = vrot.slane %v10060_v58, %v10603_v27  ;;  %v2505_v39 = vrot.slane %v2483_v25, %v10603_v27  ;;  %v11299_v23 = vsel %vm383_vm0, %v15917_v36, %v11235_v7  ;;  %v15919_v54 = vcombine.high %v10878_v48, %v10887_v6  ;;  %8291 = vmatprep.subr.mxu1 %v15879_v17 }
  0x57   : > { %8091 = vmatprep.mubr.f32.mxu0 %v15916_v22  ;;  %15918 = vst [vmem:[#allocation46_spill] sm:$0xff] %v11299_v23  ;;  %v11306_v22 = vrot.slane %v9951_v50, %v10603_v27  ;;  %v2512_v58 = vrot.slane %v2484_v20, %v10603_v27  ;;  %v11313_v25 = vsel %vm474_vm1, %v490_v38, %v491_v56  ;;  %v11329_v38 = vrot.slane %v11283_v44, 1 }
  0x58   : > { %8196 = vmatprep.mubr.f32.mxu1 %v15919_v54  ;;  %15921 = vst [vmem:[#allocation48_spill] sm:$0xff] %v11313_v25  ;;  %8562 = vmatpush1.msra.mxu0 %v3970_v42  ;;  %v15922_v36 = vcombine.low %v10878_v48, %v10887_v6  ;;  %v3969_v54 = vld [vmem:[%s15389_s1 + $0x260] sm:$0xff]  ;;  %v11326_v46 = vrot.slane %v2505_v39, %v10603_v27  ;;  %v11345_v6 = vrot.slane %v11192_v18, 2 }
  0x59   : > { %15920 = vst [vmem:[#allocation47_spill] sm:$0xff] %v11306_v22  ;;  %15924 = vst [vmem:[#allocation50_spill] sm:$0xff] %v11329_v38  ;;  %v15925_v42 = vcombine.low %v10867_v49, %v10912_v26  ;;  %8292 = vmatpush1.msra.mxu1 %v3938_v51  ;;  %v11340_v20 = vrot.slane %v2512_v58, %v10603_v27  ;;  %8563 = vmatprep.subr.mxu0 %v15879_v17 }
  0x5a   : > { %8197 = vmatmul.mubr.f32.gmra.mxu1 %v15922_v36  ;;  %15923 = vst [vmem:[#allocation49_spill] sm:$0xff] %v11326_v46  ;;  %v3937_v36 = vld [vmem:[%s15389_s1 + $0x160] sm:$0xff]  ;;  %15927 = vst [vmem:[#allocation52_spill] sm:$0xff] %v11345_v6  ;;  %8293 = vmatprep.subr.mxu1 %v15879_v17  ;;  %v849_v49 = vcombine.high %v11121_v57, %v11218_v16  ;;  %v937_v26 = vcombine.low %v11128_v14, %v11299_v23  ;;  %v3952_v16 = vld [vmem:[%s15389_s1 + $0x1d8] sm:$0xff] }
  0x5b   : > { %8092 = vmatmul.mubr.f32.gmra.mxu0 %v15925_v42  ;;  %15926 = vst [vmem:[#allocation51_spill] sm:$0xff] %v11340_v20  ;;  %v1208_v51 = vcombine.low %v11313_v25, %v11310_v29  ;;  %v15928_v58 = vcombine.high %v10987_v63, %v11007_v1  ;;  %v1209_v57 = vcombine.high %v11313_v25, %v11310_v29 }
  0x5c   : > { %8564 = vmatpush1.msra.mxu0 %v3969_v54  ;;  %v15929_v50 = vcombine.high %v10997_v41, %v11019_v35  ;;  %8294 = vmatpush1.msra.mxu1 %v3937_v36  ;;  %v3968_v54 = vld [vmem:[%s15389_s1 + $0x258] sm:$0xff]  ;;  %v11374_v42 = vrot.slane %v849_v49, %v10603_v27  ;;  %v11377_v39 = vrot.slane %v937_v26, %v10603_v27  ;;  %v15935_v49 = vrot.slane %v11137_v0, 1 }
  0x5d   : > { %8096 = vmatprep.mubr.f32.mxu0 %v15928_v58  ;;  %v3936_v58 = vld [vmem:[%s15389_s1 + $0x158] sm:$0xff]  ;;  %v11380_v48 = vrot.slane %v1208_v51, %v10603_v27  ;;  %8565 = vmatprep.subr.mxu0 %v15879_v17  ;;  %v11390_v36 = vrot.slane %v1209_v57, %v10603_v27  ;;  %v11400_v51 = vsel %vm474_vm1, %v491_v56, %v11345_v6  ;;  %v3967_v56 = vld [vmem:[%s15389_s1 + $0x250] sm:$0xff] }
  0x5e   : > { %8201 = vmatprep.mubr.f32.mxu1 %v15929_v50  ;;  %15930 = vst [vmem:[#allocation53_spill] sm:$0xff] %v11374_v42  ;;  %15931 = vst [vmem:[#allocation54_spill] sm:$0xff] %v11377_v39  ;;  %v15933_v50 = vcombine.low %v10987_v63, %v11007_v1  ;;  %v11396_v26 = vsel %vm383_vm0, %v15935_v49, %v11329_v38  ;;  %v15938_v19 = vcombine.low %v10997_v41, %v11019_v35 }
  0x5f   : > { %15932 = vst [vmem:[#allocation55_spill] sm:$0xff] %v11380_v48  ;;  %15934 = vst [vmem:[#allocation56_spill] sm:$0xff] %v11390_v36  ;;  %8295 = vmatprep.subr.mxu1 %v15879_v17  ;;  %v1225_v1 = vcombine.high %v11259_v55, %v11380_v48  ;;  %v2556_v63 = vcombine.low %v11137_v0, %v11396_v26  ;;  %v2557_v57 = vcombine.high %v11137_v0, %v11396_v26 }
  0x60   : > { %8097 = vmatmul.mubr.f32.gmra.mxu0 %v15933_v50  ;;  %15936 = vst [vmem:[#allocation57_spill] sm:$0xff] %v11396_v26  ;;  %15937 = vst [vmem:[#allocation58_spill] sm:$0xff] %v11400_v51  ;;  %8202 = vmatmul.mubr.f32.gmra.mxu1 %v15938_v19  ;;  %v1227_v19 = vcombine.high %v11374_v42, %v11390_v36  ;;  %v938_v50 = vcombine.high %v11128_v14, %v11299_v23  ;;  %v449_v35 = vrot.slane %v11383_v11, 1  ;;  %v11436_v26 = vld [vmem:[%s10570_s12 + $0x68] sm:$0xff] }
  0x61   : > { %8566 = vmatpush1.msra.mxu0 %v3968_v54  ;;  %8296 = vmatpush1.msra.mxu1 %v3936_v58  ;;  %v1006_v49 = vcombine.low %v11192_v18, %v11235_v7  ;;  %v15939_v0 = vcombine.high %v11091_v3, %v11055_v2  ;;  %v3935_v54 = vld [vmem:[%s15389_s1 + $0x150] sm:$0xff]  ;;  %v9970_v58 = vcombine.low %v1225_v1, %v11374_v42  ;;  %v15470_v18 = vrot.slane %v11403_v10, 1 }
  0x62   : > { %8567 = vmatprep.subr.mxu0 %v15879_v17  ;;  %v2578_v41 = vrot.slane %v2556_v63, %v10603_v27  ;;  %v2585_v14 = vrot.slane %v2557_v57, %v10603_v27  ;;  %v15940_v7 = vcombine.high %v11158_v45, %v11167_v53  ;;  %8297 = vmatprep.subr.mxu1 %v15879_v17  ;;  %v540_v63 = vrot.slane %v11383_v11, 2 }
  0x63   : > { %8101 = vmatprep.mubr.f32.mxu0 %v15939_v0  ;;  %v9972_v0 = vcombine.low %v1227_v19, %v11377_v39  ;;  %v11445_v6 = vrot.slane %v938_v50, %v10603_v27  ;;  %v11448_v1 = vrot.slane %v1006_v49, %v10603_v27  ;;  %8568 = vmatpush1.msra.mxu0 %v3967_v56  ;;  %v3934_v19 = vld [vmem:[%s15389_s1 + $0x148] sm:$0xff] }
  0x64   : > { %8206 = vmatprep.mubr.f32.mxu1 %v15940_v7  ;;  %v15943_v57 = vcombine.low %v11158_v45, %v11167_v53  ;;  %v3966_v7 = vld [vmem:[%s15389_s1 + $0x248] sm:$0xff]  ;;  %v11461_v50 = vrot.slane %v9970_v58, %v10603_v27  ;;  %v11464_v49 = vrot.slane %v2578_v41, %v10603_v27  ;;  %v11467_v56 = vrot.slane %v2585_v14, %v10603_v27  ;;  %v11499_v14 = vld [vmem:[%s10570_s12 + $0x150] sm:$0xff] }
  0x65   : > { %15941 = vst [vmem:[#allocation59_spill] sm:$0xff] %v11445_v6  ;;  %15942 = vst [vmem:[#allocation60_spill] sm:$0xff] %v11448_v1  ;;  %v15946_v53 = vcombine.low %v11091_v3, %v11055_v2  ;;  %8298 = vmatpush1.msra.mxu1 %v3935_v54  ;;  %v1281_v58 = vcombine.low %v11400_v51, %v11436_v26  ;;  %v1282_v41 = vcombine.high %v11400_v51, %v11436_v26  ;;  %v11526_v2 = vld [vmem:[%s10570_s12 + $0x148] sm:$0xf] }
  0x66   : > { %8207 = vmatmul.mubr.f32.gmra.mxu1 %v15943_v57  ;;  %15944 = vst [vmem:[#allocation61_spill] sm:$0xff] %v11464_v49  ;;  %15945 = vst [vmem:[#allocation62_spill] sm:$0xff] %v11467_v56  ;;  %v11474_v57 = vrot.slane %v9972_v0, %v10603_v27  ;;  %8569 = vmatprep.subr.mxu0 %v15879_v17  ;;  %v11489_v54 = vsel %vm383_vm0, %v449_v35, %v15470_v18  ;;  %v404_v3 = vrot.slane %v11310_v29, 1 }
  0x67   : > { %8102 = vmatmul.mubr.f32.gmra.mxu0 %v15946_v53  ;;  %8299 = vmatprep.subr.mxu1 %v15879_v17  ;;  %15947 = vst [vmem:[#allocation63_spill] sm:$0xff] %v11489_v54  ;;  %v11496_v45 = vrot.slane %v1281_v58, %v10603_v27  ;;  %v15949_v35 = vcombine.high %v11149_v13, %v11152_v28  ;;  %v3933_v58 = vld [vmem:[%s15389_s1 + $0x140] sm:$0xff]  ;;  %v15952_v0 = vrot.slane %v11403_v10, 2 }
  0x68   : > { %8570 = vmatpush1.msra.mxu0 %v3966_v7  ;;  %8300 = vmatpush1.msra.mxu1 %v3934_v19  ;;  %v15950_v7 = vcombine.high %v11277_v32, %v11292_v43  ;;  %v3965_v19 = vld [vmem:[%s15389_s1 + $0x240] sm:$0xff]  ;;  %v11515_v53 = vrot.slane %v1282_v41, %v10603_v27  ;;  %v15954_v48 = vcombine.low %v11149_v13, %v11152_v28 }
  0x69   : > { %15948 = vst [vmem:[#allocation64_spill] sm:$0xff] %v11496_v45  ;;  %8106 = vmatprep.mubr.f32.mxu0 %v15949_v35  ;;  %v11520_v18 = vsel %vm474_vm1, %v540_v63, %v15952_v0  ;;  %v2617_v35 = vcombine.low %v11283_v44, %v11329_v38  ;;  %8571 = vmatprep.subr.mxu0 %v15879_v17 }
  0x6a   : > { %8211 = vmatprep.mubr.f32.mxu1 %v15950_v7  ;;  %15951 = vst [vmem:[#allocation65_spill] sm:$0xff] %v11515_v53  ;;  %15953 = vst [vmem:[#allocation66_spill] sm:$0xff] %v11520_v18  ;;  %v1298_v41 = vcombine.high %v11377_v39, %v11496_v45  ;;  %v2662_v63 = vcombine.low %v11383_v11, %v11489_v54  ;;  %v2663_v0 = vcombine.high %v11383_v11, %v11489_v54  ;;  %v3964_v7 = vld [vmem:[%s15389_s1 + $0x238] sm:$0xff] }
  0x6b   : > { %8107 = vmatmul.mubr.f32.gmra.mxu0 %v15954_v48  ;;  %v15955_v44 = vcombine.low %v11277_v32, %v11292_v43  ;;  %8301 = vmatprep.subr.mxu1 %v15879_v17  ;;  %v1300_v48 = vcombine.high %v11445_v6, %v11515_v53  ;;  %v2631_v28 = vrot.slane %v2617_v35, %v10603_v27  ;;  %v3932_v11 = vld [vmem:[%s15389_s1 + $0x138] sm:$0xff]  ;;  %v11561_v54 = vrot.slane %v11526_v2, 1 }
  0x6c   : > { %v2998_v13 = vcombine.low %v11520_v18, %v11499_v14  ;;  %8572 = vmatpush1.msra.mxu0 %v3965_v19  ;;  %8302 = vmatpush1.msra.mxu1 %v3933_v58  ;;  %v9978_v32 = vcombine.low %v1298_v41, %v11445_v6  ;;  %v11555_v43 = vrot.slane %v2662_v63, %v10603_v27  ;;  %v15960_v35 = vrot.slane %v11436_v26, 1  ;;  %v11687_v45 = vld [vmem:[%s10570_s12 + $0x78] sm:$0xff] }
  0x6d   : > { %8212 = vmatmul.mubr.f32.gmra.mxu1 %v15955_v44  ;;  %v11558_v44 = vrot.slane %v2663_v0, %v10603_v27  ;;  %15958 = vst [vmem:[#allocation69_spill] sm:$0xff] %v11561_v54  ;;  %8573 = vmatprep.subr.mxu0 %v15879_v17  ;;  %v9980_v19 = vcombine.low %v1300_v48, %v11448_v1  ;;  %v11584_v48 = vrot.slane %v11526_v2, 2  ;;  %v15968_v53 = vrot.slane %v11403_v10, 1 }
  0x6e   : > { %15956 = vst [vmem:[#allocation67_spill] sm:$0xff] %v11555_v43  ;;  %8303 = vmatprep.subr.mxu1 %v15879_v17  ;;  %v11567_v58 = vrot.slane %v2998_v13, %v10603_v27  ;;  %v11572_v41 = vsel %vm383_vm0, %v404_v3, %v15960_v35  ;;  %8574 = vmatpush1.msra.mxu0 %v3964_v7  ;;  %v3963_v7 = vld [vmem:[%s15389_s1 + $0x230] sm:$0xff] }
  0x6f   : > { %15957 = vst [vmem:[#allocation68_spill] sm:$0xff] %v11558_v44  ;;  %15961 = vst [vmem:[#allocation71_spill] sm:$0xff] %v11572_v41  ;;  %v15962_v63 = vcombine.high %v11267_v24, %v11306_v22  ;;  %v11578_v0 = vrot.slane %v9978_v32, %v10603_v27  ;;  %v10049_v38 = vcombine.low %v2631_v28, %v11555_v43  ;;  %8304 = vmatpush1.msra.mxu1 %v3932_v11  ;;  %v3931_v28 = vld [vmem:[%s15389_s1 + $0x130] sm:$0xff] }
  0x70   : > { %15959 = vst [vmem:[#allocation70_spill] sm:$0xff] %v11567_v58  ;;  %v1051_v13 = vcombine.low %v11310_v29, %v11572_v41  ;;  %15963 = vst [vmem:[#allocation72_spill] sm:$0xff] %v11584_v48  ;;  %v15964_v3 = vcombine.high %v11326_v46, %v11340_v20  ;;  %v11596_v32 = vrot.slane %v9980_v19, %v10603_v27  ;;  %8575 = vmatprep.subr.mxu0 %v15879_v17 }
  0x71   : > { %8111 = vmatprep.mubr.f32.mxu0 %v15962_v63  ;;  %v3015_v35 = vcombine.high %v11555_v43, %v11567_v58  ;;  %v1052_v63 = vcombine.high %v11310_v29, %v11572_v41  ;;  %v15965_v11 = vcombine.low %v11267_v24, %v11306_v22  ;;  %v11609_v1 = vrot.slane %v10049_v38, %v10603_v27  ;;  %v11619_v29 = vld [vmem:[%s10570_s12 + $0x70] sm:$0xf] }
  0x72   : > { %8216 = vmatprep.mubr.f32.mxu1 %v15964_v3  ;;  %v15966_v3 = vcombine.low %v11326_v46, %v11340_v20  ;;  %v1073_v19 = vrot.slane %v1051_v13, %v10603_v27  ;;  %v11616_v58 = vsel %vm383_vm0, %v15968_v53, %v11561_v54  ;;  %8305 = vmatprep.subr.mxu1 %v15879_v17  ;;  %v15971_v20 = vrot.slane %v11403_v10, 2 }
  0x73   : > { %8112 = vmatmul.mubr.f32.gmra.mxu0 %v15965_v11  ;;  %15967 = vst [vmem:[#allocation73_spill] sm:$0xff] %v11609_v1  ;;  %15969 = vst [vmem:[#allocation74_spill] sm:$0xff] %v11616_v58  ;;  %v4789_v11 = vcombine.high %v11578_v0, %v11596_v32  ;;  %v10068_v38 = vcombine.low %v3015_v35, %v11558_v44  ;;  %v4788_v13 = vcombine.low %v11578_v0, %v11596_v32 }
  0x74   : > { %8217 = vmatmul.mubr.f32.gmra.mxu1 %v15966_v3  ;;  %v11629_v3 = vld [vmem:[%s10570_s12 + $0x158] sm:$0xff]  ;;  %8576 = vmatpush1.msra.mxu0 %v3963_v7  ;;  %v1080_v53 = vrot.slane %v1052_v63, %v10603_v27  ;;  %v11633_v46 = vrot.slane %v1073_v19, %v10603_v27  ;;  %v11639_v22 = vsel %vm474_vm1, %v15971_v20, %v11584_v48  ;;  %v3930_v7 = vld [vmem:[%s15389_s1 + $0x128] sm:$0xff]  ;;  %v11659_v19 = vrot.slane %v11619_v29, 1 }
  0x75   : > { %8306 = vmatpush1.msra.mxu1 %v3931_v28  ;;  %15972 = vst [vmem:[#allocation76_spill] sm:$0xff] %v11639_v22  ;;  %v15973_v35 = vcombine.high %v11461_v50, %v11474_v57  ;;  %v15974_v0 = vcombine.high %v11464_v49, %v11467_v56  ;;  %v3962_v28 = vld [vmem:[%s15389_s1 + $0x228] sm:$0xff]  ;;  %v6649_v32 = vrot.slane %v10068_v38, %v10603_v27  ;;  %v454_v24 = vrot.slane %v11499_v14, 1 }
  0x76   : > { %15970 = vst [vmem:[#allocation75_spill] sm:$0xff] %v11633_v46  ;;  %v2735_v20 = vcombine.low %v11403_v10, %v11616_v58  ;;  %v2736_v63 = vcombine.high %v11403_v10, %v11616_v58  ;;  %15975 = vst [vmem:[#allocation77_spill] sm:$0xff] %v11659_v19  ;;  %8307 = vmatprep.subr.mxu1 %v15879_v17  ;;  %8577 = vmatprep.subr.mxu0 %v15879_v17 }
  0x77   : > { %8116 = vmatprep.mubr.f32.mxu0 %v15973_v35  ;;  %8221 = vmatprep.mubr.f32.mxu1 %v15974_v0  ;;  %v11664_v35 = vrot.slane %v1080_v53, %v10603_v27  ;;  %v2999_v38 = vcombine.high %v11520_v18, %v11499_v14  ;;  %v3071_v0 = vcombine.low %v11639_v22, %v11629_v3  ;;  %v3961_v53 = vld [vmem:[%s15389_s1 + $0x220] sm:$0xff] }
  0x78   : > { %v15977_v10 = vcombine.low %v11461_v50, %v11474_v57  ;;  %v15978_v48 = vcombine.low %v11464_v49, %v11467_v56  ;;  %v6658_v58 = vcombine.high %v11609_v1, %v6649_v32  ;;  %v6657_v18 = vcombine.low %v11609_v1, %v6649_v32  ;;  %8308 = vmatpush1.msra.mxu1 %v3930_v7  ;;  %v3929_v50 = vld [vmem:[%s15389_s1 + $0x120] sm:$0xff] }
  0x79   : > { %15976 = vst [vmem:[#allocation78_spill] sm:$0xff] %v11664_v35  ;;  %v11683_v43 = vrot.slane %v2735_v20, %v10603_v27  ;;  %8578 = vmatpush1.msra.mxu0 %v3962_v28  ;;  %v4878_v57 = vcombine.high %v11633_v46, %v11664_v35  ;;  %v11698_v32 = vrot.slane %v2999_v38, %v10603_v27  ;;  %v11701_v20 = vld [vmem:[%s10570_s12 + $0x80] sm:$0xff]  ;;  %v409_v56 = vrot.slane %v11687_v45, 1 }
  0x7a   : > { %8117 = vmatmul.mubr.f32.gmra.mxu0 %v15977_v10  ;;  %8222 = vmatmul.mubr.f32.gmra.mxu1 %v15978_v48  ;;  %v11695_v48 = vrot.slane %v2736_v63, %v10603_v27  ;;  %v11706_v7 = vrot.slane %v3071_v0, %v10603_v27  ;;  %v4877_v28 = vcombine.low %v11633_v46, %v11664_v35  ;;  %v15983_v10 = vrot.slane %v11436_v26, 1  ;;  %v11740_v49 = vld [vmem:[%s10570_s12 + $0x160] sm:$0xf] }
  0x7b   : > { %15979 = vst [vmem:[#allocation79_spill] sm:$0xff] %v11683_v43  ;;  %15981 = vst [vmem:[#allocation81_spill] sm:$0xff] %v11698_v32  ;;  %8579 = vmatprep.subr.mxu0 %v15879_v17  ;;  %8309 = vmatprep.subr.mxu1 %v15879_v17  ;;  %v3017_v38 = vcombine.high %v11558_v44, %v11698_v32  ;;  %v15985_v1 = vrot.slane %v11629_v3, 1  ;;  %v500_v32 = vrot.slane %v11687_v45, 2 }
  0x7c   : > { %15980 = vst [vmem:[#allocation80_spill] sm:$0xff] %v11695_v48  ;;  %15982 = vst [vmem:[#allocation82_spill] sm:$0xff] %v11706_v7  ;;  %v11714_v63 = vsel %vm383_vm0, %v15983_v10, %v11659_v19  ;;  %8580 = vmatpush1.msra.mxu0 %v3961_v53  ;;  %8121 = vmatprep.mubr.f32.mxu0 %v4789_v11  ;;  %v3928_v10 = vld [vmem:[%s15389_s1 + $0x118] sm:$0xff]  ;;  %v3088_v53 = vcombine.high %v11683_v43, %v11706_v7 }
  0x7d   : > { %15984 = vst [vmem:[#allocation83_spill] sm:$0xff] %v11714_v63  ;;  %v1124_v41 = vcombine.low %v11436_v26, %v11714_v63  ;;  %v1125_v0 = vcombine.high %v11436_v26, %v11714_v63  ;;  %8226 = vmatprep.mubr.f32.mxu1 %v6658_v58  ;;  %8310 = vmatpush1.msra.mxu1 %v3929_v50  ;;  %v3960_v11 = vld [vmem:[%s15389_s1 + $0x218] sm:$0xff]  ;;  %v3958_v63 = vld [vmem:[%s15389_s1 + $0x208] sm:$0xff] }
  0x7e   : > { %v11734_v26 = vsel %vm383_vm0, %v454_v24, %v15985_v1  ;;  %v2796_v58 = vcombine.low %v11526_v2, %v11561_v54  ;;  %8122 = vmatmul.mubr.f32.gmra.mxu0 %v4788_v13  ;;  %8227 = vmatmul.mubr.f32.gmra.mxu1 %v6657_v18  ;;  %v10074_v46 = vcombine.low %v3017_v38, %v11683_v43  ;;  %v11747_v24 = vld [vmem:[%s10570_s12 + $0x88] sm:$0xf]  ;;  %v3927_v38 = vld [vmem:[%s15389_s1 + $0x110] sm:$0xff]  ;;  %v15992_v54 = vrot.slane %v11701_v20, 1 }
  0x7f   : > { %15986 = vst [vmem:[#allocation84_spill] sm:$0xff] %v11734_v26  ;;  %v1146_v35 = vrot.slane %v1124_v41, %v10603_v27  ;;  %v1153_v7 = vrot.slane %v1125_v0, %v10603_v27  ;;  %8311 = vmatprep.subr.mxu1 %v15879_v17  ;;  %8581 = vmatprep.subr.mxu0 %v15879_v17  ;;  %v3959_v0 = vld [vmem:[%s15389_s1 + $0x210] sm:$0xff]  ;;  %v11772_v41 = vrot.slane %v11740_v49, 1  ;;  %v11802_v43 = vrot.slane %v11747_v24, 2 }
  0x80   : > { %v10076_v2 = vcombine.low %v3088_v53, %v11695_v48  ;;  %v11753_v1 = vrot.slane %v2796_v58, %v10603_v27  ;;  %v2841_v18 = vcombine.low %v11499_v14, %v11734_v26  ;;  %8312 = vmatpush1.msra.mxu1 %v3928_v10  ;;  %8582 = vmatpush1.msra.mxu0 %v3960_v11  ;;  %v11775_v10 = vld [vmem:[%s10570_s12 + $0x168] sm:$0xff] }
  0x81   : > { %v6724_v13 = vrot.slane %v10074_v46, %v10603_v27  ;;  %v11766_v53 = vrot.slane %v1146_v35, %v10603_v27  ;;  %v11769_v58 = vrot.slane %v1153_v7, %v10603_v27  ;;  %15990 = vst [vmem:[#allocation88_spill] sm:$0xff] %v11772_v41  ;;  %8126 = vmatprep.mubr.f32.mxu0 %v4878_v57  ;;  %v11783_v35 = vrot.slane %v11747_v24, 1  ;;  %v11786_v7 = vld [vmem:[%s10570_s12 + $0x170] sm:$0xff]  ;;  %v3926_v57 = vld [vmem:[%s15389_s1 + $0x108] sm:$0xff] }
  0x82   : > { %15987 = vst [vmem:[#allocation85_spill] sm:$0xff] %v11753_v1  ;;  %v6738_v46 = vrot.slane %v10076_v2, %v10603_v27  ;;  %8313 = vmatprep.subr.mxu1 %v15879_v17  ;;  %v2863_v11 = vrot.slane %v2841_v18, %v10603_v27  ;;  %v3072_v50 = vcombine.high %v11639_v22, %v11629_v3  ;;  %15994 = vst [vmem:[#allocation91_spill] sm:$0xff] %v11802_v43 }
  0x83   : > { %15988 = vst [vmem:[#allocation86_spill] sm:$0xff] %v11766_v53  ;;  %15989 = vst [vmem:[#allocation87_spill] sm:$0xff] %v11769_v58  ;;  %8583 = vmatprep.subr.mxu0 %v15879_v17  ;;  %8127 = vmatmul.mubr.f32.gmra.mxu0 %v4877_v28  ;;  %v4967_v2 = vcombine.high %v11766_v53, %v11769_v58  ;;  %v4966_v18 = vcombine.low %v11766_v53, %v11769_v58  ;;  %v11811_v53 = vld [vmem:[%s10570_s12 + $0x90] sm:$0xff] }
  0x84   : > { %15991 = vst [vmem:[#allocation89_spill] sm:$0xff] %v11783_v35  ;;  %v11799_v22 = vsel %vm383_vm0, %v409_v56, %v15992_v54  ;;  %v6747_v28 = vcombine.high %v6724_v13, %v6738_v46  ;;  %v6746_v44 = vcombine.low %v6724_v13, %v6738_v46  ;;  %8314 = vmatpush1.msra.mxu1 %v3927_v38  ;;  %v15997_v13 = vrot.slane %v11701_v20, 2  ;;  %v11828_v46 = vld [vmem:[%s10570_s12 + $0x178] sm:$0xf] }
  0x85   : > { %15993 = vst [vmem:[#allocation90_spill] sm:$0xff] %v11799_v22  ;;  %8584 = vmatpush1.msra.mxu0 %v3959_v0  ;;  %v11808_v58 = vrot.slane %v3072_v50, %v10603_v27  ;;  %8315 = vmatprep.subr.mxu1 %v15879_v17  ;;  %v11817_v54 = vrot.slane %v2863_v11, %v10603_v27  ;;  %v15999_v0 = vrot.slane %v11629_v3, 1 }
  0x86   : > { %8585 = vmatprep.subr.mxu0 %v15879_v17  ;;  %v11822_v38 = vsel %vm474_vm1, %v500_v32, %v15997_v13  ;;  %v1185_v50 = vcombine.low %v11619_v29, %v11659_v19  ;;  %8231 = vmatprep.mubr.f32.mxu1 %v6747_v28  ;;  %v1230_v11 = vcombine.low %v11687_v45, %v11799_v22  ;;  %v11837_v32 = vld [vmem:[%s10570_s12 + $0x98] sm:$0xff]  ;;  %v3957_v28 = vld [vmem:[%s15389_s1 + $0x200] sm:$0xff]  ;;  %v11895_v19 = vld [vmem:[%s10570_s12 + $0xa8] sm:$0xff] }
  0x87   : > { %15995 = vst [vmem:[#allocation92_spill] sm:$0xff] %v11808_v58  ;;  %15996 = vst [vmem:[#allocation93_spill] sm:$0xff] %v11817_v54  ;;  %8316 = vmatpush1.msra.mxu1 %v3926_v57  ;;  %v3090_v56 = vcombine.high %v11695_v48, %v11808_v58  ;;  %v1231_v36 = vcombine.high %v11687_v45, %v11799_v22  ;;  %8586 = vmatpush1.msra.mxu0 %v3958_v63  ;;  %v3925_v57 = vld [vmem:[%s15389_s1 + $0x100] sm:$0xff]  ;;  %v11865_v48 = vrot.slane %v11828_v46, 1 }
  0x88   : > { %15998 = vst [vmem:[#allocation94_spill] sm:$0xff] %v11822_v38  ;;  %8232 = vmatmul.mubr.f32.gmra.mxu1 %v6746_v44  ;;  %v1199_v13 = vrot.slane %v1185_v50, %v10603_v27  ;;  %v1566_v45 = vcombine.low %v11822_v38, %v11811_v53  ;;  %v11853_v29 = vsel %vm383_vm0, %v15999_v0, %v11772_v41  ;;  %v11868_v22 = vld [vmem:[%s10570_s12 + $0xa0] sm:$0xf]  ;;  %v16005_v44 = vrot.slane %v11701_v20, 1 }
  0x89   : > { %16000 = vst [vmem:[#allocation95_spill] sm:$0xff] %v11853_v29  ;;  %8131 = vmatprep.mubr.f32.mxu0 %v4967_v2  ;;  %v10082_v63 = vcombine.low %v3090_v56, %v11753_v1  ;;  %8317 = vmatprep.subr.mxu1 %v15879_v17  ;;  %v11859_v58 = vrot.slane %v1230_v11, %v10603_v27  ;;  %16003 = vst [vmem:[#allocation98_spill] sm:$0xff] %v11865_v48  ;;  %v3988_v11 = vld [vmem:[%s15389_s1 + $0x2f8] sm:$0xff] }
  0x8a   : > { %v11862_v50 = vrot.slane %v1231_v36, %v10603_v27  ;;  %8132 = vmatmul.mubr.f32.gmra.mxu0 %v4966_v18  ;;  %8587 = vmatprep.subr.mxu0 %v15879_v17  ;;  %v11872_v2 = vrot.slane %v1566_v45, %v10603_v27  ;;  %v2842_v56 = vcombine.high %v11499_v14, %v11734_v26  ;;  %v3956_v36 = vld [vmem:[%s15389_s1 + $0x1f8] sm:$0xff]  ;;  %v11910_v18 = vld [vmem:[%s10570_s12 + $0xb0] sm:$0xff] }
  0x8b   : > { %16001 = vst [vmem:[#allocation96_spill] sm:$0xff] %v11859_v58  ;;  %v2914_v0 = vcombine.low %v11629_v3, %v11853_v29  ;;  %v6813_v45 = vrot.slane %v10082_v63, %v10603_v27  ;;  %8318 = vmatpush1.msra.mxu1 %v3925_v57  ;;  %8588 = vmatpush1.msra.mxu0 %v3957_v28  ;;  %v11907_v63 = vrot.slane %v11868_v22, 1 }
  0x8c   : > { %16002 = vst [vmem:[#allocation97_spill] sm:$0xff] %v11862_v50  ;;  %16004 = vst [vmem:[#allocation99_spill] sm:$0xff] %v11872_v2  ;;  %v9969_v14 = vcombine.low %v1199_v13, %v11859_v58  ;;  %v11891_v1 = vsel %vm383_vm0, %v16005_v44, %v11783_v35  ;;  %8319 = vmatprep.subr.mxu1 %v15879_v17  ;;  %8589 = vmatprep.subr.mxu0 %v15879_v17  ;;  %v3955_v44 = vld [vmem:[%s15389_s1 + $0x1f0] sm:$0xff] }
  0x8d   : > { %16006 = vst [vmem:[#allocation100_spill] sm:$0xff] %v11891_v1  ;;  %v1583_v57 = vcombine.high %v11859_v58, %v11872_v2  ;;  %v2870_v28 = vrot.slane %v2842_v56, %v10603_v27  ;;  %v2936_v13 = vrot.slane %v2914_v0, %v10603_v27  ;;  %16007 = vst [vmem:[#allocation101_spill] sm:$0xff] %v11907_v63  ;;  %8320 = vmatpush2.msra.mxu1 %v3956_v36  ;;  %v3987_v56 = vld [vmem:[%s15389_s1 + $0x2f0] sm:$0xff]  ;;  %v3954_v36 = vld [vmem:[%s15389_s1 + $0x1e8] sm:$0xff] }
  0x8e   : > { %v6836_v26 = vcombine.high %v6813_v45, %v11817_v54  ;;  %v6835_v23 = vcombine.low %v6813_v45, %v11817_v54  ;;  %v11915_v51 = vrot.slane %v9969_v14, %v10603_v27  ;;  %8590 = vmatpush2.msra.mxu0 %v3988_v11  ;;  %v11921_v0 = vrot.slane %v11828_v46, 2  ;;  %8321 = vmatprep.subr.mxu1 %v15879_v17 }
  0x8f   : > { %v9988_v2 = vcombine.low %v1583_v57, %v11862_v50  ;;  %v11925_v58 = vrot.slane %v2870_v28, %v10603_v27  ;;  %v11928_v45 = vrot.slane %v2936_v13, %v10603_v27  ;;  %8591 = vmatprep.subr.mxu0 %v15879_v17  ;;  %8322 = vmatpush2.msra.mxu1 %v3955_v44  ;;  %v16012_v11 = vrot.slane %v11701_v20, 2  ;;  %v11944_v13 = vld [vmem:[%s10570_s12 + $0x180] sm:$0xff] }
  0x90   : > { %16008 = vst [vmem:[#allocation102_spill] sm:$0xff] %v11915_v51  ;;  %16009 = vst [vmem:[#allocation103_spill] sm:$0xff] %v11921_v0  ;;  %8236 = vmatprep.mubr.f32.mxu1 %v6836_v26  ;;  %v1303_v57 = vcombine.low %v11701_v20, %v11891_v1  ;;  %v1304_v28 = vcombine.high %v11701_v20, %v11891_v1  ;;  %8592 = vmatpush2.msra.mxu0 %v3987_v56 }
  0x91   : > { %16010 = vst [vmem:[#allocation104_spill] sm:$0xff] %v11925_v58  ;;  %16011 = vst [vmem:[#allocation105_spill] sm:$0xff] %v11928_v45  ;;  %v11937_v14 = vsel %vm474_vm1, %v16012_v11, %v11802_v43  ;;  %8237 = vmatmul.mubr.f32.gmra.mxu1 %v6835_v23  ;;  %v5047_v26 = vrot.slane %v9988_v2, %v10603_v27  ;;  %v6925_v44 = vcombine.high %v11925_v58, %v11928_v45 }
  0x92   : > { %16013 = vst [vmem:[#allocation106_spill] sm:$0xff] %v11937_v14  ;;  %v6924_v11 = vcombine.low %v11925_v58, %v11928_v45  ;;  %v11957_v43 = vrot.slane %v1303_v57, %v10603_v27  ;;  %v11960_v23 = vrot.slane %v1304_v28, %v10603_v27  ;;  %v1567_v2 = vcombine.high %v11822_v38, %v11811_v53 }
  0x93   : > { %v1639_v56 = vcombine.low %v11937_v14, %v11837_v32  ;;  %8323 = vmatprep.subr.mxu1 %v15879_v17  ;;  %v5056_v54 = vcombine.high %v11915_v51, %v5047_v26  ;;  %8241 = vmatprep.mubr.f32.mxu1 %v6925_v44  ;;  %v5055_v20 = vcombine.low %v11915_v51, %v5047_v26  ;;  %v16016_v57 = vrot.slane %v11786_v7, 1  ;;  %v11989_v51 = vld [vmem:[%s10570_s12 + $0x188] sm:$0xff] }
  0x94   : > { %16014 = vst [vmem:[#allocation107_spill] sm:$0xff] %v11957_v43  ;;  %16015 = vst [vmem:[#allocation108_spill] sm:$0xff] %v11960_v23  ;;  %v16017_v45 = vrot.slane %v11775_v10, 1  ;;  %v2915_v58 = vcombine.high %v11629_v3, %v11853_v29  ;;  %v11979_v1 = vrot.slane %v1567_v2, %v10603_v27  ;;  %v2975_v44 = vcombine.low %v11740_v49, %v11772_v41  ;;  %v3986_v2 = vld [vmem:[%s15389_s1 + $0x2e8] sm:$0xff] }
  0x95   : > { %v11982_v38 = vrot.slane %v1639_v56, %v10603_v27  ;;  %8324 = vmatpush2.msra.mxu1 %v3954_v36  ;;  %8136 = vmatprep.mubr.f32.mxu0 %v5056_v54  ;;  %v16021_v56 = vrot.slane %v11837_v32, 1  ;;  %v16022_v49 = vrot.slane %v11811_v53, 1  ;;  %v1364_v36 = vcombine.low %v11747_v24, %v11783_v35  ;;  %v3985_v35 = vld [vmem:[%s15389_s1 + $0x2e0] sm:$0xff] }
  0x96   : > { %v11974_v28 = vsel %vm383_vm0, %v16017_v45, %v16016_v57  ;;  %16019 = vst [vmem:[#allocation110_spill] sm:$0xff] %v11979_v1  ;;  %v11992_v45 = vld [vmem:[%s10570_s12 + $0xb8] sm:$0xf]  ;;  %8242 = vmatmul.mubr.f32.gmra.mxu1 %v6924_v11  ;;  %v2943_v3 = vrot.slane %v2915_v58, %v10603_v27  ;;  %8137 = vmatmul.mubr.f32.gmra.mxu0 %v5055_v20 }
  0x97   : > { %16018 = vst [vmem:[#allocation109_spill] sm:$0xff] %v11974_v28  ;;  %16020 = vst [vmem:[#allocation111_spill] sm:$0xff] %v11982_v38  ;;  %v3020_v26 = vcombine.low %v11775_v10, %v11974_v28  ;;  %v12003_v57 = vsel %vm383_vm0, %v16022_v49, %v16021_v56  ;;  %v1585_v58 = vcombine.high %v11862_v50, %v11979_v1  ;;  %8593 = vmatprep.subr.mxu0 %v15879_v17 }
  0x98   : > { %v1656_v54 = vcombine.high %v11957_v43, %v11982_v38  ;;  %v2989_v11 = vrot.slane %v2975_v44, %v10603_v27  ;;  %v12017_v56 = vrot.slane %v2943_v3, %v10603_v27  ;;  %8325 = vmatprep.subr.mxu1 %v15879_v17  ;;  %v12022_v24 = vrot.slane %v1364_v36, %v10603_v27  ;;  %v3953_v44 = vld [vmem:[%s15389_s1 + $0x1e0] sm:$0xff] }
  0x99   : > { %v12014_v29 = vrot.slane %v3020_v26, %v10603_v27  ;;  %v1409_v20 = vcombine.low %v11811_v53, %v12003_v57  ;;  %v12030_v26 = vrot.slane %v11992_v45, 1  ;;  %v9994_v3 = vcombine.low %v1585_v58, %v11957_v43  ;;  %8594 = vmatpush2.msra.mxu0 %v3986_v2  ;;  %8326 = vmatpush2.msra.mxu1 %v3953_v44 }
  0x9a   : > { %16024 = vst [vmem:[#allocation113_spill] sm:$0xff] %v12017_v56  ;;  %16025 = vst [vmem:[#allocation114_spill] sm:$0xff] %v12022_v24  ;;  %v9996_v49 = vcombine.low %v1656_v54, %v11960_v23  ;;  %v1640_v36 = vcombine.high %v11937_v14, %v11837_v32  ;;  %8595 = vmatprep.subr.mxu0 %v15879_v17  ;;  %v16027_v1 = vrot.slane %v11786_v7, 1  ;;  %v16029_v54 = vrot.slane %v11786_v7, 2 }
  0x9b   : > { %16023 = vst [vmem:[#allocation112_spill] sm:$0xff] %v12014_v29  ;;  %16026 = vst [vmem:[#allocation115_spill] sm:$0xff] %v12030_v26  ;;  %v10071_v41 = vcombine.low %v2989_v11, %v12014_v29  ;;  %v1431_v38 = vrot.slane %v1409_v20, %v10603_v27  ;;  %v16030_v2 = vrot.slane %v11775_v10, 2  ;;  %v3021_v14 = vcombine.high %v11775_v10, %v11974_v28 }
  0x9c   : > { %v12046_v58 = vsel %vm383_vm0, %v16027_v1, %v11865_v48  ;;  %v5122_v43 = vrot.slane %v9994_v3, %v10603_v27  ;;  %v5136_v20 = vrot.slane %v9996_v49, %v10603_v27  ;;  %v12063_v1 = vrot.slane %v1640_v36, %v10603_v27  ;;  %8596 = vmatpush2.msra.mxu0 %v3985_v35 }
  0x9d   : > { %16028 = vst [vmem:[#allocation116_spill] sm:$0xff] %v12046_v58  ;;  %v12053_v11 = vsel %vm474_vm1, %v16030_v2, %v16029_v54  ;;  %v12060_v50 = vrot.slane %v10071_v41, %v10603_v27  ;;  %v12069_v54 = vrot.slane %v1431_v38, %v10603_v27  ;;  %v12072_v10 = vrot.slane %v3021_v14, %v10603_v27 }
  0x9e   : > { %16031 = vst [vmem:[#allocation117_spill] sm:$0xff] %v12053_v11  ;;  %v3093_v3 = vcombine.low %v11786_v7, %v12046_v58  ;;  %v3356_v41 = vcombine.low %v12053_v11, %v11944_v13  ;;  %v5145_v49 = vcombine.high %v5122_v43, %v5136_v20  ;;  %v5144_v36 = vcombine.low %v5122_v43, %v5136_v20  ;;  %v3984_v43 = vld [vmem:[%s15389_s1 + $0x2d8] sm:$0xff] }
  0x9f   : > { %16032 = vst [vmem:[#allocation118_spill] sm:$0xff] %v12060_v50  ;;  %16033 = vst [vmem:[#allocation119_spill] sm:$0xff] %v12069_v54  ;;  %v7014_v44 = vcombine.high %v12017_v56, %v12060_v50  ;;  %v7013_v2 = vcombine.low %v12017_v56, %v12060_v50  ;;  %8327 = vmatprep.subr.mxu1 %v15879_v17  ;;  %v1658_v38 = vcombine.high %v11960_v23, %v12063_v1 }
  0xa0   : > { %16034 = vst [vmem:[#allocation120_spill] sm:$0xff] %v12072_v10  ;;  %v12086_v14 = vrot.slane %v3093_v3, %v10603_v27  ;;  %v3357_v28 = vcombine.high %v12053_v11, %v11944_v13  ;;  %v12091_v35 = vrot.slane %v3356_v41, %v10603_v27  ;;  %8328 = vmatpush2.msra.mxu1 %v3952_v16  ;;  %v16037_v20 = vrot.slane %v11837_v32, 1 }
  0xa1   : > { %8141 = vmatprep.mubr.f32.mxu0 %v5145_v49  ;;  %8246 = vmatprep.mubr.f32.mxu1 %v7014_v44  ;;  %v1410_v3 = vcombine.high %v11811_v53, %v12003_v57  ;;  %v16038_v41 = vrot.slane %v11786_v7, 2  ;;  %v10002_v44 = vcombine.low %v1658_v38, %v12022_v24  ;;  %v12186_v11 = vrot.slane %v11992_v45, 2 }
  0xa2   : > { %16035 = vst [vmem:[#allocation121_spill] sm:$0xff] %v12086_v14  ;;  %16036 = vst [vmem:[#allocation122_spill] sm:$0xff] %v12091_v35  ;;  %v12100_v50 = vsel %vm383_vm0, %v16037_v20, %v11907_v63  ;;  %8142 = vmatmul.mubr.f32.gmra.mxu0 %v5144_v36  ;;  %8247 = vmatmul.mubr.f32.gmra.mxu1 %v7013_v2  ;;  %v12113_v56 = vrot.slane %v3357_v28, %v10603_v27  ;;  %v3951_v28 = vld [vmem:[%s15389_s1 + $0x1d0] sm:$0xff] }
  0xa3   : > { %v12108_v16 = vsel %vm474_vm1, %v16038_v41, %v11921_v0  ;;  %v3373_v20 = vcombine.high %v12014_v29, %v12091_v35  ;;  %8597 = vmatprep.subr.mxu0 %v15879_v17  ;;  %v1438_v41 = vrot.slane %v1410_v3, %v10603_v27  ;;  %v1482_v49 = vcombine.low %v11837_v32, %v12100_v50  ;;  %v12136_v35 = vld [vmem:[%s10570_s12 + $0x190] sm:$0xf] }
  0xa4   : > { %16039 = vst [vmem:[#allocation123_spill] sm:$0xff] %v12108_v16  ;;  %16040 = vst [vmem:[#allocation124_spill] sm:$0xff] %v12113_v56  ;;  %v3094_v36 = vcombine.high %v11786_v7, %v12046_v58  ;;  %v3154_v2 = vcombine.low %v11828_v46, %v11865_v48  ;;  %v5211_v38 = vrot.slane %v10002_v44, %v10603_v27  ;;  %8598 = vmatpush2.msra.mxu0 %v3984_v43  ;;  %v3983_v43 = vld [vmem:[%s15389_s1 + $0x2d0] sm:$0xff] }
  0xa5   : > { %v3375_v53 = vcombine.high %v12072_v10, %v12113_v56  ;;  %v10090_v3 = vcombine.low %v3373_v20, %v12072_v10  ;;  %v3429_v0 = vcombine.low %v12108_v16, %v11989_v51  ;;  %v1504_v7 = vrot.slane %v1482_v49, %v10603_v27  ;;  %8329 = vmatprep.subr.mxu1 %v15879_v17 }
  0xa6   : > { %v12140_v46 = vrot.slane %v1438_v41, %v10603_v27  ;;  %v12143_v48 = vrot.slane %v3094_v36, %v10603_v27  ;;  %v12146_v44 = vrot.slane %v3154_v2, %v10603_v27  ;;  %v5234_v20 = vcombine.high %v5211_v38, %v12069_v54  ;;  %8330 = vmatpush2.msra.mxu1 %v3951_v28 }
  0xa7   : > { %v10092_v49 = vcombine.low %v3375_v53, %v12086_v14  ;;  %v7080_v41 = vrot.slane %v10090_v3, %v10603_v27  ;;  %v5233_v56 = vcombine.low %v5211_v38, %v12069_v54  ;;  %v12157_v36 = vrot.slane %v1504_v7, %v10603_v27  ;;  %8599 = vmatprep.subr.mxu0 %v15879_v17  ;;  %v3950_v53 = vld [vmem:[%s15389_s1 + $0x1c8] sm:$0xff]  ;;  %v12173_v38 = vld [vmem:[%s10570_s12 + $0x198] sm:$0xff] }
  0xa8   : > { %16041 = vst [vmem:[#allocation125_spill] sm:$0xff] %v12140_v46  ;;  %16042 = vst [vmem:[#allocation126_spill] sm:$0xff] %v12143_v48  ;;  %v3430_v2 = vcombine.high %v12108_v16, %v11989_v51  ;;  %v12162_v58 = vrot.slane %v3429_v0, %v10603_v27  ;;  %8331 = vmatprep.subr.mxu1 %v15879_v17  ;;  %v12170_v28 = vrot.slane %v12136_v35, 1  ;;  %8146 = vmatprep.mubr.f32.mxu0 %v5234_v20 }
  0xa9   : > { %16043 = vst [vmem:[#allocation127_spill] sm:$0xff] %v12146_v44  ;;  %16044 = vst [vmem:[#allocation128_spill] sm:$0xff] %v12157_v36  ;;  %v7094_v3 = vrot.slane %v10092_v49, %v10603_v27  ;;  %8600 = vmatpush2.msra.mxu0 %v3983_v43  ;;  %v16047_v0 = vrot.slane %v11910_v18, 1  ;;  %v16048_v7 = vrot.slane %v11895_v19, 1  ;;  %v1483_v16 = vcombine.high %v11837_v32, %v12100_v50  ;;  %v3982_v32 = vld [vmem:[%s15389_s1 + $0x2c8] sm:$0xff] }
  0xaa   : > { %16045 = vst [vmem:[#allocation129_spill] sm:$0xff] %v12162_v58  ;;  %16046 = vst [vmem:[#allocation130_spill] sm:$0xff] %v12170_v28  ;;  %8147 = vmatmul.mubr.f32.gmra.mxu0 %v5233_v56  ;;  %v5323_v20 = vcombine.high %v12140_v46, %v12157_v36  ;;  %v12191_v49 = vrot.slane %v3430_v2, %v10603_v27  ;;  %v3446_v43 = vcombine.high %v12086_v14, %v12162_v58 }
  0xab   : > { %v12181_v54 = vsel %vm383_vm0, %v16048_v7, %v16047_v0  ;;  %16050 = vst [vmem:[#allocation132_spill] sm:$0xff] %v12186_v11  ;;  %v5322_v0 = vcombine.low %v12140_v46, %v12157_v36  ;;  %v12201_v7 = vld [vmem:[%s10570_s12 + $0x1a0] sm:$0xff]  ;;  %v7103_v10 = vcombine.high %v7080_v41, %v7094_v3  ;;  %v7102_v56 = vcombine.low %v7080_v41, %v7094_v3 }
  0xac   : > { %16049 = vst [vmem:[#allocation131_spill] sm:$0xff] %v12181_v54  ;;  %16051 = vst [vmem:[#allocation133_spill] sm:$0xff] %v12191_v49  ;;  %8332 = vmatpush2.msra.mxu1 %v3950_v53  ;;  %8601 = vmatprep.subr.mxu0 %v15879_v17  ;;  %v1511_v2 = vrot.slane %v1483_v16, %v10603_v27  ;;  %v3448_v58 = vcombine.high %v12143_v48, %v12191_v49  ;;  %v16053_v16 = vrot.slane %v11989_v51, 1 }
  0xad   : > { %8151 = vmatprep.mubr.f32.mxu0 %v5323_v20  ;;  %v10098_v36 = vcombine.low %v3446_v43, %v12143_v48  ;;  %v1543_v46 = vcombine.low %v11868_v22, %v11907_v63  ;;  %v1588_v14 = vcombine.low %v11895_v19, %v12181_v54  ;;  %8251 = vmatprep.mubr.f32.mxu1 %v7103_v10  ;;  %v16054_v53 = vrot.slane %v11944_v13, 1  ;;  %v3949_v22 = vld [vmem:[%s15389_s1 + $0x1c0] sm:$0xff] }
  0xae   : > { %v12214_v41 = vrot.slane %v1511_v2, %v10603_v27  ;;  %8602 = vmatpush2.msra.mxu0 %v3982_v32  ;;  %v3981_v10 = vld [vmem:[%s15389_s1 + $0x2c0] sm:$0xff]  ;;  %v16056_v20 = vrot.slane %v11910_v18, 1  ;;  %8252 = vmatmul.mubr.f32.gmra.mxu1 %v7102_v56  ;;  %v10100_v32 = vcombine.low %v3448_v58, %v12146_v44  ;;  %v1589_v29 = vcombine.high %v11895_v19, %v12181_v54 }
  0xaf   : > { %v12221_v3 = vsel %vm383_vm0, %v16054_v53, %v16053_v16  ;;  %v7169_v16 = vrot.slane %v10098_v36, %v10603_v27  ;;  %8152 = vmatmul.mubr.f32.gmra.mxu0 %v5322_v0  ;;  %v1557_v53 = vrot.slane %v1543_v46, %v10603_v27  ;;  %v12241_v49 = vrot.slane %v1588_v14, %v10603_v27  ;;  %v12250_v58 = vld [vmem:[%s10570_s12 + $0xc0] sm:$0xff]  ;;  %v3948_v46 = vld [vmem:[%s15389_s1 + $0x1b8] sm:$0xff] }
  0xb0   : > { %16052 = vst [vmem:[#allocation134_spill] sm:$0xff] %v12214_v41  ;;  %16055 = vst [vmem:[#allocation135_spill] sm:$0xff] %v12221_v3  ;;  %v12233_v43 = vsel %vm383_vm0, %v16056_v20, %v12030_v26  ;;  %v3199_v48 = vcombine.low %v11944_v13, %v12221_v3  ;;  %v3200_v20 = vcombine.high %v11944_v13, %v12221_v3  ;;  %8333 = vmatprep.subr.mxu1 %v15879_v17 }
  0xb1   : > { %16057 = vst [vmem:[#allocation136_spill] sm:$0xff] %v12233_v43  ;;  %16058 = vst [vmem:[#allocation137_spill] sm:$0xff] %v12241_v49  ;;  %8603 = vmatprep.subr.mxu0 %v15879_v17  ;;  %v7183_v14 = vrot.slane %v10100_v32, %v10603_v27  ;;  %8334 = vmatpush2.msra.mxu1 %v3949_v22  ;;  %v16059_v0 = vrot.slane %v11910_v18, 2  ;;  %v16060_v13 = vrot.slane %v11895_v19, 2  ;;  %v3980_v32 = vld [vmem:[%s15389_s1 + $0x2b8] sm:$0xff] }
  0xb2   : > { %8604 = vmatpush2.msra.mxu0 %v3981_v10  ;;  %v9991_v44 = vcombine.low %v1557_v53, %v12241_v49  ;;  %v3221_v36 = vrot.slane %v3199_v48, %v10603_v27  ;;  %v3228_v22 = vrot.slane %v3200_v20, %v10603_v27  ;;  %8335 = vmatprep.subr.mxu1 %v15879_v17 }
  0xb3   : > { %v12262_v56 = vsel %vm474_vm1, %v16060_v13, %v16059_v0  ;;  %v1661_v10 = vcombine.low %v11910_v18, %v12233_v43  ;;  %v7192_v0 = vcombine.high %v7169_v16, %v7183_v14  ;;  %v7191_v19 = vcombine.low %v7169_v16, %v7183_v14  ;;  %8336 = vmatpush2.msra.mxu1 %v3948_v46 }
  0xb4   : > { %16061 = vst [vmem:[#allocation138_spill] sm:$0xff] %v12262_v56  ;;  %v12277_v13 = vrot.slane %v1589_v29, %v10603_v27  ;;  %v1924_v48 = vcombine.low %v12262_v56, %v12250_v58  ;;  %v12282_v53 = vrot.slane %v9991_v44, %v10603_v27  ;;  %v12285_v20 = vrot.slane %v3221_v36, %v10603_v27  ;;  %v12295_v29 = vld [vmem:[%s10570_s12 + $0xc8] sm:$0xff] }
  0xb5   : > { %v12288_v2 = vrot.slane %v3228_v22, %v10603_v27  ;;  %v12291_v3 = vrot.slane %v1661_v10, %v10603_v27  ;;  %8605 = vmatprep.subr.mxu0 %v15879_v17  ;;  %8256 = vmatprep.mubr.f32.mxu1 %v7192_v0  ;;  %v1925_v16 = vcombine.high %v12262_v56, %v12250_v58  ;;  %v16068_v46 = vrot.slane %v11989_v51, 1  ;;  %v12310_v22 = vld [vmem:[%s10570_s12 + $0x1a8] sm:$0xf] }
  0xb6   : > { %16062 = vst [vmem:[#allocation139_spill] sm:$0xff] %v12277_v13  ;;  %16063 = vst [vmem:[#allocation140_spill] sm:$0xff] %v12282_v53  ;;  %v12300_v44 = vrot.slane %v1924_v48, %v10603_v27  ;;  %8606 = vmatpush2.msra.mxu0 %v3980_v32  ;;  %8257 = vmatmul.mubr.f32.gmra.mxu1 %v7191_v19  ;;  %v5412_v10 = vcombine.high %v12214_v41, %v12282_v53 }
  0xb7   : > { %16064 = vst [vmem:[#allocation141_spill] sm:$0xff] %v12285_v20  ;;  %16065 = vst [vmem:[#allocation142_spill] sm:$0xff] %v12288_v2  ;;  %v12306_v36 = vsel %vm383_vm0, %v16068_v46, %v12170_v28  ;;  %v7281_v0 = vcombine.high %v12285_v20, %v12288_v2  ;;  %v5411_v48 = vcombine.low %v12214_v41, %v12282_v53  ;;  %8337 = vmatprep.subr.mxu1 %v15879_v17 }
  0xb8   : > { %16066 = vst [vmem:[#allocation143_spill] sm:$0xff] %v12291_v3  ;;  %16067 = vst [vmem:[#allocation144_spill] sm:$0xff] %v12300_v44  ;;  %v7280_v54 = vcombine.low %v12285_v20, %v12288_v2  ;;  %v12321_v46 = vrot.slane %v1925_v16, %v10603_v27  ;;  %v1941_v32 = vcombine.high %v12241_v49, %v12300_v44  ;;  %8156 = vmatprep.mubr.f32.mxu0 %v5412_v10  ;;  %v3947_v20 = vld [vmem:[%s15389_s1 + $0x1b0] sm:$0xff] }
  0xb9   : > { %16069 = vst [vmem:[#allocation145_spill] sm:$0xff] %v12306_v36  ;;  %v3272_v19 = vcombine.low %v11989_v51, %v12306_v36  ;;  %v3273_v14 = vcombine.high %v11989_v51, %v12306_v36  ;;  %8261 = vmatprep.mubr.f32.mxu1 %v7281_v0  ;;  %v16071_v16 = vrot.slane %v11910_v18, 2  ;;  %v1662_v53 = vcombine.high %v11910_v18, %v12233_v43 }
  0xba   : > { %16070 = vst [vmem:[#allocation146_spill] sm:$0xff] %v12321_v46  ;;  %v1722_v51 = vcombine.low %v11992_v45, %v12030_v26  ;;  %v12344_v41 = vrot.slane %v12310_v22, 1  ;;  %8157 = vmatmul.mubr.f32.gmra.mxu0 %v5411_v48  ;;  %v1943_v10 = vcombine.high %v12277_v13, %v12321_v46  ;;  %v10010_v0 = vcombine.low %v1941_v32, %v12277_v13  ;;  %v3979_v32 = vld [vmem:[%s15389_s1 + $0x2b0] sm:$0xff]  ;;  %v3946_v26 = vld [vmem:[%s15389_s1 + $0x1a8] sm:$0xff] }
  0xbb   : > { %v12337_v2 = vsel %vm474_vm1, %v16071_v16, %v12186_v11  ;;  %v3294_v36 = vrot.slane %v3272_v19, %v10603_v27  ;;  %v3301_v16 = vrot.slane %v3273_v14, %v10603_v27  ;;  %8262 = vmatmul.mubr.f32.gmra.mxu1 %v7280_v54  ;;  %8607 = vmatprep.subr.mxu0 %v15879_v17  ;;  %v12364_v19 = vrot.slane %v12310_v22, 2 }
  0xbc   : > { %16072 = vst [vmem:[#allocation147_spill] sm:$0xff] %v12337_v2  ;;  %16073 = vst [vmem:[#allocation148_spill] sm:$0xff] %v12344_v41  ;;  %v12353_v18 = vrot.slane %v1662_v53, %v10603_v27  ;;  %v12356_v45 = vrot.slane %v1722_v51, %v10603_v27  ;;  %v1997_v48 = vcombine.low %v12337_v2, %v12295_v29  ;;  %8338 = vmatpush2.msra.mxu1 %v3947_v20 }
  0xbd   : > { %16076 = vst [vmem:[#allocation151_spill] sm:$0xff] %v12364_v19  ;;  %v10012_v54 = vcombine.low %v1943_v10, %v12291_v3  ;;  %v5478_v14 = vrot.slane %v10010_v0, %v10603_v27  ;;  %v12369_v53 = vrot.slane %v3294_v36, %v10603_v27  ;;  %v12372_v51 = vrot.slane %v3301_v16, %v10603_v27  ;;  %v12383_v10 = vld [vmem:[%s10570_s12 + $0x1b0] sm:$0xff] }
  0xbe   : > { %16074 = vst [vmem:[#allocation149_spill] sm:$0xff] %v12353_v18  ;;  %16075 = vst [vmem:[#allocation150_spill] sm:$0xff] %v12356_v45  ;;  %v1998_v11 = vcombine.high %v12337_v2, %v12295_v29  ;;  %v12380_v44 = vrot.slane %v1997_v48, %v10603_v27  ;;  %v16080_v0 = vrot.slane %v12201_v7, 1  ;;  %v16081_v36 = vrot.slane %v12173_v38, 1  ;;  %8339 = vmatprep.subr.mxu1 %v15879_v17 }
  0xbf   : > { %16077 = vst [vmem:[#allocation152_spill] sm:$0xff] %v12369_v53  ;;  %16078 = vst [vmem:[#allocation153_spill] sm:$0xff] %v12372_v51  ;;  %v16083_v20 = vrot.slane %v12201_v7, 2  ;;  %v16084_v46 = vrot.slane %v12173_v38, 2  ;;  %v5492_v48 = vrot.slane %v10012_v54, %v10603_v27  ;;  %v7370_v2 = vcombine.high %v12369_v53, %v12372_v51  ;;  %8608 = vmatpush2.msra.mxu0 %v3979_v32 }
  0xc0   : > { %16079 = vst [vmem:[#allocation154_spill] sm:$0xff] %v12380_v44  ;;  %v12390_v16 = vsel %vm383_vm0, %v16081_v36, %v16080_v0  ;;  %v7369_v56 = vcombine.low %v12369_v53, %v12372_v51  ;;  %v3333_v0 = vcombine.low %v12136_v35, %v12170_v28  ;;  %v12408_v36 = vrot.slane %v1998_v11, %v10603_v27  ;;  %v12420_v11 = vld [vmem:[%s10570_s12 + $0xd0] sm:$0xf] }
  0xc1   : > { %16082 = vst [vmem:[#allocation155_spill] sm:$0xff] %v12390_v16  ;;  %v12397_v43 = vsel %vm474_vm1, %v16084_v46, %v16083_v20  ;;  %v2014_v46 = vcombine.high %v12291_v3, %v12380_v44  ;;  %v3378_v20 = vcombine.low %v12173_v38, %v12390_v16  ;;  %v3379_v54 = vcombine.high %v12173_v38, %v12390_v16  ;;  %v3978_v38 = vld [vmem:[%s15389_s1 + $0x2a8] sm:$0xff] }
  0xc2   : > { %16085 = vst [vmem:[#allocation156_spill] sm:$0xff] %v12397_v43  ;;  %8340 = vmatpush2.msra.mxu1 %v3946_v26  ;;  %v5501_v63 = vcombine.high %v5478_v14, %v5492_v48  ;;  %8266 = vmatprep.mubr.f32.mxu1 %v7370_v2  ;;  %v5500_v51 = vcombine.low %v5478_v14, %v5492_v48  ;;  %v16090_v14 = vrot.slane %v12250_v58, 1 }
  0xc3   : > { %v3347_v53 = vrot.slane %v3333_v0, %v10603_v27  ;;  %v3714_v35 = vcombine.low %v12397_v43, %v12383_v10  ;;  %8267 = vmatmul.mubr.f32.gmra.mxu1 %v7369_v56  ;;  %v2016_v32 = vcombine.high %v12353_v18, %v12408_v36  ;;  %v10018_v28 = vcombine.low %v2014_v46, %v12353_v18 }
  0xc4   : > { %v12426_v44 = vrot.slane %v3378_v20, %v10603_v27  ;;  %v12429_v26 = vrot.slane %v3379_v54, %v10603_v27  ;;  %8161 = vmatprep.mubr.f32.mxu0 %v5501_v63  ;;  %8609 = vmatprep.subr.mxu0 %v15879_v17  ;;  %v16089_v56 = vrot.slane %v12295_v29, 1  ;;  %v16091_v0 = vrot.slane %v12201_v7, 1  ;;  %v3945_v63 = vld [vmem:[%s15389_s1 + $0x1a0] sm:$0xff] }
  0xc5   : > { %v12435_v2 = vrot.slane %v3714_v35, %v10603_v27  ;;  %8162 = vmatmul.mubr.f32.gmra.mxu0 %v5500_v51  ;;  %v10020_v20 = vcombine.low %v2016_v32, %v12356_v45  ;;  %v5567_v54 = vrot.slane %v10018_v28, %v10603_v27  ;;  %8341 = vmatprep.subr.mxu1 %v15879_v17  ;;  %v16093_v28 = vrot.slane %v12201_v7, 2 }
  0xc6   : > { %16086 = vst [vmem:[#allocation157_spill] sm:$0xff] %v12426_v44  ;;  %16087 = vst [vmem:[#allocation158_spill] sm:$0xff] %v12429_v26  ;;  %v12443_v48 = vsel %vm383_vm0, %v16090_v14, %v16089_v56  ;;  %v12449_v46 = vsel %vm383_vm0, %v16091_v0, %v12344_v41  ;;  %v10089_v35 = vcombine.low %v3347_v53, %v12426_v44  ;;  %v12459_v56 = vrot.slane %v12420_v11, 1 }
  0xc7   : > { %16088 = vst [vmem:[#allocation159_spill] sm:$0xff] %v12435_v2  ;;  %16092 = vst [vmem:[#allocation160_spill] sm:$0xff] %v12449_v46  ;;  %v3731_v14 = vcombine.high %v12426_v44, %v12435_v2  ;;  %8610 = vmatpush2.msra.mxu0 %v3978_v38  ;;  %v1767_v0 = vcombine.low %v12250_v58, %v12443_v48  ;;  %v1768_v51 = vcombine.high %v12250_v58, %v12443_v48  ;;  %v3977_v58 = vld [vmem:[%s15389_s1 + $0x2a0] sm:$0xff] }
  0xc8   : > { %v12471_v53 = vsel %vm474_vm1, %v16093_v28, %v12364_v19  ;;  %v5581_v32 = vrot.slane %v10020_v20, %v10603_v27  ;;  %v12475_v16 = vrot.slane %v10089_v35, %v10603_v27  ;;  %v3451_v38 = vcombine.low %v12201_v7, %v12449_v46  ;;  %8342 = vmatpush2.msra.mxu1 %v3945_v63  ;;  %v324_v19 = vld [vmem:[%s10570_s12 + $0x1b8] sm:$0xff] }
  0xc9   : > { %16094 = vst [vmem:[#allocation161_spill] sm:$0xff] %v12471_v53  ;;  %v3452_v2 = vcombine.high %v12201_v7, %v12449_v46  ;;  %v10108_v44 = vcombine.low %v3731_v14, %v12429_v26  ;;  %v1789_v28 = vrot.slane %v1767_v0, %v10603_v27  ;;  %v1796_v20 = vrot.slane %v1768_v51, %v10603_v27  ;;  %v3944_v7 = vld [vmem:[%s15389_s1 + $0x198] sm:$0xff] }
  0xca   : > { %16095 = vst [vmem:[#allocation162_spill] sm:$0xff] %v12475_v16  ;;  %v3715_v35 = vcombine.high %v12397_v43, %v12383_v10  ;;  %8611 = vmatprep.subr.mxu0 %v15879_v17  ;;  %v5590_v63 = vcombine.high %v5567_v54, %v5581_v32  ;;  %v5589_v46 = vcombine.low %v5567_v54, %v5581_v32 }
  0xcb   : > { %v12495_v45 = vrot.slane %v3451_v38, %v10603_v27  ;;  %v12498_v14 = vrot.slane %v3452_v2, %v10603_v27  ;;  %8343 = vmatprep.subr.mxu1 %v15879_v17  ;;  %v7450_v0 = vrot.slane %v10108_v44, %v10603_v27  ;;  %v12503_v10 = vrot.slane %v1789_v28, %v10603_v27 }
  0xcc   : > { %v12506_v51 = vrot.slane %v1796_v20, %v10603_v27  ;;  %v12509_v43 = vrot.slane %v3715_v35, %v10603_v27  ;;  %8612 = vmatpush2.msra.mxu0 %v3977_v58  ;;  %8166 = vmatprep.mubr.f32.mxu0 %v5590_v63  ;;  %v3787_v54 = vcombine.low %v12471_v53, %v324_v19  ;;  %v16101_v2 = vrot.slane %v12295_v29, 1  ;;  %v3976_v35 = vld [vmem:[%s15389_s1 + $0x298] sm:$0xff]  ;;  %v3943_v63 = vld [vmem:[%s15389_s1 + $0x190] sm:$0xff] }
  0xcd   : > { %16096 = vst [vmem:[#allocation163_spill] sm:$0xff] %v12495_v45  ;;  %16097 = vst [vmem:[#allocation164_spill] sm:$0xff] %v12498_v14  ;;  %8344 = vmatpush2.msra.mxu1 %v3944_v7  ;;  %v3512_v32 = vcombine.low %v12310_v22, %v12344_v41  ;;  %v7459_v38 = vcombine.high %v12475_v16, %v7450_v0  ;;  %8167 = vmatmul.mubr.f32.gmra.mxu0 %v5589_v46 }
  0xce   : > { %16098 = vst [vmem:[#allocation165_spill] sm:$0xff] %v12503_v10  ;;  %16099 = vst [vmem:[#allocation166_spill] sm:$0xff] %v12506_v51  ;;  %v12516_v44 = vsel %vm383_vm0, %v16101_v2, %v12459_v56  ;;  %v7458_v28 = vcombine.low %v12475_v16, %v7450_v0  ;;  %v5679_v58 = vcombine.high %v12503_v10, %v12506_v51  ;;  %8345 = vmatprep.subr.mxu1 %v15879_v17  ;;  %v10420_v0 = vld [vmem:[%s10570_s12] sm:$0xff] }
  0xcf   : > { %16100 = vst [vmem:[#allocation167_spill] sm:$0xff] %v12509_v43  ;;  %v3733_v20 = vcombine.high %v12429_v26, %v12509_v43  ;;  %v12530_v7 = vrot.slane %v3787_v54, %v10603_v27  ;;  %v5678_v22 = vcombine.low %v12503_v10, %v12506_v51  ;;  %8613 = vmatprep.subr.mxu0 %v15879_v17  ;;  %v475_v2 = vrot.slane %v10420_v0, 2 }
  0xd0   : > { %v1840_v46 = vcombine.low %v12295_v29, %v12516_v44  ;;  %8271 = vmatprep.mubr.f32.mxu1 %v7459_v38  ;;  %8171 = vmatprep.mubr.f32.mxu0 %v5679_v58  ;;  %v1841_v16 = vcombine.high %v12295_v29, %v12516_v44  ;;  %v12546_v10 = vrot.slane %v3512_v32, %v10603_v27  ;;  %v3942_v38 = vld [vmem:[%s15389_s1 + $0x188] sm:$0xff]  ;;  %v3975_v29 = vld [vmem:[%s15389_s1 + $0x290] sm:$0xff] }
  0xd1   : > { %16102 = vst [vmem:[#allocation168_spill] sm:$0xff] %v12530_v7  ;;  %v10114_v54 = vcombine.low %v3733_v20, %v12495_v45  ;;  %8272 = vmatmul.mubr.f32.gmra.mxu1 %v7458_v28  ;;  %v3804_v51 = vcombine.high %v12495_v45, %v12530_v7  ;;  %v3788_v43 = vcombine.high %v12471_v53, %v324_v19  ;;  %v10421_v58 = vld [vmem:[%s10570_s12 + $0x8] sm:$0xff] }
  0xd2   : > { %16103 = vst [vmem:[#allocation169_spill] sm:$0xff] %v12546_v10  ;;  %v1862_v41 = vrot.slane %v1840_v46, %v10603_v27  ;;  %8614 = vmatpush2.msra.mxu0 %v3976_v35  ;;  %v476_v32 = vrot.slane %v10421_v58, 2  ;;  %v1869_v20 = vrot.slane %v1841_v16, %v10603_v27  ;;  %8346 = vmatpush2.msra.mxu1 %v3943_v63  ;;  %v3941_v16 = vld [vmem:[%s15389_s1 + $0x180] sm:$0xff] }
  0xd3   : > { %v7525_v28 = vrot.slane %v10114_v54, %v10603_v27  ;;  %8172 = vmatmul.mubr.f32.gmra.mxu0 %v5678_v22  ;;  %v1901_v19 = vcombine.low %v12420_v11, %v12459_v56  ;;  %v10116_v35 = vcombine.low %v3804_v51, %v12498_v14  ;;  %v12568_v0 = vrot.slane %v3788_v43, %v10603_v27  ;;  %v12580_v11 = vld [vmem:[%s10570_s12 + $0xd8] sm:$0xff]  ;;  %v10423_v51 = vld [vmem:[%s10570_s12 + $0x10] sm:$0xf] }
  0xd4   : > { %v12565_v46 = vrot.slane %v1862_v41, %v10603_v27  ;;  %8347 = vmatprep.subr.mxu1 %v15879_v17  ;;  %8615 = vmatprep.subr.mxu0 %v15879_v17  ;;  %v12576_v22 = vrot.slane %v1869_v20, %v10603_v27  ;;  %v1946_v43 = vcombine.low %v12580_v11, %v10617_v33  ;;  %v478_v63 = vrot.slane %v10423_v51, 2  ;;  %v10424_v20 = vld [vmem:[%s10570_s12 + $0xf0] sm:$0xff] }
  0xd5   : > { %16105 = vst [vmem:[#allocation171_spill] sm:$0xff] %v12568_v0  ;;  %8348 = vmatpush2.msra.mxu1 %v3942_v38  ;;  %8616 = vmatpush2.msra.mxu0 %v3975_v29  ;;  %v1915_v41 = vrot.slane %v1901_v19, %v10603_v27  ;;  %v7539_v54 = vrot.slane %v10116_v35, %v10603_v27  ;;  %v3974_v19 = vld [vmem:[%s15389_s1 + $0x288] sm:$0xff] }
  0xd6   : > { %16104 = vst [vmem:[#allocation170_spill] sm:$0xff] %v12565_v46  ;;  %16106 = vst [vmem:[#allocation172_spill] sm:$0xff] %v12576_v22  ;;  %v3806_v58 = vcombine.high %v12498_v14, %v12568_v0  ;;  %8349 = vmatprep.subr.mxu1 %v15879_v17  ;;  %v2282_v38 = vcombine.low %v10630_v37, %v10424_v20  ;;  %v477_v29 = vsel %vm474_vm1, %v475_v2, %v476_v32  ;;  %v10425_v0 = vld [vmem:[%s10570_s12 + $0x18] sm:$0xff] }
  0xd7   : > { %v5768_v7 = vcombine.high %v12565_v46, %v12576_v22  ;;  %v5767_v35 = vcombine.low %v12565_v46, %v12576_v22  ;;  %v12600_v51 = vrot.slane %v1946_v43, %v10603_v27  ;;  %8350 = vmatpush2.msra.mxu1 %v3941_v16  ;;  %v593_v53 = vcombine.low %v477_v29, %v10425_v0 }
  0xd8   : > { %v7548_v14 = vcombine.high %v7525_v28, %v7539_v54  ;;  %v7547_v20 = vcombine.low %v7525_v28, %v7539_v54  ;;  %v10122_v2 = vcombine.low %v3806_v58, %v12546_v10  ;;  %v12605_v45 = vrot.slane %v2282_v38, %v10603_v27  ;;  %8617 = vmatprep.subr.mxu0 %v15879_v17 }
  0xd9   : > { %16107 = vst [vmem:[#allocation173_spill] sm:$0xff] %v12600_v51  ;;  %8176 = vmatprep.mubr.f32.mxu0 %v5768_v7  ;;  %v10009_v26 = vcombine.low %v1915_v41, %v12600_v51  ;;  %v594_v22 = vcombine.high %v477_v29, %v10425_v0  ;;  %v615_v43 = vrot.slane %v593_v53, %v10603_v27  ;;  %v3973_v7 = vld [vmem:[%s15389_s1 + $0x280] sm:$0xff]  ;;  %v12624_v41 = vld [vmem:[%s10570_s12 + $0x30] sm:$0xff] }
  0xda   : > { %8618 = vmatpush2.msra.mxu0 %v3974_v19  ;;  %8276 = vmatprep.mubr.f32.mxu1 %v7548_v14  ;;  %v7612_v16 = vrot.slane %v10122_v2, %v10603_v27  ;;  %v2299_v28 = vcombine.high %v12600_v51, %v12605_v45  ;;  %v479_v54 = vsel %vm474_vm1, %v476_v32, %v478_v63  ;;  %v485_v58 = vrot.slane %v12624_v41, 2  ;;  %v10427_v29 = vld [vmem:[%s10570_s12 + $0x20] sm:$0xff]  ;;  %v10428_v2 = vld [vmem:[%s10570_s12 + $0x28] sm:$0xf] }
  0xdb   : > { %8177 = vmatmul.mubr.f32.gmra.mxu0 %v5767_v35  ;;  %8277 = vmatmul.mubr.f32.gmra.mxu1 %v7547_v20  ;;  %v12618_v0 = vrot.slane %v10009_v26, %v10603_v27  ;;  %v622_v53 = vrot.slane %v594_v22, %v10603_v27  ;;  %v4061_v14 = vrot.slane %v615_v43, %v10603_v27 }
  0xdc   : > { %8619 = vmatprep.subr.mxu0 %v15879_v17  ;;  %v7620_v32 = vcombine.high %v7612_v16, %v7612_v16  ;;  %v10028_v38 = vcombine.low %v2299_v28, %v10663_v52  ;;  %8827 = vmatprep.subr.mxu1 %v15879_v17  ;;  %v682_v26 = vcombine.low %v479_v54, %v10427_v29 }
  0xdd   : > { %16108 = vst [vmem:[#allocation174_spill] sm:$0xff] %v12618_v0  ;;  %v683_v19 = vcombine.high %v479_v54, %v10427_v29  ;;  %v4075_v35 = vrot.slane %v622_v53, %v10603_v27  ;;  %8620 = vmatpush2.msra.mxu0 %v3973_v7  ;;  %v627_v22 = vcombine.low %v10761_v30, %v10790_v47  ;;  %v12641_v54 = vld [vmem:[%s10570_s12 + $0x38] sm:$0xff] }
  0xde   : > { %v628_v20 = vcombine.high %v10761_v30, %v10790_v47  ;;  %v770_v43 = vcombine.low %v478_v63, %v10428_v2  ;;  %8281 = vmatprep.mubr.f32.mxu1 %v7620_v32  ;;  %v5848_v28 = vrot.slane %v10028_v38, %v10603_v27  ;;  %v704_v41 = vrot.slane %v682_v26, %v10603_v27 }
  0xdf   : > { %v711_v46 = vrot.slane %v683_v19, %v10603_v27  ;;  %10185 = vmatprep.subr.mxu0 %v15879_v17  ;;  %v486_v7 = vrot.slane %v12641_v54, 2  ;;  %8282 = vmatmul.mubr.f32.gmra.mxu1 %v7612_v16  ;;  %v4078_v53 = vcombine.low %v4061_v14, %v4075_v35  ;;  %v4079_v29 = vcombine.high %v4061_v14, %v4075_v35  ;;  %v4004_v16 = vld [vmem:[%s15389_s1 + $0x378] sm:$0xff] }
  0xe0   : > { %v637_v30 = vrot.slane %v627_v22, %v10603_v27  ;;  %v644_v47 = vrot.slane %v628_v20, %v10603_v27  ;;  %v5857_v63 = vcombine.high %v12618_v0, %v5848_v28  ;;  %v5856_v32 = vcombine.low %v12618_v0, %v5848_v28 }
  0xe1   : > { %v4150_v38 = vrot.slane %v704_v41, %v10603_v27  ;;  %v4164_v26 = vrot.slane %v711_v46, %v10603_v27  ;;  %8351 = vmatprep.mubr.f32.mxu1 %v4079_v29  ;;  %v784_v14 = vrot.slane %v770_v43, %v10603_v27  ;;  %v844_v35 = vcombine.low %v10830_v9, %v10920_v34  ;;  %v4003_v43 = vld [vmem:[%s15389_s1 + $0x370] sm:$0xff] }
  0xe2   : > { %v4090_v19 = vrot.slane %v637_v30, %v10603_v27  ;;  %v4104_v2 = vrot.slane %v644_v47, %v10603_v27  ;;  %8181 = vmatprep.mubr.f32.mxu0 %v5857_v63  ;;  %v716_v46 = vcombine.low %v10855_v21, %v10896_v8  ;;  %v717_v28 = vcombine.high %v10855_v21, %v10896_v8  ;;  %v4036_v21 = vld [vmem:[%s15389_s1 + $0x478] sm:$0xff] }
  0xe3   : > { %v4168_v22 = vcombine.high %v4150_v38, %v4164_v26  ;;  %v4167_v20 = vcombine.low %v4150_v38, %v4164_v26  ;;  %8182 = vmatmul.mubr.f32.gmra.mxu0 %v5856_v32  ;;  %8352 = vmatmul.mubr.f32.vlgmr.msra.gmra.mxu1 %v4078_v53  ;;  %v9947_v30 = vcombine.low %v784_v14, %v10840_v12 }
  0xe4   : > { %v4112_v41 = vcombine.low %v4090_v19, %v4104_v2  ;;  %v4113_v29 = vcombine.high %v4090_v19, %v4104_v2  ;;  %8828 = vmatpush1.msra.mxu1 %v4004_v16  ;;  %v9949_v9 = vcombine.high %v10840_v12, %v844_v35  ;;  %v726_v47 = vrot.slane %v716_v46, %v10603_v27  ;;  %v10430_v16 = vld [vmem:[%s10570_s12 + $0x40] sm:$0xf] }
  0xe5   : > { %8356 = vmatprep.mubr.f32.mxu1 %v4168_v22  ;;  %v733_v63 = vrot.slane %v717_v28, %v10603_v27  ;;  %v4239_v8 = vrot.slane %v9947_v30, %v10603_v27  ;;  %8829 = vmatprep.subr.mxu1 %v15879_v17  ;;  %v931_v53 = vcombine.low %v10925_v5, %v10943_v40  ;;  %v12691_v14 = vrot.slane %v10430_v16, 2  ;;  %v10431_v30 = vld [vmem:[%s10570_s12 + $0x48] sm:$0xff] }
  0xe6   : > { %8621 = vmatprep.mubr.f32.mxu0 %v4113_v29  ;;  %v933_v12 = vcombine.low %v10938_v31, %v11022_v61  ;;  %v4253_v32 = vrot.slane %v9949_v9, %v10603_v27  ;;  %v4179_v38 = vrot.slane %v726_v47, %v10603_v27  ;;  %8830 = vmatpush1.msra.mxu1 %v4003_v43 }
  0xe7   : > { %v4193_v26 = vrot.slane %v733_v63, %v10603_v27  ;;  %v12684_v19 = vsel %vm474_vm1, %v485_v58, %v486_v7  ;;  %8357 = vmatmul.mubr.f32.gmra.mxu1 %v4167_v20  ;;  %8622 = vmatmul.mubr.f32.vlgmr.msra.gmra.mxu0 %v4112_v41  ;;  %v9955_v2 = vcombine.high %v10920_v34, %v931_v53 }
  0xe8   : > { %v9957_v5 = vcombine.high %v10943_v40, %v933_v12  ;;  %v786_v31 = vcombine.low %v10812_v4, %v10845_v15  ;;  %16109 = vst [vmem:[#allocation175_spill] sm:$0xff] %v12691_v14  ;;  %10186 = vmatpush3.msra.mxu0 %v4036_v21  ;;  %v4257_v35 = vcombine.high %v4239_v8, %v4253_v32  ;;  %v4002_v4 = vld [vmem:[%s15389_s1 + $0x368] sm:$0xff] }
  0xe9   : > { %v4202_v22 = vcombine.high %v4179_v38, %v4193_v26  ;;  %v4256_v46 = vcombine.low %v4239_v8, %v4253_v32  ;;  %v4201_v28 = vcombine.low %v4179_v38, %v4193_v26  ;;  %v4328_v58 = vrot.slane %v9955_v2, %v10603_v27  ;;  %8831 = vmatprep.subr.mxu1 %v15879_v17  ;;  %v4035_v26 = vld [vmem:[%s15389_s1 + $0x470] sm:$0xff]  ;;  %v16112_v2 = vld [vmem:[#allocation26_spill] sm:$0xff] }
  0xea   : > { %v4342_v20 = vrot.slane %v9957_v5, %v10603_v27  ;;  %v794_v34 = vrot.slane %v786_v31, %v10603_v27  ;;  %v846_v40 = vcombine.low %v10970_v59, %v12684_v19  ;;  %8361 = vmatprep.mubr.f32.mxu1 %v4257_v35  ;;  %v847_v41 = vcombine.high %v10970_v59, %v12684_v19  ;;  %v12737_v31 = vld [vmem:[%s10570_s12 + $0x60] sm:$0xff] }
  0xeb   : > { %8626 = vmatprep.mubr.f32.mxu0 %v4202_v22  ;;  %v989_v29 = vcombine.low %v10845_v15, %v10430_v16  ;;  %v1029_v43 = vcombine.low %v12684_v19, %v10431_v30  ;;  %8362 = vmatmul.mubr.f32.gmra.mxu1 %v4256_v46  ;;  %v12717_v15 = vsel %vm474_vm1, %v486_v7, %v12691_v14 }
  0xec   : > { %8627 = vmatmul.mubr.f32.gmra.mxu0 %v4201_v28  ;;  %v4346_v9 = vcombine.high %v4328_v58, %v4342_v20  ;;  %v856_v47 = vrot.slane %v846_v40, %v10603_v27  ;;  %v4345_v63 = vcombine.low %v4328_v58, %v4342_v20  ;;  %v12709_v21 = vrot.slane %v847_v41, %v10603_v27  ;;  %v4000_v41 = vld [vmem:[%s15389_s1 + $0x358] sm:$0xff] }
  0xed   : > { %8832 = vmatpush1.msra.mxu1 %v4002_v4  ;;  %v1003_v8 = vrot.slane %v989_v29, %v10603_v27  ;;  %v1037_v59 = vrot.slane %v1029_v43, %v10603_v27  ;;  %16111 = vst [vmem:[#allocation177_spill] sm:$0xff] %v12717_v15  ;;  %v935_v32 = vcombine.low %v11083_v62, %v12717_v15 }
  0xee   : > { %16110 = vst [vmem:[#allocation176_spill] sm:$0xff] %v12709_v21  ;;  %8366 = vmatprep.mubr.f32.mxu1 %v4346_v9  ;;  %v879_v53 = vcombine.high %v856_v47, %v11259_v55  ;;  %v9950_v12 = vcombine.low %v794_v34, %v856_v47  ;;  %v936_v38 = vcombine.high %v11083_v62, %v12717_v15  ;;  %v4001_v62 = vld [vmem:[%s15389_s1 + $0x360] sm:$0xff]  ;;  %v10433_v34 = vld [vmem:[%s10570_s12 + $0x50] sm:$0xff] }
  0xef   : > { %v1004_v5 = vcombine.low %v16112_v2, %v1003_v8  ;;  %v4431_v54 = vrot.slane %v1037_v59, %v10603_v27  ;;  %v881_v7 = vcombine.high %v12709_v21, %v11374_v42  ;;  %10187 = vmatprep.subr.mxu0 %v15879_v17  ;;  %8833 = vmatprep.subr.mxu1 %v15879_v17 }
  0xf0   : > { %v9952_v35 = vcombine.low %v879_v53, %v12709_v21  ;;  %v4268_v22 = vrot.slane %v9950_v12, %v10603_v27  ;;  %8367 = vmatmul.mubr.f32.gmra.mxu1 %v4345_v63  ;;  %v12743_v46 = vrot.slane %v935_v32, %v10603_v27  ;;  %v12746_v28 = vrot.slane %v936_v38, %v10603_v27 }
  0xf1   : > { %v9963_v58 = vcombine.high %v11022_v61, %v1004_v5  ;;  %10188 = vmatpush3.msra.mxu0 %v4035_v26  ;;  %v1030_v20 = vcombine.high %v12684_v19, %v10431_v30  ;;  %v1102_v40 = vcombine.low %v12717_v15, %v10433_v34  ;;  %v1005_v4 = vcombine.low %v11041_v60, %v12691_v14 }
  0xf2   : > { %16113 = vst [vmem:[#allocation26_spill] sm:$0xff] %v12743_v46  ;;  %16114 = vst [vmem:[#allocation178_spill] sm:$0xff] %v12746_v28  ;;  %v4282_v29 = vrot.slane %v9952_v35, %v10603_v27  ;;  %v968_v43 = vcombine.high %v12743_v46, %v11377_v39  ;;  %v9958_v61 = vcombine.low %v881_v7, %v12743_v46  ;;  %8834 = vmatpush1.msra.mxu1 %v4001_v62  ;;  %v16116_v7 = vld [vmem:[#allocation41_spill] sm:$0xff]  ;;  %v16235_v46 = vld [vmem:[#allocation70_spill] sm:$0xff] }
  0xf3   : > { %v970_v30 = vcombine.high %v12746_v28, %v11445_v6  ;;  %v4417_v9 = vrot.slane %v9963_v58, %v10603_v27  ;;  %v1044_v47 = vrot.slane %v1030_v20, %v10603_v27  ;;  %v1110_v60 = vrot.slane %v1102_v40, %v10603_v27  ;;  %8835 = vmatprep.subr.mxu1 %v15879_v17  ;;  %v10434_v20 = vld [vmem:[%s10570_s12 + $0x58] sm:$0xf] }
  0xf4   : > { %v12767_v63 = vrot.slane %v1005_v4, %v10603_v27  ;;  %v4291_v8 = vcombine.high %v4268_v22, %v4282_v29  ;;  %v4290_v59 = vcombine.low %v4268_v22, %v4282_v29  ;;  %v9960_v53 = vcombine.low %v968_v43, %v12746_v28  ;;  %8836 = vmatpush1.msra.mxu1 %v4000_v41  ;;  %v4034_v4 = vld [vmem:[%s15389_s1 + $0x468] sm:$0xff] }
  0xf5   : > { %v4357_v12 = vrot.slane %v9958_v61, %v10603_v27  ;;  %v4435_v32 = vcombine.high %v4417_v9, %v4431_v54  ;;  %v4434_v38 = vcombine.low %v4417_v9, %v4431_v54  ;;  %v4506_v26 = vrot.slane %v1044_v47, %v10603_v27  ;;  %10189 = vmatprep.subr.mxu0 %v15879_v17  ;;  %v10435_v41 = vld [vmem:[%s10570_s12 + $0x68] sm:$0xff] }
  0xf6   : > { %16115 = vst [vmem:[#allocation179_spill] sm:$0xff] %v12767_v63  ;;  %v4520_v2 = vrot.slane %v1110_v60, %v10603_v27  ;;  %8631 = vmatprep.mubr.f32.mxu0 %v4291_v8  ;;  %v4371_v5 = vrot.slane %v9960_v53, %v10603_v27  ;;  %v1049_v62 = vcombine.low %v16116_v7, %v11313_v25  ;;  %v496_v29 = vrot.slane %v10435_v41, 2  ;;  %v16117_v8 = vld [vmem:[#allocation58_spill] sm:$0xff] }
  0xf7   : > { %v9964_v35 = vcombine.low %v970_v30, %v12767_v63  ;;  %v1103_v22 = vcombine.high %v12717_v15, %v10433_v34  ;;  %8632 = vmatmul.mubr.f32.gmra.mxu0 %v4290_v59  ;;  %8371 = vmatprep.mubr.f32.mxu1 %v4435_v32  ;;  %v1175_v40 = vcombine.low %v12691_v14, %v10434_v20  ;;  %v16118_v59 = vld [vmem:[#allocation46_spill] sm:$0xff] }
  0xf8   : > { %v4524_v54 = vcombine.high %v4506_v26, %v4520_v2  ;;  %v4523_v58 = vcombine.low %v4506_v26, %v4520_v2  ;;  %v4380_v43 = vcombine.high %v4357_v12, %v4371_v5  ;;  %8372 = vmatmul.mubr.f32.gmra.mxu1 %v4434_v38  ;;  %v4379_v61 = vcombine.low %v4357_v12, %v4371_v5  ;;  %v16119_v12 = vld [vmem:[#allocation56_spill] sm:$0xff] }
  0xf9   : > { %v1059_v30 = vrot.slane %v1049_v62, %v10603_v27  ;;  %v4446_v34 = vrot.slane %v9964_v35, %v10603_v27  ;;  %v1117_v9 = vrot.slane %v1103_v22, %v10603_v27  ;;  %v1182_v47 = vrot.slane %v1175_v40, %v10603_v27  ;;  %10190 = vmatpush3.msra.mxu0 %v4034_v4  ;;  %v16120_v26 = vld [vmem:[#allocation64_spill] sm:$0xff]  ;;  %v16122_v35 = vld [vmem:[#allocation55_spill] sm:$0xff] }
  0xfa   : > { %8376 = vmatprep.mubr.f32.mxu1 %v4524_v54  ;;  %v1050_v60 = vcombine.high %v16116_v7, %v11313_v25  ;;  %v1122_v53 = vcombine.low %v16118_v59, %v16117_v8  ;;  %8636 = vmatprep.mubr.f32.mxu0 %v4380_v43  ;;  %v1226_v38 = vcombine.low %v11374_v42, %v16119_v12  ;;  %v10436_v5 = vld [vmem:[%s10570_s12 + $0x70] sm:$0xf] }
  0xfb   : > { %v4460_v32 = vrot.slane %v1059_v30, %v10603_v27  ;;  %v1297_v2 = vcombine.low %v11377_v39, %v16120_v26  ;;  %v12800_v62 = vrot.slane %v10436_v5, 2  ;;  %8637 = vmatmul.mubr.f32.gmra.mxu0 %v4379_v61  ;;  %v9967_v22 = vcombine.low %v1182_v47, %v16122_v35  ;;  %8837 = vmatprep.subr.mxu1 %v15879_v17  ;;  %v16237_v39 = vld [vmem:[#allocation74_spill] sm:$0xff] }
  0xfc   : > { %v4595_v7 = vrot.slane %v1117_v9, %v10603_v27  ;;  %v1066_v54 = vrot.slane %v1050_v60, %v10603_v27  ;;  %v1132_v20 = vrot.slane %v1122_v53, %v10603_v27  ;;  %8377 = vmatmul.mubr.f32.gmra.mxu1 %v4523_v58  ;;  %v9971_v41 = vcombine.high %v16122_v35, %v1226_v38  ;;  %v3999_v58 = vld [vmem:[%s15389_s1 + $0x350] sm:$0xff] }
  0xfd   : > { %16121 = vst [vmem:[#allocation41_spill] sm:$0xff] %v12800_v62  ;;  %v4469_v40 = vcombine.high %v4446_v34, %v4460_v32  ;;  %v4468_v4 = vcombine.low %v4446_v34, %v4460_v32  ;;  %v9973_v43 = vcombine.high %v16119_v12, %v1297_v2  ;;  %v4609_v30 = vrot.slane %v9967_v22, %v10603_v27  ;;  %v16125_v32 = vld [vmem:[#allocation52_spill] sm:$0xff]  ;;  %v16126_v12 = vld [vmem:[#allocation42_spill] sm:$0xff] }
  0xfe   : > { %v4535_v16 = vrot.slane %v1066_v54, %v10603_v27  ;;  %v4549_v61 = vrot.slane %v1132_v20, %v10603_v27  ;;  %v16123_v47 = vrot.slane %v12737_v31, 2  ;;  %v4684_v34 = vrot.slane %v9971_v41, %v10603_v27  ;;  %v16127_v41 = vld [vmem:[#allocation71_spill] sm:$0xff]  ;;  %8838 = vmatpush1.msra.mxu1 %v3999_v58  ;;  %10191 = vmatprep.subr.mxu0 %v15879_v17 }
  0xff   : > { %8641 = vmatprep.mubr.f32.mxu0 %v4469_v40  ;;  %v4698_v60 = vrot.slane %v9973_v43, %v10603_v27  ;;  %v1123_v53 = vcombine.high %v16118_v59, %v16117_v8  ;;  %v1184_v31 = vcombine.low %v16126_v12, %v16125_v32  ;;  %v4613_v38 = vcombine.high %v4595_v7, %v4609_v30  ;;  %v16128_v43 = vld [vmem:[#allocation65_spill] sm:$0xff]  ;;  %v3998_v58 = vld [vmem:[%s15389_s1 + $0x348] sm:$0xff] }
 0x100   : > { %v12814_v9 = vsel %vm474_vm1, %v16123_v47, %v496_v29  ;;  %8642 = vmatmul.mubr.f32.gmra.mxu0 %v4468_v4  ;;  %v4558_v2 = vcombine.high %v4535_v16, %v4549_v61  ;;  %v4612_v35 = vcombine.low %v4595_v7, %v4609_v30  ;;  %v4557_v22 = vcombine.low %v4535_v16, %v4549_v61 }
 0x101   : > { %16124 = vst [vmem:[#allocation46_spill] sm:$0xff] %v12814_v9  ;;  %v4702_v54 = vcombine.high %v4684_v34, %v4698_v60  ;;  %v1139_v20 = vrot.slane %v1123_v53, %v10603_v27  ;;  %v1192_v40 = vrot.slane %v1184_v31, %v10603_v27  ;;  %v1228_v47 = vcombine.low %v16127_v41, %v12814_v9 }
 0x102   : > { %8381 = vmatprep.mubr.f32.mxu1 %v4613_v38  ;;  %8646 = vmatprep.mubr.f32.mxu0 %v4558_v2  ;;  %v4701_v59 = vcombine.low %v4684_v34, %v4698_v60  ;;  %v1299_v12 = vcombine.low %v11445_v6, %v16128_v43  ;;  %v1354_v4 = vcombine.low %v16125_v32, %v10436_v5  ;;  %v16130_v60 = vld [vmem:[#allocation83_spill] sm:$0xff]  ;;  %v16132_v38 = vld [vmem:[#allocation96_spill] sm:$0xff] }
 0x103   : > { %8382 = vmatmul.mubr.f32.gmra.mxu1 %v4612_v35  ;;  %v1238_v16 = vrot.slane %v1228_v47, %v10603_v27  ;;  %v4624_v7 = vrot.slane %v1139_v20, %v10603_v27  ;;  %v12837_v30 = vsel %vm474_vm1, %v496_v29, %v12800_v62  ;;  %v1229_v61 = vcombine.high %v16127_v41, %v12814_v9  ;;  %v10437_v35 = vld [vmem:[%s10570_s12 + $0x78] sm:$0xff]  ;;  %v4033_v47 = vld [vmem:[%s15389_s1 + $0x460] sm:$0xff] }
 0x104   : > { %16129 = vst [vmem:[#allocation56_spill] sm:$0xff] %v12837_v30  ;;  %8647 = vmatmul.mubr.f32.gmra.mxu0 %v4557_v22  ;;  %8386 = vmatprep.mubr.f32.mxu1 %v4702_v54  ;;  %v1361_v5 = vrot.slane %v1354_v4, %v10603_v27  ;;  %v9979_v34 = vcombine.high %v16120_v26, %v1299_v12  ;;  %v16133_v22 = vld [vmem:[#allocation60_spill] sm:$0xff]  ;;  %v16135_v4 = vld [vmem:[#allocation97_spill] sm:$0xff] }
 0x105   : > { %v1301_v53 = vcombine.low %v16130_v60, %v12837_v30  ;;  %v9968_v31 = vcombine.low %v1192_v40, %v1238_v16  ;;  %v12849_v29 = vrot.slane %v1229_v61, %v10603_v27  ;;  %v1261_v2 = vcombine.high %v1238_v16, %v16132_v38  ;;  %8839 = vmatprep.subr.mxu1 %v15879_v17 }
 0x106   : > { %v1387_v20 = vcombine.low %v12814_v9, %v10437_v35  ;;  %v1362_v54 = vcombine.low %v16133_v22, %v1361_v5  ;;  %v4773_v41 = vrot.slane %v9979_v34, %v10603_v27  ;;  %8840 = vmatpush1.msra.mxu1 %v3998_v58  ;;  %v1388_v40 = vcombine.high %v12814_v9, %v10437_v35  ;;  %v16136_v35 = vld [vmem:[#allocation107_spill] sm:$0xff] }
 0x107   : > { %16131 = vst [vmem:[#allocation64_spill] sm:$0xff] %v12849_v29  ;;  %v12858_v26 = vrot.slane %v1301_v53, %v10603_v27  ;;  %v4638_v12 = vrot.slane %v9968_v31, %v10603_v27  ;;  %8387 = vmatmul.mubr.f32.gmra.mxu1 %v4701_v59  ;;  %v1263_v16 = vcombine.high %v12849_v29, %v16135_v4 }
 0x108   : > { %v9974_v61 = vcombine.low %v1261_v2, %v12849_v29  ;;  %v1395_v5 = vrot.slane %v1387_v20, %v10603_v27  ;;  %v9981_v34 = vcombine.high %v16128_v43, %v1362_v54  ;;  %v1402_v58 = vrot.slane %v1388_v40, %v10603_v27  ;;  %10192 = vmatpush3.msra.mxu0 %v4033_v47  ;;  %v16138_v47 = vld [vmem:[#allocation77_spill] sm:$0xff] }
 0x109   : > { %16134 = vst [vmem:[#allocation55_spill] sm:$0xff] %v12858_v26  ;;  %v1302_v53 = vcombine.high %v16130_v60, %v12837_v30  ;;  %v1334_v0 = vcombine.high %v12858_v26, %v16136_v35  ;;  %v4647_v59 = vcombine.high %v4624_v7, %v4638_v12  ;;  %v4646_v31 = vcombine.low %v4624_v7, %v4638_v12  ;;  %v3997_v7 = vld [vmem:[%s15389_s1 + $0x340] sm:$0xff] }
 0x10a   : > { %v9976_v38 = vcombine.low %v1263_v16, %v12858_v26  ;;  %v4713_v2 = vrot.slane %v9974_v61, %v10603_v27  ;;  %v4787_v43 = vrot.slane %v9981_v34, %v10603_v27  ;;  %v4862_v20 = vrot.slane %v1395_v5, %v10603_v27  ;;  %8841 = vmatprep.subr.mxu1 %v15879_v17  ;;  %v10438_v16 = vld [vmem:[%s10570_s12 + $0x80] sm:$0xff] }
 0x10b   : > { %v4876_v54 = vrot.slane %v1402_v58, %v10603_v27  ;;  %v12882_v60 = vrot.slane %v1302_v53, %v10603_v27  ;;  %8651 = vmatprep.mubr.f32.mxu0 %v4647_v59  ;;  %v1363_v12 = vcombine.low %v16138_v47, %v12800_v62  ;;  %v1460_v61 = vcombine.low %v12837_v30, %v10438_v16 }
 0x10c   : > { %v4727_v40 = vrot.slane %v9976_v38, %v10603_v27  ;;  %v1461_v5 = vcombine.high %v12837_v30, %v10438_v16  ;;  %8652 = vmatmul.mubr.f32.gmra.mxu0 %v4646_v31  ;;  %v4791_v34 = vcombine.high %v4773_v41, %v4787_v43  ;;  %v4790_v58 = vcombine.low %v4773_v41, %v4787_v43  ;;  %v16140_v31 = vld [vmem:[#allocation94_spill] sm:$0xff] }
 0x10d   : > { %16137 = vst [vmem:[#allocation42_spill] sm:$0xff] %v12882_v60  ;;  %v4880_v53 = vcombine.high %v4862_v20, %v4876_v54  ;;  %v1336_v26 = vcombine.high %v12882_v60, %v11960_v23  ;;  %v12897_v38 = vrot.slane %v1363_v12, %v10603_v27  ;;  %v9982_v47 = vcombine.low %v1334_v0, %v12882_v60  ;;  %v16141_v43 = vld [vmem:[#allocation90_spill] sm:$0xff] }
 0x10e   : > { %v4736_v29 = vcombine.high %v4713_v2, %v4727_v40  ;;  %v4735_v59 = vcombine.low %v4713_v2, %v4727_v40  ;;  %8842 = vmatpush1.msra.mxu1 %v3997_v7  ;;  %8391 = vmatprep.mubr.f32.mxu1 %v4791_v34  ;;  %v4879_v9 = vcombine.low %v4862_v20, %v4876_v54  ;;  %v3996_v20 = vld [vmem:[%s15389_s1 + $0x338] sm:$0xff]  ;;  %v10439_v54 = vld [vmem:[%s10570_s12 + $0x90] sm:$0xff] }
 0x10f   : > { %16139 = vst [vmem:[#allocation71_spill] sm:$0xff] %v12897_v38  ;;  %v1468_v16 = vrot.slane %v1460_v61, %v10603_v27  ;;  %v1475_v41 = vrot.slane %v1461_v5, %v10603_v27  ;;  %v1407_v30 = vcombine.low %v16141_v43, %v16140_v31  ;;  %8392 = vmatmul.mubr.f32.gmra.mxu1 %v4790_v58  ;;  %v505_v7 = vrot.slane %v10439_v54, 2  ;;  %v16142_v54 = vld [vmem:[#allocation110_spill] sm:$0xff] }
 0x110   : > { %8656 = vmatprep.mubr.f32.mxu0 %v4736_v29  ;;  %v9984_v2 = vcombine.low %v1336_v26, %v12897_v38  ;;  %v4802_v40 = vrot.slane %v9982_v47, %v10603_v27  ;;  %v1408_v0 = vcombine.high %v16141_v43, %v16140_v31  ;;  %8396 = vmatprep.mubr.f32.mxu1 %v4880_v53  ;;  %v12916_v26 = vld [vmem:[%s10570_s12 + $0x98] sm:$0xff]  ;;  %v10441_v47 = vld [vmem:[%s10570_s12 + $0x88] sm:$0xf]  ;;  %v16144_v38 = vld [vmem:[#allocation100_spill] sm:$0xff] }
 0x111   : > { %8657 = vmatmul.mubr.f32.gmra.mxu0 %v4735_v59  ;;  %v4951_v12 = vrot.slane %v1468_v16, %v10603_v27  ;;  %v4965_v29 = vrot.slane %v1475_v41, %v10603_v27  ;;  %v1417_v61 = vrot.slane %v1407_v30, %v10603_v27  ;;  %v1533_v43 = vcombine.low %v12800_v62, %v10441_v47  ;;  %v16143_v41 = vld [vmem:[#allocation106_spill] sm:$0xff]  ;;  %v16145_v62 = vld [vmem:[#allocation99_spill] sm:$0xff] }
 0x112   : > { %v4816_v34 = vrot.slane %v9984_v2, %v10603_v27  ;;  %v1424_v58 = vrot.slane %v1408_v0, %v10603_v27  ;;  %v1584_v53 = vcombine.low %v16135_v4, %v16142_v54  ;;  %8843 = vmatprep.subr.mxu1 %v15879_v17  ;;  %v1480_v60 = vcombine.low %v16144_v38, %v16143_v41  ;;  %v4032_v2 = vld [vmem:[%s15389_s1 + $0x458] sm:$0xff] }
 0x113   : > { %v4969_v59 = vcombine.high %v4951_v12, %v4965_v29  ;;  %v4891_v16 = vrot.slane %v1417_v61, %v10603_v27  ;;  %v4968_v30 = vcombine.low %v4951_v12, %v4965_v29  ;;  %8844 = vmatpush1.msra.mxu1 %v3996_v20  ;;  %v1540_v31 = vrot.slane %v1533_v43, %v10603_v27 }
 0x114   : > { %v4825_v0 = vcombine.high %v4802_v40, %v4816_v34  ;;  %8397 = vmatmul.mubr.f32.gmra.mxu1 %v4879_v9  ;;  %v4824_v47 = vcombine.low %v4802_v40, %v4816_v34  ;;  %v4905_v5 = vrot.slane %v1424_v58, %v10603_v27  ;;  %v9989_v61 = vcombine.high %v16145_v62, %v1584_v53  ;;  %v10442_v40 = vld [vmem:[%s10570_s12 + $0xa0] sm:$0xf] }
 0x115   : > { %8401 = vmatprep.mubr.f32.mxu1 %v4969_v59  ;;  %v1481_v12 = vcombine.high %v16144_v38, %v16143_v41  ;;  %v1490_v20 = vrot.slane %v1480_v60, %v10603_v27  ;;  %10193 = vmatprep.subr.mxu0 %v15879_v17  ;;  %v9987_v9 = vcombine.low %v1540_v31, %v16145_v62  ;;  %v12941_v34 = vrot.slane %v10442_v40, 2  ;;  %v16147_v60 = vld [vmem:[#allocation111_spill] sm:$0xff] }
 0x116   : > { %8661 = vmatprep.mubr.f32.mxu0 %v4825_v0  ;;  %v4914_v29 = vcombine.high %v4891_v16, %v4905_v5  ;;  %v4913_v4 = vcombine.low %v4891_v16, %v4905_v5  ;;  %10194 = vmatpush3.msra.mxu0 %v4032_v2  ;;  %v5054_v58 = vrot.slane %v9989_v61, %v10603_v27  ;;  %v3995_v5 = vld [vmem:[%s15389_s1 + $0x330] sm:$0xff]  ;;  %v16148_v59 = vrot.slane %v12916_v26, 2  ;;  %v12960_v2 = vld [vmem:[%s10570_s12 + $0xc0] sm:$0xff] }
 0x117   : > { %16146 = vst [vmem:[#allocation65_spill] sm:$0xff] %v12941_v34  ;;  %8662 = vmatmul.mubr.f32.gmra.mxu0 %v4824_v47  ;;  %v1497_v43 = vrot.slane %v1481_v12, %v10603_v27  ;;  %v4980_v38 = vrot.slane %v1490_v20, %v10603_v27  ;;  %v1655_v53 = vcombine.low %v16136_v35, %v16147_v60  ;;  %v16150_v12 = vld [vmem:[#allocation91_spill] sm:$0xff] }
 0x118   : > { %8666 = vmatprep.mubr.f32.mxu0 %v4914_v29  ;;  %8402 = vmatmul.mubr.f32.gmra.mxu1 %v4968_v30  ;;  %v5040_v62 = vrot.slane %v9987_v9, %v10603_v27  ;;  %v1657_v31 = vcombine.low %v11960_v23, %v12063_v1  ;;  %v12957_v16 = vsel %vm474_vm1, %v505_v7, %v16148_v59  ;;  %v16151_v30 = vld [vmem:[#allocation89_spill] sm:$0xff] }
 0x119   : > { %16149 = vst [vmem:[#allocation83_spill] sm:$0xff] %v12957_v16  ;;  %v4994_v47 = vrot.slane %v1497_v43, %v10603_v27  ;;  %v9995_v61 = vcombine.high %v16142_v54, %v1655_v53  ;;  %v1542_v20 = vcombine.low %v16151_v30, %v16150_v12  ;;  %v1586_v29 = vcombine.low %v12003_v57, %v12957_v16 }
 0x11a   : > { %8845 = vmatprep.subr.mxu1 %v15879_v17  ;;  %v5058_v9 = vcombine.high %v5040_v62, %v5054_v58  ;;  %v5057_v41 = vcombine.low %v5040_v62, %v5054_v58  ;;  %v9997_v7 = vcombine.high %v16147_v60, %v1657_v31  ;;  %v1587_v59 = vcombine.high %v12003_v57, %v12957_v16  ;;  %v10444_v57 = vld [vmem:[%s10570_s12 + $0xa8] sm:$0xff] }
 0x11b   : > { %8846 = vmatpush1.msra.mxu1 %v3995_v5  ;;  %8667 = vmatmul.mubr.f32.gmra.mxu0 %v4913_v4  ;;  %v5003_v54 = vcombine.high %v4980_v38, %v4994_v47  ;;  %v5002_v43 = vcombine.low %v4980_v38, %v4994_v47  ;;  %v5129_v53 = vrot.slane %v9995_v61, %v10603_v27  ;;  %v16153_v38 = vrot.slane %v12916_v26, 2  ;;  %v12991_v47 = vld [vmem:[%s10570_s12 + $0xc8] sm:$0xff] }
 0x11c   : > { %v1550_v30 = vrot.slane %v1542_v20, %v10603_v27  ;;  %8406 = vmatprep.mubr.f32.mxu1 %v5058_v9  ;;  %v5143_v0 = vrot.slane %v9997_v7, %v10603_v27  ;;  %v1596_v58 = vrot.slane %v1586_v29, %v10603_v27  ;;  %v12978_v62 = vrot.slane %v1587_v59, %v10603_v27 }
 0x11d   : > { %v1712_v60 = vcombine.low %v16150_v12, %v10442_v40  ;;  %8671 = vmatprep.mubr.f32.mxu0 %v5003_v54  ;;  %8407 = vmatmul.mubr.f32.gmra.mxu1 %v5057_v41  ;;  %v1745_v4 = vcombine.low %v12957_v16, %v10444_v57  ;;  %v12987_v5 = vsel %vm474_vm1, %v16153_v38, %v12941_v34  ;;  %v3994_v54 = vld [vmem:[%s15389_s1 + $0x328] sm:$0xff]  ;;  %v16197_v12 = vld [vmem:[#allocation13_spill] sm:$0xff] }
 0x11e   : > { %16152 = vst [vmem:[#allocation77_spill] sm:$0xff] %v12978_v62  ;;  %16154 = vst [vmem:[#allocation90_spill] sm:$0xff] %v12987_v5  ;;  %v1746_v31 = vcombine.high %v12957_v16, %v10444_v57  ;;  %v5147_v20 = vcombine.high %v5129_v53, %v5143_v0  ;;  %v1619_v40 = vcombine.high %v1596_v58, %v12241_v49  ;;  %8847 = vmatprep.subr.mxu1 %v15879_v17 }
 0x11f   : > { %v9990_v29 = vcombine.low %v1550_v30, %v1596_v58  ;;  %v5146_v41 = vcombine.low %v5129_v53, %v5143_v0  ;;  %8672 = vmatmul.mubr.f32.gmra.mxu0 %v5002_v43  ;;  %v1719_v26 = vrot.slane %v1712_v60, %v10603_v27  ;;  %v1753_v9 = vrot.slane %v1745_v4, %v10603_v27  ;;  %v10446_v4 = vld [vmem:[%s10570_s12 + $0xb0] sm:$0xff] }
 0x120   : > { %v1621_v7 = vcombine.high %v12978_v62, %v12277_v13  ;;  %v1659_v59 = vcombine.low %v12100_v50, %v12987_v5  ;;  %8411 = vmatprep.mubr.f32.mxu1 %v5147_v20  ;;  %v9992_v0 = vcombine.low %v1619_v40, %v12978_v62  ;;  %v1660_v43 = vcombine.high %v12100_v50, %v12987_v5  ;;  %v4031_v20 = vld [vmem:[%s15389_s1 + $0x450] sm:$0xff]  ;;  %v13056_v62 = vpop.f32.mrf.mxu0 }
 0x121   : > { %v5069_v53 = vrot.slane %v9990_v29, %v10603_v27  ;;  %v1760_v30 = vrot.slane %v1746_v31, %v10603_v27  ;;  %8412 = vmatmul.mubr.f32.gmra.mxu1 %v5146_v41  ;;  %v1720_v58 = vcombine.low %v12022_v24, %v1719_v26  ;;  %v5232_v60 = vrot.slane %v1753_v9, %v10603_v27  ;;  %v16157_v29 = vld [vmem:[#allocation101_spill] sm:$0xff] }
 0x122   : > { %v13013_v57 = vrot.slane %v1659_v59, %v10603_v27  ;;  %v1818_v38 = vcombine.low %v12987_v5, %v10446_v4  ;;  %v5083_v40 = vrot.slane %v9992_v0, %v10603_v27  ;;  %v13022_v50 = vrot.slane %v1660_v43, %v10603_v27  ;;  %8848 = vmatpush1.msra.mxu1 %v3994_v54 }
 0x123   : > { %v13025_v31 = vrot.slane %v1760_v30, %v10603_v27  ;;  %v1721_v41 = vcombine.low %v16157_v29, %v12941_v34  ;;  %v10003_v26 = vcombine.high %v12063_v1, %v1720_v58  ;;  %10195 = vmatprep.subr.mxu0 %v15879_v17  ;;  %8849 = vmatprep.subr.mxu1 %v15879_v17 }
 0x124   : > { %16155 = vst [vmem:[#allocation110_spill] sm:$0xff] %v13013_v57  ;;  %16156 = vst [vmem:[#allocation100_spill] sm:$0xff] %v13022_v50  ;;  %v1692_v9 = vcombine.high %v13013_v57, %v12291_v3  ;;  %v9998_v59 = vcombine.low %v1621_v7, %v13013_v57  ;;  %v1826_v61 = vrot.slane %v1818_v38, %v10603_v27  ;;  %10196 = vmatpush3.msra.mxu0 %v4031_v20  ;;  %v16159_v38 = vld [vmem:[#allocation138_spill] sm:$0xff]  ;;  %v10447_v57 = vld [vmem:[%s10570_s12 + $0xb8] sm:$0xf] }
 0x125   : > { %v5092_v0 = vcombine.high %v5069_v53, %v5083_v40  ;;  %v5091_v43 = vcombine.low %v5069_v53, %v5083_v40  ;;  %v1694_v30 = vcombine.high %v13022_v50, %v12353_v18  ;;  %v13038_v29 = vrot.slane %v1721_v41, %v10603_v27  ;;  %v3993_v53 = vld [vmem:[%s15389_s1 + $0x320] sm:$0xff]  ;;  %v16160_v40 = vld [vmem:[#allocation131_spill] sm:$0xff]  ;;  %10197 = vmatprep.subr.mxu0 %v15879_v17 }
 0x126   : > { %v5218_v1 = vrot.slane %v10003_v26, %v10603_v27  ;;  %v10000_v54 = vcombine.low %v1692_v9, %v13022_v50  ;;  %v5158_v7 = vrot.slane %v9998_v59, %v10603_v27  ;;  %v5321_v58 = vrot.slane %v1826_v61, %v10603_v27  ;;  %8850 = vmatpush1.msra.mxu1 %v3993_v53 }
 0x127   : > { %16158 = vst [vmem:[#allocation99_spill] sm:$0xff] %v13038_v29  ;;  %8676 = vmatprep.mubr.f32.mxu0 %v5092_v0  ;;  %v1765_v41 = vcombine.low %v16160_v40, %v16159_v38  ;;  %v10004_v20 = vcombine.low %v1694_v30, %v13038_v29  ;;  %v1819_v26 = vcombine.high %v12987_v5, %v10446_v4  ;;  %v13058_v0 = vpop.f32.mrf.mxu1  ;;  %v16161_v5 = vld [vmem:[#allocation147_spill] sm:$0xff] }
 0x128   : > { %v1891_v9 = vcombine.low %v12941_v34, %v10447_v57  ;;  %8677 = vmatmul.mubr.f32.gmra.mxu0 %v5091_v43  ;;  %v5236_v59 = vcombine.high %v5218_v1, %v5232_v60  ;;  %v5172_v61 = vrot.slane %v10000_v54, %v10603_v27  ;;  %v5235_v50 = vcombine.low %v5218_v1, %v5232_v60  ;;  %v8085_v54 = vpop.f32.mrf.mxu0 }
 0x129   : > { %v5325_v49 = vcombine.high %v13025_v31, %v5321_v58  ;;  %v1775_v16 = vrot.slane %v1765_v41, %v10603_v27  ;;  %v5247_v30 = vrot.slane %v10004_v20, %v10603_v27  ;;  %v5324_v4 = vcombine.low %v13025_v31, %v5321_v58  ;;  %v8190_v34 = vpop.f32.mrf.mxu1  ;;  %v16162_v31 = vld [vmem:[#allocation136_spill] sm:$0xff]  ;;  %8851 = vmatprep.subr.mxu1 %v15879_v17 }
 0x12a   : > { %v1833_v29 = vrot.slane %v1819_v26, %v10603_v27  ;;  %8416 = vmatprep.mubr.f32.mxu1 %v5236_v59  ;;  %v5181_v57 = vcombine.high %v5158_v7, %v5172_v61  ;;  %v5180_v43 = vcombine.low %v5158_v7, %v5172_v61  ;;  %v1898_v60 = vrot.slane %v1891_v9, %v10603_v27  ;;  %v16163_v26 = vld [vmem:[#allocation146_spill] sm:$0xff]  ;;  %v16164_v7 = vld [vmem:[#allocation144_spill] sm:$0xff] }
 0x12b   : > { %v1766_v1 = vcombine.high %v16160_v40, %v16159_v38  ;;  %8417 = vmatmul.mubr.f32.gmra.mxu1 %v5235_v50  ;;  %v5261_v41 = vrot.slane %v1775_v16, %v10603_v27  ;;  %v1838_v58 = vcombine.low %v16162_v31, %v16161_v5  ;;  %v1942_v53 = vcombine.low %v12277_v13, %v16163_v26  ;;  %v16165_v40 = vld [vmem:[#allocation154_spill] sm:$0xff]  ;;  %v13077_v50 = vpop.f32.mrf.mxu0  ;;  %v16171_v13 = vld [vmem:[#allocation115_spill] sm:$0xff] }
 0x12c   : > { %v5396_v20 = vrot.slane %v1833_v29, %v10603_v27  ;;  %8681 = vmatprep.mubr.f32.mxu0 %v5181_v57  ;;  %8421 = vmatprep.mubr.f32.mxu1 %v5325_v49  ;;  %v10007_v9 = vcombine.low %v1898_v60, %v16164_v7  ;;  %v2013_v34 = vcombine.low %v12291_v3, %v16165_v40  ;;  %v3992_v49 = vld [vmem:[%s15389_s1 + $0x318] sm:$0xff]  ;;  %v13084_v57 = vpop.f32.mrf.mxu1 }
 0x12d   : > { %v1782_v59 = vrot.slane %v1766_v1, %v10603_v27  ;;  %8682 = vmatmul.mubr.f32.gmra.mxu0 %v5180_v43  ;;  %v5270_v16 = vcombine.high %v5247_v30, %v5261_v41  ;;  %v5269_v29 = vcombine.low %v5247_v30, %v5261_v41  ;;  %v1848_v61 = vrot.slane %v1838_v58, %v10603_v27  ;;  %v8090_v58 = vpop.f32.mrf.mxu0 }
 0x12e   : > { %v10011_v54 = vcombine.high %v16164_v7, %v1942_v53  ;;  %v5410_v60 = vrot.slane %v10007_v9, %v10603_v27  ;;  %v10013_v38 = vcombine.high %v16163_v26, %v2013_v34  ;;  %v16166_v43 = vrot.slane %v12991_v47, 2  ;;  %v10448_v26 = vld [vmem:[%s10570_s12 + $0xd0] sm:$0xf]  ;;  %v8195_v34 = vpop.f32.mrf.mxu1  ;;  %8852 = vmatpush1.msra.mxu1 %v3992_v49 }
 0x12f   : > { %v5336_v1 = vrot.slane %v1782_v59, %v10603_v27  ;;  %v16167_v30 = vrot.slane %v12960_v2, 2  ;;  %8686 = vmatprep.mubr.f32.mxu0 %v5270_v16  ;;  %8422 = vmatmul.mubr.f32.gmra.mxu1 %v5324_v4  ;;  %v5350_v53 = vrot.slane %v1848_v61, %v10603_v27  ;;  %v1839_v9 = vcombine.high %v16162_v31, %v16161_v5 }
 0x130   : > { %v5485_v7 = vrot.slane %v10011_v54, %v10603_v27  ;;  %v13102_v59 = vrot.slane %v10448_v26, 2  ;;  %v5414_v2 = vcombine.high %v5396_v20, %v5410_v60  ;;  %v5413_v3 = vcombine.low %v5396_v20, %v5410_v60  ;;  %v4030_v54 = vld [vmem:[%s15389_s1 + $0x448] sm:$0xff]  ;;  %v13113_v34 = vpop.f32.mrf.mxu1  ;;  %8853 = vmatprep.subr.mxu1 %v15879_v17 }
 0x131   : > { %v13094_v41 = vsel %vm474_vm1, %v16167_v30, %v16166_v43  ;;  %v5499_v43 = vrot.slane %v10013_v38, %v10603_v27  ;;  %v16170_v30 = vld [vmem:[#allocation132_spill] sm:$0xff]  ;;  %8687 = vmatmul.mubr.f32.gmra.mxu0 %v5269_v29  ;;  %v5359_v4 = vcombine.high %v5336_v1, %v5350_v53  ;;  %v5358_v16 = vcombine.low %v5336_v1, %v5350_v53  ;;  %v13117_v29 = vpop.f32.mrf.mxu0 }
 0x132   : > { %16168 = vst [vmem:[#allocation111_spill] sm:$0xff] %v13094_v41  ;;  %16169 = vst [vmem:[#allocation89_spill] sm:$0xff] %v13102_v59  ;;  %v1900_v58 = vcombine.low %v16171_v13, %v16170_v30  ;;  %v1855_v61 = vrot.slane %v1839_v9, %v10603_v27  ;;  %v1944_v31 = vcombine.low %v12443_v48, %v13094_v41  ;;  %8426 = vmatprep.mubr.f32.mxu1 %v5414_v2  ;;  %v8200_v53 = vpop.f32.mrf.mxu1 }
 0x133   : > { %v5503_v38 = vcombine.high %v5485_v7, %v5499_v43  ;;  %v5502_v13 = vcombine.low %v5485_v7, %v5499_v43  ;;  %8691 = vmatprep.mubr.f32.mxu0 %v5359_v4  ;;  %8427 = vmatmul.mubr.f32.gmra.mxu1 %v5413_v3  ;;  %v2015_v1 = vcombine.low %v12353_v18, %v12408_v36  ;;  %v16172_v7 = vrot.slane %v12991_v47, 2  ;;  %v8095_v43 = vpop.f32.mrf.mxu0  ;;  %v3991_v47 = vld [vmem:[%s15389_s1 + $0x310] sm:$0xff]  ;;  %v16196_v18 = vld [vmem:[#allocation21_spill] sm:$0xff] }
 0x134   : > { %v1908_v20 = vrot.slane %v1900_v58, %v10603_v27  ;;  %v1954_v49 = vrot.slane %v1944_v31, %v10603_v27  ;;  %v5425_v60 = vrot.slane %v1855_v61, %v10603_v27  ;;  %v2070_v9 = vcombine.low %v16170_v30, %v10448_v26  ;;  %10198 = vmatpush3.msra.mxu0 %v4030_v54 }
 0x135   : > { %8431 = vmatprep.mubr.f32.mxu1 %v5503_v38  ;;  %v13128_v2 = vsel %vm474_vm1, %v16172_v7, %v13102_v59  ;;  %v1945_v3 = vcombine.high %v12443_v48, %v13094_v41  ;;  %8692 = vmatmul.mubr.f32.gmra.mxu0 %v5358_v16  ;;  %v10019_v4 = vcombine.high %v16165_v40, %v2015_v1  ;;  %v10449_v40 = vld [vmem:[%s10570_s12 + $0xd8] sm:$0xff]  ;;  %v13148_v54 = vpop.f32.mrf.mxu0  ;;  %v16176_v7 = vld [vmem:[#allocation150_spill] sm:$0xff] }
 0x136   : > { %16173 = vst [vmem:[#allocation101_spill] sm:$0xff] %v13128_v2  ;;  %v10008_v58 = vcombine.low %v1908_v20, %v1954_v49  ;;  %v1977_v61 = vcombine.high %v1954_v49, %v12600_v51  ;;  %v2017_v26 = vcombine.low %v12516_v44, %v13128_v2  ;;  %v2077_v31 = vrot.slane %v2070_v9, %v10603_v27  ;;  %v13162_v9 = vpop.f32.mrf.mxu1 }
 0x137   : > { %v13141_v38 = vrot.slane %v1945_v3, %v10603_v27  ;;  %v2103_v48 = vcombine.low %v13094_v41, %v12580_v11  ;;  %v2104_v16 = vcombine.high %v13094_v41, %v10449_v40  ;;  %8432 = vmatmul.mubr.f32.gmra.mxu1 %v5502_v13  ;;  %v13152_v49 = vrot.slane %v10019_v4, %v10603_v27  ;;  %v3990_v11 = vld [vmem:[%s15389_s1 + $0x308] sm:$0xff]  ;;  %v8100_v4 = vpop.f32.mrf.mxu0 }
 0x138   : > { %v5439_v20 = vrot.slane %v10008_v58, %v10603_v27  ;;  %v13155_v1 = vrot.slane %v2017_v26, %v10603_v27  ;;  %v2018_v53 = vcombine.high %v12516_v44, %v13128_v2  ;;  %v2078_v3 = vcombine.low %v16176_v7, %v2077_v31  ;;  %8854 = vmatpush1.msra.mxu1 %v3991_v47  ;;  %v8205_v41 = vpop.f32.mrf.mxu1 }
 0x139   : > { %16174 = vst [vmem:[#allocation131_spill] sm:$0xff] %v13141_v38  ;;  %v1979_v13 = vcombine.high %v13141_v38, %v10663_v52  ;;  %v10014_v43 = vcombine.low %v1977_v61, %v13141_v38  ;;  %v2111_v58 = vrot.slane %v2103_v48, %v10603_v27  ;;  %v2118_v44 = vrot.slane %v2104_v16, %v10603_v27  ;;  %v16178_v48 = vld [vmem:[#allocation8_spill] sm:$0xff] }
 0x13a   : > { %16175 = vst [vmem:[#allocation136_spill] sm:$0xff] %v13155_v1  ;;  %v5448_v26 = vcombine.high %v5425_v60, %v5439_v20  ;;  %v5447_v40 = vcombine.low %v5425_v60, %v5439_v20  ;;  %v13171_v51 = vrot.slane %v2018_v53, %v10603_v27  ;;  %8855 = vmatprep.subr.mxu1 %v15879_v17  ;;  %v16179_v20 = vld [vmem:[#allocation9_spill] sm:$0xff]  ;;  %v4029_v53 = vld [vmem:[%s15389_s1 + $0x440] sm:$0xff] }
 0x13b   : > { %v10021_v31 = vcombine.high %v12408_v36, %v2078_v3  ;;  %v10016_v30 = vcombine.low %v1979_v13, %v13155_v1  ;;  %v5514_v61 = vrot.slane %v10014_v43, %v10603_v27  ;;  %v13178_v47 = vrot.slane %v2111_v58, %v10603_v27  ;;  %8856 = vmatpush1.msra.mxu1 %v3990_v11  ;;  %v13192_v3 = vpop.f32.mrf.mxu1  ;;  %v10450_v43 = vld [vmem:[%s10570_s12 + $0xe0] sm:$0xff] }
 0x13c   : > { %16177 = vst [vmem:[#allocation146_spill] sm:$0xff] %v13171_v51  ;;  %8696 = vmatprep.mubr.f32.mxu0 %v5448_v26  ;;  %v13181_v60 = vrot.slane %v2118_v44, %v10603_v27  ;;  %v2050_v16 = vcombine.high %v13155_v1, %v16178_v48  ;;  %v2052_v41 = vcombine.high %v13171_v51, %v16179_v20  ;;  %v13199_v26 = vpop.f32.mrf.mxu0 }
 0x13d   : > { %v2079_v36 = vcombine.low %v12459_v56, %v13102_v59  ;;  %8697 = vmatmul.mubr.f32.gmra.mxu0 %v5447_v40  ;;  %v5588_v11 = vrot.slane %v10021_v31, %v10603_v27  ;;  %v5528_v13 = vrot.slane %v10016_v30, %v10603_v27  ;;  %v2176_v58 = vcombine.low %v13128_v2, %v10450_v43  ;;  %v8210_v30 = vpop.f32.mrf.mxu1 }
 0x13e   : > { %v2177_v4 = vcombine.high %v13128_v2, %v10450_v43  ;;  %v5681_v56 = vcombine.high %v13178_v47, %v13181_v60  ;;  %v10022_v1 = vcombine.low %v2050_v16, %v13171_v51  ;;  %v5680_v40 = vcombine.low %v13178_v47, %v13181_v60  ;;  %10199 = vmatprep.subr.mxu0 %v15879_v17  ;;  %v8105_v5 = vpop.f32.mrf.mxu0 }
 0x13f   : > { %v13204_v44 = vrot.slane %v2079_v36, %v10603_v27  ;;  %v5592_v31 = vcombine.high %v13152_v49, %v5588_v11  ;;  %v5537_v43 = vcombine.high %v5514_v61, %v5528_v13  ;;  %v5591_v38 = vcombine.low %v13152_v49, %v5588_v11  ;;  %10200 = vmatpush3.msra.mxu0 %v4029_v53  ;;  %v10451_v5 = vld [vmem:[%s10570_s12 + $0xe8] sm:$0xf] }
 0x140   : > { %v5536_v2 = vcombine.low %v5514_v61, %v5528_v13  ;;  %v5603_v16 = vrot.slane %v10022_v1, %v10603_v27  ;;  %v2184_v51 = vrot.slane %v2176_v58, %v10603_v27  ;;  %v2191_v47 = vrot.slane %v2177_v4, %v10603_v27  ;;  %8857 = vmatprep.subr.mxu1 %v15879_v17  ;;  %v3989_v1 = vld [vmem:[%s15389_s1 + $0x300] sm:$0xff]  ;;  %v13227_v11 = vpop.f32.mrf.mxu0 }
 0x141   : > { %16180 = vst [vmem:[#allocation144_spill] sm:$0xff] %v13204_v44  ;;  %v10024_v36 = vcombine.low %v2052_v41, %v13204_v44  ;;  %8436 = vmatprep.mubr.f32.mxu1 %v5592_v31  ;;  %8701 = vmatprep.mubr.f32.mxu0 %v5537_v43  ;;  %v2123_v49 = vcombine.low %v10617_v33, %v10630_v37  ;;  %v10452_v41 = vld [vmem:[%s10570_s12 + $0xf0] sm:$0xff]  ;;  %v13236_v31 = vpop.f32.mrf.mxu1 }
 0x142   : > { %v2124_v61 = vcombine.high %v10617_v33, %v10630_v37  ;;  %v2249_v60 = vcombine.low %v13102_v59, %v10451_v5  ;;  %v525_v53 = vrot.slane %v10452_v41, 2  ;;  %8437 = vmatmul.mubr.f32.gmra.mxu1 %v5591_v38  ;;  %8702 = vmatmul.mubr.f32.gmra.mxu0 %v5536_v2  ;;  %v5752_v58 = vrot.slane %v2184_v51, %v10603_v27  ;;  %v13233_v33 = vld [vmem:[%s10570_s12 + $0xf8] sm:$0xff]  ;;  %v16181_v2 = vld [vmem:[#allocation10_spill] sm:$0xff]  ;;  %v8110_v41 = vpop.f32.mrf.mxu0 }
 0x143   : > { %v5617_v13 = vrot.slane %v10024_v36, %v10603_v27  ;;  %v5766_v4 = vrot.slane %v2191_v47, %v10603_v27  ;;  %8441 = vmatprep.mubr.f32.mxu1 %v5681_v56  ;;  %v2133_v43 = vrot.slane %v2123_v49, %v10603_v27  ;;  %v2300_v36 = vcombine.low %v10663_v52, %v16181_v2  ;;  %v8215_v59 = vpop.f32.mrf.mxu1 }
 0x144   : > { %v2140_v5 = vrot.slane %v2124_v61, %v10603_v27  ;;  %v2256_v38 = vrot.slane %v2249_v60, %v10603_v27  ;;  %8858 = vmatpush1.msra.mxu1 %v3989_v1  ;;  %v4020_v60 = vld [vmem:[%s15389_s1 + $0x3f8] sm:$0xff]  ;;  %10201 = vmatprep.subr.mxu0 %v15879_v17 }
 0x145   : > { %v5626_v51 = vcombine.high %v5603_v16, %v5617_v13  ;;  %v5625_v44 = vcombine.low %v5603_v16, %v5617_v13  ;;  %v5770_v47 = vcombine.high %v5752_v58, %v5766_v4  ;;  %v5769_v37 = vcombine.low %v5752_v58, %v5766_v4  ;;  %8859 = vmatprep.subr.mxu1 %v15879_v17  ;;  %v16182_v16 = vld [vmem:[#allocation6_spill] sm:$0xff]  ;;  %v16183_v13 = vld [vmem:[#allocation4_spill] sm:$0xff] }
 0x146   : > { %v5692_v30 = vrot.slane %v2133_v43, %v10603_v27  ;;  %v5706_v56 = vrot.slane %v2140_v5, %v10603_v27  ;;  %v10027_v49 = vcombine.low %v2256_v38, %v12605_v45  ;;  %v10029_v61 = vcombine.high %v12605_v45, %v2300_v36  ;;  %8442 = vmatmul.mubr.f32.gmra.mxu1 %v5680_v40  ;;  %v16184_v58 = vld [vmem:[#allocation12_spill] sm:$0xff]  ;;  %v13258_v38 = vpop.f32.mrf.mxu0  ;;  %v13260_v36 = vpop.f32.mrf.mxu1 }
 0x147   : > { %8706 = vmatprep.mubr.f32.mxu0 %v5626_v51  ;;  %v2196_v1 = vcombine.low %v16183_v13, %v16182_v16  ;;  %v2197_v59 = vcombine.high %v16183_v13, %v16182_v16  ;;  %v2371_v4 = vcombine.low %v16178_v48, %v16184_v58  ;;  %8446 = vmatprep.mubr.f32.mxu1 %v5770_v47  ;;  %v16185_v13 = vld [vmem:[#allocation16_spill] sm:$0xff] }
 0x148   : > { %8707 = vmatmul.mubr.f32.gmra.mxu0 %v5625_v44  ;;  %v5715_v45 = vcombine.high %v5692_v30, %v5706_v56  ;;  %v5714_v43 = vcombine.low %v5692_v30, %v5706_v56  ;;  %v5841_v5 = vrot.slane %v10027_v49, %v10603_v27  ;;  %v5855_v40 = vrot.slane %v10029_v61, %v10603_v27  ;;  %v16188_v56 = vld [vmem:[#allocation3_spill] sm:$0xff]  ;;  %v16189_v49 = vld [vmem:[#allocation2_spill] sm:$0xff]  ;;  %v8220_v52 = vpop.f32.mrf.mxu1 }
 0x149   : > { %v2206_v41 = vrot.slane %v2196_v1, %v10603_v27  ;;  %v2213_v51 = vrot.slane %v2197_v59, %v10603_v27  ;;  %v2373_v16 = vcombine.low %v16179_v20, %v16185_v13  ;;  %8860 = vmatpush2.msra.mxu1 %v4020_v60  ;;  %v10035_v44 = vcombine.high %v16181_v2, %v2371_v4  ;;  %v10454_v61 = vld [vmem:[%s10570_s12 + $0x100] sm:$0xf]  ;;  %v8115_v59 = vpop.f32.mrf.mxu0 }
 0x14a   : > { %8711 = vmatprep.mubr.f32.mxu0 %v5715_v45  ;;  %v16186_v30 = vrot.slane %v13233_v33, 2  ;;  %v2258_v48 = vcombine.low %v16189_v49, %v16188_v56  ;;  %v13277_v1 = vrot.slane %v10454_v61, 2  ;;  %8447 = vmatmul.mubr.f32.gmra.mxu1 %v5769_v37  ;;  %v5859_v60 = vcombine.high %v5841_v5, %v5855_v40  ;;  %v16191_v37 = vld [vmem:[#allocation11_spill] sm:$0xff] }
 0x14b   : > { %v5781_v45 = vrot.slane %v2206_v41, %v10603_v27  ;;  %v5795_v2 = vrot.slane %v2213_v51, %v10603_v27  ;;  %v5858_v4 = vcombine.low %v5841_v5, %v5855_v40  ;;  %v5930_v49 = vrot.slane %v10035_v44, %v10603_v27  ;;  %v13292_v51 = vpop.f32.mrf.mxu0  ;;  %8861 = vmatprep.subr.mxu1 %v15879_v17 }
 0x14c   : > { %v13271_v47 = vsel %vm474_vm1, %v525_v53, %v16186_v30  ;;  %16190 = vst [vmem:[#allocation115_spill] sm:$0xff] %v13277_v1  ;;  %v4028_v53 = vld [vmem:[%s15389_s1 + $0x438] sm:$0xff]  ;;  %8712 = vmatmul.mubr.f32.gmra.mxu0 %v5714_v43  ;;  %v10037_v30 = vcombine.high %v16184_v58, %v2373_v16  ;;  %v2266_v59 = vrot.slane %v2258_v48, %v10603_v27  ;;  %v13294_v43 = vpop.f32.mrf.mxu1  ;;  %v10455_v58 = vld [vmem:[%s10570_s12 + $0x108] sm:$0xff] }
 0x14d   : > { %16187 = vst [vmem:[#allocation154_spill] sm:$0xff] %v13271_v47  ;;  %v2302_v52 = vcombine.low %v16191_v37, %v13271_v47  ;;  %8451 = vmatprep.mubr.f32.mxu1 %v5859_v60  ;;  %v5804_v41 = vcombine.high %v5781_v45, %v5795_v2  ;;  %v5803_v20 = vcombine.low %v5781_v45, %v5795_v2  ;;  %v16192_v60 = vrot.slane %v13233_v33, 2  ;;  %v8120_v7 = vpop.f32.mrf.mxu0 }
 0x14e   : > { %v2303_v5 = vcombine.high %v16191_v37, %v13271_v47  ;;  %v2428_v40 = vcombine.low %v16188_v56, %v10454_v61  ;;  %v5944_v16 = vrot.slane %v10037_v30, %v10603_v27  ;;  %v2461_v44 = vcombine.low %v13271_v47, %v10455_v58  ;;  %10202 = vmatpush3.msra.mxu0 %v4028_v53  ;;  %v16195_v30 = vld [vmem:[#allocation17_spill] sm:$0xff]  ;;  %v8225_v33 = vpop.f32.mrf.mxu1  ;;  %v4019_v7 = vld [vmem:[%s15389_s1 + $0x3f0] sm:$0xff] }
 0x14f   : > { %v2312_v48 = vrot.slane %v2302_v52, %v10603_v27  ;;  %v13304_v45 = vsel %vm474_vm1, %v16192_v60, %v13277_v1  ;;  %8716 = vmatprep.mubr.f32.mxu0 %v5804_v41  ;;  %8452 = vmatmul.mubr.f32.gmra.mxu1 %v5858_v4  ;;  %v13313_v52 = vld [vmem:[%s10570_s12 + $0x120] sm:$0xff] }
 0x150   : > { %16193 = vst [vmem:[#allocation10_spill] sm:$0xff] %v13304_v45  ;;  %v13307_v61 = vrot.slane %v2303_v5, %v10603_v27  ;;  %v2435_v2 = vrot.slane %v2428_v40, %v10603_v27  ;;  %v2375_v37 = vcombine.low %v16195_v30, %v13304_v45  ;;  %8717 = vmatmul.mubr.f32.gmra.mxu0 %v5803_v20  ;;  %v16198_v40 = vld [vmem:[#allocation29_spill] sm:$0xff] }
 0x151   : > { %v5948_v60 = vcombine.high %v5930_v49, %v5944_v16  ;;  %v2335_v53 = vcombine.high %v2312_v48, %v16196_v18  ;;  %v10030_v41 = vcombine.low %v2266_v59, %v2312_v48  ;;  %v5947_v4 = vcombine.low %v5930_v49, %v5944_v16  ;;  %v13333_v48 = vpop.f32.mrf.mxu0  ;;  %8862 = vmatpush2.msra.mxu1 %v4019_v7 }
 0x152   : > { %16194 = vst [vmem:[#allocation4_spill] sm:$0xff] %v13307_v61  ;;  %v2436_v5 = vcombine.low %v16197_v12, %v2435_v2  ;;  %v2469_v24 = vrot.slane %v2461_v44, %v10603_v27  ;;  %v2337_v23 = vcombine.high %v13307_v61, %v16198_v40  ;;  %v2376_v35 = vcombine.high %v16195_v30, %v13304_v45  ;;  %v13335_v44 = vpop.f32.mrf.mxu1  ;;  %v16203_v12 = vld [vmem:[#allocation15_spill] sm:$0xff] }
 0x153   : > { %8456 = vmatprep.mubr.f32.mxu1 %v5948_v60  ;;  %v10032_v20 = vcombine.low %v2335_v53, %v13307_v61  ;;  %v5870_v49 = vrot.slane %v10030_v41, %v10603_v27  ;;  %v13330_v59 = vrot.slane %v2375_v37, %v10603_v27  ;;  %v2462_v16 = vcombine.high %v13271_v47, %v10455_v58  ;;  %v10457_v60 = vld [vmem:[%s10570_s12 + $0x110] sm:$0xff]  ;;  %v4018_v37 = vld [vmem:[%s15389_s1 + $0x3e8] sm:$0xff]  ;;  %v16201_v41 = vld [vmem:[#allocation30_spill] sm:$0xff] }
 0x154   : > { %8457 = vmatmul.mubr.f32.gmra.mxu1 %v5947_v4  ;;  %v10043_v2 = vcombine.high %v16185_v13, %v2436_v5  ;;  %v6033_v30 = vrot.slane %v2469_v24, %v10603_v27  ;;  %v13340_v33 = vrot.slane %v2376_v35, %v10603_v27  ;;  %v2534_v53 = vcombine.low %v13304_v45, %v10457_v60  ;;  %v8125_v24 = vpop.f32.mrf.mxu0  ;;  %v8230_v35 = vpop.f32.mrf.mxu1  ;;  %v16202_v61 = vld [vmem:[#allocation37_spill] sm:$0xff] }
 0x155   : > { %16199 = vst [vmem:[#allocation12_spill] sm:$0xff] %v13330_v59  ;;  %v5884_v58 = vrot.slane %v10032_v20, %v10603_v27  ;;  %v2408_v56 = vcombine.high %v13330_v59, %v16201_v41  ;;  %v10038_v4 = vcombine.low %v2337_v23, %v13330_v59  ;;  %v2476_v13 = vrot.slane %v2462_v16, %v10603_v27 }
 0x156   : > { %16200 = vst [vmem:[#allocation16_spill] sm:$0xff] %v13340_v33  ;;  %v6019_v5 = vrot.slane %v10043_v2, %v10603_v27  ;;  %v2542_v18 = vrot.slane %v2534_v53, %v10603_v27  ;;  %v2410_v47 = vcombine.high %v13340_v33, %v16202_v61  ;;  %v2437_v20 = vcombine.low %v16203_v12, %v13277_v1  ;;  %v13361_v16 = vpop.f32.mrf.mxu0 }
 0x157   : > { %8863 = vmatprep.subr.mxu1 %v15879_v17  ;;  %v5893_v32 = vcombine.high %v5870_v49, %v5884_v58  ;;  %v5892_v8 = vcombine.low %v5870_v49, %v5884_v58  ;;  %v10040_v23 = vcombine.low %v2408_v56, %v13340_v33  ;;  %v5959_v7 = vrot.slane %v10038_v4, %v10603_v27  ;;  %v16205_v49 = vld [vmem:[#allocation28_spill] sm:$0xff] }
 0x158   : > { %8864 = vmatpush2.msra.mxu1 %v4018_v37  ;;  %v6037_v2 = vcombine.high %v6019_v5, %v6033_v30  ;;  %v6036_v53 = vcombine.low %v6019_v5, %v6033_v30  ;;  %v6108_v24 = vrot.slane %v2476_v13, %v10603_v27  ;;  %v6122_v35 = vrot.slane %v2542_v18, %v10603_v27  ;;  %v16206_v37 = vld [vmem:[#allocation20_spill] sm:$0xff]  ;;  %v8130_v33 = vpop.f32.mrf.mxu0  ;;  %v10458_v5 = vld [vmem:[%s10570_s12 + $0x118] sm:$0xf] }
 0x159   : > { %10203 = vmatprep.subr.mxu0 %v15879_v17  ;;  %8721 = vmatprep.mubr.f32.mxu0 %v5893_v32  ;;  %v5973_v12 = vrot.slane %v10040_v23, %v10603_v27  ;;  %v13368_v56 = vrot.slane %v2437_v20, %v10603_v27  ;;  %v2481_v58 = vcombine.low %v16206_v37, %v16205_v49  ;;  %v4027_v32 = vld [vmem:[%s15389_s1 + $0x430] sm:$0xff]  ;;  %v10459_v23 = vld [vmem:[%s10570_s12 + $0x128] sm:$0xff]  ;;  %v13381_v33 = vpop.f32.mrf.mxu1 }
 0x15a   : > { %v2535_v4 = vcombine.high %v13304_v45, %v10457_v60  ;;  %8722 = vmatmul.mubr.f32.gmra.mxu0 %v5892_v8  ;;  %8461 = vmatprep.mubr.f32.mxu1 %v6037_v2  ;;  %v6126_v30 = vcombine.high %v6108_v24, %v6122_v35  ;;  %v6125_v13 = vcombine.low %v6108_v24, %v6122_v35  ;;  %v536_v20 = vrot.slane %v10459_v23, 2  ;;  %v16208_v23 = vld [vmem:[#allocation25_spill] sm:$0xff]  ;;  %v16212_v45 = vld [vmem:[#allocation39_spill] sm:$0xff] }
 0x15b   : > { %16204 = vst [vmem:[#allocation2_spill] sm:$0xff] %v13368_v56  ;;  %v2607_v18 = vcombine.low %v13277_v1, %v10458_v5  ;;  %v5982_v59 = vcombine.high %v5959_v7, %v5973_v12  ;;  %8462 = vmatmul.mubr.f32.gmra.mxu1 %v6036_v53  ;;  %v5981_v63 = vcombine.low %v5959_v7, %v5973_v12  ;;  %v16207_v5 = vld [vmem:[#allocation34_spill] sm:$0xff] }
 0x15c   : > { %v2491_v60 = vrot.slane %v2481_v58, %v10603_v27  ;;  %v10044_v8 = vcombine.low %v2410_v47, %v13368_v56  ;;  %8466 = vmatprep.mubr.f32.mxu1 %v6126_v30  ;;  %v2549_v2 = vrot.slane %v2535_v4, %v10603_v27  ;;  %v2482_v35 = vcombine.high %v16206_v37, %v16205_v49  ;;  %v16209_v47 = vld [vmem:[#allocation33_spill] sm:$0xff]  ;;  %v10460_v58 = vld [vmem:[%s10570_s12 + $0x130] sm:$0xf]  ;;  %v8235_v4 = vpop.f32.mrf.mxu1  ;;  %v16211_v37 = vld [vmem:[#allocation31_spill] sm:$0xff] }
 0x15d   : > { %v2614_v24 = vrot.slane %v2607_v18, %v10603_v27  ;;  %v2554_v1 = vcombine.low %v16208_v23, %v16207_v5  ;;  %8726 = vmatprep.mubr.f32.mxu0 %v5982_v59  ;;  %10204 = vmatpush3.msra.mxu0 %v4027_v32  ;;  %v2658_v12 = vcombine.low %v16198_v40, %v16209_v47  ;;  %v13394_v30 = vrot.slane %v10460_v58, 2  ;;  %v13396_v18 = vpop.f32.mrf.mxu0 }
 0x15e   : > { %v6048_v7 = vrot.slane %v10044_v8, %v10603_v27  ;;  %v6062_v53 = vrot.slane %v2491_v60, %v10603_v27  ;;  %8727 = vmatmul.mubr.f32.gmra.mxu0 %v5981_v63  ;;  %v6197_v49 = vrot.slane %v2549_v2, %v10603_v27  ;;  %v2498_v59 = vrot.slane %v2482_v35, %v10603_v27 }
 0x15f   : > { %16210 = vst [vmem:[#allocation11_spill] sm:$0xff] %v13394_v30  ;;  %v10047_v56 = vcombine.low %v2614_v24, %v16211_v37  ;;  %v2564_v8 = vrot.slane %v2554_v1, %v10603_v27  ;;  %8467 = vmatmul.mubr.f32.gmra.mxu1 %v6125_v13  ;;  %v2729_v40 = vcombine.low %v16201_v41, %v16212_v45  ;;  %v8135_v4 = vpop.f32.mrf.mxu0  ;;  %v16213_v2 = vrot.slane %v13313_v52, 2  ;;  %v4017_v1 = vld [vmem:[%s15389_s1 + $0x3e0] sm:$0xff] }
 0x160   : > { %v6071_v60 = vcombine.high %v6048_v7, %v6062_v53  ;;  %v6070_v32 = vcombine.low %v6048_v7, %v6062_v53  ;;  %v10051_v22 = vcombine.high %v16211_v37, %v2658_v12  ;;  %v6137_v63 = vrot.slane %v2498_v59, %v10603_v27  ;;  %8865 = vmatprep.subr.mxu1 %v15879_v17  ;;  %v16215_v53 = vld [vmem:[#allocation32_spill] sm:$0xff]  ;;  %v16216_v12 = vld [vmem:[#allocation22_spill] sm:$0xff] }
 0x161   : > { %v6211_v25 = vrot.slane %v10047_v56, %v10603_v27  ;;  %v6151_v24 = vrot.slane %v2564_v8, %v10603_v27  ;;  %v13411_v35 = vsel %vm474_vm1, %v16213_v2, %v536_v20  ;;  %v10053_v13 = vcombine.high %v16209_v47, %v2729_v40  ;;  %v16217_v40 = vld [vmem:[#allocation43_spill] sm:$0xff]  ;;  %8866 = vmatpush2.msra.mxu1 %v4017_v1  ;;  %v13428_v47 = vpop.f32.mrf.mxu1 }
 0x162   : > { %16214 = vst [vmem:[#allocation17_spill] sm:$0xff] %v13411_v35  ;;  %8731 = vmatprep.mubr.f32.mxu0 %v6071_v60  ;;  %v6286_v56 = vrot.slane %v10051_v22, %v10603_v27  ;;  %v2555_v7 = vcombine.high %v16208_v23, %v16207_v5  ;;  %v2616_v52 = vcombine.low %v16216_v12, %v16215_v53  ;;  %v16218_v23 = vld [vmem:[#allocation40_spill] sm:$0xff] }
 0x163   : > { %8732 = vmatmul.mubr.f32.gmra.mxu0 %v6070_v32  ;;  %v6215_v37 = vcombine.high %v6197_v49, %v6211_v25  ;;  %v6160_v59 = vcombine.high %v6137_v63, %v6151_v24  ;;  %v6214_v8 = vcombine.low %v6197_v49, %v6211_v25  ;;  %v6159_v4 = vcombine.low %v6137_v63, %v6151_v24  ;;  %v8240_v12 = vpop.f32.mrf.mxu1 }
 0x164   : > { %v6300_v2 = vrot.slane %v10053_v13, %v10603_v27  ;;  %v2571_v41 = vrot.slane %v2555_v7, %v10603_v27  ;;  %v2624_v60 = vrot.slane %v2616_v52, %v10603_v27  ;;  %v2660_v22 = vcombine.low %v16217_v40, %v13411_v35  ;;  %v4016_v7 = vld [vmem:[%s15389_s1 + $0x3d8] sm:$0xff]  ;;  %8867 = vmatprep.subr.mxu1 %v15879_v17 }
 0x165   : > { %8471 = vmatprep.mubr.f32.mxu1 %v6215_v37  ;;  %8736 = vmatprep.mubr.f32.mxu0 %v6160_v59  ;;  %v2731_v32 = vcombine.low %v16202_v61, %v16218_v23  ;;  %v2786_v25 = vcombine.low %v16215_v53, %v10460_v58  ;;  %v13435_v49 = vsel %vm474_vm1, %v536_v20, %v13394_v30  ;;  %v16220_v37 = vld [vmem:[#allocation57_spill] sm:$0xff]  ;;  %v16226_v61 = vld [vmem:[#allocation79_spill] sm:$0xff] }
 0x166   : > { %16219 = vst [vmem:[#allocation15_spill] sm:$0xff] %v13435_v49  ;;  %8472 = vmatmul.mubr.f32.gmra.mxu1 %v6214_v8  ;;  %v6304_v63 = vcombine.high %v6286_v56, %v6300_v2  ;;  %v2670_v24 = vrot.slane %v2660_v22, %v10603_v27  ;;  %v6226_v1 = vrot.slane %v2571_v41, %v10603_v27  ;;  %v16221_v41 = vld [vmem:[#allocation67_spill] sm:$0xff] }
 0x167   : > { %v6303_v13 = vcombine.low %v6286_v56, %v6300_v2  ;;  %8737 = vmatmul.mubr.f32.gmra.mxu0 %v6159_v4  ;;  %v2793_v58 = vrot.slane %v2786_v25, %v10603_v27  ;;  %v10059_v20 = vcombine.high %v16212_v45, %v2731_v32  ;;  %v2661_v52 = vcombine.high %v16217_v40, %v13411_v35  ;;  %v10461_v2 = vld [vmem:[%s10570_s12 + $0x138] sm:$0xff]  ;;  %v13453_v4 = vld [vmem:[%s10570_s12 + $0x150] sm:$0xff]  ;;  %v13456_v45 = vpop.f32.mrf.mxu1  ;;  %v16222_v32 = vld [vmem:[#allocation38_spill] sm:$0xff] }
 0x168   : > { %v2733_v59 = vcombine.low %v16220_v37, %v13435_v49  ;;  %8476 = vmatprep.mubr.f32.mxu1 %v6304_v63  ;;  %v10048_v8 = vcombine.low %v2624_v60, %v2670_v24  ;;  %v2693_v56 = vcombine.high %v2670_v24, %v16221_v41  ;;  %v2819_v22 = vcombine.low %v13411_v35, %v10461_v2  ;;  %v4026_v24 = vld [vmem:[%s15389_s1 + $0x428] sm:$0xff]  ;;  %v13469_v41 = vpop.f32.mrf.mxu0 }
 0x169   : > { %v2794_v40 = vcombine.low %v16222_v32, %v2793_v58  ;;  %v6375_v12 = vrot.slane %v10059_v20, %v10603_v27  ;;  %v13461_v63 = vrot.slane %v2661_v52, %v10603_v27  ;;  %8868 = vmatpush2.msra.mxu1 %v4016_v7  ;;  %v2820_v58 = vcombine.high %v13411_v35, %v10461_v2  ;;  %v8245_v53 = vpop.f32.mrf.mxu1  ;;  %v16225_v7 = vld [vmem:[#allocation68_spill] sm:$0xff] }
 0x16a   : > { %v13464_v60 = vrot.slane %v2733_v59, %v10603_v27  ;;  %v6240_v25 = vrot.slane %v10048_v8, %v10603_v27  ;;  %8477 = vmatmul.mubr.f32.gmra.mxu1 %v6303_v13  ;;  %v2827_v20 = vrot.slane %v2819_v22, %v10603_v27  ;;  %v2734_v52 = vcombine.high %v16220_v37, %v13435_v49  ;;  %v8140_v13 = vpop.f32.mrf.mxu0 }
 0x16b   : > { %16223 = vst [vmem:[#allocation20_spill] sm:$0xff] %v13461_v63  ;;  %v10061_v59 = vcombine.high %v16218_v23, %v2794_v40  ;;  %v2695_v5 = vcombine.high %v13461_v63, %v16225_v7  ;;  %v10054_v32 = vcombine.low %v2693_v56, %v13461_v63  ;;  %10205 = vmatprep.subr.mxu0 %v15879_v17 }
 0x16c   : > { %16224 = vst [vmem:[#allocation25_spill] sm:$0xff] %v13464_v60  ;;  %v2766_v14 = vcombine.high %v13464_v60, %v16226_v61  ;;  %v6249_v8 = vcombine.high %v6226_v1, %v6240_v25  ;;  %v6248_v2 = vcombine.low %v6226_v1, %v6240_v25  ;;  %v2834_v22 = vrot.slane %v2820_v58, %v10603_v27  ;;  %v4015_v1 = vld [vmem:[%s15389_s1 + $0x3d0] sm:$0xff] }
 0x16d   : > { %v6464_v53 = vrot.slane %v2827_v20, %v10603_v27  ;;  %10206 = vmatpush3.msra.mxu0 %v4026_v24  ;;  %v6389_v23 = vrot.slane %v10061_v59, %v10603_v27  ;;  %v10056_v37 = vcombine.low %v2695_v5, %v13464_v60  ;;  %v6315_v56 = vrot.slane %v10054_v32, %v10603_v27  ;;  %v16228_v24 = vld [vmem:[#allocation50_spill] sm:$0xff]  ;;  %v16229_v60 = vld [vmem:[#allocation80_spill] sm:$0xff] }
 0x16e   : > { %v13489_v40 = vrot.slane %v2734_v52, %v10603_v27  ;;  %8869 = vmatprep.subr.mxu1 %v15879_v17  ;;  %8741 = vmatprep.mubr.f32.mxu0 %v6249_v8  ;;  %v6478_v25 = vrot.slane %v2834_v22, %v10603_v27  ;;  %v2795_v58 = vcombine.low %v16228_v24, %v13394_v30  ;;  %v10463_v20 = vld [vmem:[%s10570_s12 + $0x140] sm:$0xff] }
 0x16f   : > { %v2892_v5 = vcombine.low %v13435_v49, %v10463_v20  ;;  %v2893_v32 = vcombine.high %v13435_v49, %v10463_v20  ;;  %8742 = vmatmul.mubr.f32.gmra.mxu0 %v6248_v2  ;;  %v6393_v52 = vcombine.high %v6375_v12, %v6389_v23  ;;  %v6329_v59 = vrot.slane %v10056_v37, %v10603_v27  ;;  %v16232_v49 = vld [vmem:[#allocation63_spill] sm:$0xff] }
 0x170   : > { %16227 = vst [vmem:[#allocation33_spill] sm:$0xff] %v13489_v40  ;;  %v6392_v13 = vcombine.low %v6375_v12, %v6389_v23  ;;  %v2768_v63 = vcombine.high %v13489_v40, %v16229_v60  ;;  %v6482_v35 = vcombine.high %v6464_v53, %v6478_v25  ;;  %v13505_v8 = vrot.slane %v2795_v58, %v10603_v27  ;;  %v16231_v58 = vld [vmem:[#allocation66_spill] sm:$0xff] }
 0x171   : > { %v10062_v22 = vcombine.low %v2766_v14, %v13489_v40  ;;  %v6481_v24 = vcombine.low %v6464_v53, %v6478_v25  ;;  %8870 = vmatpush2.msra.mxu1 %v4015_v1  ;;  %8481 = vmatprep.mubr.f32.mxu1 %v6393_v52  ;;  %v6338_v28 = vcombine.high %v6315_v56, %v6329_v59  ;;  %v13516_v53 = vpop.f32.mrf.mxu0  ;;  %v16234_v40 = vld [vmem:[#allocation81_spill] sm:$0xff] }
 0x172   : > { %16230 = vst [vmem:[#allocation31_spill] sm:$0xff] %v13505_v8  ;;  %v6337_v20 = vcombine.low %v6315_v56, %v6329_v59  ;;  %v2900_v2 = vrot.slane %v2892_v5, %v10603_v27  ;;  %v2907_v12 = vrot.slane %v2893_v32, %v10603_v27  ;;  %8482 = vmatmul.mubr.f32.gmra.mxu1 %v6392_v13  ;;  %v13518_v56 = vpop.f32.mrf.mxu1  ;;  %v13527_v32 = vld [vmem:[%s10570_s12 + $0x160] sm:$0xf] }
 0x173   : > { %v10064_v23 = vcombine.low %v2768_v63, %v13505_v8  ;;  %v6404_v37 = vrot.slane %v10062_v22, %v10603_v27  ;;  %v2839_v6 = vcombine.low %v16232_v49, %v16231_v58  ;;  %v2840_v14 = vcombine.high %v16232_v49, %v16231_v58  ;;  %8746 = vmatprep.mubr.f32.mxu0 %v6338_v28  ;;  %v13523_v63 = vld [vmem:[%s10570_s12 + $0x158] sm:$0xff]  ;;  %v13536_v59 = vld [vmem:[%s10570_s12 + $0x180] sm:$0xff]  ;;  %v8145_v22 = vpop.f32.mrf.mxu0 }
 0x174   : > { %8486 = vmatprep.mubr.f32.mxu1 %v6482_v35  ;;  %v6553_v1 = vrot.slane %v2900_v2, %v10603_v27  ;;  %v6567_v25 = vrot.slane %v2907_v12, %v10603_v27  ;;  %v13530_v52 = vrot.slane %v13527_v32, 2  ;;  %8747 = vmatmul.mubr.f32.gmra.mxu0 %v6337_v20  ;;  %v8250_v2 = vpop.f32.mrf.mxu1  ;;  %v13542_v5 = vld [vmem:[%s15390_s2] ss:$0 sm:$0xff]  ;;  %v10467_v20 = vld [vmem:[%s10570_s12 + $0x148] sm:$0xf] }
 0x175   : > { %v6418_v49 = vrot.slane %v10064_v23, %v10603_v27  ;;  %v2849_v28 = vrot.slane %v2839_v6, %v10603_v27  ;;  %v2856_v35 = vrot.slane %v2840_v14, %v10603_v27  ;;  %v2965_v23 = vcombine.low %v13394_v30, %v10467_v20  ;;  %8871 = vmatprep.subr.mxu1 %v15879_v17 }
 0x176   : > { %16233 = vst [vmem:[#allocation39_spill] sm:$0xff] %v13530_v52  ;;  %v6571_v12 = vcombine.high %v6553_v1, %v6567_v25  ;;  %v6570_v8 = vcombine.low %v6553_v1, %v6567_v25  ;;  %v3016_v6 = vcombine.low %v16225_v7, %v16234_v40  ;;  %8487 = vmatmul.mubr.f32.gmra.mxu1 %v6481_v24  ;;  %v16236_v25 = vld [vmem:[#allocation76_spill] sm:$0xff]  ;;  %v13608_v55 = vpop.f32.mrf.mxu1 }
 0x177   : > { %v6427_v14 = vcombine.high %v6404_v37, %v6418_v49  ;;  %v6426_v13 = vcombine.low %v6404_v37, %v6418_v49  ;;  %v6493_v22 = vrot.slane %v2849_v28, %v10603_v27  ;;  %v6507_v2 = vrot.slane %v2856_v35, %v10603_v27  ;;  %v4014_v28 = vld [vmem:[%s15389_s1 + $0x3c8] sm:$0xff]  ;;  %10207 = vmatprep.subr.mxu0 %v15879_v17 }
 0x178   : > { %8491 = vmatprep.mubr.f32.mxu1 %v6571_v12  ;;  %v2972_v58 = vrot.slane %v2965_v23, %v10603_v27  ;;  %v10069_v1 = vcombine.high %v16235_v46, %v3016_v6  ;;  %v2912_v20 = vcombine.low %v16237_v39, %v16236_v25  ;;  %v2913_v30 = vcombine.high %v16237_v39, %v16236_v25  ;;  %v13575_v23 = vpop.f32.mrf.mxu0  ;;  %v16240_v6 = vld [vmem:[#allocation82_spill] sm:$0xff]  ;;  %v16246_v25 = vld [vmem:[#allocation72_spill] sm:$0xff] }
 0x179   : > { %8751 = vmatprep.mubr.f32.mxu0 %v6427_v14  ;;  %v6516_v7 = vcombine.high %v6493_v22, %v6507_v2  ;;  %v13559_v24 = vadd.f32 %v13542_v5, %v13056_v62  ;;  %v13563_v37 = vadd.f32 %v13542_v5, %v13058_v0  ;;  %v6515_v49 = vcombine.low %v6493_v22, %v6507_v2  ;;  %v4025_v0 = vld [vmem:[%s15389_s1 + $0x420] sm:$0xff]  ;;  %v16241_v14 = vld [vmem:[#allocation92_spill] sm:$0xff]  ;;  %v13589_v2 = vld [vmem:[%s10570_s12 + $0x188] sm:$0xff] }
 0x17a   : > { %8752 = vmatmul.mubr.f32.gmra.mxu0 %v6426_v13  ;;  %v10067_v35 = vcombine.low %v2972_v58, %v16235_v46  ;;  %v6656_v39 = vrot.slane %v10069_v1, %v10603_v27  ;;  %v2922_v12 = vrot.slane %v2912_v20, %v10603_v27  ;;  %v2929_v62 = vrot.slane %v2913_v30, %v10603_v27 }
 0x17b   : > { %16238 = vst [vmem:[#allocation22_spill] sm:$0xff] %v13559_v24  ;;  %16239 = vst [vmem:[#allocation43_spill] sm:$0xff] %v13563_v37  ;;  %8756 = vmatprep.mubr.f32.mxu0 %v6516_v7  ;;  %8492 = vmatmul.mubr.f32.gmra.mxu1 %v6570_v8  ;;  %v3087_v13 = vcombine.low %v16226_v61, %v16240_v6  ;;  %v3089_v46 = vcombine.low %v16229_v60, %v16241_v14  ;;  %v16242_v58 = vrot.slane %v13523_v63, 2  ;;  %v13597_v37 = vld [vmem:[%s10570_s12 + $0x190] sm:$0xf] }
 0x17c   : > { %v16243_v22 = vrot.slane %v13453_v4, 2  ;;  %v6642_v7 = vrot.slane %v10067_v35, %v10603_v27  ;;  %v6582_v8 = vrot.slane %v2922_v12, %v10603_v27  ;;  %v6596_v20 = vrot.slane %v2929_v62, %v10603_v27  ;;  %8872 = vmatpush2.msra.mxu1 %v4014_v28  ;;  %10208 = vmatpush3.msra.mxu0 %v4025_v0  ;;  %v16247_v35 = vld [vmem:[#allocation69_spill] sm:$0xff]  ;;  %v16248_v12 = vld [vmem:[#allocation84_spill] sm:$0xff] }
 0x17d   : > { %v13600_v4 = vrot.slane %v13597_v37, 2  ;;  %v10077_v1 = vcombine.high %v16240_v6, %v3089_v46  ;;  %v2974_v60 = vcombine.low %v16247_v35, %v16246_v25  ;;  %8873 = vmatprep.subr.mxu1 %v15879_v17  ;;  %v13627_v46 = vadd.f32 %v13542_v5, %v13084_v57  ;;  %v16252_v57 = vld [vmem:[#allocation112_spill] sm:$0xff]  ;;  %10209 = vmatprep.subr.mxu0 %v15879_v17 }
 0x17e   : > { %v13586_v30 = vsel %vm474_vm1, %v16243_v22, %v16242_v58  ;;  %v8150_v58 = vpop.f32.mrf.mxu0  ;;  %v10075_v22 = vcombine.high %v16234_v40, %v3087_v13  ;;  %8757 = vmatmul.mubr.f32.gmra.mxu0 %v6515_v49  ;;  %v6660_v28 = vcombine.high %v6642_v7, %v6656_v39  ;;  %v6605_v61 = vcombine.high %v6582_v8, %v6596_v20  ;;  %v4013_v49 = vld [vmem:[%s15389_s1 + $0x3c0] sm:$0xff] }
 0x17f   : > { %16244 = vst [vmem:[#allocation40_spill] sm:$0xff] %v13586_v30  ;;  %16245 = vst [vmem:[#allocation57_spill] sm:$0xff] %v13600_v4  ;;  %v3018_v62 = vcombine.low %v16248_v12, %v13586_v30  ;;  %v6659_v24 = vcombine.low %v6642_v7, %v6656_v39  ;;  %v6604_v15 = vcombine.low %v6582_v8, %v6596_v20  ;;  %v8255_v8 = vpop.f32.mrf.mxu1  ;;  %8874 = vmatpush2.msra.mxu1 %v4013_v49  ;;  %v13643_v7 = vld [vmem:[%s10570_s12 + $0x1b8] sm:$0xff] }
 0x180   : > { %v13610_v58 = vpop.f32.mrf.mxu0  ;;  %v6731_v40 = vrot.slane %v10075_v22, %v10603_v27  ;;  %v6745_v0 = vrot.slane %v10077_v1, %v10603_v27  ;;  %v2982_v6 = vrot.slane %v2974_v60, %v10603_v27  ;;  %v3019_v13 = vcombine.high %v16248_v12, %v13586_v30  ;;  %8496 = vmatprep.mubr.f32.mxu1 %v6660_v28  ;;  %v13631_v1 = vld [vmem:[%s10570_s12 + $0x1b0] sm:$0xff]  ;;  %v10471_v28 = vld [vmem:[%s10570_s12 + $0x168] sm:$0xff]  ;;  %v4012_v49 = vld [vmem:[%s15389_s1 + $0x3b8] sm:$0xff] }
 0x181   : > { %8761 = vmatprep.mubr.f32.mxu0 %v6605_v61  ;;  %v13623_v39 = vadd.f32 %v13542_v5, %v13077_v50  ;;  %16250 = vst [vmem:[#allocation63_spill] sm:$0xff] %v13627_v46  ;;  %v3028_v60 = vrot.slane %v3018_v62, %v10603_v27  ;;  %8497 = vmatmul.mubr.f32.gmra.mxu1 %v6659_v24 }
 0x182   : > { %v8155_v20 = vpop.f32.mrf.mxu0  ;;  %v6749_v61 = vcombine.high %v6731_v40, %v6745_v0  ;;  %v13635_v22 = vrot.slane %v3019_v13, %v10603_v27  ;;  %v6748_v50 = vcombine.low %v6731_v40, %v6745_v0  ;;  %v3144_v35 = vcombine.low %v16246_v25, %v13527_v32  ;;  %8762 = vmatmul.mubr.f32.gmra.mxu0 %v6604_v15  ;;  %v16256_v0 = vld [vmem:[#allocation120_spill] sm:$0xff] }
 0x183   : > { %16249 = vst [vmem:[#allocation50_spill] sm:$0xff] %v13623_v39  ;;  %v3051_v12 = vcombine.high %v3028_v60, %v16252_v57  ;;  %v10070_v62 = vcombine.low %v2982_v6, %v3028_v60  ;;  %v3177_v46 = vcombine.low %v13586_v30, %v10471_v28  ;;  %v13648_v13 = vadd.f32 %v13542_v5, %v13117_v29  ;;  %v16257_v20 = vld [vmem:[#allocation95_spill] sm:$0xff] }
 0x184   : > { %16251 = vst [vmem:[#allocation81_spill] sm:$0xff] %v13635_v22  ;;  %8501 = vmatprep.mubr.f32.mxu1 %v6749_v61  ;;  %v3151_v40 = vrot.slane %v3144_v35, %v10603_v27  ;;  %v16254_v15 = vrot.slane %v13523_v63, 2  ;;  %v3053_v6 = vcombine.high %v13635_v22, %v16256_v0  ;;  %8875 = vmatprep.subr.mxu1 %v15879_v17  ;;  %v16259_v35 = vld [vmem:[#allocation85_spill] sm:$0xff] }
 0x185   : > { %16253 = vst [vmem:[#allocation70_spill] sm:$0xff] %v13648_v13  ;;  %v10072_v60 = vcombine.low %v3051_v12, %v13635_v22  ;;  %v6671_v29 = vrot.slane %v10070_v62, %v10603_v27  ;;  %v3185_v8 = vrot.slane %v3177_v46, %v10603_v27  ;;  %v13670_v61 = vadd.f32 %v13542_v5, %v13113_v34  ;;  %v4024_v46 = vld [vmem:[%s15389_s1 + $0x418] sm:$0xff]  ;;  %v13679_v62 = vpop.f32.mrf.mxu1 }
 0x186   : > { %v13655_v32 = vsel %vm474_vm1, %v16254_v15, %v13530_v52  ;;  %8502 = vmatmul.mubr.f32.gmra.mxu1 %v6748_v50  ;;  %v3152_v15 = vcombine.low %v16259_v35, %v3151_v40  ;;  %v3178_v24 = vcombine.high %v13586_v30, %v10471_v28  ;;  %v10473_v50 = vld [vmem:[%s10570_s12 + $0x170] sm:$0xff]  ;;  %v16263_v35 = vld [vmem:[#allocation121_spill] sm:$0xff]  ;;  %10210 = vmatpush3.msra.mxu0 %v4024_v46 }
 0x187   : > { %16255 = vst [vmem:[#allocation74_spill] sm:$0xff] %v13655_v32  ;;  %v3091_v63 = vcombine.low %v16257_v20, %v13655_v32  ;;  %16258 = vst [vmem:[#allocation82_spill] sm:$0xff] %v13670_v61  ;;  %v3092_v12 = vcombine.high %v16257_v20, %v13655_v32  ;;  %v6685_v57 = vrot.slane %v10072_v60, %v10603_v27  ;;  %8876 = vmatpush2.msra.mxu1 %v4012_v49  ;;  %v16262_v30 = vld [vmem:[#allocation88_spill] sm:$0xff]  ;;  %v8260_v60 = vpop.f32.mrf.mxu1 }
 0x188   : > { %v6834_v22 = vrot.slane %v3185_v8, %v10603_v27  ;;  %v3250_v40 = vcombine.low %v13655_v32, %v10473_v50  ;;  %v10083_v20 = vcombine.high %v16241_v14, %v3152_v15  ;;  %v3192_v61 = vrot.slane %v3178_v24, %v10603_v27  ;;  %v13699_v14 = vpop.f32.mrf.mxu0  ;;  %8877 = vmatprep.subr.mxu1 %v15879_v17 }
 0x189   : > { %v13684_v34 = vrot.slane %v3091_v63, %v10603_v27  ;;  %v13690_v28 = vrot.slane %v3092_v12, %v10603_v27  ;;  %v3153_v25 = vcombine.low %v16262_v30, %v13530_v52  ;;  %v6694_v8 = vcombine.high %v6671_v29, %v6685_v57  ;;  %16264 = vst [vmem:[#allocation84_spill] sm:$0xff] %v13699_v14  ;;  %v16265_v30 = vld [vmem:[#allocation126_spill] sm:$0xff] }
 0x18a   : > { %v6693_v63 = vcombine.low %v6671_v29, %v6685_v57  ;;  %v6820_v15 = vrot.slane %v10083_v20, %v10603_v27  ;;  %v3258_v24 = vrot.slane %v3250_v40, %v10603_v27  ;;  %v6909_v12 = vrot.slane %v3192_v61, %v10603_v27  ;;  %v4011_v57 = vld [vmem:[%s15389_s1 + $0x3b0] sm:$0xff]  ;;  %v13710_v29 = vpop.f32.mrf.mxu1  ;;  %v16268_v61 = vld [vmem:[#allocation117_spill] sm:$0xff]  ;;  %10211 = vmatprep.subr.mxu0 %v15879_v17 }
 0x18b   : > { %16260 = vst [vmem:[#allocation92_spill] sm:$0xff] %v13684_v34  ;;  %16261 = vst [vmem:[#allocation69_spill] sm:$0xff] %v13690_v28  ;;  %v3124_v49 = vcombine.high %v13684_v34, %v16263_v35  ;;  %v10078_v13 = vcombine.low %v3053_v6, %v13684_v34  ;;  %v3126_v39 = vcombine.high %v13690_v28, %v16265_v30  ;;  %8766 = vmatprep.mubr.f32.mxu0 %v6694_v8  ;;  %v16269_v20 = vld [vmem:[#allocation109_spill] sm:$0xff]  ;;  %v8160_v34 = vpop.f32.mrf.mxu0 }
 0x18c   : > { %16266 = vst [vmem:[#allocation95_spill] sm:$0xff] %v13710_v29  ;;  %v13715_v40 = vrot.slane %v3153_v25, %v10603_v27  ;;  %v3197_v60 = vcombine.low %v16269_v20, %v16268_v61  ;;  %8767 = vmatmul.mubr.f32.gmra.mxu0 %v6693_v63  ;;  %v6838_v14 = vcombine.high %v6820_v15, %v6834_v22 }
 0x18d   : > { %v10080_v6 = vcombine.low %v3124_v49, %v13690_v28  ;;  %v6760_v46 = vrot.slane %v10078_v13, %v10603_v27  ;;  %v13721_v21 = vadd.f32 %v13542_v5, %v13148_v54  ;;  %v6837_v29 = vcombine.low %v6820_v15, %v6834_v22  ;;  %v8265_v49 = vpop.f32.mrf.mxu1  ;;  %8878 = vmatpush2.msra.mxu1 %v4011_v57  ;;  %v10474_v22 = vld [vmem:[%s10570_s12 + $0x178] sm:$0xf] }
 0x18e   : > { %16267 = vst [vmem:[#allocation88_spill] sm:$0xff] %v13715_v40  ;;  %v6923_v8 = vrot.slane %v3258_v24, %v10603_v27  ;;  %v13727_v25 = vadd.f32 %v13542_v5, %v13162_v9  ;;  %v3207_v28 = vrot.slane %v3197_v60, %v10603_v27  ;;  %v10084_v34 = vcombine.low %v3126_v39, %v13715_v40 }
 0x18f   : > { %v6774_v13 = vrot.slane %v10080_v6, %v10603_v27  ;;  %8506 = vmatprep.mubr.f32.mxu1 %v6838_v14  ;;  %v3251_v54 = vcombine.high %v13655_v32, %v10473_v50  ;;  %v3323_v15 = vcombine.low %v13530_v52, %v10474_v22  ;;  %v3198_v14 = vcombine.high %v16269_v20, %v16268_v61  ;;  %v16272_v50 = vld [vmem:[#allocation116_spill] sm:$0xff] }
 0x190   : > { %16270 = vst [vmem:[#allocation109_spill] sm:$0xff] %v13727_v25  ;;  %v6927_v63 = vcombine.high %v6909_v12, %v6923_v8  ;;  %v6926_v42 = vcombine.low %v6909_v12, %v6923_v8  ;;  %8507 = vmatmul.mubr.f32.gmra.mxu1 %v6837_v29  ;;  %v6849_v49 = vrot.slane %v10084_v34, %v10603_v27  ;;  %v16271_v12 = vld [vmem:[#allocation123_spill] sm:$0xff]  ;;  %v13742_v8 = vpop.f32.mrf.mxu1  ;;  %v16274_v34 = vld [vmem:[#allocation122_spill] sm:$0xff] }
 0x191   : > { %v6783_v24 = vcombine.high %v6760_v46, %v6774_v13  ;;  %v6782_v6 = vcombine.low %v6760_v46, %v6774_v13  ;;  %v6863_v9 = vrot.slane %v3207_v28, %v10603_v27  ;;  %v3265_v60 = vrot.slane %v3251_v54, %v10603_v27  ;;  %8879 = vmatprep.subr.mxu1 %v15879_v17 }
 0x192   : > { %8511 = vmatprep.mubr.f32.mxu1 %v6927_v63  ;;  %v3330_v39 = vrot.slane %v3323_v15, %v10603_v27  ;;  %v3270_v57 = vcombine.low %v16272_v50, %v16271_v12  ;;  %v13746_v46 = vadd.f32 %v13542_v5, %v13199_v26  ;;  %v13750_v28 = vadd.f32 %v13542_v5, %v13192_v3  ;;  %v4010_v15 = vld [vmem:[%s15389_s1 + $0x3a8] sm:$0xff]  ;;  %v13759_v26 = vpop.f32.mrf.mxu0  ;;  %v16275_v3 = vld [vmem:[#allocation124_spill] sm:$0xff] }
 0x193   : > { %8771 = vmatprep.mubr.f32.mxu0 %v6783_v24  ;;  %v6872_v29 = vcombine.high %v6849_v49, %v6863_v9  ;;  %v6871_v13 = vcombine.low %v6849_v49, %v6863_v9  ;;  %v6998_v20 = vrot.slane %v3265_v60, %v10603_v27  ;;  %v3214_v54 = vrot.slane %v3198_v14, %v10603_v27  ;;  %v8270_v24 = vpop.f32.mrf.mxu1  ;;  %v16276_v49 = vld [vmem:[#allocation129_spill] sm:$0xff] }
 0x194   : > { %16273 = vst [vmem:[#allocation116_spill] sm:$0xff] %v13750_v28  ;;  %8772 = vmatmul.mubr.f32.gmra.mxu0 %v6782_v6  ;;  %v10087_v63 = vcombine.low %v3330_v39, %v16274_v34  ;;  %v3280_v22 = vrot.slane %v3270_v57, %v10603_v27  ;;  %8512 = vmatmul.mubr.f32.gmra.mxu1 %v6926_v42  ;;  %v16277_v60 = vrot.slane %v13589_v2, 2  ;;  %v16278_v39 = vrot.slane %v13536_v59, 2  ;;  %v8165_v25 = vpop.f32.mrf.mxu0  ;;  %v16282_v57 = vld [vmem:[#allocation135_spill] sm:$0xff] }
 0x195   : > { %8776 = vmatprep.mubr.f32.mxu0 %v6872_v29  ;;  %v3374_v6 = vcombine.low %v16256_v0, %v16275_v3  ;;  %v3445_v9 = vcombine.low %v16263_v35, %v16276_v49  ;;  %v6938_v29 = vrot.slane %v3214_v54, %v10603_v27  ;;  %v3271_v24 = vcombine.high %v16272_v50, %v16271_v12 }
 0x196   : > { %v13770_v14 = vsel %vm474_vm1, %v16278_v39, %v16277_v60  ;;  %v7012_v28 = vrot.slane %v10087_v63, %v10603_v27  ;;  %v6952_v42 = vrot.slane %v3280_v22, %v10603_v27  ;;  %v16280_v60 = vld [vmem:[#allocation103_spill] sm:$0xff]  ;;  %v16281_v39 = vld [vmem:[#allocation98_spill] sm:$0xff]  ;;  %8880 = vmatpush2.msra.mxu1 %v4010_v15 }
 0x197   : > { %16279 = vst [vmem:[#allocation122_spill] sm:$0xff] %v13770_v14  ;;  %v10091_v40 = vcombine.high %v16274_v34, %v3374_v6  ;;  %v10093_v59 = vcombine.high %v16275_v3, %v3445_v9  ;;  %v3332_v61 = vcombine.low %v16281_v39, %v16280_v60  ;;  %v3376_v63 = vcombine.low %v16282_v57, %v13770_v14  ;;  %v13803_v15 = vld [vmem:[%s10570_s12 + $0x1c8] sm:$0xff] }
 0x198   : > { %8777 = vmatmul.mubr.f32.gmra.mxu0 %v6871_v13  ;;  %v7016_v54 = vcombine.high %v6998_v20, %v7012_v28  ;;  %v6961_v22 = vcombine.high %v6938_v29, %v6952_v42  ;;  %v7015_v52 = vcombine.low %v6998_v20, %v7012_v28  ;;  %v6960_v50 = vcombine.low %v6938_v29, %v6952_v42  ;;  %v4023_v20 = vld [vmem:[%s15389_s1 + $0x410] sm:$0xff]  ;;  %v16284_v29 = vld [vmem:[#allocation133_spill] sm:$0xff] }
 0x199   : > { %v7087_v12 = vrot.slane %v10091_v40, %v10603_v27  ;;  %v7101_v25 = vrot.slane %v10093_v59, %v10603_v27  ;;  %v3287_v34 = vrot.slane %v3271_v24, %v10603_v27  ;;  %v3340_v3 = vrot.slane %v3332_v61, %v10603_v27  ;;  %10212 = vmatpush3.msra.mxu0 %v4023_v20  ;;  %v13839_v20 = vpop.f32.mrf.mxu1 }
 0x19a   : > { %8516 = vmatprep.mubr.f32.mxu1 %v7016_v54  ;;  %8781 = vmatprep.mubr.f32.mxu0 %v6961_v22  ;;  %v13792_v13 = vadd.f32 %v13542_v5, %v13227_v11  ;;  %v13796_v28 = vadd.f32 %v13542_v5, %v13236_v31  ;;  %v3386_v40 = vrot.slane %v3376_v63, %v10603_v27  ;;  %v13809_v31 = vpop.f32.mrf.mxu0  ;;  %v16285_v39 = vrot.slane %v13589_v2, 2  ;;  %v16287_v54 = vld [vmem:[#allocation157_spill] sm:$0xff]  ;;  %v16292_v2 = vld [vmem:[#allocation127_spill] sm:$0xff] }
 0x19b   : > { %8517 = vmatmul.mubr.f32.gmra.mxu1 %v7015_v52  ;;  %v7105_v6 = vcombine.high %v7087_v12, %v7101_v25  ;;  %v7027_v9 = vrot.slane %v3287_v34, %v10603_v27  ;;  %v7104_v11 = vcombine.low %v7087_v12, %v7101_v25  ;;  %v3447_v42 = vcombine.low %v16265_v30, %v16284_v29 }
 0x19c   : > { %16283 = vst [vmem:[#allocation124_spill] sm:$0xff] %v13796_v28  ;;  %8782 = vmatmul.mubr.f32.gmra.mxu0 %v6960_v50  ;;  %v10088_v24 = vcombine.low %v3340_v3, %v3386_v40  ;;  %v3502_v59 = vcombine.low %v16280_v60, %v13597_v37  ;;  %v13817_v63 = vsel %vm474_vm1, %v16285_v39, %v13600_v4  ;;  %v16288_v50 = vld [vmem:[#allocation145_spill] sm:$0xff]  ;;  %v4009_v37 = vld [vmem:[%s15389_s1 + $0x3a0] sm:$0xff]  ;;  %v8170_v34 = vpop.f32.mrf.mxu0 }
 0x19d   : > { %16286 = vst [vmem:[#allocation129_spill] sm:$0xff] %v13817_v63  ;;  %v3377_v52 = vcombine.high %v16282_v57, %v13770_v14  ;;  %8521 = vmatprep.mubr.f32.mxu1 %v7105_v6  ;;  %v10099_v12 = vcombine.high %v16276_v49, %v3447_v42  ;;  %v3409_v22 = vcombine.high %v3386_v40, %v16287_v54  ;;  %v16293_v54 = vld [vmem:[#allocation158_spill] sm:$0xff] }
 0x19e   : > { %v3449_v25 = vcombine.low %v16288_v50, %v13817_v63  ;;  %v7041_v3 = vrot.slane %v10088_v24, %v10603_v27  ;;  %v13832_v57 = vadd.f32 %v13542_v5, %v13258_v38  ;;  %v3509_v49 = vrot.slane %v3502_v59, %v10603_v27  ;;  %8881 = vmatprep.subr.mxu1 %v15879_v17  ;;  %v10475_v38 = vld [vmem:[%s10570_s12 + $0x198] sm:$0xff]  ;;  %v13851_v39 = vpop.f32.mrf.mxu0 }
 0x19f   : > { %v13836_v40 = vrot.slane %v3377_v52, %v10603_v27  ;;  %v13843_v6 = vadd.f32 %v13542_v5, %v13260_v36  ;;  %8522 = vmatmul.mubr.f32.gmra.mxu1 %v7104_v11  ;;  %v7176_v42 = vrot.slane %v10099_v12, %v10603_v27  ;;  %v3535_v59 = vcombine.low %v13770_v14, %v10475_v38  ;;  %v8275_v36 = vpop.f32.mrf.mxu1 }
 0x1a0   : > { %v13847_v24 = vrot.slane %v3449_v25, %v10603_v27  ;;  %v7050_v52 = vcombine.high %v7027_v9, %v7041_v3  ;;  %v7049_v34 = vcombine.low %v7027_v9, %v7041_v3  ;;  %v3510_v61 = vcombine.low %v16292_v2, %v3509_v49  ;;  %8882 = vmatpush2.msra.mxu1 %v4009_v37  ;;  %v4008_v9 = vld [vmem:[%s15389_s1 + $0x398] sm:$0xff]  ;;  %v8175_v3 = vpop.f32.mrf.mxu0 }
 0x1a1   : > { %16289 = vst [vmem:[#allocation98_spill] sm:$0xff] %v13836_v40  ;;  %16290 = vst [vmem:[#allocation135_spill] sm:$0xff] %v13843_v6  ;;  %v3411_v28 = vcombine.high %v13836_v40, %v16293_v54  ;;  %v10094_v11 = vcombine.low %v3409_v22, %v13836_v40  ;;  %v3536_v12 = vcombine.high %v13770_v14, %v10475_v38  ;;  %8883 = vmatprep.subr.mxu1 %v15879_v17  ;;  %v16294_v22 = vld [vmem:[#allocation163_spill] sm:$0xff] }
 0x1a2   : > { %16291 = vst [vmem:[#allocation133_spill] sm:$0xff] %v13847_v24  ;;  %v3543_v25 = vrot.slane %v3535_v59, %v10603_v27  ;;  %v3450_v6 = vcombine.high %v16288_v50, %v13817_v63  ;;  %8786 = vmatprep.mubr.f32.mxu0 %v7050_v52  ;;  %v10101_v37 = vcombine.high %v16284_v29, %v3510_v61  ;;  %v16295_v59 = vld [vmem:[#allocation130_spill] sm:$0xff] }
 0x1a3   : > { %v10096_v49 = vcombine.low %v3411_v28, %v13847_v24  ;;  %v3482_v38 = vcombine.high %v13847_v24, %v16294_v22  ;;  %v3511_v36 = vcombine.low %v16295_v59, %v13600_v4  ;;  %8787 = vmatmul.mubr.f32.gmra.mxu0 %v7049_v34  ;;  %v7116_v50 = vrot.slane %v10094_v11, %v10603_v27  ;;  %v4022_v28 = vld [vmem:[%s15389_s1 + $0x408] sm:$0xff]  ;;  %v13902_v24 = vld [vmem:[%s10570_s12 + $0x1c0] sm:$0xf] }
 0x1a4   : > { %v3550_v40 = vrot.slane %v3536_v12, %v10603_v27  ;;  %v7265_v14 = vrot.slane %v3543_v25, %v10603_v27  ;;  %v13875_v52 = vrot.slane %v3450_v6, %v10603_v27  ;;  %v7190_v61 = vrot.slane %v10101_v37, %v10603_v27  ;;  %8884 = vmatpush2.msra.mxu1 %v4008_v9  ;;  %v16299_v25 = vld [vmem:[#allocation164_spill] sm:$0xff] }
 0x1a5   : > { %v7130_v29 = vrot.slane %v10096_v49, %v10603_v27  ;;  %v13884_v34 = vadd.f32 %v13542_v5, %v13292_v51  ;;  %v13887_v11 = vrot.slane %v3511_v36, %v10603_v27  ;;  %v13891_v6 = vadd.f32 %v13542_v5, %v13294_v43  ;;  %10213 = vmatprep.subr.mxu0 %v15879_v17  ;;  %v13899_v49 = vld [vmem:[%s10570_s12 + $0x1d0] sm:$0xff]  ;;  %v13904_v43 = vpop.f32.mrf.mxu0 }
 0x1a6   : > { %16296 = vst [vmem:[#allocation145_spill] sm:$0xff] %v13875_v52  ;;  %v7279_v12 = vrot.slane %v3550_v40, %v10603_v27  ;;  %v3484_v3 = vcombine.high %v13875_v52, %v16299_v25  ;;  %v10102_v37 = vcombine.low %v3482_v38, %v13875_v52  ;;  %v7194_v51 = vcombine.high %v7176_v42, %v7190_v61  ;;  %v13913_v52 = vpop.f32.mrf.mxu1 }
 0x1a7   : > { %16297 = vst [vmem:[#allocation130_spill] sm:$0xff] %v13887_v11  ;;  %16298 = vst [vmem:[#allocation180_spill] sm:$0xff] %v13891_v6  ;;  %v7139_v59 = vcombine.high %v7116_v50, %v7130_v29  ;;  %v7193_v36 = vcombine.low %v7176_v42, %v7190_v61  ;;  %v7138_v9 = vcombine.low %v7116_v50, %v7130_v29  ;;  %10214 = vmatpush3.msra.mxu0 %v4022_v28  ;;  %v10476_v42 = vld [vmem:[%s10570_s12 + $0x1a0] sm:$0xff]  ;;  %v16301_v61 = vld [vmem:[#allocation156_spill] sm:$0xff] }
 0x1a8   : > { %v7283_v40 = vcombine.high %v7265_v14, %v7279_v12  ;;  %v10104_v6 = vcombine.low %v3484_v3, %v13887_v11  ;;  %v7205_v60 = vrot.slane %v10102_v37, %v10603_v27  ;;  %v13910_v38 = vadd.f32 %v13542_v5, %v13333_v48  ;;  %8885 = vmatprep.subr.mxu1 %v15879_v17  ;;  %v16302_v29 = vld [vmem:[#allocation155_spill] sm:$0xff]  ;;  %v4007_v37 = vld [vmem:[%s15389_s1 + $0x390] sm:$0xff]  ;;  %v8180_v11 = vpop.f32.mrf.mxu0 }
 0x1a9   : > { %16300 = vst [vmem:[#allocation181_spill] sm:$0xff] %v13913_v52  ;;  %8526 = vmatprep.mubr.f32.mxu1 %v7194_v51  ;;  %8791 = vmatprep.mubr.f32.mxu0 %v7139_v59  ;;  %v3608_v50 = vcombine.low %v13817_v63, %v10476_v42  ;;  %v3609_v28 = vcombine.high %v13817_v63, %v10476_v42  ;;  %v13928_v42 = vrot.slane %v13902_v24, 1  ;;  %v8280_v63 = vpop.f32.mrf.mxu1 }
 0x1aa   : > { %v3555_v3 = vcombine.low %v16302_v29, %v16301_v61  ;;  %8527 = vmatmul.mubr.f32.gmra.mxu1 %v7193_v36  ;;  %8792 = vmatmul.mubr.f32.gmra.mxu0 %v7138_v9  ;;  %v7219_v51 = vrot.slane %v10104_v6, %v10603_v27  ;;  %v7282_v59 = vcombine.low %v7265_v14, %v7279_v12  ;;  %v13966_v35 = vpop.f32.mrf.mxu0 }
 0x1ab   : > { %v3556_v52 = vcombine.high %v16302_v29, %v16301_v61  ;;  %16303 = vst [vmem:[#allocation155_spill] sm:$0xff] %v13928_v42  ;;  %8531 = vmatprep.mubr.f32.mxu1 %v7283_v40  ;;  %v13932_v2 = vadd.f32 %v13542_v5, %v13335_v44  ;;  %v3616_v11 = vrot.slane %v3608_v50, %v10603_v27  ;;  %v10477_v29 = vld [vmem:[%s10570_s12 + $0x1a8] sm:$0xf]  ;;  %v13940_v63 = vpop.f32.mrf.mxu1 }
 0x1ac   : > { %v3623_v36 = vrot.slane %v3609_v28, %v10603_v27  ;;  %v3565_v9 = vrot.slane %v3555_v3, %v10603_v27  ;;  %v7228_v6 = vcombine.high %v7205_v60, %v7219_v51  ;;  %v7227_v14 = vcombine.low %v7205_v60, %v7219_v51  ;;  %8886 = vmatpush2.msra.mxu1 %v4007_v37  ;;  %v4006_v60 = vld [vmem:[%s15389_s1 + $0x388] sm:$0xff]  ;;  %v16307_v37 = vld [vmem:[#allocation161_spill] sm:$0xff]  ;;  %v16308_v51 = vld [vmem:[#allocation160_spill] sm:$0xff] }
 0x1ad   : > { %16304 = vst [vmem:[#allocation182_spill] sm:$0xff] %v13932_v2  ;;  %v3572_v12 = vrot.slane %v3556_v52, %v10603_v27  ;;  %v3681_v48 = vcombine.low %v13600_v4, %v10477_v29  ;;  %16305 = vst [vmem:[#allocation183_spill] sm:$0xff] %v13940_v63  ;;  %v7354_v40 = vrot.slane %v3616_v11, %v10603_v27  ;;  %v16306_v2 = vld [vmem:[#allocation167_spill] sm:$0xff]  ;;  %8887 = vmatprep.subr.mxu1 %v15879_v17 }
 0x1ae   : > { %v7368_v44 = vrot.slane %v3623_v36, %v10603_v27  ;;  %v7294_v50 = vrot.slane %v3565_v9, %v10603_v27  ;;  %v3732_v28 = vcombine.low %v16293_v54, %v16306_v2  ;;  %8796 = vmatprep.mubr.f32.mxu0 %v7228_v6  ;;  %8532 = vmatmul.mubr.f32.gmra.mxu1 %v7282_v59  ;;  %v13956_v36 = vrot.slane %v13902_v24, 2  ;;  %v8285_v9 = vpop.f32.mrf.mxu1  ;;  %v16310_v61 = vld [vmem:[#allocation159_spill] sm:$0xff]  ;;  %v13962_v59 = vld [vmem:[%s10570_s12 + $0x1d8] sm:$0xf] }
 0x1af   : > { %v7308_v52 = vrot.slane %v3572_v12, %v10603_v27  ;;  %v3688_v3 = vrot.slane %v3681_v48, %v10603_v27  ;;  %v3628_v11 = vcombine.low %v16308_v51, %v16307_v37  ;;  %8797 = vmatmul.mubr.f32.gmra.mxu0 %v7227_v14  ;;  %v3629_v6 = vcombine.high %v16308_v51, %v16307_v37 }
 0x1b0   : > { %16309 = vst [vmem:[#allocation167_spill] sm:$0xff] %v13956_v36  ;;  %v7372_v29 = vcombine.high %v7354_v40, %v7368_v44  ;;  %v7371_v63 = vcombine.low %v7354_v40, %v7368_v44  ;;  %v10109_v4 = vcombine.high %v16310_v61, %v3732_v28  ;;  %16311 = vst [vmem:[#allocation160_spill] sm:$0xff] %v13962_v59  ;;  %8888 = vmatpush2.msra.mxu1 %v4006_v60  ;;  %v13968_v9 = vpop.f32.mrf.mxu1  ;;  %v16313_v60 = vld [vmem:[#allocation168_spill] sm:$0xff] }
 0x1b1   : > { %v7317_v12 = vcombine.high %v7294_v50, %v7308_v52  ;;  %v7316_v54 = vcombine.low %v7294_v50, %v7308_v52  ;;  %v10107_v48 = vcombine.low %v3688_v3, %v16310_v61  ;;  %v3638_v30 = vrot.slane %v3628_v11, %v10603_v27  ;;  %v8185_v3 = vpop.f32.mrf.mxu0  ;;  %v16314_v11 = vld [vmem:[#allocation171_spill] sm:$0xff]  ;;  %10215 = vmatprep.subr.mxu0 %v15879_v17 }
 0x1b2   : > { %8536 = vmatprep.mubr.f32.mxu1 %v7372_v29  ;;  %v13972_v14 = vadd.f32 %v13542_v5, %v13361_v16  ;;  %v13976_v40 = vadd.f32 %v13542_v5, %v13381_v33  ;;  %v7457_v44 = vrot.slane %v10109_v4, %v10603_v27  ;;  %v3645_v61 = vrot.slane %v3629_v6, %v10603_v27  ;;  %v4021_v33 = vld [vmem:[%s15389_s1 + $0x400] sm:$0xff]  ;;  %v8355_v51 = vpop.f32.mrf.mxu1 }
 0x1b3   : > { %8801 = vmatprep.mubr.f32.mxu0 %v7317_v12  ;;  %8537 = vmatmul.mubr.f32.gmra.mxu1 %v7371_v63  ;;  %v7443_v50 = vrot.slane %v10107_v48, %v10603_v27  ;;  %v7383_v28 = vrot.slane %v3638_v30, %v10603_v27  ;;  %v3803_v52 = vcombine.low %v16294_v22, %v16313_v60  ;;  %v16315_v29 = vrot.slane %v13643_v7, 1 }
 0x1b4   : > { %16312 = vst [vmem:[#allocation159_spill] sm:$0xff] %v13976_v40  ;;  %8802 = vmatmul.mubr.f32.gmra.mxu0 %v7316_v54  ;;  %v7397_v4 = vrot.slane %v3645_v61, %v10603_v27  ;;  %v3805_v63 = vcombine.low %v16299_v25, %v16314_v11  ;;  %v16316_v30 = vrot.slane %v13631_v1, 1  ;;  %v16318_v12 = vrot.slane %v13643_v7, 2  ;;  %8889 = vmatprep.subr.mxu1 %v15879_v17 }
 0x1b5   : > { %v16319_v48 = vrot.slane %v13631_v1, 2  ;;  %v7461_v54 = vcombine.high %v7443_v50, %v7457_v44  ;;  %v7460_v51 = vcombine.low %v7443_v50, %v7457_v44  ;;  %v10115_v61 = vcombine.high %v16306_v2, %v3803_v52  ;;  %v16324_v44 = vld [vmem:[#allocation148_spill] sm:$0xff]  ;;  %10216 = vmatpush3.msra.mxu0 %v4021_v33 }
 0x1b6   : > { %v13996_v6 = vsel %vm383_vm0, %v16316_v30, %v16315_v29  ;;  %v16321_v16 = vrot.slane %v13899_v49, 1  ;;  %v16322_v40 = vrot.slane %v13803_v15, 1  ;;  %v14012_v29 = vpop.f32.mrf.mxu1  ;;  %v14014_v30 = vpop.f32.mrf.mxu0  ;;  %v7406_v1 = vcombine.high %v7383_v28, %v7397_v4 }
 0x1b7   : > { %16317 = vst [vmem:[#allocation168_spill] sm:$0xff] %v13996_v6  ;;  %v14003_v3 = vsel %vm474_vm1, %v16319_v48, %v16318_v12  ;;  %v7405_v25 = vcombine.low %v7383_v28, %v7397_v4  ;;  %v10117_v12 = vcombine.high %v16313_v60, %v3805_v63  ;;  %v16323_v48 = vld [vmem:[#allocation151_spill] sm:$0xff]  ;;  %8541 = vmatprep.mubr.f32.mxu1 %v7461_v54  ;;  %v4005_v4 = vld [vmem:[%s15389_s1 + $0x380] sm:$0xff] }
 0x1b8   : > { %16320 = vst [vmem:[#allocation171_spill] sm:$0xff] %v14003_v3  ;;  %v583_v37 = vsel %vm383_vm0, %v16322_v40, %v16321_v16  ;;  %v3690_v50 = vcombine.low %v16324_v44, %v16323_v48  ;;  %v7532_v2 = vrot.slane %v10115_v61, %v10603_v27  ;;  %v3734_v40 = vcombine.low %v13996_v6, %v14003_v3  ;;  %v8360_v22 = vpop.f32.mrf.mxu1  ;;  %v8625_v32 = vpop.f32.mrf.mxu0 }
 0x1b9   : > { %v3735_v52 = vcombine.high %v13996_v6, %v14003_v3  ;;  %v3736_v16 = vcombine.low %v13803_v15, %v583_v37  ;;  %8806 = vmatprep.mubr.f32.mxu0 %v7406_v1  ;;  %v14027_v28 = vadd.f32 %v13542_v5, %v13396_v18  ;;  %8542 = vmatmul.mubr.f32.gmra.mxu1 %v7460_v51  ;;  %v16380_v6 = vld [vmem:[#allocation22_spill] sm:$0xff] }
 0x1ba   : > { %v7546_v60 = vrot.slane %v10117_v12, %v10603_v27  ;;  %v3698_v33 = vrot.slane %v3690_v50, %v10603_v27  ;;  %v14036_v63 = vadd.f32 %v13542_v5, %v13428_v47  ;;  %8807 = vmatmul.mubr.f32.gmra.mxu0 %v7405_v25  ;;  %v3744_v32 = vrot.slane %v3734_v40, %v10603_v27  ;;  %v14045_v54 = vpop.f32.mrf.mxu1  ;;  %v14047_v51 = vpop.f32.mrf.mxu0 }
 0x1bb   : > { %v14040_v22 = vrot.slane %v3735_v52, %v10603_v27  ;;  %v14043_v18 = vrot.slane %v3736_v16, %v10603_v27  ;;  %v3860_v12 = vcombine.low %v16323_v48, %v13902_v24  ;;  %v16328_v47 = vrot.slane %v13643_v7, 1  ;;  %8890 = vmatpush2.msra.mxu1 %v4005_v4 }
 0x1bc   : > { %16325 = vst [vmem:[#allocation148_spill] sm:$0xff] %v14036_v63  ;;  %v7550_v61 = vcombine.high %v7532_v2, %v7546_v60  ;;  %v7549_v1 = vcombine.low %v7532_v2, %v7546_v60  ;;  %v10110_v50 = vcombine.low %v3698_v33, %v3744_v32  ;;  %v16330_v40 = vrot.slane %v13643_v7, 2  ;;  %v8365_v60 = vpop.f32.mrf.mxu1 }
 0x1bd   : > { %16326 = vst [vmem:[#allocation184_spill] sm:$0xff] %v14040_v22  ;;  %16327 = vst [vmem:[#allocation185_spill] sm:$0xff] %v14043_v18  ;;  %v14055_v25 = vsel %vm383_vm0, %v16328_v47, %v13928_v42  ;;  %v3767_v44 = vcombine.high %v3744_v32, %v14043_v18  ;;  %v16332_v2 = vrot.slane %v13962_v59, 1  ;;  %v16333_v24 = vrot.slane %v13899_v49, 1  ;;  %v8630_v47 = vpop.f32.mrf.mxu0 }
 0x1be   : > { %16329 = vst [vmem:[#allocation186_spill] sm:$0xff] %v14055_v25  ;;  %v14063_v52 = vsel %vm474_vm1, %v16330_v40, %v13956_v36  ;;  %8546 = vmatprep.mubr.f32.mxu1 %v7550_v61  ;;  %v3867_v63 = vrot.slane %v3860_v12, %v10603_v27  ;;  %v3737_v33 = vcombine.high %v13803_v15, %v583_v37  ;;  %v9367_v40 = vld [vmem:[%s15391_s3] sm:$0xff]  ;;  %v14086_v37 = vpop.f32.mrf.mxu1 }
 0x1bf   : > { %16331 = vst [vmem:[#allocation187_spill] sm:$0xff] %v14063_v52  ;;  %v585_v16 = vsel %vm383_vm0, %v16333_v24, %v16332_v2  ;;  %v3807_v7 = vcombine.low %v14055_v25, %v14063_v52  ;;  %v3808_v32 = vcombine.high %v14055_v25, %v14063_v52  ;;  %v10112_v2 = vcombine.low %v3767_v44, %v14040_v22  ;;  %v16350_v52 = vld [vmem:[#allocation44_spill] sm:$0xff] }
 0x1c0   : > { %v7472_v4 = vrot.slane %v10110_v50, %v10603_v27  ;;  %v14083_v61 = vadd.f32 %v13542_v5, %v13469_v41  ;;  %8547 = vmatmul.mubr.f32.gmra.mxu1 %v7549_v1  ;;  %v3809_v15 = vcombine.low %v13899_v49, %v585_v16  ;;  %v14090_v12 = vadd.f32 %v13542_v5, %v13456_v45  ;;  %v9369_v41 = vld [vmem:[%s15391_s3 + $0x10] sm:$0xff] }
 0x1c1   : > { %v3868_v24 = vcombine.low %v12546_v10, %v3867_v63  ;;  %v14094_v60 = vrot.slane %v3737_v33, %v10603_v27  ;;  %v14097_v44 = vrot.slane %v3807_v7, %v10603_v27  ;;  %v10496_v50 = vmov 0   ;;  %v8370_v33 = vpop.f32.mrf.mxu1  ;;  %v16381_v10 = vld [vmem:[#allocation96_spill] sm:$0xff] }
 0x1c2   : > { %16334 = vst [vmem:[#allocation188_spill] sm:$0xff] %v14090_v12  ;;  %10418 = vset.pattern.permute.xlu0 %v10496_v50  ;;  %v7486_v1 = vrot.slane %v10112_v2, %v10603_v27  ;;  %v14104_v47 = vrot.slane %v3808_v32, %v10603_v27  ;;  %v14107_v45 = vrot.slane %v3809_v15, %v10603_v27 }
 0x1c3   : > { %16335 = vst [vmem:[#allocation189_spill] sm:$0xff] %v14094_v60  ;;  %16336 = vst [vmem:[#allocation190_spill] sm:$0xff] %v14097_v44  ;;  %v3810_v63 = vcombine.high %v13899_v49, %v585_v16  ;;  %9410 = vperm.xlu0 %10418, %v9367_v40   ;;  %v10123_v7 = vcombine.high %v16314_v11, %v3868_v24  ;;  %v3769_v59 = vcombine.high %v14040_v22, %v14094_v60 }
 0x1c4   : > { %16337 = vst [vmem:[#allocation191_spill] sm:$0xff] %v14104_v47  ;;  %16338 = vst [vmem:[#allocation192_spill] sm:$0xff] %v14107_v45  ;;  %v14115_v12 = vadd.f32 %v13542_v5, %v13516_v53  ;;  %v3869_v32 = vcombine.low %v13928_v42, %v13956_v36  ;;  %10419 = vset.pattern.permute.xlu1 %v10496_v50  ;;  %v7495_v2 = vcombine.high %v7472_v4, %v7486_v1 }
 0x1c5   : > { %v7494_v15 = vcombine.low %v7472_v4, %v7486_v1  ;;  %v3840_v49 = vcombine.high %v14097_v44, %v14107_v45  ;;  %v14122_v16 = vrot.slane %v3810_v63, %v10603_v27  ;;  %9420 = vperm.xlu1 %10419, %v9369_v41   ;;  %v7619_v11 = vrot.slane %v10123_v7, %v10603_v27  ;;  %v9368_v4 = vld [vmem:[%s15391_s3 + $0x8] sm:$0xff] }
 0x1c6   : > { %v10118_v40 = vcombine.low %v3769_v59, %v14097_v44  ;;  %v14128_v53 = vadd.f32 %v13542_v5, %v13518_v56  ;;  %v14131_v24 = vrot.slane %v3869_v32, %v10603_v27  ;;  %8811 = vmatprep.mubr.f32.mxu0 %v7495_v2  ;;  %v16342_v1 = vld [vmem:[#allocation35_spill] sm:$0xff]  ;;  %v14143_v56 = vadd.f32 %v13542_v5, %v13575_v23  ;;  %v16346_v23 = vld [vmem:[#allocation36_spill] sm:$0xff] }
 0x1c7   : > { %16339 = vst [vmem:[#allocation193_spill] sm:$0xff] %v14122_v16  ;;  %v10120_v50 = vcombine.low %v3840_v49, %v14104_v47  ;;  %v3842_v41 = vcombine.high %v14104_v47, %v14122_v16  ;;  %v16343_v63 = vld [vmem:[#allocation27_spill] sm:$0xff]  ;;  %8812 = vmatmul.mubr.f32.gmra.mxu0 %v7494_v15  ;;  %v7621_v33 = vcombine.high %v7619_v11, %v7619_v11  ;;  %v14152_v49 = vpop.f32.mrf.mxu0  ;;  %v16345_v47 = vld [vmem:[#allocation45_spill] sm:$0xff] }
 0x1c8   : > { %16340 = vst [vmem:[#allocation194_spill] sm:$0xff] %v14128_v53  ;;  %16341 = vst [vmem:[#allocation195_spill] sm:$0xff] %v14131_v24  ;;  %v4115_v59 = vcombine.high %v16343_v63, %v16342_v1  ;;  %v7561_v7 = vrot.slane %v10118_v40, %v10603_v27  ;;  %v14148_v32 = vadd.f32 %v13542_v5, %v13608_v55  ;;  %v14162_v40 = vpop.f32.mrf.mxu1  ;;  %9415 = vperm.xlu0 %10418, %v9368_v4  }
 0x1c9   : > { %v4114_v2 = vcombine.low %v16343_v63, %v16342_v1  ;;  %v7575_v53 = vrot.slane %v10120_v50, %v10603_v27  ;;  %v10124_v36 = vcombine.low %v3842_v41, %v14131_v24  ;;  %v4204_v16 = vcombine.high %v16346_v23, %v16345_v47  ;;  %8551 = vmatprep.mubr.f32.mxu1 %v7621_v33  ;;  %v16348_v1 = vld [vmem:[#allocation53_spill] sm:$0xff]  ;;  %v16349_v63 = vld [vmem:[#allocation176_spill] sm:$0xff] }
 0x1ca   : > { %16344 = vst [vmem:[#allocation35_spill] sm:$0xff] %v14148_v32  ;;  %v14160_v15 = vadd.f32 %v13542_v5, %v13610_v58  ;;  %v14166_v55 = vadd.f32 %v13542_v5, %v13679_v62  ;;  %v663_v50 = vcombine.high %v12684_v19, %v12684_v19  ;;  %v670_v41 = vrot.slane %v12684_v19, %v10603_v27  ;;  %v8635_v32 = vpop.f32.mrf.mxu0  ;;  %v8375_v62 = vpop.f32.mrf.mxu1  ;;  %v16351_v19 = vld [vmem:[#allocation177_spill] sm:$0xff] }
 0x1cb   : > { %v880_v24 = vcombine.low %v16349_v63, %v16348_v1  ;;  %v7584_v58 = vcombine.high %v7561_v7, %v7575_v53  ;;  %8552 = vmatmul.mubr.f32.gmra.mxu1 %v7619_v11  ;;  %v7583_v44 = vcombine.low %v7561_v7, %v7575_v53  ;;  %v7630_v4 = vrot.slane %v10124_v36, %v10603_v27  ;;  %v16352_v53 = vld [vmem:[#allocation54_spill] sm:$0xff]  ;;  %v16354_v32 = vld [vmem:[#allocation59_spill] sm:$0xff] }
 0x1cc   : > { %16347 = vst [vmem:[#allocation27_spill] sm:$0xff] %v14166_v55  ;;  %v4203_v33 = vcombine.low %v16346_v23, %v16345_v47  ;;  %8891 = vmatprep.mubr.f32.mxu1 %v4115_v59  ;;  %v677_v55 = vrot.slane %v663_v50, %v10603_v27  ;;  %v678_v45 = vcombine.high %v670_v41, %v670_v41  ;;  %v14181_v63 = vpop.f32.mrf.mxu0  ;;  %v16353_v7 = vld [vmem:[#allocation26_spill] sm:$0xff]  ;;  %v14189_v50 = vpop.f32.mrf.mxu1 }
 0x1cd   : > { %v9953_v18 = vcombine.high %v16350_v52, %v880_v24  ;;  %v752_v22 = vcombine.high %v16351_v19, %v16351_v19  ;;  %8816 = vmatprep.mubr.f32.mxu0 %v7584_v58  ;;  %v7638_v11 = vcombine.high %v7630_v4, %v7630_v4  ;;  %v759_v36 = vrot.slane %v16351_v19, %v10603_v27  ;;  %v16355_v59 = vld [vmem:[#allocation178_spill] sm:$0xff] }
 0x1ce   : > { %v967_v47 = vcombine.low %v16353_v7, %v16352_v53  ;;  %v969_v23 = vcombine.low %v16355_v59, %v16354_v32  ;;  %8817 = vmatmul.mubr.f32.gmra.mxu0 %v7583_v44  ;;  %v679_v52 = vcombine.high %v677_v55, %v677_v55  ;;  %v4116_v24 = vcombine.low %v670_v41, %v678_v45  ;;  %v8640_v58 = vpop.f32.mrf.mxu0  ;;  %v9371_v19 = vld [vmem:[%s15391_s3 + $0x20] sm:$0xff]  ;;  %v8380_v3 = vpop.f32.mrf.mxu1 }
 0x1cf   : > { %v4289_v62 = vrot.slane %v9953_v18, %v10603_v27  ;;  %v766_v60 = vrot.slane %v752_v22, %v10603_v27  ;;  %8821 = vmatprep.mubr.f32.mxu0 %v7638_v11  ;;  %8892 = vmatmul.mubr.f32.vlgmr.msra.gmra.mxu1 %v4114_v2  ;;  %v767_v7 = vcombine.high %v759_v36, %v759_v36  ;;  %v16356_v18 = vld [vmem:[#allocation47_spill] sm:$0xff]  ;;  %v16357_v22 = vld [vmem:[#allocation84_spill] sm:$0xff] }
 0x1d0   : > { %v9959_v42 = vcombine.high %v16348_v1, %v967_v47  ;;  %v9961_v59 = vcombine.high %v16352_v53, %v969_v23  ;;  %8896 = vmatprep.mubr.f32.mxu1 %v4204_v16  ;;  %v4117_v44 = vcombine.low %v677_v55, %v679_v52  ;;  %v4124_v45 = vrot.slane %v4116_v24, %v10603_v27  ;;  %v14204_v25 = vpop.f32.mrf.mxu0  ;;  %v16358_v16 = vld [vmem:[#allocation95_spill] sm:$0xff] }
 0x1d1   : > { %v4293_v41 = vcombine.high %v16356_v18, %v4289_v62  ;;  %v14202_v58 = vadd.f32 %v13542_v5, %v16357_v22  ;;  %v768_v11 = vcombine.high %v766_v60, %v766_v60  ;;  %v4205_v2 = vcombine.low %v759_v36, %v767_v7  ;;  %9430 = vperm.xlu0 %10418, %v9371_v19   ;;  %v16360_v47 = vld [vmem:[#allocation175_spill] sm:$0xff] }
 0x1d2   : > { %v4364_v48 = vrot.slane %v9959_v42, %v10603_v27  ;;  %v4378_v1 = vrot.slane %v9961_v59, %v10603_v27  ;;  %8822 = vmatmul.mubr.f32.gmra.mxu0 %v7630_v4  ;;  %v4131_v3 = vrot.slane %v4117_v44, %v10603_v27  ;;  %v14211_v55 = vadd.f32 %v13542_v5, %v16358_v16  ;;  %v8645_v52 = vpop.f32.mrf.mxu0  ;;  %v9370_v42 = vld [vmem:[%s15391_s3 + $0x18] sm:$0xff]  ;;  %v14225_v5 = vld [vmem:[%s15390_s2] ss:$0 sm:$0xff]  ;;  %v16361_v59 = vld [vmem:[#allocation48_spill] sm:$0xff] }
 0x1d3   : > { %v4292_v53 = vcombine.low %v16356_v18, %v4289_v62  ;;  %v809_v23 = vrot.slane %v16360_v47, %v10603_v27  ;;  %10217 = vmatprep.mubr.msk.f32.mxu0 %vm10497_vm2, %v15879_v17  ;;  %8897 = vmatmul.mubr.f32.gmra.mxu1 %v4203_v33  ;;  %v4206_v4 = vcombine.low %v766_v60, %v768_v11  ;;  %v14231_v62 = vpop.f32.mrf.mxu1  ;;  %v16363_v11 = vld [vmem:[#allocation60_spill] sm:$0xff]  ;;  %v16365_v52 = vld [vmem:[#allocation58_spill] sm:$0xff] }
 0x1d4   : > { %16359 = vst [vmem:[#allocation45_spill] sm:$0xff] %v14211_v55  ;;  %v4213_v36 = vrot.slane %v4205_v2, %v10603_v27  ;;  %v14229_v24 = vadd.f32 %v14225_v5, %v13759_v26  ;;  %v4132_v19 = vcombine.low %v4124_v45, %v4131_v3  ;;  %8901 = vmatprep.mubr.f32.mxu1 %v4293_v41  ;;  %v14237_v44 = vpop.f32.mrf.mxu0  ;;  %v16364_v2 = vld [vmem:[#allocation179_spill] sm:$0xff] }
 0x1d5   : > { %v4382_v7 = vcombine.high %v4364_v48, %v4378_v1  ;;  %v882_v33 = vcombine.high %v16361_v59, %v16361_v59  ;;  %v889_v60 = vrot.slane %v16361_v59, %v10603_v27  ;;  %v4220_v18 = vrot.slane %v4206_v4, %v10603_v27  ;;  %v8385_v41 = vpop.f32.mrf.mxu1  ;;  %9425 = vperm.xlu1 %10419, %v9370_v42  }
 0x1d6   : > { %v14242_v22 = vadd.f32 %v14225_v5, %v13742_v8  ;;  %v4381_v26 = vcombine.low %v4364_v48, %v4378_v1  ;;  %v1021_v45 = vcombine.low %v16364_v2, %v16363_v11  ;;  %10218 = vmatmul.mubr.f32.vlgmr.msra.gmra.mxu0 %v4132_v19  ;;  %v971_v59 = vcombine.high %v16365_v52, %v16365_v52  ;;  %v8650_v55 = vpop.f32.mrf.mxu0  ;;  %v9373_v8 = vld [vmem:[%s15391_s3 + $0x30] sm:$0xff]  ;;  %v16368_v41 = vld [vmem:[#allocation78_spill] sm:$0xff] }
 0x1d7   : > { %v896_v3 = vrot.slane %v882_v33, %v10603_v27  ;;  %v897_v16 = vcombine.high %v889_v60, %v889_v60  ;;  %v4294_v47 = vcombine.low %v809_v23, %v889_v60  ;;  %10220 = vmatprep.mubr.msk.f32.mxu0 %vm10497_vm2, %v15879_v17  ;;  %8902 = vmatmul.mubr.f32.gmra.mxu1 %v4292_v53  ;;  %v14257_v4 = vpop.f32.mrf.mxu1 }
 0x1d8   : > { %16362 = vst [vmem:[#allocation36_spill] sm:$0xff] %v14242_v22  ;;  %v4221_v48 = vcombine.low %v4213_v36, %v4220_v18  ;;  %v9965_v1 = vcombine.high %v16354_v32, %v1021_v45  ;;  %v978_v42 = vrot.slane %v16365_v52, %v10603_v27  ;;  %8906 = vmatprep.mubr.f32.mxu1 %v4382_v7  ;;  %v9372_v7 = vld [vmem:[%s15391_s3 + $0x28] sm:$0xff]  ;;  %v16367_v45 = vld [vmem:[#allocation86_spill] sm:$0xff] }
 0x1d9   : > { %v4295_v23 = vcombine.low %v897_v16, %v896_v3  ;;  %v4302_v55 = vrot.slane %v4294_v47, %v10603_v27  ;;  %v898_v19 = vcombine.high %v896_v3, %v896_v3  ;;  %v985_v33 = vrot.slane %v971_v59, %v10603_v27  ;;  %v8390_v18 = vpop.f32.mrf.mxu1  ;;  %9440 = vperm.xlu0 %10418, %v9373_v8  }
 0x1da   : > { %v4453_v60 = vrot.slane %v9965_v1, %v10603_v27  ;;  %v14264_v53 = vadd.f32 %v14225_v5, %v13809_v31  ;;  %v14268_v32 = vadd.f32 %v14225_v5, %v13839_v20  ;;  %v986_v36 = vcombine.high %v978_v42, %v978_v42  ;;  %10221 = vmatmul.mubr.f32.gmra.mxu0 %v4221_v48  ;;  %v16369_v20 = vld [vmem:[#allocation75_spill] sm:$0xff]  ;;  %v16370_v1 = vld [vmem:[#allocation52_spill] sm:$0xff] }
 0x1db   : > { %v4309_v11 = vrot.slane %v4295_v23, %v10603_v27  ;;  %v4383_v2 = vcombine.low %v898_v19, %v978_v42  ;;  %v4560_v3 = vcombine.high %v16368_v41, %v16367_v45  ;;  %v14278_v31 = vadd.f32 %v14225_v5, %v13851_v39  ;;  %10223 = vmatprep.mubr.msk.f32.mxu0 %vm10497_vm2, %v15879_v17  ;;  %v14287_v23 = vpop.f32.mrf.mxu0  ;;  %v16371_v19 = vld [vmem:[#allocation46_spill] sm:$0xff] }
 0x1dc   : > { %16366 = vst [vmem:[#allocation53_spill] sm:$0xff] %v14268_v32  ;;  %8907 = vmatmul.mubr.f32.gmra.mxu1 %v4381_v26  ;;  %v4471_v16 = vcombine.high %v4453_v60, %v16369_v20  ;;  %v4470_v47 = vcombine.low %v4453_v60, %v16369_v20  ;;  %v4384_v52 = vcombine.low %v986_v36, %v985_v33  ;;  %v16372_v36 = vld [vmem:[#allocation102_spill] sm:$0xff] }
 0x1dd   : > { %v4310_v59 = vcombine.low %v4302_v55, %v4309_v11  ;;  %v4391_v8 = vrot.slane %v4383_v2, %v10603_v27  ;;  %v987_v48 = vcombine.high %v985_v33, %v985_v33  ;;  %v1028_v42 = vrot.slane %v16370_v1, %v10603_v27  ;;  %9435 = vperm.xlu1 %10419, %v9372_v7   ;;  %v16373_v55 = vld [vmem:[#allocation87_spill] sm:$0xff]  ;;  %v8655_v20 = vpop.f32.mrf.mxu0 }
 0x1de   : > { %8911 = vmatprep.mubr.f32.mxu1 %v4471_v16  ;;  %v4398_v39 = vrot.slane %v4384_v52, %v10603_v27  ;;  %v4559_v26 = vcombine.low %v16368_v41, %v16367_v45  ;;  %v1092_v60 = vrot.slane %v16371_v19, %v10603_v27  ;;  %v4649_v18 = vcombine.high %v16373_v55, %v16372_v36  ;;  %v9375_v45 = vld [vmem:[%s15391_s3 + $0x40] sm:$0xff]  ;;  %v16378_v20 = vld [vmem:[#allocation55_spill] sm:$0xff] }
 0x1df   : > { %10224 = vmatmul.mubr.f32.gmra.mxu0 %v4310_v59  ;;  %v4472_v33 = vcombine.low %v987_v48, %v1028_v42  ;;  %v14298_v11 = vadd.f32 %v14225_v5, %v13904_v43  ;;  %v4648_v7 = vcombine.low %v16373_v55, %v16372_v36  ;;  %v1085_v2 = vcombine.high %v16371_v19, %v16371_v19  ;;  %v16374_v43 = vld [vmem:[#allocation56_spill] sm:$0xff]  ;;  %v14311_v59 = vpop.f32.mrf.mxu1  ;;  %v16375_v42 = vld [vmem:[#allocation97_spill] sm:$0xff]  ;;  %v16377_v55 = vld [vmem:[#allocation107_spill] sm:$0xff]  ;;  %v14319_v22 = vpop.f32.mrf.mxu0 }
 0x1e0   : > { %10226 = vmatprep.mubr.msk.f32.mxu0 %vm10497_vm2, %v15879_v17  ;;  %8912 = vmatmul.mubr.f32.gmra.mxu1 %v4470_v47  ;;  %v4399_v41 = vcombine.low %v4391_v8, %v4398_v39  ;;  %v1100_v16 = vcombine.high %v1092_v60, %v1092_v60  ;;  %v1165_v52 = vrot.slane %v16374_v43, %v10603_v27  ;;  %v16376_v19 = vld [vmem:[#allocation64_spill] sm:$0xff] }
 0x1e1   : > { %8916 = vmatprep.mubr.f32.mxu1 %v4560_v3  ;;  %v4480_v48 = vrot.slane %v4472_v33, %v10603_v27  ;;  %v1099_v1 = vrot.slane %v1085_v2, %v10603_v27  ;;  %v1262_v36 = vcombine.low %v16376_v19, %v16375_v42  ;;  %v1333_v32 = vcombine.low %v16378_v20, %v16377_v55  ;;  %v8395_v33 = vpop.f32.mrf.mxu1 }
 0x1e2   : > { %v4473_v47 = vcombine.low %v1092_v60, %v1100_v16  ;;  %v1173_v8 = vcombine.high %v1165_v52, %v1165_v52  ;;  %v14323_v39 = vadd.f32 %v14225_v5, %v13966_v35  ;;  %v8354_v3 = vadd.f32 %v13968_v9, %v16380_v6  ;;  %9450 = vperm.xlu0 %10418, %v9375_v45   ;;  %v8660_v60 = vpop.f32.mrf.mxu0  ;;  %v9374_v35 = vld [vmem:[%s15391_s3 + $0x38] sm:$0xff]  ;;  %v16385_v33 = vld [vmem:[#allocation42_spill] sm:$0xff] }
 0x1e3   : > { %10227 = vmatmul.mubr.f32.gmra.mxu0 %v4399_v41  ;;  %v1101_v2 = vcombine.high %v1099_v1, %v1099_v1  ;;  %v9975_v19 = vcombine.high %v16381_v10, %v1262_v36  ;;  %v9977_v0 = vcombine.high %v16375_v42, %v1333_v32  ;;  %v1158_v20 = vcombine.high %v16374_v43, %v16374_v43  ;;  %v16382_v5 = vld [vmem:[#allocation41_spill] sm:$0xff]  ;;  %v14339_v45 = vpop.f32.mrf.mxu1  ;;  %v9377_v32 = vld [vmem:[%s15391_s3 + $0x50] sm:$0xff]  ;;  %v16383_v36 = vld [vmem:[#allocation94_spill] sm:$0xff] }
 0x1e4   : > { %16379 = vst [vmem:[#allocation176_spill] sm:$0xff] %v14323_v39  ;;  %10229 = vmatprep.mubr.msk.f32.mxu0 %vm10497_vm2, %v15879_v17  ;;  %8917 = vmatmul.mubr.f32.gmra.mxu1 %v4559_v26  ;;  %v4487_v9 = vrot.slane %v4473_v47, %v10603_v27  ;;  %v4562_v6 = vcombine.low %v1165_v52, %v1173_v8  ;;  %v16384_v8 = vld [vmem:[#allocation108_spill] sm:$0xff]  ;;  %v14353_v39 = vpop.f32.mrf.mxu0 }
 0x1e5   : > { %v1207_v10 = vrot.slane %v16382_v5, %v10603_v27  ;;  %8921 = vmatprep.mubr.f32.mxu1 %v4649_v18  ;;  %v4561_v41 = vcombine.low %v1099_v1, %v1101_v2  ;;  %v4720_v16 = vrot.slane %v9975_v19, %v10603_v27  ;;  %v4734_v43 = vrot.slane %v9977_v0, %v10603_v27  ;;  %v8400_v5 = vpop.f32.mrf.mxu1  ;;  %v9376_v0 = vld [vmem:[%s15391_s3 + $0x48] sm:$0xff] }
 0x1e6   : > { %v1172_v26 = vrot.slane %v1158_v20, %v10603_v27  ;;  %v4488_v42 = vcombine.low %v4480_v48, %v4487_v9  ;;  %v4576_v52 = vrot.slane %v4562_v6, %v10603_v27  ;;  %v1271_v47 = vrot.slane %v16383_v36, %v10603_v27  ;;  %9445 = vperm.xlu1 %10419, %v9374_v35   ;;  %v16386_v20 = vld [vmem:[#allocation114_spill] sm:$0xff]  ;;  %v16387_v9 = vld [vmem:[#allocation71_spill] sm:$0xff] }
 0x1e7   : > { %v1335_v60 = vcombine.low %v16385_v33, %v16384_v8  ;;  %v4569_v18 = vrot.slane %v4561_v41, %v10603_v27  ;;  %v4738_v1 = vcombine.high %v4720_v16, %v4734_v43  ;;  %v4737_v2 = vcombine.low %v4720_v16, %v4734_v43  ;;  %9460 = vperm.xlu0 %10418, %v9377_v32   ;;  %v14361_v33 = vpop.f32.mrf.mxu1  ;;  %v9379_v41 = vld [vmem:[%s15391_s3 + $0x60] sm:$0xff] }
 0x1e8   : > { %v1174_v19 = vcombine.high %v1172_v26, %v1172_v26  ;;  %10230 = vmatmul.mubr.f32.gmra.mxu0 %v4488_v42  ;;  %8922 = vmatmul.mubr.f32.gmra.mxu1 %v4648_v7  ;;  %v4651_v48 = vcombine.low %v1207_v10, %v1271_v47  ;;  %v1379_v6 = vcombine.low %v16387_v9, %v16386_v20  ;;  %v16388_v43 = vld [vmem:[#allocation50_spill] sm:$0xff]  ;;  %v8665_v10 = vpop.f32.mrf.mxu0 }
 0x1e9   : > { %v9983_v35 = vcombine.high %v16377_v55, %v1335_v60  ;;  %10232 = vmatprep.mubr.msk.f32.mxu0 %vm10497_vm2, %v15879_v17  ;;  %v4577_v32 = vcombine.low %v4569_v18, %v4576_v52  ;;  %8926 = vmatprep.mubr.f32.mxu1 %v4738_v1  ;;  %v8359_v7 = vadd.f32 %v14012_v29, %v16388_v43  ;;  %v8405_v20 = vpop.f32.mrf.mxu1  ;;  %v16389_v29 = vld [vmem:[#allocation106_spill] sm:$0xff] }
 0x1ea   : > { %v4650_v16 = vcombine.low %v1172_v26, %v1174_v19  ;;  %v4665_v42 = vrot.slane %v4651_v48, %v10603_v27  ;;  %v9985_v55 = vcombine.high %v16384_v8, %v1379_v6  ;;  %v14374_v5 = vadd.f32 %v14014_v30, %v8354_v3  ;;  %9455 = vperm.xlu1 %10419, %v9376_v0   ;;  %v14381_v1 = vpop.f32.mrf.mxu0  ;;  %v9378_v8 = vld [vmem:[%s15391_s3 + $0x58] sm:$0xff]  ;;  %v16391_v19 = vld [vmem:[#allocation119_spill] sm:$0xff]  ;;  %v16392_v48 = vld [vmem:[#allocation70_spill] sm:$0xff] }
 0x1eb   : > { %v4809_v60 = vrot.slane %v9983_v35, %v10603_v27  ;;  %v1264_v26 = vcombine.high %v16383_v36, %v16383_v36  ;;  %v1279_v52 = vcombine.high %v1271_v47, %v1271_v47  ;;  %v1344_v18 = vrot.slane %v16389_v29, %v10603_v27  ;;  %9470 = vperm.xlu0 %10418, %v9379_v41   ;;  %v16390_v3 = vld [vmem:[#allocation125_spill] sm:$0xff]  ;;  %v9381_v47 = vld [vmem:[%s15391_s3 + $0x70] sm:$0xff] }
 0x1ec   : > { %v4658_v9 = vrot.slane %v4650_v16, %v10603_v27  ;;  %10233 = vmatmul.mubr.f32.gmra.mxu0 %v4577_v32  ;;  %8927 = vmatmul.mubr.f32.gmra.mxu1 %v4737_v2  ;;  %v4823_v30 = vrot.slane %v9985_v55, %v10603_v27  ;;  %v4916_v0 = vcombine.high %v16391_v19, %v16390_v3  ;;  %v8670_v32 = vpop.f32.mrf.mxu0  ;;  %v14402_v16 = vpop.f32.mrf.mxu1 }
 0x1ed   : > { %v8364_v36 = vadd.f32 %v14045_v54, %v16392_v48  ;;  %10235 = vmatprep.mubr.msk.f32.mxu0 %vm10497_vm2, %v15879_v17  ;;  %v1278_v35 = vrot.slane %v1264_v26, %v10603_v27  ;;  %v14398_v2 = vadd.f32 %v14047_v51, %v8359_v7  ;;  %v4915_v41 = vcombine.low %v16391_v19, %v16390_v3  ;;  %v16395_v51 = vld [vmem:[#allocation134_spill] sm:$0xff]  ;;  %v16396_v7 = vld [vmem:[#allocation128_spill] sm:$0xff] }
 0x1ee   : > { %v4666_v6 = vcombine.low %v4658_v9, %v4665_v42  ;;  %v4827_v54 = vcombine.high %v4809_v60, %v4823_v30  ;;  %v4826_v43 = vcombine.low %v4809_v60, %v4823_v30  ;;  %v1337_v10 = vcombine.high %v16389_v29, %v16389_v29  ;;  %9465 = vperm.xlu1 %10419, %v9378_v8   ;;  %v16394_v9 = vld [vmem:[#allocation91_spill] sm:$0xff]  ;;  %v8410_v3 = vpop.f32.mrf.mxu1 }
 0x1ef   : > { %16393 = vst [vmem:[#allocation44_spill] sm:$0xff] %v14398_v2  ;;  %v1352_v55 = vcombine.high %v1344_v18, %v1344_v18  ;;  %v1280_v20 = vcombine.high %v1278_v35, %v1278_v35  ;;  %v4739_v42 = vcombine.low %v1279_v52, %v1278_v35  ;;  %v1386_v26 = vrot.slane %v16394_v9, %v10603_v27  ;;  %v14410_v2 = vpop.f32.mrf.mxu0  ;;  %v9380_v52 = vld [vmem:[%s15391_s3 + $0x68] sm:$0xff] }
 0x1f0   : > { %v5005_v48 = vcombine.high %v16396_v7, %v16395_v51  ;;  %9480 = vperm.xlu0 %10418, %v9381_v47   ;;  %10236 = vmatmul.mubr.f32.gmra.mxu0 %v4666_v6  ;;  %v1351_v60 = vrot.slane %v1337_v10, %v10603_v27  ;;  %v8369_v29 = vadd.f32 %v14086_v37, %v13721_v21  ;;  %v14426_v35 = vpop.f32.mrf.mxu1  ;;  %v9383_v21 = vld [vmem:[%s15391_s3 + $0x80] sm:$0xff]  ;;  %v16400_v10 = vld [vmem:[#allocation77_spill] sm:$0xff] }
 0x1f1   : > { %8931 = vmatprep.mubr.f32.mxu1 %v4827_v54  ;;  %v14416_v8 = vadd.f32 %v14152_v49, %v8364_v36  ;;  %10238 = vmatprep.mubr.msk.f32.mxu0 %vm10497_vm2, %v15879_v17  ;;  %v4740_v30 = vcombine.low %v1280_v20, %v1344_v18  ;;  %v4747_v19 = vrot.slane %v4739_v42, %v10603_v27  ;;  %v8675_v6 = vpop.f32.mrf.mxu0  ;;  %v16398_v36 = vld [vmem:[#allocation83_spill] sm:$0xff] }
 0x1f2   : > { %8932 = vmatmul.mubr.f32.gmra.mxu1 %v4826_v43  ;;  %v5004_v47 = vcombine.low %v16396_v7, %v16395_v51  ;;  %v1353_v37 = vcombine.high %v1351_v60, %v1351_v60  ;;  %v4828_v49 = vcombine.low %v1352_v55, %v1351_v60  ;;  %v1443_v32 = vcombine.high %v16398_v36, %v16398_v36  ;;  %v16399_v43 = vld [vmem:[#allocation139_spill] sm:$0xff] }
 0x1f3   : > { %16397 = vst [vmem:[#allocation177_spill] sm:$0xff] %v14416_v8  ;;  %8936 = vmatprep.mubr.f32.mxu1 %v4916_v0  ;;  %v1450_v18 = vrot.slane %v16398_v36, %v10603_v27  ;;  %v4754_v54 = vrot.slane %v4740_v30, %v10603_v27  ;;  %v1620_v20 = vcombine.low %v16400_v10, %v16399_v43  ;;  %v8415_v0 = vpop.f32.mrf.mxu1  ;;  %v16402_v30 = vld [vmem:[#allocation137_spill] sm:$0xff]  ;;  %v16403_v36 = vld [vmem:[#allocation90_spill] sm:$0xff] }
 0x1f4   : > { %v8374_v42 = vadd.f32 %v14162_v40, %v13746_v46  ;;  %v14441_v9 = vadd.f32 %v14181_v63, %v8369_v29  ;;  %9475 = vperm.xlu1 %10419, %v9380_v52   ;;  %v4829_v55 = vcombine.low %v1353_v37, %v1386_v26  ;;  %v4836_v51 = vrot.slane %v4828_v49, %v10603_v27  ;;  %v16404_v29 = vld [vmem:[#allocation143_spill] sm:$0xff]  ;;  %v16405_v52 = vld [vmem:[#allocation110_spill] sm:$0xff]  ;;  %v16406_v49 = vld [vmem:[#allocation149_spill] sm:$0xff] }
 0x1f5   : > { %v1457_v7 = vrot.slane %v1443_v32, %v10603_v27  ;;  %v1458_v3 = vcombine.high %v1450_v18, %v1450_v18  ;;  %9490 = vperm.xlu0 %10418, %v9383_v21   ;;  %v4755_v60 = vcombine.low %v4747_v19, %v4754_v54  ;;  %v9993_v6 = vcombine.high %v16402_v30, %v1620_v20  ;;  %v16407_v32 = vld [vmem:[#allocation100_spill] sm:$0xff]  ;;  %v14457_v20 = vpop.f32.mrf.mxu0 }
 0x1f6   : > { %16401 = vst [vmem:[#allocation54_spill] sm:$0xff] %v14441_v9  ;;  %8937 = vmatmul.mubr.f32.gmra.mxu1 %v4915_v41  ;;  %v1516_v10 = vcombine.high %v16403_v36, %v16403_v36  ;;  %v1523_v46 = vrot.slane %v16403_v36, %v10603_v27  ;;  %v4843_v40 = vrot.slane %v4829_v55, %v10603_v27 }
 0x1f7   : > { %8941 = vmatprep.mubr.f32.mxu1 %v5005_v48  ;;  %v1459_v63 = vcombine.high %v1457_v7, %v1457_v7  ;;  %v4917_v26 = vcombine.low %v1450_v18, %v1458_v3  ;;  %v1691_v37 = vcombine.low %v16405_v52, %v16404_v29  ;;  %10239 = vmatmul.mubr.f32.gmra.mxu0 %v4755_v60  ;;  %v9382_v48 = vld [vmem:[%s15391_s3 + $0x78] sm:$0xff]  ;;  %v16408_v60 = vld [vmem:[#allocation140_spill] sm:$0xff]  ;;  %v8680_v52 = vpop.f32.mrf.mxu0 }
 0x1f8   : > { %v5090_v19 = vrot.slane %v9993_v6, %v10603_v27  ;;  %v1530_v41 = vrot.slane %v1516_v10, %v10603_v27  ;;  %v1531_v21 = vcombine.high %v1523_v46, %v1523_v46  ;;  %v1693_v54 = vcombine.low %v16407_v32, %v16406_v49  ;;  %10241 = vmatprep.mubr.msk.f32.mxu0 %vm10497_vm2, %v15879_v17 }
 0x1f9   : > { %v4844_v18 = vcombine.low %v4836_v51, %v4843_v40  ;;  %v4918_v0 = vcombine.low %v1457_v7, %v1459_v63  ;;  %v4925_v55 = vrot.slane %v4917_v26, %v10603_v27  ;;  %v9999_v3 = vcombine.high %v16399_v43, %v1691_v37  ;;  %v14473_v7 = vpop.f32.mrf.mxu1  ;;  %9485 = vperm.xlu1 %10419, %v9382_v48   ;;  %v9385_v40 = vld [vmem:[%s15391_s3 + $0x90] sm:$0xff] }
 0x1fa   : > { %8942 = vmatmul.mubr.f32.gmra.mxu1 %v5004_v47  ;;  %v5094_v30 = vcombine.high %v16408_v60, %v5090_v19  ;;  %v5093_v6 = vcombine.low %v16408_v60, %v5090_v19  ;;  %v1532_v36 = vcombine.high %v1530_v41, %v1530_v41  ;;  %v5006_v10 = vcombine.low %v1523_v46, %v1531_v21  ;;  %v14489_v19 = vpop.f32.mrf.mxu0  ;;  %v16411_v21 = vld [vmem:[#allocation150_spill] sm:$0xff] }
 0x1fb   : > { %v4932_v32 = vrot.slane %v4918_v0, %v10603_v27  ;;  %v10001_v9 = vcombine.high %v16404_v29, %v1693_v54  ;;  %v5165_v8 = vrot.slane %v9999_v3, %v10603_v27  ;;  %v8379_v51 = vadd.f32 %v14189_v50, %v13792_v13  ;;  %10242 = vmatmul.mubr.f32.gmra.mxu0 %v4844_v18  ;;  %v16409_v50 = vld [vmem:[#allocation65_spill] sm:$0xff]  ;;  %v16410_v29 = vld [vmem:[#allocation138_spill] sm:$0xff]  ;;  %v16412_v54 = vld [vmem:[#allocation99_spill] sm:$0xff] }
 0x1fc   : > { %8946 = vmatprep.mubr.f32.mxu1 %v5094_v30  ;;  %v5007_v47 = vcombine.low %v1530_v41, %v1532_v36  ;;  %v5014_v43 = vrot.slane %v5006_v10, %v10603_v27  ;;  %v14477_v46 = vadd.f32 %v14204_v25, %v8374_v42  ;;  %10244 = vmatprep.mubr.msk.f32.mxu0 %vm10497_vm2, %v15879_v17  ;;  %v8420_v25 = vpop.f32.mrf.mxu1  ;;  %v8685_v60 = vpop.f32.mrf.mxu0 }
 0x1fd   : > { %v4933_v63 = vcombine.low %v4925_v55, %v4932_v32  ;;  %v5179_v13 = vrot.slane %v10001_v9, %v10603_v27  ;;  %v1565_v26 = vrot.slane %v16409_v50, %v10603_v27  ;;  %v1622_v37 = vcombine.high %v16410_v29, %v16410_v29  ;;  %9500 = vperm.xlu0 %10418, %v9385_v40  }
 0x1fe   : > { %8947 = vmatmul.mubr.f32.gmra.mxu1 %v5093_v6  ;;  %v5021_v42 = vrot.slane %v5007_v47, %v10603_v27  ;;  %v1629_v41 = vrot.slane %v16410_v29, %v10603_v27  ;;  %v1737_v48 = vcombine.low %v16412_v54, %v16411_v21  ;;  %v8384_v9 = vadd.f32 %v14231_v62, %v13832_v57  ;;  %v14502_v30 = vpop.f32.mrf.mxu1  ;;  %v9384_v57 = vld [vmem:[%s15391_s3 + $0x88] sm:$0xff]  ;;  %v16416_v54 = vld [vmem:[#allocation165_spill] sm:$0xff] }
 0x1ff   : > { %v5183_v18 = vcombine.high %v5165_v8, %v5179_v13  ;;  %v5182_v0 = vcombine.low %v5165_v8, %v5179_v13  ;;  %v1636_v55 = vrot.slane %v1622_v37, %v10603_v27  ;;  %v14500_v3 = vadd.f32 %v14237_v44, %v8379_v51  ;;  %10245 = vmatmul.mubr.f32.gmra.mxu0 %v4933_v63  ;;  %v16413_v44 = vld [vmem:[#allocation147_spill] sm:$0xff]  ;;  %v14514_v51 = vpop.f32.mrf.mxu0  ;;  %v16414_v63 = vld [vmem:[#allocation170_spill] sm:$0xff] }
 0x200   : > { %v5022_v6 = vcombine.low %v5014_v43, %v5021_v42  ;;  %v1637_v36 = vcombine.high %v1629_v41, %v1629_v41  ;;  %v5095_v10 = vcombine.low %v1565_v26, %v1629_v41  ;;  %v10005_v52 = vcombine.high %v16406_v49, %v1737_v48  ;;  %10247 = vmatprep.mubr.msk.f32.mxu0 %vm10497_vm2, %v15879_v17  ;;  %v8425_v47 = vpop.f32.mrf.mxu1  ;;  %v16415_v13 = vld [vmem:[#allocation166_spill] sm:$0xff] }
 0x201   : > { %8951 = vmatprep.mubr.f32.mxu1 %v5183_v18  ;;  %v1638_v62 = vcombine.high %v1636_v55, %v1636_v55  ;;  %v1695_v8 = vcombine.high %v16413_v44, %v16413_v44  ;;  %v1702_v32 = vrot.slane %v16413_v44, %v10603_v27  ;;  %v5361_v50 = vcombine.high %v16415_v13, %v16414_v63  ;;  %v8690_v42 = vpop.f32.mrf.mxu0  ;;  %v16420_v44 = vld [vmem:[#allocation172_spill] sm:$0xff] }
 0x202   : > { %8952 = vmatmul.mubr.f32.gmra.mxu1 %v5182_v0  ;;  %v5096_v49 = vcombine.low %v1637_v36, %v1636_v55  ;;  %v5103_v43 = vrot.slane %v5095_v10, %v10603_v27  ;;  %v5254_v40 = vrot.slane %v10005_v52, %v10603_v27  ;;  %v8389_v25 = vadd.f32 %v14257_v4, %v13884_v34  ;;  %v14523_v41 = vpop.f32.mrf.mxu1  ;;  %v16417_v52 = vld [vmem:[#allocation132_spill] sm:$0xff]  ;;  %v16423_v42 = vld [vmem:[#allocation131_spill] sm:$0xff] }
 0x203   : > { %v1709_v26 = vrot.slane %v1695_v8, %v10603_v27  ;;  %v1710_v29 = vcombine.high %v1702_v32, %v1702_v32  ;;  %v5184_v37 = vcombine.low %v1638_v62, %v1702_v32  ;;  %9495 = vperm.xlu1 %10419, %v9384_v57   ;;  %10248 = vmatmul.mubr.f32.gmra.mxu0 %v5022_v6  ;;  %v14536_v6 = vpop.f32.mrf.mxu0  ;;  %v16419_v62 = vld [vmem:[#allocation174_spill] sm:$0xff] }
 0x204   : > { %v5110_v21 = vrot.slane %v5096_v49, %v10603_v27  ;;  %v5272_v48 = vcombine.high %v5254_v40, %v16416_v54  ;;  %v5271_v18 = vcombine.low %v5254_v40, %v16416_v54  ;;  %v14529_v0 = vadd.f32 %v14287_v23, %v8384_v9  ;;  %10250 = vmatprep.mubr.msk.f32.mxu0 %vm10497_vm2, %v15879_v17  ;;  %v8430_v36 = vpop.f32.mrf.mxu1  ;;  %v16418_v23 = vld [vmem:[#allocation111_spill] sm:$0xff]  ;;  %v16424_v54 = vld [vmem:[#allocation8_spill] sm:$0xff] }
 0x205   : > { %v5185_v55 = vcombine.low %v1710_v29, %v1709_v26  ;;  %v5192_v34 = vrot.slane %v5184_v37, %v10603_v27  ;;  %v5360_v4 = vcombine.low %v16415_v13, %v16414_v63  ;;  %v1711_v60 = vcombine.high %v1709_v26, %v1709_v26  ;;  %v8695_v40 = vpop.f32.mrf.mxu0  ;;  %v9387_v13 = vld [vmem:[%s15391_s3 + $0xa0] sm:$0xff] }
 0x206   : > { %v5111_v10 = vcombine.low %v5103_v43, %v5110_v21  ;;  %8956 = vmatprep.mubr.f32.mxu1 %v5272_v48  ;;  %v1744_v57 = vrot.slane %v16417_v52, %v10603_v27  ;;  %v1808_v9 = vrot.slane %v16418_v23, %v10603_v27  ;;  %v5450_v8 = vcombine.high %v16420_v44, %v16419_v62  ;;  %v14552_v63 = vpop.f32.mrf.mxu1  ;;  %v16425_v48 = vld [vmem:[#allocation136_spill] sm:$0xff]  ;;  %v16426_v52 = vld [vmem:[#allocation173_spill] sm:$0xff] }
 0x207   : > { %8957 = vmatmul.mubr.f32.gmra.mxu1 %v5271_v18  ;;  %v5199_v32 = vrot.slane %v5185_v55, %v10603_v27  ;;  %v8394_v47 = vadd.f32 %v14311_v59, %v13910_v38  ;;  %v14548_v49 = vadd.f32 %v14319_v22, %v8389_v25  ;;  %v5449_v43 = vcombine.low %v16420_v44, %v16419_v62  ;;  %v16421_v59 = vld [vmem:[#allocation101_spill] sm:$0xff]  ;;  %v16422_v25 = vld [vmem:[#allocation7_spill] sm:$0xff] }
 0x208   : > { %10251 = vmatmul.mubr.f32.gmra.mxu0 %v5111_v10  ;;  %8961 = vmatprep.mubr.f32.mxu1 %v5361_v50  ;;  %v1816_v26 = vcombine.high %v1808_v9, %v1808_v9  ;;  %v5273_v29 = vcombine.low %v1711_v60, %v1744_v57  ;;  %v1801_v38 = vcombine.high %v16418_v23, %v16418_v23  ;;  %v8435_v55 = vpop.f32.mrf.mxu1  ;;  %v16427_v40 = vld [vmem:[#allocation89_spill] sm:$0xff] }
 0x209   : > { %10253 = vmatprep.mubr.msk.f32.mxu0 %vm10497_vm2, %v15879_v17  ;;  %v5200_v22 = vcombine.low %v5192_v34, %v5199_v32  ;;  %v1881_v37 = vrot.slane %v16421_v59, %v10603_v27  ;;  %v1978_v21 = vcombine.low %v16423_v42, %v16422_v25  ;;  %v2049_v18 = vcombine.low %v16425_v48, %v16424_v54  ;;  %v16430_v48 = vld [vmem:[#allocation146_spill] sm:$0xff]  ;;  %v9389_v55 = vld [vmem:[%s15391_s3 + $0xb0] sm:$0xff] }
 0x20a   : > { %v5274_v50 = vcombine.low %v1808_v9, %v1816_v26  ;;  %v5281_v60 = vrot.slane %v5273_v29, %v10603_v27  ;;  %v1815_v36 = vrot.slane %v1801_v38, %v10603_v27  ;;  %v8399_v10 = vadd.f32 %v14339_v45, %v13972_v14  ;;  %9510 = vperm.xlu0 %10418, %v9387_v13   ;;  %v9386_v9 = vld [vmem:[%s15391_s3 + $0x98] sm:$0xff]  ;;  %v14582_v45 = vpop.f32.mrf.mxu0 }
 0x20b   : > { %8962 = vmatmul.mubr.f32.gmra.mxu1 %v5360_v4  ;;  %v1889_v34 = vcombine.high %v1881_v37, %v1881_v37  ;;  %v10015_v57 = vcombine.high %v16426_v52, %v1978_v21  ;;  %v10017_v23 = vcombine.high %v16422_v25, %v2049_v18  ;;  %v14574_v62 = vadd.f32 %v14353_v39, %v8394_v47  ;;  %v16428_v38 = vld [vmem:[#allocation5_spill] sm:$0xff]  ;;  %v16432_v52 = vld [vmem:[#allocation144_spill] sm:$0xff] }
 0x20c   : > { %10254 = vmatmul.mubr.f32.gmra.mxu0 %v5200_v22  ;;  %v5288_v44 = vrot.slane %v5274_v50, %v10603_v27  ;;  %8966 = vmatprep.mubr.f32.mxu1 %v5450_v8  ;;  %v1817_v32 = vcombine.high %v1815_v36, %v1815_v36  ;;  %v1874_v14 = vcombine.high %v16421_v59, %v16421_v59  ;;  %v8700_v59 = vpop.f32.mrf.mxu0  ;;  %v16429_v21 = vld [vmem:[#allocation9_spill] sm:$0xff] }
 0x20d   : > { %10256 = vmatprep.mubr.msk.f32.mxu0 %vm10497_vm2, %v15879_v17  ;;  %v5363_v4 = vcombine.low %v1881_v37, %v1889_v34  ;;  %v5521_v39 = vrot.slane %v10015_v57, %v10603_v27  ;;  %v5535_v47 = vrot.slane %v10017_v23, %v10603_v27  ;;  %v1923_v13 = vrot.slane %v16427_v40, %v10603_v27  ;;  %v16431_v34 = vld [vmem:[#allocation13_spill] sm:$0xff]  ;;  %v16434_v59 = vld [vmem:[#allocation18_spill] sm:$0xff] }
 0x20e   : > { %v5289_v26 = vcombine.low %v5281_v60, %v5288_v44  ;;  %v5362_v29 = vcombine.low %v1815_v36, %v1817_v32  ;;  %v1888_v8 = vrot.slane %v1874_v14, %v10603_v27  ;;  %v1987_v22 = vrot.slane %v16428_v38, %v10603_v27  ;;  %9505 = vperm.xlu1 %10419, %v9386_v9   ;;  %v14610_v44 = vpop.f32.mrf.mxu1  ;;  %v14612_v32 = vpop.f32.mrf.mxu0 }
 0x20f   : > { %8967 = vmatmul.mubr.f32.gmra.mxu1 %v5449_v43  ;;  %v5377_v25 = vrot.slane %v5363_v4, %v10603_v27  ;;  %v5539_v37 = vcombine.high %v5521_v39, %v5535_v47  ;;  %v5538_v42 = vcombine.low %v5521_v39, %v5535_v47  ;;  %v2051_v18 = vcombine.low %v16430_v48, %v16429_v21 }
 0x210   : > { %10257 = vmatmul.mubr.f32.gmra.mxu0 %v5289_v26  ;;  %v5370_v50 = vrot.slane %v5362_v29, %v10603_v27  ;;  %v1890_v60 = vcombine.high %v1888_v8, %v1888_v8  ;;  %v5452_v36 = vcombine.low %v1923_v13, %v1987_v22  ;;  %v2095_v57 = vcombine.low %v16432_v52, %v16431_v34  ;;  %v8440_v40 = vpop.f32.mrf.mxu1  ;;  %v8705_v13 = vpop.f32.mrf.mxu0  ;;  %v9388_v26 = vld [vmem:[%s15391_s3 + $0xa8] sm:$0xff] }
 0x211   : > { %10259 = vmatprep.mubr.msk.f32.mxu0 %vm10497_vm2, %v15879_v17  ;;  %8971 = vmatprep.mubr.f32.mxu1 %v5539_v37  ;;  %v10023_v43 = vcombine.high %v16424_v54, %v2051_v18  ;;  %v8404_v23 = vadd.f32 %v14361_v33, %v14027_v28  ;;  %v14608_v9 = vadd.f32 %v14381_v1, %v8399_v10  ;;  %v16433_v1 = vld [vmem:[#allocation6_spill] sm:$0xff] }
 0x212   : > { %v5378_v14 = vcombine.low %v5370_v50, %v5377_v25  ;;  %v5451_v4 = vcombine.low %v1888_v8, %v1890_v60  ;;  %v5466_v39 = vrot.slane %v5452_v36, %v10603_v27  ;;  %v10025_v47 = vcombine.high %v16429_v21, %v2095_v57  ;;  %9520 = vperm.xlu0 %10418, %v9389_v55   ;;  %v16435_v25 = vld [vmem:[#allocation14_spill] sm:$0xff]  ;;  %v14643_v55 = vpop.f32.mrf.mxu1  ;;  %v14645_v36 = vpop.f32.mrf.mxu0  ;;  %v16436_v57 = vld [vmem:[#allocation3_spill] sm:$0xff] }
 0x213   : > { %8972 = vmatmul.mubr.f32.gmra.mxu1 %v5538_v42  ;;  %v5610_v54 = vrot.slane %v10023_v43, %v10603_v27  ;;  %v1980_v28 = vcombine.high %v16428_v38, %v16428_v38  ;;  %v1995_v33 = vcombine.high %v1987_v22, %v1987_v22  ;;  %v2060_v10 = vrot.slane %v16433_v1, %v10603_v27  ;;  %v9391_v22 = vld [vmem:[%s15391_s3 + $0xc0] sm:$0xff] }
 0x214   : > { %10260 = vmatmul.mubr.f32.gmra.mxu0 %v5378_v14  ;;  %v5459_v29 = vrot.slane %v5451_v4, %v10603_v27  ;;  %v5624_v8 = vrot.slane %v10025_v47, %v10603_v27  ;;  %v5717_v37 = vcombine.high %v16435_v25, %v16434_v59  ;;  %v8409_v38 = vadd.f32 %v14402_v16, %v14083_v61  ;;  %v16437_v14 = vld [vmem:[#allocation23_spill] sm:$0xff] }
 0x215   : > { %10262 = vmatprep.mubr.msk.f32.mxu0 %vm10497_vm2, %v15879_v17  ;;  %v1994_v42 = vrot.slane %v1980_v28, %v10603_v27  ;;  %v14637_v21 = vadd.f32 %v14410_v2, %v8404_v23  ;;  %v5716_v48 = vcombine.low %v16435_v25, %v16434_v59  ;;  %v2053_v18 = vcombine.high %v16433_v1, %v16433_v1  ;;  %v8445_v23 = vpop.f32.mrf.mxu1  ;;  %v16438_v4 = vld [vmem:[#allocation19_spill] sm:$0xff]  ;;  %v8710_v28 = vpop.f32.mrf.mxu0 }
 0x216   : > { %v5467_v61 = vcombine.low %v5459_v29, %v5466_v39  ;;  %v5628_v16 = vcombine.high %v5610_v54, %v5624_v8  ;;  %v5627_v50 = vcombine.low %v5610_v54, %v5624_v8  ;;  %v2068_v60 = vcombine.high %v2060_v10, %v2060_v10  ;;  %9515 = vperm.xlu1 %10419, %v9388_v26   ;;  %v16439_v29 = vld [vmem:[#allocation154_spill] sm:$0xff] }
 0x217   : > { %v1996_v34 = vcombine.high %v1994_v42, %v1994_v42  ;;  %v5540_v52 = vcombine.low %v1995_v33, %v1994_v42  ;;  %v2067_v2 = vrot.slane %v2053_v18, %v10603_v27  ;;  %v2102_v43 = vrot.slane %v16436_v57, %v10603_v27  ;;  %9530 = vperm.xlu0 %10418, %v9391_v22   ;;  %v9390_v33 = vld [vmem:[%s15391_s3 + $0xb8] sm:$0xff]  ;;  %v14663_v26 = vpop.f32.mrf.mxu1  ;;  %v14674_v59 = vpop.f32.mrf.mxu0  ;;  %v16441_v42 = vld [vmem:[#allocation4_spill] sm:$0xff] }
 0x218   : > { %10263 = vmatmul.mubr.f32.gmra.mxu0 %v5467_v61  ;;  %8976 = vmatprep.mubr.f32.mxu1 %v5628_v16  ;;  %v5806_v39 = vcombine.high %v16438_v4, %v16437_v14  ;;  %v8414_v47 = vadd.f32 %v14426_v35, %v14115_v12  ;;  %v14655_v54 = vadd.f32 %v14457_v20, %v8409_v38  ;;  %v9393_v12 = vld [vmem:[%s15391_s3 + $0xd0] sm:$0xff]  ;;  %v16440_v22 = vld [vmem:[#allocation29_spill] sm:$0xff] }
 0x219   : > { %10265 = vmatprep.mubr.msk.f32.mxu0 %vm10497_vm2, %v15879_v17  ;;  %8977 = vmatmul.mubr.f32.gmra.mxu1 %v5627_v50  ;;  %v5541_v1 = vcombine.low %v1996_v34, %v2060_v10  ;;  %v5548_v40 = vrot.slane %v5540_v52, %v10603_v27  ;;  %v2069_v13 = vcombine.high %v2067_v2, %v2067_v2  ;;  %v8450_v61 = vpop.f32.mrf.mxu1  ;;  %v8715_v52 = vpop.f32.mrf.mxu0 }
 0x21a   : > { %8981 = vmatprep.mubr.f32.mxu1 %v5717_v37  ;;  %v5629_v35 = vcombine.low %v2068_v60, %v2067_v2  ;;  %v5805_v20 = vcombine.low %v16438_v4, %v16437_v14  ;;  %v2159_v8 = vcombine.high %v16439_v29, %v16439_v29  ;;  %v2166_v10 = vrot.slane %v16439_v29, %v10603_v27  ;;  %v16443_v14 = vld [vmem:[#allocation10_spill] sm:$0xff]  ;;  %v16447_v29 = vld [vmem:[#allocation16_spill] sm:$0xff] }
 0x21b   : > { %v5555_v25 = vrot.slane %v5541_v1, %v10603_v27  ;;  %v5630_v38 = vcombine.low %v2069_v13, %v2102_v43  ;;  %v2336_v18 = vcombine.low %v16441_v42, %v16440_v22  ;;  %v8419_v37 = vadd.f32 %v14473_v7, %v14143_v56  ;;  %9525 = vperm.xlu1 %10419, %v9390_v33   ;;  %v16442_v43 = vld [vmem:[#allocation21_spill] sm:$0xff]  ;;  %v14690_v7 = vpop.f32.mrf.mxu1  ;;  %v16445_v33 = vld [vmem:[#allocation12_spill] sm:$0xff] }
 0x21c   : > { %v5637_v16 = vrot.slane %v5629_v35, %v10603_v27  ;;  %v2173_v50 = vrot.slane %v2159_v8, %v10603_v27  ;;  %v2174_v60 = vcombine.high %v2166_v10, %v2166_v10  ;;  %v14684_v34 = vadd.f32 %v14489_v19, %v8414_v47  ;;  %9540 = vperm.xlu0 %10418, %v9393_v12   ;;  %v16444_v47 = vld [vmem:[#allocation30_spill] sm:$0xff]  ;;  %v16446_v35 = vld [vmem:[#allocation37_spill] sm:$0xff] }
 0x21d   : > { %v5556_v2 = vcombine.low %v5548_v40, %v5555_v25  ;;  %8982 = vmatmul.mubr.f32.gmra.mxu1 %v5716_v48  ;;  %v5644_v57 = vrot.slane %v5630_v38, %v10603_v27  ;;  %v10033_v23 = vcombine.high %v16442_v43, %v2336_v18  ;;  %v2232_v56 = vcombine.high %v16443_v14, %v16443_v14  ;;  %v14696_v40 = vpop.f32.mrf.mxu0 }
 0x21e   : > { %8986 = vmatprep.mubr.f32.mxu1 %v5806_v39  ;;  %v2175_v4 = vcombine.high %v2173_v50, %v2173_v50  ;;  %v5718_v28 = vcombine.low %v2166_v10, %v2174_v60  ;;  %v2239_v19 = vrot.slane %v16443_v14, %v10603_v27  ;;  %v2407_v1 = vcombine.low %v16445_v33, %v16444_v47  ;;  %v8455_v39 = vpop.f32.mrf.mxu1  ;;  %v9392_v10 = vld [vmem:[%s15391_s3 + $0xc8] sm:$0xff] }
 0x21f   : > { %10266 = vmatmul.mubr.f32.gmra.mxu0 %v5556_v2  ;;  %v5645_v48 = vcombine.low %v5637_v16, %v5644_v57  ;;  %v5891_v13 = vrot.slane %v10033_v23, %v10603_v27  ;;  %v2246_v12 = vrot.slane %v2232_v56, %v10603_v27  ;;  %v2409_v8 = vcombine.low %v16447_v29, %v16446_v35  ;;  %v8720_v61 = vpop.f32.mrf.mxu0  ;;  %v16448_v16 = vld [vmem:[#allocation24_spill] sm:$0xff]  ;;  %v16452_v39 = vld [vmem:[#allocation2_spill] sm:$0xff] }
 0x220   : > { %10268 = vmatprep.mubr.msk.f32.mxu0 %vm10497_vm2, %v15879_v17  ;;  %v5719_v25 = vcombine.low %v2173_v50, %v2175_v4  ;;  %v5726_v38 = vrot.slane %v5718_v28, %v10603_v27  ;;  %v2247_v42 = vcombine.high %v2239_v19, %v2239_v19  ;;  %v10039_v18 = vcombine.high %v16440_v22, %v2407_v1  ;;  %v14712_v43 = vpop.f32.mrf.mxu1  ;;  %v16450_v1 = vld [vmem:[#allocation28_spill] sm:$0xff] }
 0x221   : > { %8987 = vmatmul.mubr.f32.gmra.mxu1 %v5805_v20  ;;  %v5895_v60 = vcombine.high %v16448_v16, %v5891_v13  ;;  %v5894_v52 = vcombine.low %v16448_v16, %v5891_v13  ;;  %v2248_v2 = vcombine.high %v2246_v12, %v2246_v12  ;;  %v10041_v57 = vcombine.high %v16444_v47, %v2409_v8  ;;  %v9395_v47 = vld [vmem:[%s15391_s3 + $0xe0] sm:$0xff]  ;;  %v14743_v16 = vpop.f32.mrf.mxu0 }
 0x222   : > { %v5733_v23 = vrot.slane %v5719_v25, %v10603_v27  ;;  %v5807_v14 = vcombine.low %v2239_v19, %v2247_v42  ;;  %v5966_v50 = vrot.slane %v10039_v18, %v10603_v27  ;;  %v8424_v56 = vadd.f32 %v14502_v30, %v14160_v15  ;;  %9535 = vperm.xlu1 %10419, %v9392_v10   ;;  %v8460_v28 = vpop.f32.mrf.mxu1  ;;  %v16449_v30 = vld [vmem:[#allocation115_spill] sm:$0xff]  ;;  %v16451_v8 = vld [vmem:[#allocation38_spill] sm:$0xff] }
 0x223   : > { %10269 = vmatmul.mubr.f32.gmra.mxu0 %v5645_v48  ;;  %8991 = vmatprep.mubr.f32.mxu1 %v5895_v60  ;;  %v5808_v20 = vcombine.low %v2246_v12, %v2248_v2  ;;  %v5980_v22 = vrot.slane %v10041_v57, %v10603_v27  ;;  %v14720_v4 = vadd.f32 %v14514_v51, %v8419_v37  ;;  %v9394_v60 = vld [vmem:[%s15391_s3 + $0xd8] sm:$0xff] }
 0x224   : > { %10271 = vmatprep.mubr.msk.f32.mxu0 %vm10497_vm2, %v15879_v17  ;;  %v5734_v19 = vcombine.low %v5726_v38, %v5733_v23  ;;  %v5815_v15 = vrot.slane %v5807_v14, %v10603_v27  ;;  %v2281_v33 = vrot.slane %v16449_v30, %v10603_v27  ;;  %v2338_v48 = vcombine.high %v16450_v1, %v16450_v1  ;;  %v14755_v57 = vpop.f32.mrf.mxu1 }
 0x225   : > { %8992 = vmatmul.mubr.f32.gmra.mxu1 %v5894_v52  ;;  %v5822_v51 = vrot.slane %v5808_v20, %v10603_v27  ;;  %v5984_v37 = vcombine.high %v5966_v50, %v5980_v22  ;;  %v5983_v13 = vcombine.low %v5966_v50, %v5980_v22  ;;  %v2345_v12 = vrot.slane %v16450_v1, %v10603_v27  ;;  %v16454_v50 = vld [vmem:[#allocation61_spill] sm:$0xff] }
 0x226   : > { %v2352_v29 = vrot.slane %v2338_v48, %v10603_v27  ;;  %v2453_v10 = vcombine.low %v16452_v39, %v16451_v8  ;;  %v8429_v25 = vadd.f32 %v14523_v41, %v14202_v58  ;;  %v14741_v38 = vadd.f32 %v14536_v6, %v8424_v56  ;;  %9550 = vperm.xlu0 %10418, %v9395_v47   ;;  %v16453_v6 = vld [vmem:[#allocation34_spill] sm:$0xff]  ;;  %v16455_v56 = vld [vmem:[#allocation51_spill] sm:$0xff]  ;;  %v8465_v30 = vpop.f32.mrf.mxu1 }
 0x227   : > { %10272 = vmatmul.mubr.f32.gmra.mxu0 %v5734_v19  ;;  %v5823_v42 = vcombine.low %v5815_v15, %v5822_v51  ;;  %8996 = vmatprep.mubr.f32.mxu1 %v5984_v37  ;;  %v2353_v18 = vcombine.high %v2345_v12, %v2345_v12  ;;  %v5896_v61 = vcombine.low %v2281_v33, %v2345_v12  ;;  %v9397_v33 = vld [vmem:[%s15391_s3 + $0xf0] sm:$0xff] }
 0x228   : > { %10274 = vmatprep.mubr.msk.f32.mxu0 %vm10497_vm2, %v15879_v17  ;;  %v10045_v58 = vcombine.high %v16446_v35, %v2453_v10  ;;  %v2354_v41 = vcombine.high %v2352_v29, %v2352_v29  ;;  %v2411_v52 = vcombine.high %v16453_v6, %v16453_v6  ;;  %v2418_v2 = vrot.slane %v16453_v6, %v10603_v27  ;;  %v8725_v35 = vpop.f32.mrf.mxu0 }
 0x229   : > { %8997 = vmatmul.mubr.f32.gmra.mxu1 %v5983_v13  ;;  %v5897_v23 = vcombine.low %v2353_v18, %v2352_v29  ;;  %v5904_v14 = vrot.slane %v5896_v61, %v10603_v27  ;;  %v6162_v20 = vcombine.high %v16455_v56, %v16454_v50  ;;  %v8434_v22 = vadd.f32 %v14552_v63, %v14229_v24  ;;  %v16456_v63 = vld [vmem:[#allocation32_spill] sm:$0xff]  ;;  %v16457_v13 = vld [vmem:[#allocation49_spill] sm:$0xff] }
 0x22a   : > { %v6055_v28 = vrot.slane %v10045_v58, %v10603_v27  ;;  %v2425_v47 = vrot.slane %v2411_v52, %v10603_v27  ;;  %v2426_v19 = vcombine.high %v2418_v2, %v2418_v2  ;;  %v5985_v15 = vcombine.low %v2354_v41, %v2418_v2  ;;  %9545 = vperm.xlu1 %10419, %v9394_v60   ;;  %v14775_v37 = vpop.f32.mrf.mxu0  ;;  %v16459_v61 = vld [vmem:[#allocation73_spill] sm:$0xff]  ;;  %v16460_v60 = vld [vmem:[#allocation62_spill] sm:$0xff] }
 0x22b   : > { %10275 = vmatmul.mubr.f32.gmra.mxu0 %v5823_v42  ;;  %v5911_v1 = vrot.slane %v5897_v23, %v10603_v27  ;;  %v14769_v48 = vadd.f32 %v14582_v45, %v8429_v25  ;;  %v6161_v24 = vcombine.low %v16455_v56, %v16454_v50  ;;  %v2460_v51 = vrot.slane %v16456_v63, %v10603_v27  ;;  %v14782_v45 = vpop.f32.mrf.mxu1  ;;  %v16458_v42 = vld [vmem:[#allocation17_spill] sm:$0xff]  ;;  %v9396_v50 = vld [vmem:[%s15391_s3 + $0xe8] sm:$0xff] }
 0x22c   : > { %10277 = vmatprep.mubr.msk.f32.mxu0 %vm10497_vm2, %v15879_v17  ;;  %v6073_v12 = vcombine.high %v6055_v28, %v16457_v13  ;;  %v6072_v29 = vcombine.low %v6055_v28, %v16457_v13  ;;  %v5986_v8 = vcombine.low %v2426_v19, %v2425_v47  ;;  %v5993_v39 = vrot.slane %v5985_v15, %v10603_v27  ;;  %v8730_v41 = vpop.f32.mrf.mxu0  ;;  %v16462_v19 = vld [vmem:[#allocation68_spill] sm:$0xff]  ;;  %v16465_v13 = vld [vmem:[#allocation25_spill] sm:$0xff] }
 0x22d   : > { %v5912_v10 = vcombine.low %v5904_v14, %v5911_v1  ;;  %v2427_v25 = vcombine.high %v2425_v47, %v2425_v47  ;;  %v2524_v18 = vrot.slane %v16458_v42, %v10603_v27  ;;  %v6251_v58 = vcombine.high %v16460_v60, %v16459_v61  ;;  %9560 = vperm.xlu0 %10418, %v9397_v33   ;;  %v8470_v14 = vpop.f32.mrf.mxu1  ;;  %v16463_v15 = vld [vmem:[#allocation20_spill] sm:$0xff] }
 0x22e   : > { %9001 = vmatprep.mubr.f32.mxu1 %v6073_v12  ;;  %v6000_v6 = vrot.slane %v5986_v8, %v10603_v27  ;;  %v8439_v52 = vadd.f32 %v14610_v44, %v14264_v53  ;;  %v14792_v2 = vadd.f32 %v14612_v32, %v8434_v22  ;;  %v6250_v23 = vcombine.low %v16460_v60, %v16459_v61  ;;  %v14801_v47 = vpop.f32.mrf.mxu0  ;;  %v9399_v53 = vld [vmem:[%s15391_s3 + $0x100] sm:$0xff]  ;;  %v16461_v32 = vld [vmem:[#allocation15_spill] sm:$0xff] }
 0x22f   : > { %10278 = vmatmul.mubr.f32.gmra.mxu0 %v5912_v10  ;;  %9002 = vmatmul.mubr.f32.gmra.mxu1 %v6072_v29  ;;  %v2532_v56 = vcombine.high %v2524_v18, %v2524_v18  ;;  %v6074_v35 = vcombine.low %v2427_v25, %v2460_v51  ;;  %v2517_v28 = vcombine.high %v16458_v42, %v16458_v42  ;;  %v16464_v51 = vld [vmem:[#allocation79_spill] sm:$0xff]  ;;  %v14822_v42 = vpop.f32.mrf.mxu1 }
 0x230   : > { %10280 = vmatprep.mubr.msk.f32.mxu0 %vm10497_vm2, %v15879_v17  ;;  %v6001_v44 = vcombine.low %v5993_v39, %v6000_v6  ;;  %9006 = vmatprep.mubr.f32.mxu1 %v6162_v20  ;;  %v2597_v22 = vrot.slane %v16461_v32, %v10603_v27  ;;  %v2694_v30 = vcombine.low %v16463_v15, %v16462_v19  ;;  %v8735_v29 = vpop.f32.mrf.mxu0  ;;  %v16466_v10 = vld [vmem:[#allocation67_spill] sm:$0xff]  ;;  %v16469_v15 = vld [vmem:[#allocation80_spill] sm:$0xff] }
 0x231   : > { %v6075_v33 = vcombine.low %v2524_v18, %v2532_v56  ;;  %v6082_v1 = vrot.slane %v6074_v35, %v10603_v27  ;;  %v2531_v63 = vrot.slane %v2517_v28, %v10603_v27  ;;  %v2765_v12 = vcombine.low %v16465_v13, %v16464_v51  ;;  %9555 = vperm.xlu1 %10419, %v9396_v50   ;;  %v9398_v18 = vld [vmem:[%s15391_s3 + $0xf8] sm:$0xff]  ;;  %v16467_v35 = vld [vmem:[#allocation11_spill] sm:$0xff] }
 0x232   : > { %v2605_v8 = vcombine.high %v2597_v22, %v2597_v22  ;;  %v10055_v39 = vcombine.high %v16466_v10, %v2694_v30  ;;  %v8444_v20 = vadd.f32 %v14643_v55, %v14278_v31  ;;  %v14820_v25 = vadd.f32 %v14645_v36, %v8439_v52  ;;  %9570 = vperm.xlu0 %10418, %v9399_v53   ;;  %v14829_v6 = vpop.f32.mrf.mxu0  ;;  %v9401_v31 = vld [vmem:[%s15391_s3 + $0x110] sm:$0xff]  ;;  %v8475_v52 = vpop.f32.mrf.mxu1  ;;  %v16470_v30 = vld [vmem:[#allocation33_spill] sm:$0xff] }
 0x233   : > { %10281 = vmatmul.mubr.f32.gmra.mxu0 %v6001_v44  ;;  %9007 = vmatmul.mubr.f32.gmra.mxu1 %v6161_v24  ;;  %v6089_v61 = vrot.slane %v6075_v33, %v10603_v27  ;;  %v2533_v60 = vcombine.high %v2531_v63, %v2531_v63  ;;  %v10057_v41 = vcombine.high %v16462_v19, %v2765_v12  ;;  %v9400_v12 = vld [vmem:[%s15391_s3 + $0x108] sm:$0xff]  ;;  %v16471_v10 = vld [vmem:[#allocation85_spill] sm:$0xff] }
 0x234   : > { %10283 = vmatprep.mubr.msk.f32.mxu0 %vm10497_vm2, %v15879_v17  ;;  %9011 = vmatprep.mubr.f32.mxu1 %v6251_v58  ;;  %v6164_v55 = vcombine.low %v2597_v22, %v2605_v8  ;;  %v6322_v36 = vrot.slane %v10055_v39, %v10603_v27  ;;  %v2590_v24 = vcombine.high %v16461_v32, %v16461_v32  ;;  %v8740_v53 = vpop.f32.mrf.mxu0  ;;  %v16468_v22 = vld [vmem:[#allocation66_spill] sm:$0xff]  ;;  %v14848_v33 = vpop.f32.mrf.mxu1  ;;  %v16472_v39 = vld [vmem:[#allocation31_spill] sm:$0xff] }
 0x235   : > { %v6090_v14 = vcombine.low %v6082_v1, %v6089_v61  ;;  %v6163_v50 = vcombine.low %v2531_v63, %v2533_v60  ;;  %v6336_v56 = vrot.slane %v10057_v41, %v10603_v27  ;;  %v2639_v28 = vrot.slane %v16467_v35, %v10603_v27  ;;  %9565 = vperm.xlu1 %10419, %v9398_v18   ;;  %v16474_v53 = vld [vmem:[#allocation104_spill] sm:$0xff] }
 0x236   : > { %v6178_v44 = vrot.slane %v6164_v55, %v10603_v27  ;;  %v2604_v58 = vrot.slane %v2590_v24, %v10603_v27  ;;  %v2703_v19 = vrot.slane %v16468_v22, %v10603_v27  ;;  %v2767_v32 = vcombine.low %v16470_v30, %v16469_v15  ;;  %9580 = vperm.xlu0 %10418, %v9401_v31   ;;  %v8480_v60 = vpop.f32.mrf.mxu1 }
 0x237   : > { %10284 = vmatmul.mubr.f32.gmra.mxu0 %v6090_v14  ;;  %9012 = vmatmul.mubr.f32.gmra.mxu1 %v6250_v23  ;;  %v6171_v1 = vrot.slane %v6163_v50, %v10603_v27  ;;  %v6340_v63 = vcombine.high %v6322_v36, %v6336_v56  ;;  %v6339_v13 = vcombine.low %v6322_v36, %v6336_v56  ;;  %v14875_v50 = vpop.f32.mrf.mxu0  ;;  %v9402_v56 = vld [vmem:[%s15391_s3 + $0x118] sm:$0xff] }
 0x238   : > { %10286 = vmatprep.mubr.msk.f32.mxu0 %vm10497_vm2, %v15879_v17  ;;  %v2606_v29 = vcombine.high %v2604_v58, %v2604_v58  ;;  %v6253_v8 = vcombine.low %v2639_v28, %v2703_v19  ;;  %v2811_v18 = vcombine.low %v16472_v39, %v16471_v10  ;;  %v10063_v61 = vcombine.high %v16464_v51, %v2767_v32  ;;  %v9403_v51 = vld [vmem:[%s15391_s3 + $0x120] sm:$0xff]  ;;  %v14895_v10 = vpop.f32.mrf.mxu1 }
 0x239   : > { %v6179_v23 = vcombine.low %v6171_v1, %v6178_v44  ;;  %9016 = vmatprep.mubr.f32.mxu1 %v6340_v63  ;;  %v8449_v41 = vadd.f32 %v14663_v26, %v14298_v11  ;;  %v14862_v31 = vadd.f32 %v14674_v59, %v8444_v20  ;;  %v2696_v55 = vcombine.high %v16468_v22, %v16468_v22  ;;  %v16473_v59 = vld [vmem:[#allocation76_spill] sm:$0xff]  ;;  %v16475_v44 = vld [vmem:[#allocation93_spill] sm:$0xff]  ;;  %v8745_v63 = vpop.f32.mrf.mxu0 }
 0x23a   : > { %v6252_v36 = vcombine.low %v2604_v58, %v2606_v29  ;;  %v6267_v24 = vrot.slane %v6253_v8, %v10603_v27  ;;  %v10065_v52 = vcombine.high %v16469_v15, %v2811_v18  ;;  %v6411_v14 = vrot.slane %v10063_v61, %v10603_v27  ;;  %9575 = vperm.xlu1 %10419, %v9400_v12   ;;  %v16476_v22 = vld [vmem:[#allocation176_spill] sm:$0xff]  ;;  %v16484_v63 = vld [vmem:[#allocation63_spill] sm:$0xff] }
 0x23b   : > { %10287 = vmatmul.mubr.f32.gmra.mxu0 %v6179_v23  ;;  %9017 = vmatmul.mubr.f32.gmra.mxu1 %v6339_v13  ;;  %v2710_v11 = vrot.slane %v2696_v55, %v10603_v27  ;;  %v2711_v26 = vcombine.high %v2703_v19, %v2703_v19  ;;  %v2776_v20 = vrot.slane %v16473_v59, %v10603_v27  ;;  %v16478_v23 = vld [vmem:[#allocation113_spill] sm:$0xff] }
 0x23c   : > { %10289 = vmatprep.mubr.msk.f32.mxu0 %vm10497_vm2, %v15879_v17  ;;  %v6260_v35 = vrot.slane %v6252_v36, %v10603_v27  ;;  %v6425_v28 = vrot.slane %v10065_v52, %v10603_v27  ;;  %v6518_v58 = vcombine.high %v16475_v44, %v16474_v53  ;;  %v8454_v19 = vadd.f32 %v14690_v7, %v16476_v22  ;;  %v16480_v36 = vld [vmem:[#allocation43_spill] sm:$0xff]  ;;  %v14905_v52 = vpop.f32.mrf.mxu0 }
 0x23d   : > { %v2712_v15 = vcombine.high %v2710_v11, %v2710_v11  ;;  %v6341_v30 = vcombine.low %v2711_v26, %v2710_v11  ;;  %v14889_v32 = vadd.f32 %v14696_v40, %v8449_v41  ;;  %v6517_v1 = vcombine.low %v16475_v44, %v16474_v53  ;;  %9590 = vperm.xlu0 %10418, %v9403_v51   ;;  %v16477_v40 = vld [vmem:[#allocation72_spill] sm:$0xff]  ;;  %v16479_v41 = vld [vmem:[#allocation105_spill] sm:$0xff] }
 0x23e   : > { %v6268_v13 = vcombine.low %v6260_v35, %v6267_v24  ;;  %v6429_v12 = vcombine.high %v6411_v14, %v6425_v28  ;;  %v6428_v29 = vcombine.low %v6411_v14, %v6425_v28  ;;  %v2769_v8 = vcombine.high %v16473_v59, %v16473_v59  ;;  %9585 = vperm.xlu1 %10419, %v9402_v56   ;;  %v8485_v14 = vpop.f32.mrf.mxu1  ;;  %v9405_v51 = vld [vmem:[%s15391_s3 + $0x130] sm:$0xff]  ;;  %v8750_v44 = vpop.f32.mrf.mxu0 }
 0x23f   : > { %v6342_v7 = vcombine.low %v2712_v15, %v2776_v20  ;;  %v6349_v39 = vrot.slane %v6341_v30, %v10603_v27  ;;  %v2784_v18 = vcombine.high %v2776_v20, %v2776_v20  ;;  %v2818_v61 = vrot.slane %v16477_v40, %v10603_v27  ;;  %v16481_v35 = vld [vmem:[#allocation40_spill] sm:$0xff]  ;;  %v16483_v15 = vld [vmem:[#allocation81_spill] sm:$0xff] }
 0x240   : > { %10290 = vmatmul.mubr.f32.gmra.mxu0 %v6268_v13  ;;  %9021 = vmatprep.mubr.f32.mxu1 %v6429_v12  ;;  %v2783_v60 = vrot.slane %v2769_v8, %v10603_v27  ;;  %v6607_v55 = vcombine.high %v16479_v41, %v16478_v23  ;;  %v8459_v24 = vadd.f32 %v14712_v43, %v16480_v36  ;;  %v9404_v43 = vld [vmem:[%s15391_s3 + $0x128] sm:$0xff]  ;;  %v14925_v22 = vpop.f32.mrf.mxu1  ;;  %v16485_v40 = vld [vmem:[#allocation112_spill] sm:$0xff] }
 0x241   : > { %10292 = vmatprep.mubr.msk.f32.mxu0 %vm10497_vm2, %v15879_v17  ;;  %9022 = vmatmul.mubr.f32.gmra.mxu1 %v6428_v29  ;;  %v6356_v11 = vrot.slane %v6342_v7, %v10603_v27  ;;  %v14914_v26 = vadd.f32 %v14743_v16, %v8454_v19  ;;  %v6606_v59 = vcombine.low %v16479_v41, %v16478_v23  ;;  %v16482_v19 = vld [vmem:[#allocation120_spill] sm:$0xff]  ;;  %v14944_v23 = vpop.f32.mrf.mxu0  ;;  %v9406_v41 = vld [vmem:[%s15391_s3 + $0x138] sm:$0xff] }
 0x242   : > { %9026 = vmatprep.mubr.f32.mxu1 %v6518_v58  ;;  %v2785_v20 = vcombine.high %v2783_v60, %v2783_v60  ;;  %v6430_v56 = vcombine.low %v2784_v18, %v2783_v60  ;;  %v2875_v28 = vcombine.high %v16481_v35, %v16481_v35  ;;  %v2882_v53 = vrot.slane %v16481_v35, %v10603_v27  ;;  %v8490_v18 = vpop.f32.mrf.mxu1  ;;  %v16486_v60 = vld [vmem:[#allocation74_spill] sm:$0xff] }
 0x243   : > { %v6357_v16 = vcombine.low %v6349_v39, %v6356_v11  ;;  %v3052_v30 = vcombine.low %v16483_v15, %v16482_v19  ;;  %v8464_v13 = vadd.f32 %v14755_v57, %v16484_v63  ;;  %v14932_v58 = vadd.f32 %v14775_v37, %v8459_v24  ;;  %9600 = vperm.xlu0 %10418, %v9405_v51   ;;  %v9407_v39 = vld [vmem:[%s15391_s3 + $0x140] sm:$0xf] }
 0x244   : > { %v6431_v12 = vcombine.low %v2785_v20, %v2818_v61  ;;  %v6438_v29 = vrot.slane %v6430_v56, %v10603_v27  ;;  %v2889_v8 = vrot.slane %v2875_v28, %v10603_v27  ;;  %v2890_v7 = vcombine.high %v2882_v53, %v2882_v53  ;;  %9595 = vperm.xlu1 %10419, %v9404_v43   ;;  %v14952_v14 = vpop.f32.mrf.mxu1  ;;  %v16487_v20 = vld [vmem:[#allocation121_spill] sm:$0xff]  ;;  %v16488_v56 = vld [vmem:[#allocation92_spill] sm:$0xff]  ;;  %v8755_v28 = vpop.f32.mrf.mxu0 }
 0x245   : > { %10293 = vmatmul.mubr.f32.gmra.mxu0 %v6357_v16  ;;  %9027 = vmatmul.mubr.f32.gmra.mxu1 %v6517_v1  ;;  %v10073_v57 = vcombine.high %v16485_v40, %v3052_v30  ;;  %v2948_v37 = vcombine.high %v16486_v60, %v16486_v60  ;;  %v2955_v61 = vrot.slane %v16486_v60, %v10603_v27  ;;  %v16489_v30 = vld [vmem:[#allocation126_spill] sm:$0xff]  ;;  %v16496_v28 = vld [vmem:[#allocation88_spill] sm:$0xff] }
 0x246   : > { %10295 = vmatprep.mubr.msk.f32.mxu0 %vm10497_vm2, %v15879_v17  ;;  %v6445_v36 = vrot.slane %v6431_v12, %v10603_v27  ;;  %9031 = vmatprep.mubr.f32.mxu1 %v6607_v55  ;;  %v2891_v1 = vcombine.high %v2889_v8, %v2889_v8  ;;  %v6519_v24 = vcombine.low %v2882_v53, %v2890_v7  ;;  %v16490_v55 = vld [vmem:[#allocation69_spill] sm:$0xff]  ;;  %v8495_v53 = vpop.f32.mrf.mxu1  ;;  %v16491_v12 = vld [vmem:[#allocation118_spill] sm:$0xff]  ;;  %v14963_v60 = vpop.f32.mrf.mxu0 }
 0x247   : > { %v6692_v51 = vrot.slane %v10073_v57, %v10603_v27  ;;  %v2962_v11 = vrot.slane %v2948_v37, %v10603_v27  ;;  %v2963_v43 = vcombine.high %v2955_v61, %v2955_v61  ;;  %v3123_v35 = vcombine.low %v16488_v56, %v16487_v20  ;;  %9610 = vperm.xlu0 %10418, %v9407_v39   ;;  %v16492_v37 = vld [vmem:[#allocation82_spill] sm:$0xff] }
 0x248   : > { %v6446_v44 = vcombine.low %v6438_v29, %v6445_v36  ;;  %v6520_v16 = vcombine.low %v2889_v8, %v2891_v1  ;;  %v6527_v15 = vrot.slane %v6519_v24, %v10603_v27  ;;  %v3125_v63 = vcombine.low %v16490_v55, %v16489_v30  ;;  %9605 = vperm.xlu1 %10419, %v9406_v41   ;;  %v8760_v1 = vpop.f32.mrf.mxu0 }
 0x249   : > { %9032 = vmatmul.mubr.f32.gmra.mxu1 %v6606_v59  ;;  %v6696_v7 = vcombine.high %v16491_v12, %v6692_v51  ;;  %v6695_v18 = vcombine.low %v16491_v12, %v6692_v51  ;;  %v2964_v40 = vcombine.high %v2962_v11, %v2962_v11  ;;  %v6608_v57 = vcombine.low %v2955_v61, %v2963_v43  ;;  %v16493_v43 = vld [vmem:[#allocation39_spill] sm:$0xff] }
 0x24a   : > { %10296 = vmatmul.mubr.f32.gmra.mxu0 %v6446_v44  ;;  %v6534_v29 = vrot.slane %v6520_v16, %v10603_v27  ;;  %v10079_v8 = vcombine.high %v16482_v19, %v3123_v35  ;;  %v10081_v39 = vcombine.high %v16487_v20, %v3125_v63  ;;  %v8469_v36 = vadd.f32 %v14782_v45, %v16492_v37  ;;  %v14980_v45 = vpop.f32.mrf.mxu1  ;;  %v14989_v16 = vpop.f32.mrf.mxu0  ;;  %v16497_v63 = vld [vmem:[#allocation109_spill] sm:$0xff]  ;;  %v16498_v37 = vld [vmem:[#allocation123_spill] sm:$0xff] }
 0x24b   : > { %10298 = vmatprep.mubr.msk.f32.mxu0 %vm10497_vm2, %v15879_v17  ;;  %9036 = vmatprep.mubr.f32.mxu1 %v6696_v7  ;;  %v6609_v59 = vcombine.low %v2962_v11, %v2964_v40  ;;  %v6616_v41 = vrot.slane %v6608_v57, %v10603_v27  ;;  %v14974_v61 = vadd.f32 %v14801_v47, %v8464_v13  ;;  %v16494_v11 = vld [vmem:[#allocation117_spill] sm:$0xff]  ;;  %v16495_v13 = vld [vmem:[#allocation127_spill] sm:$0xff] }
 0x24c   : > { %v6535_v24 = vcombine.low %v6527_v15, %v6534_v29  ;;  %v6767_v51 = vrot.slane %v10079_v8, %v10603_v27  ;;  %v6781_v19 = vrot.slane %v10081_v39, %v10603_v27  ;;  %v2997_v20 = vrot.slane %v16493_v43, %v10603_v27  ;;  %v8500_v7 = vpop.f32.mrf.mxu1  ;;  %v8765_v8 = vpop.f32.mrf.mxu0  ;;  %v16501_v43 = vld [vmem:[#allocation116_spill] sm:$0xff] }
 0x24d   : > { %9037 = vmatmul.mubr.f32.gmra.mxu1 %v6695_v18  ;;  %v6623_v56 = vrot.slane %v6609_v59, %v10603_v27  ;;  %v3054_v35 = vcombine.high %v16494_v11, %v16494_v11  ;;  %v3061_v47 = vrot.slane %v16494_v11, %v10603_v27  ;;  %v3169_v44 = vcombine.low %v16496_v28, %v16495_v13  ;;  %v16505_v8 = vld [vmem:[#allocation162_spill] sm:$0xff] }
 0x24e   : > { %10299 = vmatmul.mubr.f32.gmra.mxu0 %v6535_v24  ;;  %v6785_v15 = vcombine.high %v6767_v51, %v6781_v19  ;;  %v6784_v55 = vcombine.low %v6767_v51, %v6781_v19  ;;  %v8474_v53 = vadd.f32 %v14822_v42, %v16497_v63  ;;  %v14994_v12 = vadd.f32 %v14829_v6, %v8469_v36  ;;  %v16499_v6 = vld [vmem:[#allocation152_spill] sm:$0xff]  ;;  %v16500_v36 = vld [vmem:[#allocation142_spill] sm:$0xff]  ;;  %v15006_v24 = vpop.f32.mrf.mxu1 }
 0x24f   : > { %10301 = vmatprep.mubr.msk.f32.mxu0 %vm10497_vm2, %v15879_v17  ;;  %v6624_v18 = vcombine.low %v6616_v41, %v6623_v56  ;;  %v3068_v40 = vrot.slane %v3054_v35, %v10603_v27  ;;  %v3069_v57 = vcombine.high %v3061_v47, %v3061_v47  ;;  %v6697_v29 = vcombine.low %v2997_v20, %v3061_v47 }
 0x250   : > { %9041 = vmatprep.mubr.f32.mxu1 %v6785_v15  ;;  %v10085_v39 = vcombine.high %v16489_v30, %v3169_v44  ;;  %v3127_v59 = vcombine.high %v16498_v37, %v16498_v37  ;;  %v3134_v42 = vrot.slane %v16498_v37, %v10603_v27  ;;  %v6963_v1 = vcombine.high %v16500_v36, %v16499_v6  ;;  %v8505_v47 = vpop.f32.mrf.mxu1 }
 0x251   : > { %9042 = vmatmul.mubr.f32.gmra.mxu1 %v6784_v55  ;;  %v6698_v41 = vcombine.low %v3069_v57, %v3068_v40  ;;  %v6705_v51 = vrot.slane %v6697_v29, %v10603_v27  ;;  %v3070_v19 = vcombine.high %v3068_v40, %v3068_v40  ;;  %v8479_v20 = vadd.f32 %v14848_v33, %v16501_v43  ;;  %v16502_v33 = vld [vmem:[#allocation103_spill] sm:$0xff]  ;;  %v16503_v55 = vld [vmem:[#allocation141_spill] sm:$0xff]  ;;  %v16504_v57 = vld [vmem:[#allocation122_spill] sm:$0xff] }
 0x252   : > { %10302 = vmatmul.mubr.f32.gmra.mxu0 %v6624_v18  ;;  %v6856_v30 = vrot.slane %v10085_v39, %v10603_v27  ;;  %v3141_v56 = vrot.slane %v3127_v59, %v10603_v27  ;;  %v3142_v11 = vcombine.high %v3134_v42, %v3134_v42  ;;  %v15014_v35 = vadd.f32 %v14875_v50, %v8474_v53  ;;  %v16506_v39 = vld [vmem:[#allocation153_spill] sm:$0xff] }
 0x253   : > { %10304 = vmatprep.mubr.msk.f32.mxu0 %vm10497_vm2, %v15879_v17  ;;  %v6712_v13 = vrot.slane %v6698_v41, %v10603_v27  ;;  %v6786_v28 = vcombine.low %v3070_v19, %v3134_v42  ;;  %v6962_v44 = vcombine.low %v16500_v36, %v16499_v6  ;;  %v3176_v15 = vrot.slane %v16502_v33, %v10603_v27  ;;  %v16507_v6 = vld [vmem:[#allocation124_spill] sm:$0xff]  ;;  %v15036_v19 = vpop.f32.mrf.mxu0  ;;  %v16510_v33 = vld [vmem:[#allocation98_spill] sm:$0xff] }
 0x254   : > { %v6874_v63 = vcombine.high %v6856_v30, %v16503_v55  ;;  %v6873_v7 = vcombine.low %v6856_v30, %v16503_v55  ;;  %v6787_v18 = vcombine.low %v3142_v11, %v3141_v56  ;;  %v3143_v50 = vcombine.high %v3141_v56, %v3141_v56  ;;  %v16511_v55 = vld [vmem:[#allocation163_spill] sm:$0xff] }
 0x255   : > { %v6713_v53 = vcombine.low %v6705_v51, %v6712_v13  ;;  %v6794_v40 = vrot.slane %v6786_v28, %v10603_v27  ;;  %v3240_v29 = vrot.slane %v16504_v57, %v10603_v27  ;;  %v7052_v37 = vcombine.high %v16506_v39, %v16505_v8  ;;  %v8770_v11 = vpop.f32.mrf.mxu0  ;;  %v16509_v28 = vld [vmem:[#allocation158_spill] sm:$0xff] }
 0x256   : > { %9046 = vmatprep.mubr.f32.mxu1 %v6874_v63  ;;  %v6801_v59 = vrot.slane %v6787_v18, %v10603_v27  ;;  %v6875_v42 = vcombine.low %v3143_v50, %v3176_v15  ;;  %v8484_v36 = vadd.f32 %v14895_v10, %v16507_v6  ;;  %v15034_v41 = vadd.f32 %v14905_v52, %v8479_v20  ;;  %v16508_v52 = vld [vmem:[#allocation129_spill] sm:$0xff]  ;;  %v15052_v18 = vpop.f32.mrf.mxu1 }
 0x257   : > { %10305 = vmatmul.mubr.f32.gmra.mxu0 %v6713_v53  ;;  %9047 = vmatmul.mubr.f32.gmra.mxu1 %v6873_v7  ;;  %v3248_v51 = vcombine.high %v3240_v29, %v3240_v29  ;;  %v7051_v43 = vcombine.low %v16506_v39, %v16505_v8  ;;  %v3233_v30 = vcombine.high %v16504_v57, %v16504_v57  ;;  %v16512_v63 = vld [vmem:[#allocation133_spill] sm:$0xff]  ;;  %v16513_v53 = vld [vmem:[#allocation135_spill] sm:$0xff] }
 0x258   : > { %10307 = vmatprep.mubr.msk.f32.mxu0 %vm10497_vm2, %v15879_v17  ;;  %v6802_v56 = vcombine.low %v6794_v40, %v6801_v59  ;;  %9051 = vmatprep.mubr.f32.mxu1 %v6963_v1  ;;  %v6883_v10 = vrot.slane %v6875_v42, %v10603_v27  ;;  %v3313_v20 = vrot.slane %v16508_v52, %v10603_v27  ;;  %v16514_v39 = vld [vmem:[#allocation157_spill] sm:$0xff]  ;;  %v8510_v42 = vpop.f32.mrf.mxu1 }
 0x259   : > { %v6876_v47 = vcombine.low %v3240_v29, %v3248_v51  ;;  %v3247_v13 = vrot.slane %v3233_v30, %v10603_v27  ;;  %v3410_v15 = vcombine.low %v16510_v33, %v16509_v28  ;;  %v3481_v7 = vcombine.low %v16512_v63, %v16511_v55  ;;  %v16518_v63 = vld [vmem:[#allocation145_spill] sm:$0xff] }
 0x25a   : > { %v3321_v50 = vcombine.high %v3313_v20, %v3313_v20  ;;  %v8489_v1 = vadd.f32 %v14925_v22, %v16513_v53  ;;  %v15057_v40 = vadd.f32 %v14944_v23, %v8484_v36  ;;  %v3306_v57 = vcombine.high %v16508_v52, %v16508_v52  ;;  %v15067_v36 = vpop.f32.mrf.mxu0  ;;  %v15072_v11 = vpop.f32.mrf.mxu1  ;;  %v16520_v53 = vld [vmem:[#allocation130_spill] sm:$0xff] }
 0x25b   : > { %10308 = vmatmul.mubr.f32.gmra.mxu0 %v6802_v56  ;;  %9052 = vmatmul.mubr.f32.gmra.mxu1 %v6962_v44  ;;  %v6890_v29 = vrot.slane %v6876_v47, %v10603_v27  ;;  %v3249_v8 = vcombine.high %v3247_v13, %v3247_v13  ;;  %v10095_v59 = vcombine.high %v16514_v39, %v3410_v15  ;;  %v16515_v56 = vld [vmem:[#allocation57_spill] sm:$0xff] }
 0x25c   : > { %10310 = vmatprep.mubr.msk.f32.mxu0 %vm10497_vm2, %v15879_v17  ;;  %9056 = vmatprep.mubr.f32.mxu1 %v7052_v37  ;;  %v6965_v6 = vcombine.low %v3313_v20, %v3321_v50  ;;  %v10097_v22 = vcombine.high %v16509_v28, %v3481_v7  ;;  %v3320_v23 = vrot.slane %v3306_v57, %v10603_v27  ;;  %v16516_v28 = vld [vmem:[#allocation156_spill] sm:$0xff]  ;;  %v8775_v15 = vpop.f32.mrf.mxu0  ;;  %v16519_v50 = vld [vmem:[#allocation169_spill] sm:$0xff] }
 0x25d   : > { %v6891_v51 = vcombine.low %v6883_v10, %v6890_v29  ;;  %v6964_v30 = vcombine.low %v3247_v13, %v3249_v8  ;;  %v7123_v44 = vrot.slane %v10095_v59, %v10603_v27  ;;  %v3355_v52 = vrot.slane %v16515_v56, %v10603_v27  ;;  %v16517_v13 = vld [vmem:[#allocation164_spill] sm:$0xff]  ;;  %v8515_v29 = vpop.f32.mrf.mxu1 }
 0x25e   : > { %v6979_v47 = vrot.slane %v6965_v6, %v10603_v27  ;;  %v7137_v37 = vrot.slane %v10097_v22, %v10603_v27  ;;  %v3322_v20 = vcombine.high %v3320_v23, %v3320_v23  ;;  %v3419_v33 = vrot.slane %v16516_v28, %v10603_v27  ;;  %v15085_v6 = vpop.f32.mrf.mxu0  ;;  %v16524_v29 = vld [vmem:[#allocation182_spill] sm:$0xff] }
 0x25f   : > { %10311 = vmatmul.mubr.f32.gmra.mxu0 %v6891_v51  ;;  %9057 = vmatmul.mubr.f32.gmra.mxu1 %v7051_v43  ;;  %v6972_v10 = vrot.slane %v6964_v30, %v10603_v27  ;;  %v3483_v7 = vcombine.low %v16518_v63, %v16517_v13  ;;  %v3527_v57 = vcombine.low %v16520_v53, %v16519_v50  ;;  %v16521_v30 = vld [vmem:[#allocation180_spill] sm:$0xff] }
 0x260   : > { %10313 = vmatprep.mubr.msk.f32.mxu0 %vm10497_vm2, %v15879_v17  ;;  %v7141_v8 = vcombine.high %v7123_v44, %v7137_v37  ;;  %v7140_v39 = vcombine.low %v7123_v44, %v7137_v37  ;;  %v7053_v59 = vcombine.low %v3320_v23, %v3322_v20  ;;  %v7054_v42 = vcombine.low %v3355_v52, %v3419_v33  ;;  %v8780_v52 = vpop.f32.mrf.mxu0  ;;  %v15100_v37 = vpop.f32.mrf.mxu1 }
 0x261   : > { %v6980_v22 = vcombine.low %v6972_v10, %v6979_v47  ;;  %v10103_v43 = vcombine.high %v16511_v55, %v3483_v7  ;;  %v10105_v51 = vcombine.high %v16517_v13, %v3527_v57  ;;  %v8494_v56 = vadd.f32 %v14952_v14, %v16521_v30  ;;  %v16523_v13 = vld [vmem:[#allocation168_spill] sm:$0xff]  ;;  %v15128_v52 = vld [vmem:[%s10570_s12 + $0x1c8] sm:$0xff] }
 0x262   : > { %9061 = vmatprep.mubr.f32.mxu1 %v7141_v8  ;;  %v7061_v15 = vrot.slane %v7053_v59, %v10603_v27  ;;  %v7068_v63 = vrot.slane %v7054_v42, %v10603_v27  ;;  %v15094_v44 = vadd.f32 %v14963_v60, %v8489_v1  ;;  %v3412_v23 = vcombine.high %v16516_v28, %v16516_v28  ;;  %v16522_v1 = vld [vmem:[#allocation161_spill] sm:$0xff]  ;;  %v10479_v28 = vld [vmem:[%s10570_s12 + $0x1b0] sm:$0xff]  ;;  %v15109_v50 = vpop.f32.mrf.mxu0 }
 0x263   : > { %10314 = vmatmul.mubr.f32.gmra.mxu0 %v6980_v22  ;;  %9062 = vmatmul.mubr.f32.gmra.mxu1 %v7140_v39  ;;  %v7212_v55 = vrot.slane %v10103_v43, %v10603_v27  ;;  %v7226_v47 = vrot.slane %v10105_v51, %v10603_v27  ;;  %v3427_v14 = vcombine.high %v3419_v33, %v3419_v33  ;;  %v8520_v39 = vpop.f32.mrf.mxu1 }
 0x264   : > { %10316 = vmatprep.mubr.msk.f32.mxu0 %vm10497_vm2, %v15879_v17  ;;  %v7069_v20 = vcombine.low %v7061_v15, %v7068_v63  ;;  %v3426_v60 = vrot.slane %v3412_v23, %v10603_v27  ;;  %v3492_v10 = vrot.slane %v16522_v1, %v10603_v27  ;;  %v3557_v7 = vcombine.low %v10479_v28, %v16523_v13  ;;  %v8785_v51 = vpop.f32.mrf.mxu0 }
 0x265   : > { %v7230_v53 = vcombine.high %v7212_v55, %v7226_v47  ;;  %v7229_v57 = vcombine.low %v7212_v55, %v7226_v47  ;;  %v3558_v33 = vcombine.high %v10479_v28, %v16523_v13  ;;  %v8499_v8 = vadd.f32 %v14980_v45, %v16524_v29  ;;  %v15121_v45 = vpop.f32.mrf.mxu1  ;;  %v16526_v28 = vld [vmem:[#allocation186_spill] sm:$0xff] }
 0x266   : > { %v3428_v59 = vcombine.high %v3426_v60, %v3426_v60  ;;  %v7142_v42 = vcombine.low %v3427_v14, %v3426_v60  ;;  %v3579_v22 = vrot.slane %v3557_v7, %v10603_v27  ;;  %v15116_v43 = vadd.f32 %v14989_v16, %v8494_v56  ;;  %v15144_v51 = vpop.f32.mrf.mxu0 }
 0x267   : > { %10317 = vmatmul.mubr.f32.gmra.mxu0 %v7069_v20  ;;  %9066 = vmatprep.mubr.f32.mxu1 %v7230_v53  ;;  %v3586_v30 = vrot.slane %v3558_v33, %v10603_v27  ;;  %v3485_v15 = vcombine.high %v16522_v1, %v16522_v1  ;;  %v3500_v63 = vcombine.high %v3492_v10, %v3492_v10  ;;  %v16525_v20 = vld [vmem:[#allocation151_spill] sm:$0xff]  ;;  %v10481_v1 = vld [vmem:[%s10570_s12 + $0x1b8] sm:$0xff]  ;;  %v8525_v7 = vpop.f32.mrf.mxu1 }
 0x268   : > { %10319 = vmatprep.mubr.msk.f32.mxu0 %vm10497_vm2, %v15879_v17  ;;  %9067 = vmatmul.mubr.f32.gmra.mxu1 %v7229_v57  ;;  %v7143_v23 = vcombine.low %v3428_v59, %v3492_v10  ;;  %v7150_v16 = vrot.slane %v7142_v42, %v10603_v27  ;;  %v7301_v56 = vrot.slane %v3579_v22, %v10603_v27  ;;  %v16527_v57 = vld [vmem:[#allocation159_spill] sm:$0xff]  ;;  %v15159_v7 = vld [vmem:[%s10570_s12 + $0x1d0] sm:$0xff] }
 0x269   : > { %v7315_v47 = vrot.slane %v3586_v30, %v10603_v27  ;;  %v3499_v14 = vrot.slane %v3485_v15, %v10603_v27  ;;  %v3534_v60 = vrot.slane %v16525_v20, %v10603_v27  ;;  %v3630_v13 = vcombine.low %v10481_v1, %v16526_v28  ;;  %v16529_v20 = vld [vmem:[#allocation171_spill] sm:$0xff] }
 0x26a   : > { %v7157_v10 = vrot.slane %v7143_v23, %v10603_v27  ;;  %v3631_v53 = vcombine.high %v10481_v1, %v16526_v28  ;;  %v8504_v33 = vadd.f32 %v15006_v24, %v16527_v57  ;;  %v15142_v29 = vadd.f32 %v15036_v19, %v8499_v8 }
 0x26b   : > { %v7319_v39 = vcombine.high %v7301_v56, %v7315_v47  ;;  %v7318_v59 = vcombine.low %v7301_v56, %v7315_v47  ;;  %v3501_v42 = vcombine.high %v3499_v14, %v3499_v14  ;;  %v7231_v22 = vcombine.low %v3500_v63, %v3499_v14  ;;  %v10482_v56 = vld [vmem:[%s10570_s12 + $0x1c0] sm:$0xf]  ;;  %v16530_v63 = vld [vmem:[#allocation155_spill] sm:$0xff]  ;;  %v8790_v14 = vpop.f32.mrf.mxu0 }
 0x26c   : > { %16528 = vst [vmem:[#allocation26_spill] sm:$0xff] %v15142_v29  ;;  %v7158_v30 = vcombine.low %v7150_v16, %v7157_v10  ;;  %v3652_v15 = vrot.slane %v3630_v13, %v10603_v27  ;;  %v3659_v23 = vrot.slane %v3631_v53, %v10603_v27  ;;  %v3591_v1 = vcombine.high %v16529_v20, %v16529_v20 }
 0x26d   : > { %9071 = vmatprep.mubr.f32.mxu1 %v7319_v39  ;;  %v7232_v24 = vcombine.low %v3501_v42, %v3534_v60  ;;  %v7239_v19 = vrot.slane %v7231_v22, %v10603_v27  ;;  %v3598_v8 = vrot.slane %v16529_v20, %v10603_v27  ;;  %v3691_v47 = vcombine.low %v10482_v56, %v16530_v63  ;;  %v16531_v39 = vld [vmem:[#allocation189_spill] sm:$0xff]  ;;  %v15174_v60 = vpop.f32.mrf.mxu0 }
 0x26e   : > { %10320 = vmatmul.mubr.f32.gmra.mxu0 %v7158_v30  ;;  %9072 = vmatmul.mubr.f32.gmra.mxu1 %v7318_v59  ;;  %v7390_v16 = vrot.slane %v3652_v15, %v10603_v27  ;;  %v7404_v28 = vrot.slane %v3659_v23, %v10603_v27  ;;  %v3605_v13 = vrot.slane %v3591_v1, %v10603_v27  ;;  %v16532_v59 = vld [vmem:[#allocation184_spill] sm:$0xff]  ;;  %v16534_v63 = vld [vmem:[#allocation185_spill] sm:$0xff] }
 0x26f   : > { %10322 = vmatprep.mubr.msk.f32.mxu0 %vm10497_vm2, %v15879_v17  ;;  %v7246_v10 = vrot.slane %v7232_v24, %v10603_v27  ;;  %v3606_v53 = vcombine.high %v3598_v8, %v3598_v8  ;;  %v3705_v57 = vrot.slane %v3691_v47, %v10603_v27  ;;  %v3768_v42 = vcombine.low %v16532_v59, %v16531_v39  ;;  %v16533_v23 = vld [vmem:[#allocation148_spill] sm:$0xff]  ;;  %v15172_v24 = vpop.f32.mrf.mxu1 }
 0x270   : > { %v7408_v22 = vcombine.high %v7390_v16, %v7404_v28  ;;  %v7407_v30 = vcombine.low %v7390_v16, %v7404_v28  ;;  %v3607_v15 = vcombine.high %v3605_v13, %v3605_v13  ;;  %v8509_v20 = vadd.f32 %v15052_v18, %v16533_v23  ;;  %v16536_v16 = vld [vmem:[#allocation187_spill] sm:$0xff] }
 0x271   : > { %v7247_v1 = vcombine.low %v7239_v19, %v7246_v10  ;;  %v7320_v56 = vcombine.low %v3598_v8, %v3606_v53  ;;  %v10111_v14 = vcombine.low %v3705_v57, %v16534_v63  ;;  %v10113_v55 = vcombine.high %v16534_v63, %v3768_v42  ;;  %v15187_v53 = vld [vmem:[%s10570_s12 + $0x1d8] sm:$0xf]  ;;  %v16540_v63 = vld [vmem:[#allocation191_spill] sm:$0xff] }
 0x272   : > { %9076 = vmatprep.mubr.f32.mxu1 %v7408_v22  ;;  %v7321_v47 = vcombine.low %v3605_v13, %v3607_v15  ;;  %v15177_v59 = vadd.f32 %v15067_v36, %v8504_v33  ;;  %v3664_v28 = vcombine.high %v16536_v16, %v16536_v16  ;;  %v3671_v18 = vrot.slane %v16536_v16, %v10603_v27  ;;  %v8530_v36 = vpop.f32.mrf.mxu1  ;;  %v8795_v33 = vpop.f32.mrf.mxu0  ;;  %v16538_v15 = vld [vmem:[#allocation190_spill] sm:$0xff]  ;;  %v16541_v16 = vld [vmem:[#allocation188_spill] sm:$0xff] }
 0x273   : > { %10323 = vmatmul.mubr.f32.gmra.mxu0 %v7247_v1  ;;  %9077 = vmatmul.mubr.f32.gmra.mxu1 %v7407_v30  ;;  %v7328_v19 = vrot.slane %v7320_v56, %v10603_v27  ;;  %v7479_v8 = vrot.slane %v10111_v14, %v10603_v27  ;;  %v7493_v10 = vrot.slane %v10113_v55, %v10603_v27  ;;  %v16537_v30 = vld [vmem:[#allocation192_spill] sm:$0xff]  ;;  %v16539_v55 = vld [vmem:[#allocation193_spill] sm:$0xff] }
 0x274   : > { %16535 = vst [vmem:[#allocation59_spill] sm:$0xff] %v15177_v59  ;;  %10325 = vmatprep.mubr.msk.f32.mxu0 %vm10497_vm2, %v15879_v17  ;;  %v7335_v57 = vrot.slane %v7321_v47, %v10603_v27  ;;  %v3678_v42 = vrot.slane %v3664_v28, %v10603_v27  ;;  %v3679_v22 = vcombine.high %v3671_v18, %v3671_v18  ;;  %v15200_v33 = vpop.f32.mrf.mxu1  ;;  %v15203_v28 = vpop.f32.mrf.mxu0 }
 0x275   : > { %v3839_v23 = vcombine.low %v16538_v15, %v16537_v30  ;;  %v7497_v1 = vcombine.high %v7479_v8, %v7493_v10  ;;  %v7496_v56 = vcombine.low %v7479_v8, %v7493_v10  ;;  %v3841_v14 = vcombine.low %v16540_v63, %v16539_v55 }
 0x276   : > { %v8514_v36 = vadd.f32 %v15072_v11, %v16541_v16  ;;  %v7336_v13 = vcombine.low %v7328_v19, %v7335_v57  ;;  %v3680_v59 = vcombine.high %v3678_v42, %v3678_v42  ;;  %v7409_v29 = vcombine.low %v3671_v18, %v3679_v22  ;;  %v16545_v19 = vld [vmem:[#allocation167_spill] sm:$0xff]  ;;  %v8535_v18 = vpop.f32.mrf.mxu1 }
 0x277   : > { %v10119_v47 = vcombine.high %v16531_v39, %v3839_v23  ;;  %9081 = vmatprep.mubr.f32.mxu1 %v7497_v1  ;;  %v10121_v15 = vcombine.high %v16537_v30, %v3841_v14  ;;  %v15207_v8 = vadd.f32 %v15085_v6, %v8509_v20  ;;  %v16543_v10 = vrot.slane %v15159_v7, 2  ;;  %v8800_v23 = vpop.f32.mrf.mxu0  ;;  %v16546_v1 = vld [vmem:[#allocation160_spill] sm:$0xff] }
 0x278   : > { %v16544_v63 = vrot.slane %v15128_v52, 2  ;;  %v3713_v57 = vrot.slane %v16545_v19, %v10603_v27  ;;  %10326 = vmatmul.mubr.f32.gmra.mxu0 %v7336_v13  ;;  %9082 = vmatmul.mubr.f32.gmra.mxu1 %v7496_v56  ;;  %v7410_v39 = vcombine.low %v3678_v42, %v3680_v59  ;;  %v7417_v22 = vrot.slane %v7409_v29, %v10603_v27  ;;  %v8538_v13 = vpop.f32.mrf.mxu1  ;;  %v16548_v42 = vld [vmem:[#allocation194_spill] sm:$0xff] }
 0x279   : > { %16542 = vst [vmem:[#allocation178_spill] sm:$0xff] %v15207_v8  ;;  %v7568_v30 = vrot.slane %v10119_v47, %v10603_v27  ;;  %10328 = vmatprep.mubr.msk.f32.mxu0 %vm10497_vm2, %v15879_v17  ;;  %v7582_v6 = vrot.slane %v10121_v15, %v10603_v27  ;;  %v16547_v14 = vrot.slane %v16546_v1, 1  ;;  %v8519_v29 = vadd.f32 %v15100_v37, %v16548_v42  ;;  %v16552_v8 = vld [vmem:[#allocation35_spill] sm:$0xff] }
 0x27a   : > { %v588_v11 = vsel %vm474_vm1, %v16544_v63, %v16543_v10  ;;  %v7424_v59 = vrot.slane %v7410_v39, %v10603_v27  ;;  %v15229_v56 = vadd.f32 %v15109_v50, %v8514_v36  ;;  %v16550_v47 = vrot.slane %v15187_v53, 2  ;;  %v8803_v63 = vpop.f32.mrf.mxu0  ;;  %v8540_v1 = vpop.f32.mrf.mxu1 }
 0x27b   : > { %v3770_v52 = vcombine.high %v588_v11, %v588_v11  ;;  %v3777_v20 = vrot.slane %v588_v11, %v10603_v27  ;;  %v3870_v16 = vcombine.low %v15187_v53, %v16547_v14  ;;  %v16551_v15 = vmov %v16543_v10 }
 0x27c   : > { %16549 = vst [vmem:[#allocation47_spill] sm:$0xff] %v15229_v56  ;;  %v590_v10 = vsel %vm474_vm1, %v16551_v15, %v16550_v47  ;;  %v7586_v11 = vcombine.high %v7568_v30, %v7582_v6  ;;  %v7585_v19 = vcombine.low %v7568_v30, %v7582_v6  ;;  %v7425_v39 = vcombine.low %v7417_v22, %v7424_v59  ;;  %v8805_v50 = vpop.f32.mrf.mxu0  ;;  %v16553_v6 = vld [vmem:[#allocation195_spill] sm:$0xff]  ;;  %v8543_v22 = vpop.f32.mrf.mxu1 }
 0x27d   : > { %v3784_v18 = vrot.slane %v3770_v52, %v10603_v27  ;;  %v3785_v23 = vcombine.high %v3777_v20, %v3777_v20  ;;  %v7498_v14 = vcombine.low %v3713_v57, %v3777_v20  ;;  %v3884_v37 = vrot.slane %v3870_v16, %v10603_v27  ;;  %v16557_v50 = vld [vmem:[#allocation45_spill] sm:$0xff] }
 0x27e   : > { %v3843_v42 = vcombine.high %v590_v10, %v590_v10  ;;  %9086 = vmatprep.mubr.f32.mxu1 %v7586_v11  ;;  %v3850_v7 = vrot.slane %v590_v10, %v10603_v27  ;;  %v8524_v47 = vadd.f32 %v15121_v45, %v16552_v8  ;;  %10329 = vmatmul.mubr.f32.gmra.mxu0 %v7425_v39  ;;  %v8808_v45 = vpop.f32.mrf.mxu0  ;;  %v16554_v11 = vrot.slane %v15187_v53, 2  ;;  %v8545_v1 = vpop.f32.mrf.mxu1 }
 0x27f   : > { %v7499_v36 = vcombine.low %v3785_v23, %v3784_v18  ;;  %v3786_v56 = vcombine.high %v3784_v18, %v3784_v18  ;;  %9087 = vmatmul.mubr.f32.gmra.mxu1 %v7585_v19  ;;  %v7506_v30 = vrot.slane %v7498_v14, %v10603_v27  ;;  %v3885_v52 = vcombine.low %v16553_v6, %v3884_v37  ;;  %v16555_v18 = vld [vmem:[#allocation27_spill] sm:$0xff]  ;;  %v16559_v6 = vld [vmem:[#allocation53_spill] sm:$0xff] }
 0x280   : > { %v3857_v57 = vrot.slane %v3843_v42, %v10603_v27  ;;  %10331 = vmatprep.mubr.msk.f32.mxu0 %vm10497_vm2, %v15879_v17  ;;  %v3858_v16 = vcombine.high %v3850_v7, %v3850_v7  ;;  %v15248_v15 = vadd.f32 %v15144_v51, %v8519_v29  ;;  %v3892_v19 = vrot.slane %v16554_v11, %v10603_v27  ;;  %v8810_v51 = vpop.f32.mrf.mxu0  ;;  %v16556_v29 = vld [vmem:[#allocation181_spill] sm:$0xff] }
 0x281   : > { %v7513_v20 = vrot.slane %v7499_v36, %v10603_v27  ;;  %v7587_v59 = vcombine.low %v3786_v56, %v3850_v7  ;;  %v10125_v8 = vcombine.high %v16539_v55, %v3885_v52  ;;  %v8529_v23 = vadd.f32 %v15172_v24, %v16555_v18  ;;  %v10485_v55 = vld [vmem:[%s15390_s2] ss:$0 sm:$0xff] }
 0x282   : > { %v3859_v10 = vcombine.high %v3857_v57, %v3857_v57  ;;  %v7588_v14 = vcombine.low %v3858_v16, %v3857_v57  ;;  %v15258_v56 = vadd.f32 %v15174_v60, %v8524_v47  ;;  %v8279_v42 = vadd.f32 %v10485_v55, %v16556_v29  ;;  %v16558_v47 = vld [vmem:[#allocation36_spill] sm:$0xff]  ;;  %v8548_v57 = vpop.f32.mrf.mxu1 }
 0x283   : > { %v7514_v39 = vcombine.low %v7506_v30, %v7513_v20  ;;  %v7595_v37 = vrot.slane %v7587_v59, %v10603_v27  ;;  %v7637_v53 = vrot.slane %v10125_v8, %v10603_v27  ;;  %v8534_v24 = vadd.f32 %v15200_v33, %v16557_v50 }
 0x284   : > { %v15268_v36 = vadd.f32 %v15203_v28, %v8529_v23  ;;  %v7602_v7 = vrot.slane %v7588_v14, %v10603_v27  ;;  %v7640_v60 = vcombine.low %v3859_v10, %v3892_v19  ;;  %v8539_v30 = vadd.f32 %v8538_v13, %v16558_v47  ;;  %v8550_v28 = vpop.f32.mrf.mxu1 }
 0x285   : > { %10332 = vmatmul.mubr.f32.gmra.mxu0 %v7514_v39  ;;  %v8544_v52 = vadd.f32 %v8543_v22, %v16559_v6  ;;  %v7639_v20 = vcombine.high %v7637_v53, %v7637_v53  ;;  %v15275_v16 = vadd.f32 %v8803_v63, %v8534_v24  ;;  %v8549_v59 = vadd.f32 %v8548_v57, %v8279_v42  ;;  %v16560_v63 = vld [vmem:[#allocation183_spill] sm:$0xff] }
 0x286   : > { %10334 = vmatprep.mubr.msk.f32.mxu0 %vm10497_vm2, %v15879_v17  ;;  %v7603_v33 = vcombine.low %v7595_v37, %v7602_v7  ;;  %v15277_v8 = vadd.f32 %v8808_v45, %v8539_v30  ;;  %v7647_v10 = vrot.slane %v7640_v60, %v10603_v27  ;;  %v8284_v11 = vadd.f32 %v10485_v55, %v16560_v63  ;;  %v16561_v30 = vld [vmem:[#allocation44_spill] sm:$0xff] }
 0x287   : > { %9091 = vmatprep.mubr.f32.mxu1 %v7639_v20  ;;  %v8813_v13 = vpop.f32.mrf.mxu0 }
 0x288   : > { %9092 = vmatmul.mubr.f32.gmra.mxu1 %v7637_v53  ;;  %v15282_v22 = vadd.f32 %v8813_v13, %v8544_v52  ;;  %v9411_v53 = vpop.permute.xlu0 %9410  ;;  %v16562_v13 = vld [vmem:[#allocation177_spill] sm:$0xff] }
 0x289   : > { %10335 = vmatmul.mubr.f32.gmra.mxu0 %v7603_v33  ;;  %v8815_v19 = vpop.f32.mrf.mxu0 }
 0x28a   : > { %10337 = vmatprep.mubr.msk.f32.mxu0 %vm10497_vm2, %v15879_v17 }
 0x28b   : > { %v8553_v18 = vpop.f32.mrf.mxu1 }
 0x28c   : > { %v8554_v45 = vadd.f32 %v8553_v18, %v8284_v11  ;;  %v9416_v20 = vpop.permute.xlu0 %9415 }
 0x28d   : > { %10338 = vmatmul.mubr.f32.gmra.mxu0 %v7647_v10  ;;  %v8555_v23 = vpop.f32.mrf.mxu1  ;;  %v9421_v10 = vpop.permute.xlu1 %9420 }
 0x28e   : > { %v8818_v1 = vpop.f32.mrf.mxu0 }
 0x28f   : > { %v15285_v39 = vadd.f32 %v8818_v1, %v8549_v59  ;;  %v8893_v14 = vpop.f32.mrf.mxu1 }
 0x290   : > { %v8820_v37 = vpop.f32.mrf.mxu0  ;;  %v8894_v50 = vadd.f32 %v8893_v14, %v14374_v5 }
 0x291   : > { %v8895_v27 = vpop.f32.mrf.mxu1 }
 0x292   : > { %v8823_v51 = vpop.f32.mrf.mxu0 }
 0x293   : > { %v15288_v29 = vadd.f32 %v8823_v51, %v8554_v45  ;;  %v8898_v17 = vpop.f32.mrf.mxu1 }
 0x294   : > { %v8825_v42 = vpop.f32.mrf.mxu0  ;;  %v8899_v6 = vadd.f32 %v8898_v17, %v16561_v30  ;;  %v16563_v17 = vld [vmem:[#allocation54_spill] sm:$0xff] }
 0x295   : > { %v8900_v55 = vpop.f32.mrf.mxu1 }
 0x296   : > { %v9163_v24 = vpop.f32.mrf.mxu0 }
 0x297   : > { %v9164_v7 = vadd.f32 %v9163_v24, %v8894_v50  ;;  %v8903_v60 = vpop.f32.mrf.mxu1  ;;  %v9426_v24 = vpop.permute.xlu1 %9425 }
 0x298   : > { %v10219_v47 = vpop.f32.mrf.mxu0  ;;  %v8904_v63 = vadd.f32 %v8903_v60, %v16562_v13 }
 0x299   : > { %9654 = vst [vmem:[%s15294_s26] sm:$0xff] %v9164_v7  ;;  %v8905_v52 = vpop.f32.mrf.mxu1  ;;  %v9613_v59 = vmul.f32 %v9411_v53, %v9164_v7 }
 0x29a   : > { %v9168_v57 = vpop.f32.mrf.mxu0 }
 0x29b   : > { %v9169_v5 = vadd.f32 %v9168_v57, %v8899_v6  ;;  %v9744_v45 = vmul.f32 %v9613_v59, %v9164_v7 }
 0x29c   : > { %v8908_v33 = vpop.f32.mrf.mxu1  ;;  %v10222_v28 = vpop.f32.mrf.mxu0 }
 0x29d   : > { %9655 = vst [vmem:[%s15294_s26 + $0x8] sm:$0xff] %v9169_v5  ;;  %v9614_v11 = vmul.f32 %v9416_v20, %v9169_v5  ;;  %v8909_v42 = vadd.f32 %v8908_v33, %v16563_v17  ;;  %v9436_v17 = vpop.permute.xlu1 %9435 }
 0x29e   : > { %v8910_v19 = vpop.f32.mrf.mxu1 }
 0x29f   : > { %v9173_v18 = vpop.f32.mrf.mxu0  ;;  %v9695_v23 = vadd.f32 %v9614_v11, %v9613_v59  ;;  %v9745_v1 = vmul.f32 %v9614_v11, %v9169_v5 }
 0x2a0   : > { %v9174_v14 = vadd.f32 %v9173_v18, %v8904_v63  ;;  %v8913_v37 = vpop.f32.mrf.mxu1 }
 0x2a1   : > { %v10225_v27 = vpop.f32.mrf.mxu0  ;;  %v9785_v51 = vadd.f32 %v9745_v1, %v9744_v45  ;;  %v8914_v59 = vadd.f32 %v8913_v37, %v14477_v46 }
 0x2a2   : > { %9656 = vst [vmem:[%s15294_s26 + $0x10] sm:$0xff] %v9174_v14  ;;  %v9615_v53 = vmul.f32 %v9421_v10, %v9174_v14  ;;  %v8915_v50 = vpop.f32.mrf.mxu1  ;;  %v9431_v10 = vpop.permute.xlu0 %9430 }
 0x2a3   : > { %v9178_v55 = vpop.f32.mrf.mxu0 }
 0x2a4   : > { %v9696_v60 = vadd.f32 %v9695_v23, %v9615_v53  ;;  %v9746_v47 = vmul.f32 %v9615_v53, %v9174_v14  ;;  %v9179_v30 = vadd.f32 %v9178_v55, %v8909_v42  ;;  %v8918_v6 = vpop.f32.mrf.mxu1 }
 0x2a5   : > { %v10228_v52 = vpop.f32.mrf.mxu0  ;;  %v8919_v45 = vadd.f32 %v8918_v6, %v14500_v3 }
 0x2a6   : > { %v9786_v7 = vadd.f32 %v9785_v51, %v9746_v47  ;;  %9657 = vst [vmem:[%s15294_s26 + $0x18] sm:$0xff] %v9179_v30  ;;  %v9616_v57 = vmul.f32 %v9426_v24, %v9179_v30  ;;  %v8920_v20 = vpop.f32.mrf.mxu1  ;;  %v9441_v6 = vpop.permute.xlu0 %9440 }
 0x2a8   : > { %v9697_v5 = vadd.f32 %v9696_v60, %v9616_v57  ;;  %v9747_v28 = vmul.f32 %v9616_v57, %v9179_v30  ;;  %v9183_v33 = vpop.f32.mrf.mxu0  ;;  %v8923_v13 = vpop.f32.mrf.mxu1 }
 0x2a9   : > { %v9184_v63 = vadd.f32 %v9183_v33, %v8914_v59  ;;  %v8924_v50 = vadd.f32 %v8923_v13, %v14529_v0 }
 0x2aa   : > { %v9787_v11 = vadd.f32 %v9786_v7, %v9747_v28  ;;  %v10231_v19 = vpop.f32.mrf.mxu0  ;;  %v8925_v18 = vpop.f32.mrf.mxu1 }
 0x2ab   : > { %v9617_v23 = vmul.f32 %v9431_v10, %v9184_v63  ;;  %9658 = vst [vmem:[%s15294_s26 + $0x20] sm:$0xff] %v9184_v63 }
 0x2ac   : > { %v9188_v1 = vpop.f32.mrf.mxu0  ;;  %v8928_v14 = vpop.f32.mrf.mxu1 }
 0x2ad   : > { %v9698_v27 = vadd.f32 %v9697_v5, %v9617_v23  ;;  %v9748_v51 = vmul.f32 %v9617_v23, %v9184_v63  ;;  %v9189_v46 = vadd.f32 %v9188_v1, %v8919_v45  ;;  %v8929_v33 = vadd.f32 %v8928_v14, %v14548_v49  ;;  %v9446_v63 = vpop.permute.xlu1 %9445 }
 0x2ae   : > { %v10234_v37 = vpop.f32.mrf.mxu0  ;;  %v8930_v42 = vpop.f32.mrf.mxu1 }
 0x2af   : > { %v9788_v53 = vadd.f32 %v9787_v11, %v9748_v51  ;;  %v9618_v55 = vmul.f32 %v9436_v17, %v9189_v46  ;;  %9659 = vst [vmem:[%s15294_s26 + $0x28] sm:$0xff] %v9189_v46  ;;  %v9451_v51 = vpop.permute.xlu0 %9450 }
 0x2b0   : > { %v9193_v24 = vpop.f32.mrf.mxu0 }
 0x2b1   : > { %v9699_v60 = vadd.f32 %v9698_v27, %v9618_v55  ;;  %v9749_v47 = vmul.f32 %v9618_v55, %v9189_v46  ;;  %v9194_v3 = vadd.f32 %v9193_v24, %v8924_v50 }
 0x2b2   : > { %v8933_v30 = vpop.f32.mrf.mxu1  ;;  %v10237_v52 = vpop.f32.mrf.mxu0 }
 0x2b3   : > { %v9789_v7 = vadd.f32 %v9788_v53, %v9749_v47  ;;  %v9619_v57 = vmul.f32 %v9441_v6, %v9194_v3  ;;  %9660 = vst [vmem:[%s15294_s26 + $0x30] sm:$0xff] %v9194_v3  ;;  %v8934_v45 = vadd.f32 %v8933_v30, %v14574_v62 }
 0x2b4   : > { %v8935_v20 = vpop.f32.mrf.mxu1 }
 0x2b5   : > { %v9700_v59 = vadd.f32 %v9699_v60, %v9619_v57  ;;  %v9750_v5 = vmul.f32 %v9619_v57, %v9194_v3  ;;  %v9456_v60 = vpop.permute.xlu1 %9455 }
 0x2b6   : > { %v8938_v28 = vpop.f32.mrf.mxu1 }
 0x2b7   : > { %v9790_v0 = vadd.f32 %v9789_v7, %v9750_v5  ;;  %v9198_v13 = vpop.f32.mrf.mxu0  ;;  %v8939_v53 = vadd.f32 %v8938_v28, %v14608_v9 }
 0x2b8   : > { %v8940_v10 = vpop.f32.mrf.mxu1  ;;  %v9199_v11 = vadd.f32 %v9198_v13, %v8929_v33  ;;  %v9461_v33 = vpop.permute.xlu0 %9460 }
 0x2b9   : > { %v10240_v19 = vpop.f32.mrf.mxu0 }
 0x2ba   : > { %v8943_v18 = vpop.f32.mrf.mxu1  ;;  %v9620_v23 = vmul.f32 %v9446_v63, %v9199_v11  ;;  %9661 = vst [vmem:[%s15294_s26 + $0x38] sm:$0xff] %v9199_v11 }
 0x2bb   : > { %v9203_v1 = vpop.f32.mrf.mxu0  ;;  %v8944_v7 = vadd.f32 %v8943_v18, %v14637_v21 }
 0x2bc   : > { %v8945_v27 = vpop.f32.mrf.mxu1  ;;  %v9701_v17 = vadd.f32 %v9700_v59, %v9620_v23  ;;  %v9751_v46 = vmul.f32 %v9620_v23, %v9199_v11  ;;  %v9204_v37 = vadd.f32 %v9203_v1, %v8934_v45  ;;  %v9466_v1 = vpop.permute.xlu1 %9465 }
 0x2bd   : > { %v10243_v42 = vpop.f32.mrf.mxu0 }
 0x2be   : > { %v8948_v49 = vpop.f32.mrf.mxu1  ;;  %v9791_v14 = vadd.f32 %v9790_v0, %v9751_v46  ;;  %v9621_v50 = vmul.f32 %v9451_v51, %v9204_v37  ;;  %9662 = vst [vmem:[%s15294_s26 + $0x40] sm:$0xff] %v9204_v37 }
 0x2bf   : > { %v9208_v55 = vpop.f32.mrf.mxu0  ;;  %v8949_v10 = vadd.f32 %v8948_v49, %v14655_v54 }
 0x2c0   : > { %v8950_v24 = vpop.f32.mrf.mxu1  ;;  %v9702_v62 = vadd.f32 %v9701_v17, %v9621_v50  ;;  %v9752_v47 = vmul.f32 %v9621_v50, %v9204_v37  ;;  %v9209_v3 = vadd.f32 %v9208_v55, %v8939_v53  ;;  %v9471_v50 = vpop.permute.xlu0 %9470 }
 0x2c1   : > { %v10246_v30 = vpop.f32.mrf.mxu0 }
 0x2c2   : > { %v8953_v6 = vpop.f32.mrf.mxu1  ;;  %v9792_v52 = vadd.f32 %v9791_v14, %v9752_v47  ;;  %v9622_v57 = vmul.f32 %v9456_v60, %v9209_v3  ;;  %9663 = vst [vmem:[%s15294_s26 + $0x48] sm:$0xff] %v9209_v3 }
 0x2c3   : > { %v9213_v20 = vpop.f32.mrf.mxu0  ;;  %v8954_v17 = vadd.f32 %v8953_v6, %v14684_v34 }
 0x2c4   : > { %v8955_v59 = vpop.f32.mrf.mxu1  ;;  %v9703_v5 = vadd.f32 %v9702_v62, %v9622_v57  ;;  %v9753_v9 = vmul.f32 %v9622_v57, %v9209_v3  ;;  %v9214_v28 = vadd.f32 %v9213_v20, %v8944_v7  ;;  %v9476_v7 = vpop.permute.xlu1 %9475 }
 0x2c5   : > { %v10249_v0 = vpop.f32.mrf.mxu0 }
 0x2c6   : > { %v9793_v13 = vadd.f32 %v9792_v52, %v9753_v9  ;;  %v9623_v63 = vmul.f32 %v9461_v33, %v9214_v28  ;;  %9664 = vst [vmem:[%s15294_s26 + $0x50] sm:$0xff] %v9214_v28 }
 0x2c7   : > { %v8958_v11 = vpop.f32.mrf.mxu1 }
 0x2c8   : > { %v9218_v19 = vpop.f32.mrf.mxu0  ;;  %v9704_v45 = vadd.f32 %v9703_v5, %v9623_v63  ;;  %v9754_v23 = vmul.f32 %v9623_v63, %v9214_v28  ;;  %v8959_v60 = vadd.f32 %v8958_v11, %v14720_v4 }
 0x2c9   : > { %v9219_v21 = vadd.f32 %v9218_v19, %v8949_v10  ;;  %v8960_v18 = vpop.f32.mrf.mxu1  ;;  %v9481_v10 = vpop.permute.xlu0 %9480 }
 0x2ca   : > { %v10252_v27 = vpop.f32.mrf.mxu0  ;;  %v9794_v51 = vadd.f32 %v9793_v13, %v9754_v23 }
 0x2cb   : > { %v9624_v46 = vmul.f32 %v9466_v1, %v9219_v21  ;;  %9665 = vst [vmem:[%s15294_s26 + $0x58] sm:$0xff] %v9219_v21  ;;  %v8963_v37 = vpop.f32.mrf.mxu1  ;;  %v9486_v27 = vpop.permute.xlu1 %9485 }
 0x2cc   : > { %v9223_v42 = vpop.f32.mrf.mxu0  ;;  %v8964_v59 = vadd.f32 %v8963_v37, %v14741_v38 }
 0x2cd   : > { %v9705_v14 = vadd.f32 %v9704_v45, %v9624_v46  ;;  %v9755_v54 = vmul.f32 %v9624_v46, %v9219_v21  ;;  %v9224_v49 = vadd.f32 %v9223_v42, %v8954_v17  ;;  %v8965_v53 = vpop.f32.mrf.mxu1 }
 0x2ce   : > { %v10255_v55 = vpop.f32.mrf.mxu0 }
 0x2cf   : > { %v9795_v24 = vadd.f32 %v9794_v51, %v9755_v54  ;;  %v9625_v62 = vmul.f32 %v9471_v50, %v9224_v49  ;;  %9666 = vst [vmem:[%s15294_s26 + $0x60] sm:$0xff] %v9224_v49  ;;  %v8968_v47 = vpop.f32.mrf.mxu1  ;;  %v9491_v55 = vpop.permute.xlu0 %9490 }
 0x2d0   : > { %v9228_v3 = vpop.f32.mrf.mxu0  ;;  %v8969_v19 = vadd.f32 %v8968_v47, %v14769_v48 }
 0x2d1   : > { %v9706_v30 = vadd.f32 %v9705_v14, %v9625_v62  ;;  %v9756_v34 = vmul.f32 %v9625_v62, %v9224_v49  ;;  %v9229_v6 = vadd.f32 %v9228_v3, %v8959_v60  ;;  %v8970_v52 = vpop.f32.mrf.mxu1 }
 0x2d2   : > { %v10258_v57 = vpop.f32.mrf.mxu0 }
 0x2d3   : > { %v9796_v20 = vadd.f32 %v9795_v24, %v9756_v34  ;;  %v9626_v5 = vmul.f32 %v9476_v7, %v9229_v6  ;;  %9667 = vst [vmem:[%s15294_s26 + $0x68] sm:$0xff] %v9229_v6  ;;  %v8973_v9 = vpop.f32.mrf.mxu1 }
 0x2d4   : > { %v9233_v28 = vpop.f32.mrf.mxu0  ;;  %v8974_v49 = vadd.f32 %v8973_v9, %v14792_v2 }
 0x2d5   : > { %v9707_v33 = vadd.f32 %v9706_v30, %v9626_v5  ;;  %v9757_v4 = vmul.f32 %v9626_v5, %v9229_v6  ;;  %v9234_v0 = vadd.f32 %v9233_v28, %v8964_v59  ;;  %v8975_v13 = vpop.f32.mrf.mxu1  ;;  %v9496_v6 = vpop.permute.xlu1 %9495 }
 0x2d6   : > { %v10261_v63 = vpop.f32.mrf.mxu0 }
 0x2d7   : > { %v9797_v11 = vadd.f32 %v9796_v20, %v9757_v4  ;;  %v9627_v45 = vmul.f32 %v9481_v10, %v9234_v0  ;;  %9668 = vst [vmem:[%s15294_s26 + $0x70] sm:$0xff] %v9234_v0  ;;  %v9501_v4 = vpop.permute.xlu0 %9500 }
 0x2d8   : > { %v9238_v23 = vpop.f32.mrf.mxu0 }
 0x2d9   : > { %v9708_v21 = vadd.f32 %v9707_v33, %v9627_v45  ;;  %v9758_v18 = vmul.f32 %v9627_v45, %v9234_v0  ;;  %v9239_v38 = vadd.f32 %v9238_v23, %v8969_v19  ;;  %v8978_v1 = vpop.f32.mrf.mxu1 }
 0x2da   : > { %v10264_v51 = vpop.f32.mrf.mxu0  ;;  %v8979_v47 = vadd.f32 %v8978_v1, %v14820_v25  ;;  %v9506_v1 = vpop.permute.xlu1 %9505 }
 0x2db   : > { %v9798_v17 = vadd.f32 %v9797_v11, %v9758_v18  ;;  %v9628_v46 = vmul.f32 %v9486_v27, %v9239_v38  ;;  %9669 = vst [vmem:[%s15294_s26 + $0x78] sm:$0xff] %v9239_v38  ;;  %v8980_v37 = vpop.f32.mrf.mxu1 }
 0x2dd   : > { %v9709_v42 = vadd.f32 %v9708_v21, %v9628_v46  ;;  %v9759_v14 = vmul.f32 %v9628_v46, %v9239_v38  ;;  %v8983_v54 = vpop.f32.mrf.mxu1 }
 0x2de   : > { %v8984_v5 = vadd.f32 %v8983_v54, %v14862_v31 }
 0x2df   : > { %v9799_v48 = vadd.f32 %v9798_v17, %v9759_v14  ;;  %v9243_v53 = vpop.f32.mrf.mxu0  ;;  %v8985_v50 = vpop.f32.mrf.mxu1 }
 0x2e0   : > { %v9244_v24 = vadd.f32 %v9243_v53, %v8974_v49  ;;  %v9511_v14 = vpop.permute.xlu0 %9510 }
 0x2e1   : > { %v10267_v60 = vpop.f32.mrf.mxu0  ;;  %v8988_v62 = vpop.f32.mrf.mxu1 }
 0x2e2   : > { %v9629_v3 = vmul.f32 %v9491_v55, %v9244_v24  ;;  %9670 = vst [vmem:[%s15294_s26 + $0x80] sm:$0xff] %v9244_v24  ;;  %v8989_v19 = vadd.f32 %v8988_v62, %v14889_v32 }
 0x2e3   : > { %v9248_v30 = vpop.f32.mrf.mxu0  ;;  %v8990_v34 = vpop.f32.mrf.mxu1 }
 0x2e4   : > { %v9710_v52 = vadd.f32 %v9709_v42, %v9629_v3  ;;  %v9760_v7 = vmul.f32 %v9629_v3, %v9244_v24  ;;  %v9249_v57 = vadd.f32 %v9248_v30, %v8979_v47  ;;  %v9516_v47 = vpop.permute.xlu1 %9515 }
 0x2e5   : > { %v10270_v20 = vpop.f32.mrf.mxu0  ;;  %v8993_v2 = vpop.f32.mrf.mxu1 }
 0x2e6   : > { %v9800_v59 = vadd.f32 %v9799_v48, %v9760_v7  ;;  %v9630_v9 = vmul.f32 %v9496_v6, %v9249_v57  ;;  %9671 = vst [vmem:[%s15294_s26 + $0x88] sm:$0xff] %v9249_v57  ;;  %v8994_v17 = vadd.f32 %v8993_v2, %v14914_v26 }
 0x2e7   : > { %v9253_v28 = vpop.f32.mrf.mxu0  ;;  %v8995_v33 = vpop.f32.mrf.mxu1 }
 0x2e8   : > { %v9711_v25 = vadd.f32 %v9710_v52, %v9630_v9  ;;  %v9761_v0 = vmul.f32 %v9630_v9, %v9249_v57  ;;  %v9254_v13 = vadd.f32 %v9253_v28, %v8984_v5 }
 0x2e9   : > { %v10273_v10 = vpop.f32.mrf.mxu0  ;;  %v8998_v63 = vpop.f32.mrf.mxu1 }
 0x2ea   : > { %v9801_v11 = vadd.f32 %v9800_v59, %v9761_v0  ;;  %v9631_v45 = vmul.f32 %v9501_v4, %v9254_v13  ;;  %9672 = vst [vmem:[%s15294_s26 + $0x90] sm:$0xff] %v9254_v13  ;;  %v8999_v55 = vadd.f32 %v8998_v63, %v14932_v58  ;;  %v9521_v59 = vpop.permute.xlu0 %9520  ;;  %v9526_v63 = vpop.permute.xlu1 %9525 }
 0x2eb   : > { %v9258_v23 = vpop.f32.mrf.mxu0  ;;  %v9000_v21 = vpop.f32.mrf.mxu1 }
 0x2ec   : > { %v9712_v18 = vadd.f32 %v9711_v25, %v9631_v45  ;;  %v9762_v31 = vmul.f32 %v9631_v45, %v9254_v13  ;;  %v9259_v38 = vadd.f32 %v9258_v23, %v8989_v19 }
 0x2ed   : > { %v10276_v27 = vpop.f32.mrf.mxu0 }
 0x2ee   : > { %v9802_v51 = vadd.f32 %v9801_v11, %v9762_v31  ;;  %v9632_v46 = vmul.f32 %v9506_v1, %v9259_v38  ;;  %9673 = vst [vmem:[%s15294_s26 + $0x98] sm:$0xff] %v9259_v38 }
 0x2ef   : > { %v9263_v37 = vpop.f32.mrf.mxu0  ;;  %v9003_v42 = vpop.f32.mrf.mxu1 }
 0x2f0   : > { %v9713_v54 = vadd.f32 %v9712_v18, %v9632_v46  ;;  %v9763_v32 = vmul.f32 %v9632_v46, %v9259_v38  ;;  %v9264_v49 = vadd.f32 %v9263_v37, %v8994_v17  ;;  %v9004_v7 = vadd.f32 %v9003_v42, %v14974_v61  ;;  %v9531_v17 = vpop.permute.xlu0 %9530 }
 0x2f1   : > { %v10279_v48 = vpop.f32.mrf.mxu0  ;;  %v9005_v53 = vpop.f32.mrf.mxu1 }
 0x2f2   : > { %v9803_v50 = vadd.f32 %v9802_v51, %v9763_v32  ;;  %v9633_v24 = vmul.f32 %v9511_v14, %v9264_v49  ;;  %9674 = vst [vmem:[%s15294_s26 + $0xa0] sm:$0xff] %v9264_v49 }
 0x2f3   : > { %v9268_v60 = vpop.f32.mrf.mxu0  ;;  %v9008_v62 = vpop.f32.mrf.mxu1 }
 0x2f4   : > { %v9714_v26 = vadd.f32 %v9713_v54, %v9633_v24  ;;  %v9764_v3 = vmul.f32 %v9633_v24, %v9264_v49  ;;  %v9269_v30 = vadd.f32 %v9268_v60, %v8999_v55  ;;  %v9009_v25 = vadd.f32 %v9008_v62, %v14994_v12 }
 0x2f5   : > { %v10282_v34 = vpop.f32.mrf.mxu0  ;;  %v9010_v6 = vpop.f32.mrf.mxu1 }
 0x2f6   : > { %v9804_v52 = vadd.f32 %v9803_v50, %v9764_v3  ;;  %v9634_v57 = vmul.f32 %v9516_v47, %v9269_v30  ;;  %9675 = vst [vmem:[%s15294_s26 + $0xa8] sm:$0xff] %v9269_v30  ;;  %v9536_v50 = vpop.permute.xlu1 %9535 }
 0x2f7   : > { %v9273_v20 = vpop.f32.mrf.mxu0  ;;  %v9013_v2 = vpop.f32.mrf.mxu1 }
 0x2f8   : > { %v9715_v58 = vadd.f32 %v9714_v26, %v9634_v57  ;;  %v9765_v5 = vmul.f32 %v9634_v57, %v9269_v30  ;;  %v9274_v9 = vadd.f32 %v9273_v20, %v9004_v7  ;;  %v9014_v31 = vadd.f32 %v9013_v2, %v15014_v35 }
 0x2f9   : > { %v10285_v28 = vpop.f32.mrf.mxu0  ;;  %v9015_v33 = vpop.f32.mrf.mxu1 }
 0x2fa   : > { %v9805_v4 = vadd.f32 %v9804_v52, %v9765_v5  ;;  %v9635_v0 = vmul.f32 %v9521_v59, %v9274_v9  ;;  %9676 = vst [vmem:[%s15294_s26 + $0xb0] sm:$0xff] %v9274_v9  ;;  %v9541_v52 = vpop.permute.xlu0 %9540  ;;  %v9546_v33 = vpop.permute.xlu1 %9545 }
 0x2fb   : > { %v9278_v13 = vpop.f32.mrf.mxu0  ;;  %v9018_v10 = vpop.f32.mrf.mxu1 }
 0x2fc   : > { %v9716_v61 = vadd.f32 %v9715_v58, %v9635_v0  ;;  %v9766_v11 = vmul.f32 %v9635_v0, %v9274_v9  ;;  %v9279_v19 = vadd.f32 %v9278_v13, %v9009_v25  ;;  %v9019_v54 = vadd.f32 %v9018_v10, %v15034_v41 }
 0x2fd   : > { %v10288_v45 = vpop.f32.mrf.mxu0  ;;  %v9020_v23 = vpop.f32.mrf.mxu1 }
 0x2fe   : > { %v9806_v21 = vadd.f32 %v9805_v4, %v9766_v11  ;;  %v9636_v18 = vmul.f32 %v9526_v63, %v9279_v19  ;;  %9677 = vst [vmem:[%s15294_s26 + $0xb8] sm:$0xff] %v9279_v19  ;;  %v9551_v45 = vpop.permute.xlu0 %9550 }
 0x300   : > { %v9717_v38 = vadd.f32 %v9716_v61, %v9636_v18  ;;  %v9767_v1 = vmul.f32 %v9636_v18, %v9279_v19  ;;  %v9283_v27 = vpop.f32.mrf.mxu0 }
 0x301   : > { %v9284_v12 = vadd.f32 %v9283_v27, %v9014_v31  ;;  %v9023_v51 = vpop.f32.mrf.mxu1  ;;  %v16564_v31 = vld [vmem:[#allocation26_spill] sm:$0xff] }
 0x302   : > { %v9807_v46 = vadd.f32 %v9806_v21, %v9767_v1  ;;  %v10291_v37 = vpop.f32.mrf.mxu0  ;;  %v9024_v47 = vadd.f32 %v9023_v51, %v15057_v40  ;;  %v9556_v51 = vpop.permute.xlu1 %9555 }
 0x303   : > { %v9637_v42 = vmul.f32 %v9531_v17, %v9284_v12  ;;  %9678 = vst [vmem:[%s15294_s26 + $0xc0] sm:$0xff] %v9284_v12  ;;  %v9025_v14 = vpop.f32.mrf.mxu1 }
 0x304   : > { %v16565_v14 = vld [vmem:[#allocation59_spill] sm:$0xff] }
 0x305   : > { %v9718_v32 = vadd.f32 %v9717_v38, %v9637_v42  ;;  %v9768_v49 = vmul.f32 %v9637_v42, %v9284_v12  ;;  %v9288_v48 = vpop.f32.mrf.mxu0  ;;  %v9028_v53 = vpop.f32.mrf.mxu1 }
 0x306   : > { %v9289_v35 = vadd.f32 %v9288_v48, %v9019_v54  ;;  %v9029_v20 = vadd.f32 %v9028_v53, %v15094_v44  ;;  %v9561_v53 = vpop.permute.xlu0 %9560 }
 0x307   : > { %v9808_v55 = vadd.f32 %v9807_v46, %v9768_v49  ;;  %v10294_v24 = vpop.f32.mrf.mxu0  ;;  %v9030_v60 = vpop.f32.mrf.mxu1 }
 0x308   : > { %v9638_v62 = vmul.f32 %v9536_v50, %v9289_v35  ;;  %9679 = vst [vmem:[%s15294_s26 + $0xc8] sm:$0xff] %v9289_v35 }
 0x309   : > { %v9033_v26 = vpop.f32.mrf.mxu1 }
 0x30a   : > { %v9719_v3 = vadd.f32 %v9718_v32, %v9638_v62  ;;  %v9769_v30 = vmul.f32 %v9638_v62, %v9289_v35  ;;  %v9293_v34 = vpop.f32.mrf.mxu0  ;;  %v9034_v0 = vadd.f32 %v9033_v26, %v15116_v43 }
 0x30b   : > { %v9294_v6 = vadd.f32 %v9293_v34, %v9024_v47  ;;  %v9035_v41 = vpop.f32.mrf.mxu1  ;;  %v16566_v47 = vld [vmem:[#allocation178_spill] sm:$0xff] }
 0x30c   : > { %v9809_v7 = vadd.f32 %v9808_v55, %v9769_v30  ;;  %v10297_v57 = vpop.f32.mrf.mxu0 }
 0x30d   : > { %v9639_v2 = vmul.f32 %v9541_v52, %v9294_v6  ;;  %9680 = vst [vmem:[%s15294_s26 + $0xd0] sm:$0xff] %v9294_v6  ;;  %v9038_v59 = vpop.f32.mrf.mxu1 }
 0x30e   : > { %v9298_v58 = vpop.f32.mrf.mxu0  ;;  %v9039_v38 = vadd.f32 %v9038_v59, %v16564_v31  ;;  %v16567_v59 = vld [vmem:[#allocation47_spill] sm:$0xff] }
 0x30f   : > { %v9720_v5 = vadd.f32 %v9719_v3, %v9639_v2  ;;  %v9770_v9 = vmul.f32 %v9639_v2, %v9294_v6  ;;  %v9299_v28 = vadd.f32 %v9298_v58, %v9029_v20  ;;  %v9040_v40 = vpop.f32.mrf.mxu1  ;;  %v9566_v6 = vpop.permute.xlu1 %9565 }
 0x310   : > { %v10300_v4 = vpop.f32.mrf.mxu0  ;;  %v9571_v40 = vpop.permute.xlu0 %9570 }
 0x311   : > { %v9810_v25 = vadd.f32 %v9809_v7, %v9770_v9  ;;  %v9640_v13 = vmul.f32 %v9546_v33, %v9299_v28  ;;  %9681 = vst [vmem:[%s15294_s26 + $0xd8] sm:$0xff] %v9299_v28  ;;  %v9043_v10 = vpop.f32.mrf.mxu1 }
 0x312   : > { %v9303_v63 = vpop.f32.mrf.mxu0  ;;  %v9044_v54 = vadd.f32 %v9043_v10, %v16565_v14 }
 0x313   : > { %v9721_v61 = vadd.f32 %v9720_v5, %v9640_v13  ;;  %v9771_v44 = vmul.f32 %v9640_v13, %v9299_v28  ;;  %v9304_v11 = vadd.f32 %v9303_v63, %v9034_v0  ;;  %v9045_v19 = vpop.f32.mrf.mxu1 }
 0x314   : > { %v10303_v23 = vpop.f32.mrf.mxu0 }
 0x315   : > { %v9811_v21 = vadd.f32 %v9810_v25, %v9771_v44  ;;  %v9641_v18 = vmul.f32 %v9551_v45, %v9304_v11  ;;  %9682 = vst [vmem:[%s15294_s26 + $0xe0] sm:$0xff] %v9304_v11 }
 0x317   : > { %v9722_v1 = vadd.f32 %v9721_v61, %v9641_v18  ;;  %v9772_v27 = vmul.f32 %v9641_v18, %v9304_v11  ;;  %v9308_v12 = vpop.f32.mrf.mxu0  ;;  %v9048_v43 = vpop.f32.mrf.mxu1 }
 0x318   : > { %v9309_v17 = vadd.f32 %v9308_v12, %v9039_v38  ;;  %v9049_v26 = vadd.f32 %v9048_v43, %v16566_v47 }
 0x319   : > { %v9812_v46 = vadd.f32 %v9811_v21, %v9772_v27  ;;  %v10306_v37 = vpop.f32.mrf.mxu0  ;;  %v9050_v42 = vpop.f32.mrf.mxu1 }
 0x31a   : > { %v9642_v32 = vmul.f32 %v9556_v51, %v9309_v17  ;;  %9683 = vst [vmem:[%s15294_s26 + $0xe8] sm:$0xff] %v9309_v17  ;;  %v9576_v21 = vpop.permute.xlu1 %9575 }
 0x31b   : > { %v9313_v49 = vpop.f32.mrf.mxu0  ;;  %v9053_v48 = vpop.f32.mrf.mxu1 }
 0x31c   : > { %v9723_v50 = vadd.f32 %v9722_v1, %v9642_v32  ;;  %v9773_v35 = vmul.f32 %v9642_v32, %v9309_v17  ;;  %v9314_v55 = vadd.f32 %v9313_v49, %v9044_v54  ;;  %v9054_v58 = vadd.f32 %v9053_v48, %v16567_v59 }
 0x31d   : > { %v10309_v24 = vpop.f32.mrf.mxu0  ;;  %v9055_v60 = vpop.f32.mrf.mxu1 }
 0x31e   : > { %v9813_v62 = vadd.f32 %v9812_v46, %v9773_v35  ;;  %v9643_v3 = vmul.f32 %v9561_v53, %v9314_v55  ;;  %9684 = vst [vmem:[%s15294_s26 + $0xf0] sm:$0xff] %v9314_v55  ;;  %v9581_v46 = vpop.permute.xlu0 %9580  ;;  %v9586_v35 = vpop.permute.xlu1 %9585 }
 0x31f   : > { %v9318_v30 = vpop.f32.mrf.mxu0  ;;  %v9058_v34 = vpop.f32.mrf.mxu1 }
 0x320   : > { %v9724_v41 = vadd.f32 %v9723_v50, %v9643_v3  ;;  %v9774_v52 = vmul.f32 %v9643_v3, %v9314_v55  ;;  %v9319_v7 = vadd.f32 %v9318_v30, %v9049_v26  ;;  %v9059_v63 = vadd.f32 %v9058_v34, %v15248_v15 }
 0x321   : > { %v10312_v57 = vpop.f32.mrf.mxu0  ;;  %v9060_v20 = vpop.f32.mrf.mxu1 }
 0x322   : > { %v9814_v2 = vadd.f32 %v9813_v62, %v9774_v52  ;;  %v9644_v5 = vmul.f32 %v9566_v6, %v9319_v7  ;;  %9685 = vst [vmem:[%s15294_s26 + $0xf8] sm:$0xff] %v9319_v7  ;;  %v9591_v6 = vpop.permute.xlu0 %9590 }
 0x323   : > { %v9323_v9 = vpop.f32.mrf.mxu0  ;;  %v9063_v28 = vpop.f32.mrf.mxu1 }
 0x324   : > { %v9725_v33 = vadd.f32 %v9724_v41, %v9644_v5  ;;  %v9775_v4 = vmul.f32 %v9644_v5, %v9319_v7  ;;  %v9324_v25 = vadd.f32 %v9323_v9, %v9054_v58  ;;  %v9064_v43 = vadd.f32 %v9063_v28, %v15258_v56  ;;  %v9596_v9 = vpop.permute.xlu1 %9595 }
 0x325   : > { %v10315_v0 = vpop.f32.mrf.mxu0  ;;  %v9065_v13 = vpop.f32.mrf.mxu1 }
 0x326   : > { %v9815_v10 = vadd.f32 %v9814_v2, %v9775_v4  ;;  %v9645_v61 = vmul.f32 %v9571_v40, %v9324_v25  ;;  %9686 = vst [vmem:[%s15294_s26 + $0x100] sm:$0xff] %v9324_v25 }
 0x327   : > { %v9328_v44 = vpop.f32.mrf.mxu0 }
 0x328   : > { %v9726_v11 = vadd.f32 %v9725_v33, %v9645_v61  ;;  %v9776_v19 = vmul.f32 %v9645_v61, %v9324_v25  ;;  %v9329_v45 = vadd.f32 %v9328_v44, %v9059_v63  ;;  %v9068_v23 = vpop.f32.mrf.mxu1  ;;  %v9601_v61 = vpop.permute.xlu0 %9600 }
 0x329   : > { %v10318_v18 = vpop.f32.mrf.mxu0  ;;  %v9069_v32 = vadd.f32 %v9068_v23, %v15268_v36 }
 0x32a   : > { %v9816_v31 = vadd.f32 %v9815_v10, %v9776_v19  ;;  %v9646_v38 = vmul.f32 %v9576_v21, %v9329_v45  ;;  %9687 = vst [vmem:[%s15294_s26 + $0x108] sm:$0xff] %v9329_v45  ;;  %v9070_v1 = vpop.f32.mrf.mxu1  ;;  %v9606_v21 = vpop.permute.xlu1 %9605 }
 0x32c   : > { %v9727_v27 = vadd.f32 %v9726_v11, %v9646_v38  ;;  %v9777_v12 = vmul.f32 %v9646_v38, %v9329_v45 }
 0x32e   : > { %v9817_v51 = vadd.f32 %v9816_v31, %v9777_v12  ;;  %v9333_v15 = vpop.f32.mrf.mxu0  ;;  %v9073_v17 = vpop.f32.mrf.mxu1 }
 0x32f   : > { %v9334_v37 = vadd.f32 %v9333_v15, %v9064_v43  ;;  %v9074_v47 = vadd.f32 %v9073_v17, %v15275_v16 }
 0x330   : > { %v10321_v42 = vpop.f32.mrf.mxu0  ;;  %v9075_v14 = vpop.f32.mrf.mxu1 }
 0x331   : > { %v9647_v54 = vmul.f32 %v9581_v46, %v9334_v37  ;;  %9688 = vst [vmem:[%s15294_s26 + $0x110] sm:$0xff] %v9334_v37  ;;  %v9611_v46 = vpop.permute.xlu0 %9610 }
 0x333   : > { %v9728_v49 = vadd.f32 %v9727_v27, %v9647_v54  ;;  %v9778_v48 = vmul.f32 %v9647_v54, %v9334_v37  ;;  %v9338_v53 = vpop.f32.mrf.mxu0  ;;  %v9078_v50 = vpop.f32.mrf.mxu1 }
 0x334   : > { %v9339_v55 = vadd.f32 %v9338_v53, %v9069_v32  ;;  %v9079_v20 = vadd.f32 %v9078_v50, %v15277_v8 }
 0x335   : > { %v9818_v24 = vadd.f32 %v9817_v51, %v9778_v48  ;;  %v10324_v56 = vpop.f32.mrf.mxu0  ;;  %v9080_v60 = vpop.f32.mrf.mxu1 }
 0x336   : > { %v9648_v62 = vmul.f32 %v9586_v35, %v9339_v55  ;;  %9689 = vst [vmem:[%s15294_s26 + $0x118] sm:$0xff] %v9339_v55 }
 0x338   : > { %v9729_v26 = vadd.f32 %v9728_v49, %v9648_v62  ;;  %v9779_v3 = vmul.f32 %v9648_v62, %v9339_v55  ;;  %v9343_v30 = vpop.f32.mrf.mxu0  ;;  %v9083_v34 = vpop.f32.mrf.mxu1 }
 0x339   : > { %v9344_v36 = vadd.f32 %v9343_v30, %v9074_v47  ;;  %v9084_v25 = vadd.f32 %v9083_v34, %v15282_v22 }
 0x33a   : > { %v9819_v41 = vadd.f32 %v9818_v24, %v9779_v3  ;;  %v10327_v52 = vpop.f32.mrf.mxu0  ;;  %v9085_v7 = vpop.f32.mrf.mxu1 }
 0x33b   : > { %v9649_v57 = vmul.f32 %v9591_v6, %v9344_v36  ;;  %9690 = vst [vmem:[%s15294_s26 + $0x120] sm:$0xff] %v9344_v36 }
 0x33d   : > { %v9730_v2 = vadd.f32 %v9729_v26, %v9649_v57  ;;  %v9780_v59 = vmul.f32 %v9649_v57, %v9344_v36 }
 0x33e   : > { %v9348_v58 = vpop.f32.mrf.mxu0 }
 0x33f   : > { %v9088_v5 = vpop.f32.mrf.mxu1  ;;  %v9820_v16 = vadd.f32 %v9819_v41, %v9780_v59  ;;  %v9349_v28 = vadd.f32 %v9348_v58, %v9079_v20 }
 0x340   : > { %v10330_v40 = vpop.f32.mrf.mxu0  ;;  %v9089_v11 = vadd.f32 %v9088_v5, %v15285_v39 }
 0x341   : > { %v9090_v33 = vpop.f32.mrf.mxu1  ;;  %v9650_v4 = vmul.f32 %v9596_v9, %v9349_v28  ;;  %9691 = vst [vmem:[%s15294_s26 + $0x128] sm:$0xff] %v9349_v28 }
 0x343   : > { %v9731_v0 = vadd.f32 %v9730_v2, %v9650_v4  ;;  %v9781_v13 = vmul.f32 %v9650_v4, %v9349_v28 }
 0x345   : > { %v9353_v10 = vpop.f32.mrf.mxu0  ;;  %v9821_v8 = vadd.f32 %v9820_v16, %v9781_v13 }
 0x346   : > { %v9354_v63 = vadd.f32 %v9353_v10, %v9084_v25 }
 0x347   : > { %v10333_v44 = vpop.f32.mrf.mxu0 }
 0x348   : > { %v9651_v19 = vmul.f32 %v9601_v61, %v9354_v63  ;;  %9692 = vst [vmem:[%s15294_s26 + $0x130] sm:$0xff] %v9354_v63  ;;  %v9093_v45 = vpop.f32.mrf.mxu1 }
 0x349   : > { %v9358_v23 = vpop.f32.mrf.mxu0  ;;  %v9094_v12 = vadd.f32 %v9093_v45, %v15288_v29 }
 0x34a   : > { %v9732_v18 = vadd.f32 %v9731_v0, %v9651_v19  ;;  %v9782_v31 = vmul.f32 %v9651_v19, %v9354_v63  ;;  %v9359_v38 = vadd.f32 %v9358_v23, %v9089_v11  ;;  %v9095_v1 = vpop.f32.mrf.mxu1 }
 0x34b   : > { %v10336_v22 = vpop.f32.mrf.mxu0 }
 0x34c   : > { %v9822_v27 = vadd.f32 %v9821_v8, %v9782_v31  ;;  %v9652_v43 = vmul.f32 %v9606_v21, %v9359_v38  ;;  %9693 = vst [vmem:[%s15294_s26 + $0x138] sm:$0xff] %v9359_v38 }
 0x34d   : > { %v9363_v51 = vpop.f32.mrf.mxu0 }
 0x34e   : > { %v9733_v15 = vadd.f32 %v9732_v18, %v9652_v43  ;;  %v9783_v17 = vmul.f32 %v9652_v43, %v9359_v38  ;;  %v9364_v39 = vadd.f32 %v9363_v51, %v9094_v12 }
 0x34f   : > { %v10339_v37 = vpop.f32.mrf.mxu0 }
 0x350   : > { %v9823_v42 = vadd.f32 %v9822_v27, %v9783_v17  ;;  %v9653_v14 = vmul.f32 %v9611_v46, %v9364_v39  ;;  %9694 = vst [vmem:[%s15294_s26 + $0x140] sm:$0xf] %v9364_v39 }
 0x352   : > { %v9735_v54 = vsel %vm9734_vm3, %v9653_v14, 0.0  ;;  %v9784_v32 = vmul.f32 %v9653_v14, %v9364_v39 }
 0x353   : > { %v9736_v49 = vadd.f32 %v9735_v54, %v9733_v15 }
 0x354   : > { %v9824_v48 = vsel %vm9734_vm3, %v9784_v32, 0.0 }
 0x355   : > { %v9737_v53 = vrot.slane %v9736_v49, 4  ;;  %v9825_v29 = vadd.f32 %v9824_v48, %v9823_v42 }
 0x357   : > { %v9738_v50 = vadd.f32 %v9737_v53, %v9736_v49  ;;  %v9826_v35 = vrot.slane %v9825_v29, 4 }
 0x359   : > { %v9739_v55 = vrot.slane %v9738_v50, 2  ;;  %v9827_v24 = vadd.f32 %v9826_v35, %v9825_v29 }
 0x35b   : > { %v9740_v56 = vadd.f32 %v9739_v55, %v9738_v50  ;;  %v9828_v60 = vrot.slane %v9827_v24, 2 }
 0x35d   : > { %v9741_v62 = vrot.slane %v9740_v56, 1  ;;  %v9829_v47 = vadd.f32 %v9828_v60, %v9827_v24 }
 0x35f   : > { %v9742_v26 = vadd.f32 %v9741_v62, %v9740_v56  ;;  %v9830_v3 = vrot.slane %v9829_v47, 1 }
 0x361   : > { %9743 = vst [vmem:[%s265_s29] sm:$0x1] %v9742_v26  ;;  %v9831_v30 = vadd.f32 %v9830_v3, %v9829_v47 }
 0x363   : > { %9832 = vst [vmem:[%s268_s8] sm:$0x1] %v9831_v30 }
 0x364 PF: > { %s17_s21 = sadd.s32 1, %s10492_s21  }
 0x365   : > { %p14_p4 = scmp.ge.s32.totalorder %s17_s21, 4  }
 0x367   :  { %16 = sbr.rel (!%p14_p4) target bundleno = 1 (0x1), region = 90 }

// kernel: double_conv.4
= control target key start
LH: loop header
LB: loop body
LE: loop exit
PB: predicated region body
PF: predicated region fallthrough
CT: control target
= control target key end

     0   :  { %s4833_s27 = smov 0   ;;  %s8051_s0 = inlined_call_operand.vmem [shape: f32[2,324,128], index: 0, kind: input, shape index: {}]   ;;  %s8052_s1 = inlined_call_operand.vmem [shape: f32[1,128], index: 1, kind: input, shape index: {}]   ;;  %s8053_s2 = inlined_call_operand.vmem [shape: f32[1,128], index: 2, kind: input, shape index: {}]   ;;  %s8054_s3 = inlined_call_operand.vmem [shape: f32[324,1], index: 3, kind: input, shape index: {}]   ;;  %s8055_s4 = inlined_call_operand.vmem [shape: f32[1152,128], index: 4, kind: input, shape index: {}]   ;;  %s8056_s5 = inlined_call_operand.vmem [shape: f32[1,128], index: 5, kind: input, shape index: {}]   ;;  %s8057_s6 = inlined_call_operand.vmem [shape: f32[2,256,128], index: 6, kind: output, shape index: {0}]   ;;  %s8058_s7 = inlined_call_operand.vmem [shape: f32[2,1,128], index: 7, kind: output, shape index: {1}]   ;;  %s8059_s8 = inlined_call_operand.vmem [shape: f32[2,1,128], index: 8, kind: output, shape index: {2}]  }
   0x1 LB: > { %s4587_s28 = sadd.s32 4294967295, %s4783_s27   ;;  %p4591_p0 = scmp.ge.s32.totalorder %s4783_s27, 1  ;;  %s4783_s27 = sphi %s4833_s27, %s19_s27  }
   0x2   : > { %p267_p1 = scmp.lt.s32.totalorder %s4783_s27, 3 }
   0x4   : > { %p268_p2 = pnand %p4591_p0, %p267_p1 }
   0x6   : > { %271 = sbr.rel (%p268_p2) target bundleno = 756 (0x2f4), region = 44 }
   0xb   : > { %v503_v0 = vld [vmem:[%s8054_s3 + $0x10] sm:$0xff]  ;;  %v501_v1 = vld [vmem:[%s8054_s3] sm:$0xff]  ;;  %v4785_v2 = vmov 0   ;;  %v504_v3 = vld [vmem:[%s8054_s3 + $0x18] sm:$0xff]  ;;  %v8060_v5 = vmov 0.0   ;;  %p307_p3 = scmp.lt.s32.totalorder %s4587_s28, 1 }
   0xc   : > { %4774 = vset.pattern.permute.xlu1 %v4785_v2  ;;  %4773 = vset.pattern.permute.xlu0 %v4785_v2  ;;  %v502_v4 = vld [vmem:[%s8054_s3 + $0x8] sm:$0xff]  ;;  %v505_v7 = vld [vmem:[%s8054_s3 + $0x20] sm:$0xff]  ;;  %v508_v8 = vld [vmem:[%s8054_s3 + $0x38] sm:$0xff]  ;;  %vm2205_vm0 = vcmask 1046528  }
   0xd   : > { %554 = vperm.xlu1 %4774, %v503_v0   ;;  %544 = vperm.xlu0 %4773, %v501_v1   ;;  %v506_v6 = vld [vmem:[%s8054_s3 + $0x28] sm:$0xff]  ;;  %v507_v9 = vld [vmem:[%s8054_s3 + $0x30] sm:$0xff]  ;;  %v3113_v10 = vld [vmem:[%s8055_s4 + $0x178] sm:$0xff]  ;;  %s8516_s28 = smov (!%p307_p3, %s4587_s28), 1 }
   0xe   : > { %3442 = vmatprep.subr.mxu1 %v8060_v5  ;;  %3217 = vmatprep.subr.mxu0 %v8060_v5  ;;  %v3112_v11 = vld [vmem:[%s8055_s4 + $0x170] sm:$0xff]  ;;  %v3081_v12 = vld [vmem:[%s8055_s4 + $0x78] sm:$0xff]  ;;  %v510_v13 = vld [vmem:[%s8054_s3 + $0x48] sm:$0xff]  ;;  %s4761_s17 = smul.u32 328, %s8516_s28  ;;  %s319_s25 = scalar_lea.vmem %s8058_s7, %s8516_s28 }
   0xf   : > { %3443 = vmatpush1.msra.mxu1 %v3113_v10  ;;  %v509_v14 = vld [vmem:[%s8054_s3 + $0x40] sm:$0xff]  ;;  %3218 = vmatpush1.msra.mxu0 %v3081_v12  ;;  %v3080_v15 = vld [vmem:[%s8055_s4 + $0x70] sm:$0xff]  ;;  %v3111_v16 = vld [vmem:[%s8055_s4 + $0x168] sm:$0xff]  ;;  %s322_s30 = scalar_lea.vmem %s8059_s8, %s8516_s28 }
  0x10   : > { %3444 = vmatprep.subr.mxu1 %v8060_v5  ;;  %3219 = vmatprep.subr.mxu0 %v8060_v5  ;;  %v3079_v17 = vld [vmem:[%s8055_s4 + $0x68] sm:$0xff]  ;;  %v3110_v18 = vld [vmem:[%s8055_s4 + $0x160] sm:$0xff]  ;;  %v512_v19 = vld [vmem:[%s8054_s3 + $0x58] sm:$0xff]  ;;  %s5232_s20 = scalar_lea.vmem %s8051_s0, %s4761_s17 }
  0x11   : > { %559 = vperm.xlu1 %4774, %v504_v3   ;;  %549 = vperm.xlu0 %4773, %v502_v4   ;;  %v511_v20 = vld [vmem:[%s8054_s3 + $0x50] sm:$0xff]  ;;  %v3078_v21 = vld [vmem:[%s8055_s4 + $0x60] sm:$0xff]  ;;  %v3109_v22 = vld [vmem:[%s8055_s4 + $0x158] sm:$0xff] }
  0x12   : > { %3445 = vmatpush1.msra.mxu1 %v3112_v11  ;;  %3220 = vmatpush1.msra.mxu0 %v3080_v15  ;;  %v3077_v23 = vld [vmem:[%s8055_s4 + $0x58] sm:$0xff]  ;;  %v514_v24 = vld [vmem:[%s8054_s3 + $0x68] sm:$0xff]  ;;  %v513_v25 = vld [vmem:[%s8054_s3 + $0x60] sm:$0xff] }
  0x13   : > { %3446 = vmatprep.subr.mxu1 %v8060_v5  ;;  %3221 = vmatprep.subr.mxu0 %v8060_v5  ;;  %v3108_v26 = vld [vmem:[%s8055_s4 + $0x150] sm:$0xff]  ;;  %v3107_v28 = vld [vmem:[%s8055_s4 + $0x148] sm:$0xff]  ;;  %v516_v29 = vld [vmem:[%s8054_s3 + $0x78] sm:$0xff] }
  0x14   : > { %3447 = vmatpush1.msra.mxu1 %v3111_v16  ;;  %3222 = vmatpush1.msra.mxu0 %v3079_v17  ;;  %v3076_v27 = vld [vmem:[%s8055_s4 + $0x50] sm:$0xff]  ;;  %v3075_v31 = vld [vmem:[%s8055_s4 + $0x48] sm:$0xff]  ;;  %v3106_v32 = vld [vmem:[%s8055_s4 + $0x140] sm:$0xff] }
  0x15   : > { %569 = vperm.xlu1 %4774, %v506_v6   ;;  %564 = vperm.xlu0 %4773, %v505_v7   ;;  %v515_v30 = vld [vmem:[%s8054_s3 + $0x70] sm:$0xff]  ;;  %v3074_v33 = vld [vmem:[%s8055_s4 + $0x40] sm:$0xff]  ;;  %v518_v34 = vld [vmem:[%s8054_s3 + $0x88] sm:$0xff] }
  0x16   : > { %3448 = vmatprep.subr.mxu1 %v8060_v5  ;;  %3223 = vmatprep.subr.mxu0 %v8060_v5  ;;  %v517_v35 = vld [vmem:[%s8054_s3 + $0x80] sm:$0xff]  ;;  %v3105_v36 = vld [vmem:[%s8055_s4 + $0x138] sm:$0xff]  ;;  %v3104_v38 = vld [vmem:[%s8055_s4 + $0x130] sm:$0xff] }
  0x17   : > { %3449 = vmatpush1.msra.mxu1 %v3110_v18  ;;  %3224 = vmatpush1.msra.mxu0 %v3078_v21  ;;  %v3073_v37 = vld [vmem:[%s8055_s4 + $0x38] sm:$0xff]  ;;  %v519_v40 = vld [vmem:[%s8054_s3 + $0x90] sm:$0xff]  ;;  %v3103_v42 = vld [vmem:[%s8055_s4 + $0x128] sm:$0xff] }
  0x18   : > { %3450 = vmatprep.subr.mxu1 %v8060_v5  ;;  %3225 = vmatprep.subr.mxu0 %v8060_v5  ;;  %v520_v39 = vld [vmem:[%s8054_s3 + $0x98] sm:$0xff]  ;;  %v3072_v41 = vld [vmem:[%s8055_s4 + $0x30] sm:$0xff]  ;;  %v3071_v43 = vld [vmem:[%s8055_s4 + $0x28] sm:$0xff] }
  0x19   : > { %579 = vperm.xlu1 %4774, %v508_v8   ;;  %574 = vperm.xlu0 %4773, %v507_v9   ;;  %v522_v44 = vld [vmem:[%s8054_s3 + $0xa8] sm:$0xff]  ;;  %v521_v45 = vld [vmem:[%s8054_s3 + $0xa0] sm:$0xff]  ;;  %v3101_v48 = vld [vmem:[%s8055_s4 + $0x118] sm:$0xff] }
  0x1a   : > { %3451 = vmatpush1.msra.mxu1 %v3109_v22  ;;  %3226 = vmatpush1.msra.mxu0 %v3077_v23  ;;  %v3102_v46 = vld [vmem:[%s8055_s4 + $0x120] sm:$0xff]  ;;  %v524_v49 = vld [vmem:[%s8054_s3 + $0xb8] sm:$0xff]  ;;  %v523_v50 = vld [vmem:[%s8054_s3 + $0xb0] sm:$0xff] }
  0x1b   : > { %3452 = vmatprep.subr.mxu1 %v8060_v5  ;;  %3227 = vmatprep.subr.mxu0 %v8060_v5  ;;  %v3070_v47 = vld [vmem:[%s8055_s4 + $0x20] sm:$0xff]  ;;  %v3069_v51 = vld [vmem:[%s8055_s4 + $0x18] sm:$0xff]  ;;  %v3100_v52 = vld [vmem:[%s8055_s4 + $0x110] sm:$0xff] }
  0x1c   : > { %3453 = vmatpush1.msra.mxu1 %v3108_v26  ;;  %3228 = vmatpush1.msra.mxu0 %v3076_v27  ;;  %v3068_v53 = vld [vmem:[%s8055_s4 + $0x10] sm:$0xff]  ;;  %v526_v54 = vld [vmem:[%s8054_s3 + $0xc8] sm:$0xff]  ;;  %v525_v55 = vld [vmem:[%s8054_s3 + $0xc0] sm:$0xff] }
  0x1d   : > { %589 = vperm.xlu1 %4774, %v510_v13   ;;  %584 = vperm.xlu0 %4773, %v509_v14   ;;  %v3099_v56 = vld [vmem:[%s8055_s4 + $0x108] sm:$0xff]  ;;  %v3098_v58 = vld [vmem:[%s8055_s4 + $0x100] sm:$0xff]  ;;  %v528_v59 = vld [vmem:[%s8054_s3 + $0xd8] sm:$0xff] }
  0x1e   : > { %3454 = vmatprep.subr.mxu1 %v8060_v5  ;;  %3229 = vmatprep.subr.mxu0 %v8060_v5  ;;  %v3067_v57 = vld [vmem:[%s8055_s4 + $0x8] sm:$0xff]  ;;  %v527_v60 = vld [vmem:[%s8054_s3 + $0xd0] sm:$0xff]  ;;  %v3066_v61 = vld [vmem:[%s8055_s4] sm:$0xff] }
  0x1f   : > { %3455 = vmatpush1.msra.mxu1 %v3107_v28  ;;  %3230 = vmatpush1.msra.mxu0 %v3075_v31  ;;  %v3129_v62 = vld [vmem:[%s8055_s4 + $0x1f8] sm:$0xff]  ;;  %v530_v0 = vld [vmem:[%s8054_s3 + $0xe8] sm:$0xff]  ;;  %v529_v1 = vld [vmem:[%s8054_s3 + $0xe0] sm:$0xff] }
  0x20   : > { %3456 = vmatprep.subr.mxu1 %v8060_v5  ;;  %3231 = vmatprep.subr.mxu0 %v8060_v5  ;;  %v3097_v63 = vld [vmem:[%s8055_s4 + $0xf8] sm:$0xff]  ;;  %v3128_v2 = vld [vmem:[%s8055_s4 + $0x1f0] sm:$0xff]  ;;  %v3127_v4 = vld [vmem:[%s8055_s4 + $0x1e8] sm:$0xff] }
  0x21   : > { %599 = vperm.xlu1 %4774, %v512_v19   ;;  %594 = vperm.xlu0 %4773, %v511_v20   ;;  %v3096_v3 = vld [vmem:[%s8055_s4 + $0xf0] sm:$0xff]  ;;  %v532_v6 = vld [vmem:[%s8054_s3 + $0xf8] sm:$0xff]  ;;  %v3095_v8 = vld [vmem:[%s8055_s4 + $0xe8] sm:$0xff] }
  0x22   : > { %3457 = vmatpush1.msra.mxu1 %v3106_v32  ;;  %3232 = vmatpush1.msra.mxu0 %v3074_v33  ;;  %v531_v7 = vld [vmem:[%s8054_s3 + $0xf0] sm:$0xff]  ;;  %v3126_v9 = vld [vmem:[%s8055_s4 + $0x1e0] sm:$0xff]  ;;  %v534_v11 = vld [vmem:[%s8054_s3 + $0x108] sm:$0xff] }
  0x23   : > { %3458 = vmatprep.subr.mxu1 %v8060_v5  ;;  %3233 = vmatprep.subr.mxu0 %v8060_v5  ;;  %v3094_v10 = vld [vmem:[%s8055_s4 + $0xe0] sm:$0xff]  ;;  %v3125_v13 = vld [vmem:[%s8055_s4 + $0x1d8] sm:$0xff]  ;;  %v3124_v15 = vld [vmem:[%s8055_s4 + $0x1d0] sm:$0xff] }
  0x24   : > { %3459 = vmatpush1.msra.mxu1 %v3105_v36  ;;  %3234 = vmatpush1.msra.mxu0 %v3073_v37  ;;  %v533_v12 = vld [vmem:[%s8054_s3 + $0x100] sm:$0xff]  ;;  %v3093_v14 = vld [vmem:[%s8055_s4 + $0xd8] sm:$0xff]  ;;  %v535_v17 = vld [vmem:[%s8054_s3 + $0x110] sm:$0xff] }
  0x25   : > { %609 = vperm.xlu1 %4774, %v514_v24   ;;  %604 = vperm.xlu0 %4773, %v513_v25   ;;  %v536_v16 = vld [vmem:[%s8054_s3 + $0x118] sm:$0xff]  ;;  %v3092_v18 = vld [vmem:[%s8055_s4 + $0xd0] sm:$0xff]  ;;  %v3123_v19 = vld [vmem:[%s8055_s4 + $0x1c8] sm:$0xff] }
  0x26   : > { %3460 = vmatprep.subr.mxu1 %v8060_v5  ;;  %3235 = vmatprep.subr.mxu0 %v8060_v5  ;;  %v3091_v20 = vld [vmem:[%s8055_s4 + $0xc8] sm:$0xff]  ;;  %v537_v22 = vld [vmem:[%s8054_s3 + $0x120] sm:$0xff]  ;;  %v3121_v25 = vld [vmem:[%s8055_s4 + $0x1b8] sm:$0xff] }
  0x27   : > { %3461 = vmatpush1.msra.mxu1 %v3104_v38  ;;  %3236 = vmatpush1.msra.mxu0 %v3072_v41  ;;  %v538_v21 = vld [vmem:[%s8054_s3 + $0x128] sm:$0xff]  ;;  %v3122_v23 = vld [vmem:[%s8055_s4 + $0x1c0] sm:$0xff]  ;;  %v540_v26 = vld [vmem:[%s8054_s3 + $0x138] sm:$0xff] }
  0x28   : > { %3462 = vmatprep.subr.mxu1 %v8060_v5  ;;  %3237 = vmatprep.subr.mxu0 %v8060_v5  ;;  %v3090_v24 = vld [vmem:[%s8055_s4 + $0xc0] sm:$0xff]  ;;  %v539_v27 = vld [vmem:[%s8054_s3 + $0x130] sm:$0xff]  ;;  %v3089_v28 = vld [vmem:[%s8055_s4 + $0xb8] sm:$0xff] }
  0x29   : > { %619 = vperm.xlu1 %4774, %v516_v29   ;;  %614 = vperm.xlu0 %4773, %v515_v30   ;;  %v3120_v29 = vld [vmem:[%s8055_s4 + $0x1b0] sm:$0xff]  ;;  %v541_v31 = vld [vmem:[%s8054_s3 + $0x140] sm:$0xf]  ;;  %v3119_v32 = vld [vmem:[%s8055_s4 + $0x1a8] sm:$0xff] }
  0x2a   : > { %3463 = vmatpush1.msra.mxu1 %v3103_v42  ;;  %3238 = vmatpush1.msra.mxu0 %v3071_v43  ;;  %v3088_v30 = vld [vmem:[%s8055_s4 + $0xb0] sm:$0xff]  ;;  %v3118_v33 = vld [vmem:[%s8055_s4 + $0x1a0] sm:$0xff]  ;;  %v3085_v38 = vld [vmem:[%s8055_s4 + $0x98] sm:$0xff] }
  0x2b   : > { %3464 = vmatprep.subr.mxu1 %v8060_v5  ;;  %3239 = vmatprep.subr.mxu0 %v8060_v5  ;;  %v3086_v36 = vld [vmem:[%s8055_s4 + $0xa0] sm:$0xff]  ;;  %v3116_v37 = vld [vmem:[%s8055_s4 + $0x190] sm:$0xff]  ;;  %v3083_v42 = vld [vmem:[%s8055_s4 + $0x88] sm:$0xff] }
  0x2c   : > { %3465 = vmatpush1.msra.mxu1 %v3102_v46  ;;  %3240 = vmatpush1.msra.mxu0 %v3070_v47  ;;  %v3114_v41 = vld [vmem:[%s8055_s4 + $0x180] sm:$0xff]  ;;  %v326_v47 = vld [vmem:[%s5232_s20 + $0x18] sm:$0xff] }
  0x2d   : > { %629 = vperm.xlu1 %4774, %v518_v34   ;;  %624 = vperm.xlu0 %4773, %v517_v35   ;;  %v3087_v34 = vld [vmem:[%s8055_s4 + $0xa8] sm:$0xff]  ;;  %v3117_v35 = vld [vmem:[%s8055_s4 + $0x198] sm:$0xff]  ;;  %v3082_v43 = vld [vmem:[%s8055_s4 + $0x80] sm:$0xff] }
  0x2e   : > { %3466 = vmatprep.subr.mxu1 %v8060_v5  ;;  %3241 = vmatprep.subr.mxu0 %v8060_v5  ;;  %v323_v46 = vld [vmem:[%s5232_s20] sm:$0xff] }
  0x2f   : > { %3467 = vmatpush1.msra.mxu1 %v3101_v48  ;;  %3242 = vmatpush1.msra.mxu0 %v3069_v51  ;;  %v4787_v48 = vmov 1983009808   ;;  %v324_v51 = vld [vmem:[%s5232_s20 + $0x8] sm:$0xff] }
  0x30   : > { %3468 = vmatprep.subr.mxu1 %v8060_v5  ;;  %3243 = vmatprep.subr.mxu0 %v8060_v5 }
  0x31   : > { %639 = vperm.xlu1 %4774, %v520_v39   ;;  %634 = vperm.xlu0 %4773, %v519_v40   ;;  %v3115_v39 = vld [vmem:[%s8055_s4 + $0x188] sm:$0xff]  ;;  %v3084_v40 = vld [vmem:[%s8055_s4 + $0x90] sm:$0xff] }
  0x32   : > { %3469 = vmatpush1.msra.mxu1 %v3100_v52  ;;  %3244 = vmatpush1.msra.mxu0 %v3068_v53  ;;  %v328_v52 = vld [vmem:[%s5232_s20 + $0x28] sm:$0xff] }
  0x33   : > { %3470 = vmatprep.subr.mxu1 %v8060_v5  ;;  %3245 = vmatprep.subr.mxu0 %v8060_v5 }
  0x34   : > { %3471 = vmatpush1.msra.mxu1 %v3099_v56  ;;  %3246 = vmatpush1.msra.mxu0 %v3067_v57  ;;  %v5250_v56 = vld [vmem:[%s8053_s2] ss:$0 sm:$0xff] }
  0x35   : > { %649 = vperm.xlu1 %4774, %v522_v44   ;;  %644 = vperm.xlu0 %4773, %v521_v45   ;;  %v325_v44 = vld [vmem:[%s5232_s20 + $0x10] sm:$0xff]  ;;  %v5238_v45 = vld [vmem:[%s8052_s1] ss:$0 sm:$0xff] }
  0x36   : > { %3472 = vmatprep.subr.mxu1 %v8060_v5  ;;  %3247 = vmatprep.subr.mxu0 %v8060_v5  ;;  %v373_v53 = vmul.f32 %v5238_v45, %v325_v44  ;;  %v374_v57 = vmul.f32 %v5238_v45, %v326_v47 }
  0x37   : > { %3473 = vmatpush1.msra.mxu1 %v3098_v58  ;;  %3248 = vmatpush1.msra.mxu0 %v3066_v61  ;;  %v372_v58 = vmul.f32 %v5238_v45, %v324_v51  ;;  %v329_v61 = vld [vmem:[%s5232_s20 + $0x30] sm:$0xff] }
  0x38   : > { %3474 = vmatprep.subr.mxu1 %v8060_v5  ;;  %3249 = vmatprep.subr.mxu0 %v8060_v5  ;;  %v341_v51 = vld [vmem:[%s5232_s20 + $0x90] sm:$0xff] }
  0x39   : > { %659 = vperm.xlu1 %4774, %v524_v49   ;;  %654 = vperm.xlu0 %4773, %v523_v50   ;;  %v831_v49 = vunpack.c.l.s4 %v4787_v48  ;;  %v833_v50 = vlaneseq  ;;  %v353_v48 = vld [vmem:[%s5232_s20 + $0xf0] sm:$0xff] }
  0x3a   : > { %3475 = vmatpush2.msra.mxu1 %v3129_v62  ;;  %3250 = vmatpush2.msra.mxu0 %v3097_v63 }
  0x3b   : > { %3476 = vmatprep.subr.mxu1 %v8060_v5  ;;  %3251 = vmatprep.subr.mxu0 %v8060_v5  ;;  %v832_v62 = vunpack.c.0.s8 %v831_v49  ;;  %v834_v63 = vshrl.u32 %v833_v50, 7 }
  0x3c   : > { %3477 = vmatpush2.msra.mxu1 %v3128_v2  ;;  %3252 = vmatpush2.msra.mxu0 %v3096_v3  ;;  %v332_v3 = vld [vmem:[%s5232_s20 + $0x48] sm:$0xff] }
  0x3d   : > { %669 = vperm.xlu1 %4774, %v526_v54   ;;  %664 = vperm.xlu0 %4773, %v525_v55   ;;  %v371_v54 = vmul.f32 %v5238_v45, %v323_v46  ;;  %v327_v55 = vld [vmem:[%s5232_s20 + $0x20] sm:$0xff]  ;;  %v342_v46 = vld [vmem:[%s5232_s20 + $0x98] sm:$0xff] }
  0x3e   : > { %3478 = vmatprep.subr.mxu1 %v8060_v5  ;;  %3253 = vmatprep.subr.mxu0 %v8060_v5 }
  0x3f   : > { %3479 = vmatpush2.msra.mxu1 %v3127_v4  ;;  %3254 = vmatpush2.msra.mxu0 %v3095_v8  ;;  %v419_v2 = vadd.f32 %v5250_v56, %v371_v54  ;;  %v331_v4 = vld [vmem:[%s5232_s20 + $0x40] sm:$0xff]  ;;  %v377_v8 = vmul.f32 %v5238_v45, %v329_v61 }
  0x40   : > { %3480 = vmatprep.subr.mxu1 %v8060_v5  ;;  %3255 = vmatprep.subr.mxu0 %v8060_v5 }
  0x41   : > { %679 = vperm.xlu1 %4774, %v528_v59   ;;  %674 = vperm.xlu0 %4773, %v527_v60   ;;  %v376_v59 = vmul.f32 %v5238_v45, %v328_v52  ;;  %v330_v60 = vld [vmem:[%s5232_s20 + $0x38] sm:$0xff] }
  0x42   : > { %3481 = vmatpush2.msra.mxu1 %v3126_v9  ;;  %3256 = vmatpush2.msra.mxu0 %v3094_v10  ;;  %v334_v9 = vld [vmem:[%s5232_s20 + $0x58] sm:$0xff]  ;;  %v333_v10 = vld [vmem:[%s5232_s20 + $0x50] sm:$0xff] }
  0x43   : > { %3482 = vmatprep.subr.mxu1 %v8060_v5  ;;  %3257 = vmatprep.subr.mxu0 %v8060_v5 }
  0x44   : > { %3483 = vmatpush2.msra.mxu1 %v3125_v13  ;;  %3258 = vmatpush2.msra.mxu0 %v3093_v14  ;;  %v336_v13 = vld [vmem:[%s5232_s20 + $0x68] sm:$0xff]  ;;  %v5276_v14 = vsub.s32 %v832_v62, %v834_v63  ;;  %v390_v63 = vmul.f32 %v5238_v45, %v342_v46 }
  0x45   : > { %689 = vperm.xlu1 %4774, %v530_v0   ;;  %684 = vperm.xlu0 %4773, %v529_v1   ;;  %v375_v0 = vmul.f32 %v5238_v45, %v327_v55  ;;  %v421_v1 = vadd.f32 %v5250_v56, %v373_v53 }
  0x46   : > { %3484 = vmatprep.subr.mxu1 %v8060_v5  ;;  %3259 = vmatprep.subr.mxu0 %v8060_v5 }
  0x47   : > { %3485 = vmatpush2.msra.mxu1 %v3124_v15  ;;  %3260 = vmatpush2.msra.mxu0 %v3092_v18  ;;  %v5279_v15 = vadd.f32 %v5250_v56, %v375_v0  ;;  %v335_v18 = vld [vmem:[%s5232_s20 + $0x60] sm:$0xff] }
  0x48   : > { %3486 = vmatprep.subr.mxu1 %v8060_v5  ;;  %3261 = vmatprep.subr.mxu0 %v8060_v5 }
  0x49   : > { %699 = vperm.xlu1 %4774, %v532_v6   ;;  %694 = vperm.xlu0 %4773, %v531_v7   ;;  %v5263_v6 = vadd.f32 %v5250_v56, %v374_v57  ;;  %v378_v7 = vmul.f32 %v5238_v45, %v330_v60  ;;  %v344_v57 = vld [vmem:[%s5232_s20 + $0xa8] sm:$0xff] }
  0x4a   : > { %3487 = vmatpush2.msra.mxu1 %v3123_v19  ;;  %3262 = vmatpush2.msra.mxu0 %v3091_v20  ;;  %v338_v19 = vld [vmem:[%s5232_s20 + $0x78] sm:$0xff]  ;;  %v462_v20 = vmax.f32 %v421_v1, 0.0 }
  0x4b   : > { %3488 = vmatprep.subr.mxu1 %v8060_v5  ;;  %3263 = vmatprep.subr.mxu0 %v8060_v5  ;;  %v3177_v1 = vld [vmem:[%s8055_s4 + $0x378] sm:$0xff] }
  0x4c   : > { %3489 = vmatpush2.msra.mxu1 %v3122_v23  ;;  %3264 = vmatpush2.msra.mxu0 %v3090_v24  ;;  %v381_v23 = vmul.f32 %v5238_v45, %v333_v10  ;;  %v337_v24 = vld [vmem:[%s5232_s20 + $0x70] sm:$0xff]  ;;  %v392_v10 = vmul.f32 %v5238_v45, %v344_v57 }
  0x4d   : > { %709 = vperm.xlu1 %4774, %v534_v11   ;;  %704 = vperm.xlu0 %4773, %v533_v12   ;;  %v5270_v11 = vadd.f32 %v5250_v56, %v372_v58  ;;  %v5273_v12 = vadd.f32 %v5250_v56, %v376_v59 }
  0x4e   : > { %3490 = vmatprep.subr.mxu1 %v8060_v5  ;;  %3265 = vmatprep.subr.mxu0 %v8060_v5 }
  0x4f   : > { %3491 = vmatpush2.msra.mxu1 %v3121_v25  ;;  %3266 = vmatpush2.msra.mxu0 %v3089_v28  ;;  %v463_v25 = vmax.f32 %v5263_v6, 0.0  ;;  %v384_v28 = vmul.f32 %v5238_v45, %v336_v13  ;;  %v346_v6 = vld [vmem:[%s5232_s20 + $0xb8] sm:$0xff] }
  0x50   : > { %3492 = vmatprep.subr.mxu1 %v8060_v5  ;;  %3267 = vmatprep.subr.mxu0 %v8060_v5 }
  0x51   : > { %719 = vperm.xlu1 %4774, %v536_v16   ;;  %714 = vperm.xlu0 %4773, %v535_v17   ;;  %v380_v16 = vmul.f32 %v5238_v45, %v332_v3  ;;  %v379_v17 = vmul.f32 %v5238_v45, %v331_v4  ;;  %v5321_v50 = vadd.f32 %v5250_v56, %v384_v28  ;;  %v343_v4 = vld [vmem:[%s5232_s20 + $0xa0] sm:$0xff]  ;;  %v345_v28 = vld [vmem:[%s5232_s20 + $0xb0] sm:$0xff] }
  0x52   : > { %3493 = vmatpush2.msra.mxu1 %v3120_v29  ;;  %3268 = vmatpush2.msra.mxu0 %v3088_v30  ;;  %v340_v29 = vld [vmem:[%s5232_s20 + $0x88] sm:$0xff]  ;;  %v461_v30 = vmax.f32 %v5270_v11, 0.0  ;;  %v389_v3 = vmul.f32 %v5238_v45, %v341_v51 }
  0x53   : > { %3494 = vmatprep.subr.mxu1 %v8060_v5  ;;  %3269 = vmatprep.subr.mxu0 %v8060_v5  ;;  %v388_v44 = vmul.f32 %v5238_v45, %v340_v29 }
  0x54   : > { %3495 = vmatpush2.msra.mxu1 %v3119_v32  ;;  %3270 = vmatpush2.msra.mxu0 %v3087_v34  ;;  %v383_v32 = vmul.f32 %v5238_v45, %v335_v18 }
  0x55   : > { %729 = vperm.xlu1 %4774, %v538_v21   ;;  %724 = vperm.xlu0 %4773, %v537_v22   ;;  %v460_v21 = vmax.f32 %v419_v2, 0.0  ;;  %v382_v22 = vmul.f32 %v5238_v45, %v334_v9  ;;  %v5341_v2 = vadd.f32 %v5250_v56, %v388_v44 }
  0x56   : > { %3496 = vmatprep.subr.mxu1 %v8060_v5  ;;  %3271 = vmatprep.subr.mxu0 %v8060_v5  ;;  %v5325_v53 = vadd.f32 %v5250_v56, %v383_v32 }
  0x57   : > { %3497 = vmatpush2.msra.mxu1 %v3118_v33  ;;  %3272 = vmatpush2.msra.mxu0 %v3086_v36  ;;  %v386_v33 = vmul.f32 %v5238_v45, %v338_v19  ;;  %v464_v36 = vmax.f32 %v5279_v15, 0.0  ;;  %v5358_v19 = vadd.f32 %v5250_v56, %v390_v63 }
  0x58   : > { %3498 = vmatprep.subr.mxu1 %v8060_v5  ;;  %3273 = vmatprep.subr.mxu0 %v8060_v5 }
  0x59   : > { %739 = vperm.xlu1 %4774, %v540_v26   ;;  %734 = vperm.xlu0 %4773, %v539_v27   ;;  %v5290_v26 = vadd.f32 %v5250_v56, %v378_v7  ;;  %v5293_v27 = vadd.f32 %v5250_v56, %v377_v8  ;;  %v5328_v54 = vadd.f32 %v5250_v56, %v386_v33 }
  0x5a   : > { %3499 = vmatpush2.msra.mxu1 %v3117_v35  ;;  %3274 = vmatpush2.msra.mxu0 %v3085_v38  ;;  %v5306_v38 = vadd.f32 %v5250_v56, %v379_v17 }
  0x5b   : > { %3500 = vmatprep.subr.mxu1 %v8060_v5  ;;  %3275 = vmatprep.subr.mxu0 %v8060_v5  ;;  %v466_v49 = vmax.f32 %v5293_v27, 0.0 }
  0x5c   : > { %3501 = vmatpush2.msra.mxu1 %v3116_v37  ;;  %3276 = vmatpush2.msra.mxu0 %v3084_v40  ;;  %v5303_v37 = vadd.f32 %v5250_v56, %v380_v16  ;;  %v339_v40 = vld [vmem:[%s5232_s20 + $0x80] sm:$0xff] }
  0x5d   : > { %744 = vperm.xlu0 %4773, %v541_v31   ;;  %3502 = vmatprep.subr.mxu1 %v8060_v5  ;;  %v465_v31 = vmax.f32 %v5273_v12, 0.0  ;;  %v387_v55 = vmul.f32 %v5238_v45, %v339_v40 }
  0x5e   : > { %3503 = vmatpush2.msra.mxu1 %v3115_v39  ;;  %3277 = vmatprep.subr.mxu0 %v8060_v5  ;;  %v385_v39 = vmul.f32 %v5238_v45, %v337_v24 }
  0x5f   : > { %3504 = vmatprep.subr.mxu1 %v8060_v5  ;;  %3278 = vmatpush2.msra.mxu0 %v3083_v42  ;;  %v5311_v42 = vadd.f32 %v5250_v56, %v382_v22  ;;  %v5354_v16 = vadd.f32 %v5250_v56, %v387_v55 }
  0x60   : > { %3505 = vmatpush2.msra.mxu1 %v3114_v41  ;;  %3279 = vmatprep.subr.mxu0 %v8060_v5  ;;  %v5335_v62 = vadd.f32 %v5250_v56, %v385_v39 }
  0x61   : > { %3892 = vmatprep.subr.mxu1 %v8060_v5  ;;  %3280 = vmatpush2.msra.mxu0 %v3082_v43  ;;  %v5314_v43 = vadd.f32 %v5250_v56, %v381_v23 }
  0x62   : > { %3667 = vmatprep.subr.mxu0 %v8060_v5 }
  0x88   : > { %v555_v34 = vpop.permute.xlu1 %554  ;;  %v545_v35 = vpop.permute.xlu0 %544 }
  0x89   : > { %v749_v41 = vmul.f32 %v555_v34, %v462_v20  ;;  %v747_v47 = vmul.f32 %v545_v35, %v460_v21  ;;  %v391_v20 = vmul.f32 %v5238_v45, %v343_v4  ;;  %v394_v21 = vmul.f32 %v5238_v45, %v346_v6  ;;  %v348_v35 = vld [vmem:[%s5232_s20 + $0xc8] sm:$0xff] }
  0x8a   : > { %v5374_v34 = vadd.f32 %v5250_v56, %v392_v10 }
  0x8b   : > { %v863_v52 = vcombine.high %v749_v41, %v749_v41  ;;  %v829_v7 = vcombine.high %v747_v47, %v747_v47  ;;  %v5368_v29 = vrot.slane %v747_v47, %v5276_v14  ;;  %v5390_v47 = vadd.f32 %v5250_v56, %v391_v20  ;;  %v350_v20 = vld [vmem:[%s5232_s20 + $0xd8] sm:$0xff] }
  0x8c   : > { %v560_v58 = vpop.permute.xlu1 %559  ;;  %v550_v59 = vpop.permute.xlu0 %549  ;;  %v5393_v51 = vadd.f32 %v5250_v56, %v394_v21  ;;  %v349_v21 = vld [vmem:[%s5232_s20 + $0xd0] sm:$0xff] }
  0x8d   : > { %v750_v8 = vmul.f32 %v560_v58, %v463_v25  ;;  %v5349_v11 = vrot.slane %v863_v52, %v5276_v14  ;;  %v5364_v25 = vadd.f32 %v5250_v56, %v389_v3  ;;  %v5371_v32 = vrot.slane %v829_v7, %v5276_v14 }
  0x8e   : > { %v748_v33 = vmul.f32 %v550_v59, %v461_v30  ;;  %8204 = vst [vmem:[#allocation2_spill] sm:$0xff] %v5393_v51  ;;  %v396_v58 = vmul.f32 %v5238_v45, %v348_v35  ;;  %v347_v59 = vld [vmem:[%s5232_s20 + $0xc0] sm:$0xff]  ;;  %v5404_v63 = vcombine.high %v5368_v29, %v5368_v29 }
  0x8f   : > { %v880_v22 = vcombine.high %v750_v8, %v750_v8  ;;  %v5382_v39 = vcombine.high %v5349_v11, %v5349_v11  ;;  %v5385_v40 = vrot.slane %v750_v8, %v5276_v14  ;;  %v5408_v3 = vcombine.high %v5371_v32, %v5371_v32 }
  0x90   : > { %v565_v17 = vpop.permute.xlu0 %564  ;;  %v570_v46 = vpop.permute.xlu1 %569  ;;  %v5411_v4 = vrot.slane %v748_v33, %v5276_v14  ;;  %v846_v10 = vcombine.high %v748_v33, %v748_v33  ;;  %v395_v6 = vmul.f32 %v5238_v45, %v347_v59  ;;  %v398_v59 = vmul.f32 %v5238_v45, %v350_v20 }
  0x91   : > { %v751_v23 = vmul.f32 %v565_v17, %v464_v36  ;;  %v5378_v36 = vrot.slane %v749_v41, %v5276_v14  ;;  %v393_v41 = vmul.f32 %v5238_v45, %v345_v28  ;;  %v5397_v52 = vrot.slane %v880_v22, %v5276_v14 }
  0x92   : > { %v1552_v8 = vcombine.low %v5382_v39, %v5385_v40  ;;  %v5420_v17 = vmul.f32 %v570_v46, %v465_v31  ;;  %v5439_v31 = vadd.f32 %v5250_v56, %v396_v58  ;;  %v352_v46 = vld [vmem:[%s5232_s20 + $0xe8] sm:$0xff]  ;;  %v2318_v28 = vcombine.low %v5404_v63, %v5371_v32 }
  0x93   : > { %v897_v55 = vcombine.high %v751_v23, %v751_v23  ;;  %v878_v7 = vcombine.high %v5378_v36, %v5378_v36  ;;  %v5427_v35 = vadd.f32 %v5250_v56, %v393_v41  ;;  %v5432_v57 = vcombine.high %v5397_v52, %v5397_v52 }
  0x94   : > { %v5435_v33 = vrot.slane %v751_v23, %v5276_v14  ;;  %8205 = vst [vmem:[#allocation3_spill] sm:$0xff] %v5439_v31  ;;  %v2319_v41 = vcombine.low %v5408_v3, %v5411_v4  ;;  %v397_v22 = vmul.f32 %v5238_v45, %v349_v21  ;;  %v5449_v30 = vrot.slane %v846_v10, %v5276_v14  ;;  %v575_v15 = vpop.permute.xlu0 %574 }
  0x95   : > { %v911_v12 = vrot.slane %v897_v55, %v5276_v14  ;;  %v5453_v23 = vrot.slane %v5420_v17, %v5276_v14  ;;  %v1551_v55 = vcombine.low %v878_v7, %v5349_v11  ;;  %v1566_v58 = vrot.slane %v1552_v8, %v5276_v14 }
  0x96   : > { %v5459_v44 = vcombine.high %v5385_v40, %v5385_v40  ;;  %v5463_v20 = vadd.f32 %v5250_v56, %v395_v6  ;;  %v400_v10 = vmul.f32 %v5238_v45, %v352_v46  ;;  %v1569_v18 = vcombine.low %v5432_v57, %v5435_v33 }
  0x97   : > { %v5466_v21 = vcombine.high %v911_v12, %v911_v12  ;;  %v1559_v7 = vrot.slane %v1551_v55, %v5276_v14  ;;  %v2326_v13 = vrot.slane %v2318_v28, %v5276_v14  ;;  %v2333_v9 = vrot.slane %v2319_v41, %v5276_v14 }
  0x98   : > { %8206 = vst [vmem:[#allocation4_spill] sm:$0xff] %v5463_v20  ;;  %v5475_v24 = vadd.f32 %v5250_v56, %v398_v59  ;;  %v5478_v6 = vadd.f32 %v5250_v56, %v397_v22  ;;  %v861_v46 = vcombine.high %v5411_v4, %v5411_v4  ;;  %v862_v55 = vcombine.high %v5449_v30, %v5449_v30  ;;  %v3144_v20 = vld [vmem:[%s8055_s4 + $0x270] sm:$0xff] }
  0x99   : > { %v5486_v8 = vcombine.high %v5453_v23, %v5453_v23  ;;  %v5488_v28 = vcombine.low %v1559_v7, %v1566_v58  ;;  %v5492_v41 = vmul.f32 %v575_v15, %v466_v49  ;;  %v2334_v59 = vcombine.low %v2326_v13, %v2333_v9  ;;  %v351_v9 = vld [vmem:[%s5232_s20 + $0xe0] sm:$0xff]  ;;  %v354_v13 = vld [vmem:[%s5232_s20 + $0xf8] sm:$0xff]  ;;  %v3175_v7 = vld [vmem:[%s8055_s4 + $0x368] sm:$0xff] }
  0x9a   : > { %8207 = vst [vmem:[#allocation5_spill] sm:$0xff] %v5475_v24  ;;  %8208 = vst [vmem:[#allocation6_spill] sm:$0xff] %v5478_v6  ;;  %v1568_v22 = vcombine.low %v5459_v44, %v5397_v52  ;;  %v5500_v0 = vadd.f32 %v5250_v56, %v400_v10  ;;  %v1517_v61 = vcombine.low %v5368_v29, %v5404_v63  ;;  %v3176_v63 = vld [vmem:[%s8055_s4 + $0x370] sm:$0xff]  ;;  %v358_v6 = vld [vmem:[%s5232_s20 + $0x118] sm:$0xff] }
  0x9b   : > { %v914_v58 = vcombine.high %v5420_v17, %v5420_v17  ;;  %v1585_v27 = vcombine.low %v911_v12, %v5466_v21  ;;  %3506 = vmatprep.mubr.f32.mxu1 %v5488_v28  ;;  %v1583_v49 = vrot.slane %v1569_v18, %v5276_v14  ;;  %v1518_v17 = vcombine.low %v5371_v32, %v5408_v3 }
  0x9c   : > { %8209 = vst [vmem:[#allocation7_spill] sm:$0xff] %v5500_v0  ;;  %3507 = vmatmul.mubr.f32.vlgmr.msra.gmra.mxu1 %v2334_v59  ;;  %v1576_v15 = vrot.slane %v1568_v22, %v5276_v14  ;;  %v1534_v18 = vcombine.low %v5411_v4, %v861_v46  ;;  %v1535_v12 = vcombine.low %v5449_v30, %v862_v55  ;;  %v580_v22 = vpop.permute.xlu1 %579  ;;  %v8211_v0 = vmov 0.0  }
  0x9d   : > { %v1586_v59 = vcombine.low %v5453_v23, %v5486_v8  ;;  %3893 = vmatpush1.msra.mxu1 %v3177_v1  ;;  %v5526_v29 = vrot.slane %v5492_v41, %v5276_v14  ;;  %v399_v10 = vmul.f32 %v5238_v45, %v351_v9  ;;  %v402_v32 = vmul.f32 %v5238_v45, %v354_v13 }
  0x9e   : > { %3894 = vmatprep.subr.mxu1 %v8060_v5  ;;  %v1525_v3 = vrot.slane %v1517_v61, %v5276_v14  ;;  %v5534_v4 = vrot.slane %v914_v58, %v5276_v14  ;;  %v1593_v60 = vrot.slane %v1585_v27, %v5276_v14  ;;  %v5537_v1 = vcombine.low %v1576_v15, %v1583_v49 }
  0x9f   : > { %3895 = vmatpush1.msra.mxu1 %v3176_v63  ;;  %v8210_v9 = vmax.f32 %v5290_v26, 0.0  ;;  %v931_v13 = vcombine.high %v5492_v41, %v5492_v41  ;;  %v2335_v61 = vcombine.low %v861_v46, %v5449_v30  ;;  %v2336_v58 = vcombine.low %v862_v55, %v5378_v36  ;;  %v3174_v41 = vld [vmem:[%s8055_s4 + $0x360] sm:$0xff] }
  0xa0   : > { %3896 = vmatprep.subr.mxu1 %v8211_v0  ;;  %v1600_v27 = vrot.slane %v1586_v59, %v5276_v14  ;;  %3511 = vmatprep.mubr.f32.mxu1 %v5537_v1  ;;  %v1532_v49 = vrot.slane %v1518_v17, %v5276_v14  ;;  %v1542_v15 = vrot.slane %v1534_v18, %v5276_v14 }
  0xa1   : > { %v754_v5 = vmul.f32 %v580_v22, %v8210_v9  ;;  %v1549_v26 = vrot.slane %v1535_v12, %v5276_v14  ;;  %v5560_v30 = vcombine.high %v5526_v29, %v5526_v29  ;;  %v2343_v46 = vrot.slane %v2335_v61, %v5276_v14  ;;  %3897 = vmatpush1.msra.mxu1 %v3175_v7  ;;  %v356_v22 = vld [vmem:[%s5232_s20 + $0x108] sm:$0xff]  ;;  %v585_v7 = vpop.permute.xlu0 %584 }
  0xa2   : > { %v2350_v55 = vrot.slane %v2336_v58, %v5276_v14  ;;  %v401_v63 = vmul.f32 %v5238_v45, %v353_v48  ;;  %v1533_v17 = vcombine.low %v1525_v3, %v1532_v49  ;;  %v5567_v12 = vcombine.low %v1593_v60, %v1600_v27  ;;  %3898 = vmatprep.subr.mxu1 %v8211_v0  ;;  %v355_v49 = vld [vmem:[%s5232_s20 + $0x100] sm:$0xff] }
  0xa3   : > { %v5565_v18 = vcombine.low %v1542_v15, %v1549_v26  ;;  %v2099_v59 = vrot.slane %v5378_v36, %v5276_v14  ;;  %v5575_v9 = vcombine.high %v5534_v4, %v5534_v4  ;;  %v948_v61 = vcombine.high %v754_v5, %v754_v5  ;;  %3899 = vmatpush1.msra.mxu1 %v3174_v41  ;;  %v590_v26 = vpop.permute.xlu1 %589 }
  0xa4   : > { %8212 = vst [vmem:[#allocation8_spill] sm:$0xff] %v5567_v12  ;;  %v5578_v48 = vrot.slane %v754_v5, %v5276_v14  ;;  %v2351_v3 = vcombine.low %v2343_v46, %v2350_v55  ;;  %v5581_v60 = vrot.slane %v931_v13, %v5276_v14  ;;  %v2206_v58 = vrot.slane %v1533_v17, 1  ;;  %3900 = vmatprep.subr.mxu1 %v8211_v0 }
  0xa5   : > { %v2207_v36 = vrot.slane %v5565_v18, 1  ;;  %v5585_v27 = vadd.f32 %v5250_v56, %v399_v10  ;;  %v2353_v15 = vcombine.low %v5385_v40, %v5459_v44  ;;  %v1603_v5 = vcombine.low %v5526_v29, %v5560_v30  ;;  %v3145_v40 = vld [vmem:[%s8055_s4 + $0x278] sm:$0xff]  ;;  %v595_v51 = vpop.permute.xlu0 %594 }
  0xa6   : > { %3512 = vmatmul.mubr.f32.gmra.mxu1 %v2351_v3  ;;  %v5594_v13 = vadd.f32 %v5250_v56, %v402_v32  ;;  %v404_v41 = vmul.f32 %v5238_v45, %v356_v22  ;;  %v5599_v10 = vcombine.high %v5435_v33, %v5435_v33  ;;  %v2209_v44 = vrot.slane %v2099_v59, 1 }
  0xa7   : > { %v2208_v46 = vsel %vm2205_vm0, %v2206_v58, %v2207_v36  ;;  %3516 = vmatprep.mubr.f32.mxu1 %v5567_v12  ;;  %v5607_v55 = vadd.f32 %v5250_v56, %v401_v63  ;;  %v1602_v32 = vcombine.low %v5534_v4, %v5575_v9  ;;  %v5612_v22 = vrot.slane %v948_v61, %v5276_v14 }
  0xa8   : > { %v5616_v3 = vcombine.high %v5578_v48, %v5578_v48  ;;  %3281 = vmatprep.mubr.f32.mxu0 %v2208_v46  ;;  %v403_v58 = vmul.f32 %v5238_v45, %v355_v49  ;;  %v947_v59 = vcombine.high %v5581_v60, %v5581_v60  ;;  %v8214_v63 = vmax.f32 %v5303_v37, 0.0  ;;  %v357_v46 = vld [vmem:[%s5232_s20 + $0x110] sm:$0xff] }
  0xa9   : > { %8213 = vst [vmem:[#allocation9_spill] sm:$0xff] %v5607_v55  ;;  %3282 = vmatmul.mubr.f32.vlgmr.msra.gmra.mxu0 %v1533_v17  ;;  %v2210_v31 = vsel %vm2205_vm0, %v2207_v36, %v2209_v44  ;;  %v2352_v61 = vcombine.low %v5349_v11, %v5382_v39  ;;  %v1617_v49 = vrot.slane %v1603_v5, %v5276_v14  ;;  %v8216_v39 = vmax.f32 %v5306_v38, 0.0 }
  0xaa   : > { %v756_v24 = vmul.f32 %v590_v26, %v8214_v63  ;;  %3668 = vmatpush1.msra.mxu0 %v3145_v40  ;;  %3286 = vmatprep.mubr.f32.mxu0 %v2210_v31  ;;  %v2367_v37 = vrot.slane %v2353_v15, %v5276_v14  ;;  %v5635_v36 = vadd.f32 %v5250_v56, %v404_v41  ;;  %v3173_v15 = vld [vmem:[%s8055_s4 + $0x358] sm:$0xff]  ;;  %v2211_v41 = vrot.slane %v5488_v28, 1 }
  0xab   : > { %v2370_v11 = vcombine.low %v5435_v33, %v5599_v10  ;;  %v755_v26 = vmul.f32 %v585_v7, %v8216_v39  ;;  %v2360_v44 = vrot.slane %v2352_v61, %v5276_v14  ;;  %3669 = vmatprep.subr.mxu0 %v8211_v0  ;;  %v406_v31 = vmul.f32 %v5238_v45, %v358_v6  ;;  %v360_v7 = vld [vmem:[%s5232_s20 + $0x128] sm:$0xff]  ;;  %v600_v61 = vpop.permute.xlu1 %599 }
  0xac   : > { %8215 = vst [vmem:[#allocation10_spill] sm:$0xff] %v5635_v36  ;;  %v1610_v5 = vrot.slane %v1602_v32, %v5276_v14  ;;  %3670 = vmatpush1.msra.mxu0 %v3144_v20  ;;  %v5650_v33 = vadd.f32 %v5250_v56, %v403_v58  ;;  %v405_v38 = vmul.f32 %v5238_v45, %v357_v46  ;;  %v359_v20 = vld [vmem:[%s5232_s20 + $0x120] sm:$0xff]  ;;  %v2212_v46 = vrot.slane %v5537_v1, 1 }
  0xad   : > { %v1620_v40 = vcombine.low %v5616_v3, %v5612_v22  ;;  %v1619_v6 = vcombine.low %v947_v59, %v5578_v48  ;;  %v982_v63 = vcombine.high %v756_v24, %v756_v24  ;;  %v5657_v39 = vcombine.low %v2360_v44, %v2367_v37  ;;  %3287 = vmatmul.mubr.f32.gmra.mxu0 %v5565_v18 }
  0xae   : > { %v5662_v32 = vrot.slane %v756_v24, %v5276_v14  ;;  %v5664_v58 = vcombine.low %v1610_v5, %v1617_v49  ;;  %v2369_v17 = vcombine.low %v5397_v52, %v5432_v57  ;;  %3671 = vmatprep.subr.mxu0 %v8211_v0  ;;  %3901 = vmatpush1.msra.mxu1 %v3173_v15  ;;  %v8219_v49 = vmax.f32 %v5311_v42, 0.0  ;;  %v605_v5 = vpop.permute.xlu0 %604 }
  0xaf   : > { %8217 = vst [vmem:[#allocation11_spill] sm:$0xff] %v5657_v39  ;;  %v965_v59 = vcombine.high %v755_v26, %v755_v26  ;;  %v5671_v37 = vrot.slane %v755_v26, %v5276_v14  ;;  %3517 = vmatmul.mubr.f32.gmra.mxu1 %v5657_v39  ;;  %v2384_v18 = vrot.slane %v2370_v11, %v5276_v14  ;;  %v3143_v26 = vld [vmem:[%s8055_s4 + $0x268] sm:$0xff] }
  0xb0   : > { %8218 = vst [vmem:[#allocation12_spill] sm:$0xff] %v5664_v58  ;;  %v408_v24 = vmul.f32 %v5238_v45, %v360_v7  ;;  %v758_v44 = vmul.f32 %v600_v61, %v8219_v49  ;;  %3521 = vmatprep.mubr.f32.mxu1 %v5664_v58  ;;  %v5680_v52 = vsel %vm2205_vm0, %v2211_v41, %v2212_v46  ;;  %v8221_v61 = vmax.f32 %v5314_v43, 0.0 }
  0xb1   : > { %8220 = vst [vmem:[#allocation13_spill] sm:$0xff] %v5680_v52  ;;  %v2377_v57 = vrot.slane %v2369_v17, %v5276_v14  ;;  %v407_v15 = vmul.f32 %v5238_v45, %v359_v20  ;;  %v5688_v11 = vrot.slane %v982_v63, %v5276_v14  ;;  %v5692_v42 = vcombine.high %v5612_v22, %v5612_v22 }
  0xb2   : > { %3291 = vmatprep.mubr.f32.mxu0 %v5680_v52  ;;  %v1627_v41 = vrot.slane %v1619_v6, %v5276_v14  ;;  %v1634_v7 = vrot.slane %v1620_v40, %v5276_v14  ;;  %v5699_v17 = vcombine.high %v5662_v32, %v5662_v32  ;;  %v757_v45 = vmul.f32 %v595_v51, %v8221_v61  ;;  %v610_v6 = vpop.permute.xlu1 %609 }
  0xb3   : > { %v5703_v20 = vcombine.low %v2377_v57, %v2384_v18  ;;  %3292 = vmatmul.mubr.f32.gmra.mxu0 %v5488_v28  ;;  %v5707_v63 = vadd.f32 %v5250_v56, %v406_v31  ;;  %v5710_v49 = vrot.slane %v965_v59, %v5276_v14  ;;  %v5714_v40 = vcombine.high %v5671_v37, %v5671_v37  ;;  %v3142_v31 = vld [vmem:[%s8055_s4 + $0x260] sm:$0xff] }
  0xb4   : > { %v5716_v52 = vcombine.low %v1627_v41, %v1634_v7  ;;  %3672 = vmatpush1.msra.mxu0 %v3143_v26  ;;  %v5719_v43 = vadd.f32 %v5250_v56, %v405_v38  ;;  %v1016_v51 = vcombine.high %v758_v44, %v758_v44  ;;  %v2106_v28 = vrot.slane %v5599_v10, %v5276_v14  ;;  %v615_v7 = vpop.permute.xlu0 %614 }
  0xb5   : > { %8222 = vst [vmem:[#allocation14_spill] sm:$0xff] %v5703_v20  ;;  %8223 = vst [vmem:[#allocation15_spill] sm:$0xff] %v5707_v63  ;;  %3522 = vmatmul.mubr.f32.gmra.mxu1 %v5703_v20  ;;  %v5728_v59 = vadd.f32 %v5250_v56, %v408_v24  ;;  %v5731_v18 = vadd.f32 %v5250_v56, %v407_v15  ;;  %v2403_v57 = vcombine.low %v5575_v9, %v5526_v29 }
  0xb6   : > { %8224 = vst [vmem:[#allocation16_spill] sm:$0xff] %v5716_v52  ;;  %8225 = vst [vmem:[#allocation17_spill] sm:$0xff] %v5719_v43  ;;  %v5739_v26 = vcombine.high %v5688_v11, %v5688_v11  ;;  %v1636_v10 = vcombine.low %v5692_v42, %v5671_v37  ;;  %3526 = vmatprep.mubr.f32.mxu1 %v5716_v52  ;;  %v1653_v24 = vcombine.low %v5662_v32, %v5699_v17  ;;  %v620_v39 = vpop.permute.xlu1 %619 }
  0xb7   : > { %8226 = vst [vmem:[#allocation18_spill] sm:$0xff] %v5728_v59  ;;  %8227 = vst [vmem:[#allocation19_spill] sm:$0xff] %v5731_v18  ;;  %v999_v56 = vcombine.high %v757_v45, %v757_v45  ;;  %v8228_v15 = vmax.f32 %v5321_v50, 0.0  ;;  %v2214_v61 = vrot.slane %v2106_v28, 1  ;;  %3673 = vmatprep.subr.mxu0 %v8211_v0  ;;  %3902 = vmatprep.subr.mxu1 %v8211_v0 }
  0xb8   : > { %v1637_v29 = vcombine.low %v5714_v40, %v5710_v49  ;;  %v5753_v9 = vrot.slane %v758_v44, %v5276_v14  ;;  %v5756_v38 = vrot.slane %v757_v45, %v5276_v14  ;;  %v2386_v32 = vcombine.low %v5466_v21, %v5453_v23  ;;  %3674 = vmatpush1.msra.mxu0 %v3142_v31  ;;  %v3141_v45 = vld [vmem:[%s8055_s4 + $0x258] sm:$0xff] }
  0xb9   : > { %v760_v41 = vmul.f32 %v610_v6, %v8228_v15  ;;  %v5763_v6 = vrot.slane %v1016_v51, %v5276_v14  ;;  %v5766_v28 = vsel %vm2205_vm0, %v2212_v46, %v2214_v61  ;;  %v2387_v44 = vcombine.low %v5486_v8, %v5534_v4  ;;  %3675 = vmatprep.subr.mxu0 %v8211_v0  ;;  %v3172_v8 = vld [vmem:[%s8055_s4 + $0x350] sm:$0xff] }
  0xba   : > { %8229 = vst [vmem:[#allocation20_spill] sm:$0xff] %v5766_v28  ;;  %v1654_v23 = vcombine.low %v5688_v11, %v5739_v26  ;;  %v5778_v21 = vcombine.high %v5710_v49, %v5710_v49  ;;  %v1644_v51 = vrot.slane %v1636_v10, %v5276_v14  ;;  %v8230_v46 = vmax.f32 %v5325_v53, 0.0  ;;  %3296 = vmatprep.mubr.f32.mxu0 %v5766_v28  ;;  %v3140_v53 = vld [vmem:[%s8055_s4 + $0x250] sm:$0xff] }
  0xbb   : > { %v1661_v4 = vrot.slane %v1653_v24, %v5276_v14  ;;  %v5789_v15 = vrot.slane %v999_v56, %v5276_v14  ;;  %v1050_v61 = vcombine.high %v760_v41, %v760_v41  ;;  %v2394_v50 = vrot.slane %v2386_v32, %v5276_v14  ;;  %3297 = vmatmul.mubr.f32.gmra.mxu0 %v5537_v1  ;;  %v5808_v1 = vpop.permute.xlu0 %624 }
  0xbc   : > { %v759_v31 = vmul.f32 %v605_v5, %v8230_v46  ;;  %v1031_v5 = vcombine.high %v5753_v9, %v5753_v9  ;;  %v5800_v10 = vcombine.high %v5756_v38, %v5756_v38  ;;  %v2401_v24 = vrot.slane %v2387_v44, %v5276_v14  ;;  %3676 = vmatpush1.msra.mxu0 %v3141_v45 }
  0xbd   : > { %v1651_v56 = vrot.slane %v1637_v29, %v5276_v14  ;;  %v5806_v32 = vcombine.high %v5763_v6, %v5763_v6  ;;  %v2216_v46 = vrot.slane %v5567_v12, 1  ;;  %v2404_v20 = vcombine.low %v5560_v30, %v5581_v60  ;;  %3677 = vmatprep.subr.mxu0 %v8211_v0  ;;  %3903 = vmatpush1.msra.mxu1 %v3172_v8 }
  0xbe   : > { %v5816_v44 = vrot.slane %v760_v41, %v5276_v14  ;;  %v1033_v29 = vcombine.high %v759_v31, %v759_v31  ;;  %v5819_v45 = vrot.slane %v759_v31, %v5276_v14  ;;  %v5821_v59 = vcombine.low %v2394_v50, %v2401_v24  ;;  %3678 = vmatpush1.msra.mxu0 %v3140_v53  ;;  %v3139_v50 = vld [vmem:[%s8055_s4 + $0x248] sm:$0xff] }
  0xbf   : > { %v5825_v28 = vcombine.high %v5789_v15, %v5789_v15  ;;  %v5828_v30 = vrot.slane %v1050_v61, %v5276_v14  ;;  %v5830_v43 = vcombine.low %v1644_v51, %v1651_v56  ;;  %v8233_v41 = vrot.slane %v5664_v58, 1  ;;  %3679 = vmatprep.subr.mxu0 %v8211_v0  ;;  %3904 = vmatprep.subr.mxu1 %v8211_v0 }
  0xc0   : > { %8231 = vst [vmem:[#allocation21_spill] sm:$0xff] %v5821_v59  ;;  %v1670_v31 = vcombine.low %v5756_v38, %v5800_v10  ;;  %3527 = vmatmul.mubr.f32.gmra.mxu1 %v5821_v59  ;;  %v2411_v51 = vrot.slane %v2403_v57, %v5276_v14  ;;  %v2418_v61 = vrot.slane %v2404_v20, %v5276_v14  ;;  %v8235_v24 = vmax.f32 %v5328_v54, 0.0 }
  0xc1   : > { %8232 = vst [vmem:[#allocation22_spill] sm:$0xff] %v5830_v43  ;;  %v5835_v8 = vsel %vm2205_vm0, %v2216_v46, %v8233_v41  ;;  %v8236_v46 = vmax.f32 %v5335_v62, 0.0  ;;  %3531 = vmatprep.mubr.f32.mxu1 %v5830_v43  ;;  %v1668_v63 = vrot.slane %v1654_v23, %v5276_v14  ;;  %v5860_v20 = vcombine.high %v5816_v44, %v5816_v44 }
  0xc2   : > { %8234 = vst [vmem:[#allocation23_spill] sm:$0xff] %v5835_v8  ;;  %3301 = vmatprep.mubr.f32.mxu0 %v5835_v8  ;;  %v5850_v56 = vmul.f32 %v620_v39, %v8235_v24  ;;  %v5863_v57 = vrot.slane %v1033_v29, %v5276_v14  ;;  %v1688_v54 = vcombine.low %v5806_v32, %v5819_v45  ;;  %v5877_v24 = vpop.permute.xlu0 %634 }
  0xc3   : > { %v761_v41 = vmul.f32 %v615_v7, %v8236_v46  ;;  %3302 = vmatmul.mubr.f32.gmra.mxu0 %v5567_v12  ;;  %v5867_v62 = vcombine.low %v2411_v51, %v2418_v61  ;;  %v1671_v7 = vcombine.low %v5789_v15, %v5825_v28  ;;  %v5875_v23 = vcombine.high %v5828_v30, %v5828_v30  ;;  %v3137_v46 = vld [vmem:[%s8055_s4 + $0x238] sm:$0xff] }
  0xc4   : > { %3680 = vmatpush1.msra.mxu0 %v3139_v50  ;;  %v5879_v29 = vcombine.low %v1661_v4, %v1668_v63  ;;  %v3138_v50 = vld [vmem:[%s8055_s4 + $0x240] sm:$0xff]  ;;  %v5886_v51 = vcombine.low %v1031_v5, %v5763_v6  ;;  %v1678_v61 = vrot.slane %v1670_v31, %v5276_v14  ;;  %v5893_v59 = vcombine.high %v5819_v45, %v5819_v45  ;;  %v630_v5 = vpop.permute.xlu1 %629 }
  0xc5   : > { %8237 = vst [vmem:[#allocation24_spill] sm:$0xff] %v5867_v62  ;;  %3681 = vmatprep.subr.mxu0 %v8211_v0  ;;  %3532 = vmatmul.mubr.f32.gmra.mxu1 %v5867_v62  ;;  %v5898_v63 = vrot.slane %v5850_v56, %v5276_v14  ;;  %v1067_v4 = vcombine.high %v761_v41, %v761_v41 }
  0xc6   : > { %8238 = vst [vmem:[#allocation25_spill] sm:$0xff] %v5879_v29  ;;  %v5901_v53 = vrot.slane %v761_v41, %v5276_v14  ;;  %3536 = vmatprep.mubr.f32.mxu1 %v5879_v29  ;;  %v2113_v31 = vrot.slane %v5581_v60, %v5276_v14  ;;  %v5913_v62 = vcombine.high %v5863_v57, %v5863_v57 }
  0xc7   : > { %v5916_v41 = vrot.slane %v1688_v54, %v5276_v14  ;;  %v2421_v12 = vcombine.low %v5612_v22, %v5692_v42  ;;  %3682 = vmatpush1.msra.mxu0 %v3138_v50  ;;  %v1721_v60 = vcombine.low %v5828_v30, %v5875_v23  ;;  %v1084_v8 = vcombine.high %v5850_v56, %v5850_v56 }
  0xc8   : > { %v2219_v55 = vrot.slane %v2113_v31, 1  ;;  %v1685_v39 = vrot.slane %v1671_v7, %v5276_v14  ;;  %3683 = vmatprep.subr.mxu0 %v8211_v0  ;;  %v8239_v54 = vmax.f32 %v5341_v2, 0.0  ;;  %v8240_v22 = vcombine.low %v5578_v48, %v5616_v3  ;;  %v640_v3 = vpop.permute.xlu1 %639 }
  0xc9   : > { %v2435_v30 = vrot.slane %v2421_v12, %v5276_v14  ;;  %3684 = vmatpush1.msra.mxu0 %v3137_v46  ;;  %v5937_v56 = vcombine.high %v5898_v63, %v5898_v63  ;;  %v5940_v7 = vrot.slane %v1067_v4, %v5276_v14  ;;  %v5944_v2 = vcombine.high %v5901_v53, %v5901_v53 }
  0xca   : > { %v764_v18 = vmul.f32 %v630_v5, %v8239_v54  ;;  %v2428_v42 = vrot.slane %v8240_v22, %v5276_v14  ;;  %v5946_v5 = vpop.permute.xlu0 %644  ;;  %v8242_v48 = vrot.slane %v5664_v58, 1  ;;  %3685 = vmatprep.subr.mxu0 %v8211_v0  ;;  %v2221_v31 = vrot.slane %v5716_v52, 1 }
  0xcb   : > { %8241 = vst [vmem:[#allocation26_spill] sm:$0xff] %v5937_v56  ;;  %v5963_v54 = vrot.slane %v1721_v60, %v5276_v14  ;;  %v8245_v22 = vmax.f32 %v5354_v16, 0.0  ;;  %v5970_v50 = vcombine.low %v1678_v61, %v1685_v39  ;;  %v8247_v46 = vrot.slane %v5830_v43, 1 }
  0xcc   : > { %v5951_v12 = vsel %vm2205_vm0, %v8242_v48, %v2219_v55  ;;  %v5959_v4 = vcombine.low %v2428_v42, %v2435_v30  ;;  %v1705_v55 = vcombine.low %v5913_v62, %v5816_v44  ;;  %v3136_v42 = vld [vmem:[%s8055_s4 + $0x230] sm:$0xff]  ;;  %v5977_v30 = vrot.slane %v1084_v8, %v5276_v14 }
  0xcd   : > { %8243 = vst [vmem:[#allocation27_spill] sm:$0xff] %v5951_v12  ;;  %3306 = vmatprep.mubr.f32.mxu0 %v5951_v12  ;;  %v763_v48 = vmul.f32 %v5808_v1, %v8245_v22  ;;  %8246 = vst [vmem:[#allocation29_spill] sm:$0xff] %v5970_v50  ;;  %v1118_v60 = vcombine.high %v764_v18, %v764_v18  ;;  %v5983_v16 = vsel %vm2205_vm0, %v2221_v31, %v8247_v46 }
  0xce   : > { %8244 = vst [vmem:[#allocation28_spill] sm:$0xff] %v5959_v4  ;;  %3307 = vmatmul.mubr.f32.gmra.mxu0 %v5664_v58  ;;  %3537 = vmatmul.mubr.f32.gmra.mxu1 %v5959_v4  ;;  %8248 = vst [vmem:[#allocation30_spill] sm:$0xff] %v5983_v16  ;;  %v2438_v1 = vcombine.low %v5710_v49, %v5778_v21  ;;  %v1739_v39 = vcombine.low %v5898_v63, %v5937_v56  ;;  %v8249_v49 = vmax.f32 %v5358_v19, 0.0  ;;  %v6016_v19 = vpop.permute.xlu0 %654 }
  0xcf   : > { %v5991_v61 = vcombine.high %v5940_v7, %v5940_v7  ;;  %v1722_v8 = vcombine.low %v5901_v53, %v5944_v2  ;;  %3541 = vmatprep.mubr.f32.mxu1 %v5970_v50  ;;  %3311 = vmatprep.mubr.f32.mxu0 %v5983_v16  ;;  %v5999_v31 = vrot.slane %v764_v18, %v5276_v14  ;;  %v3135_v16 = vld [vmem:[%s8055_s4 + $0x228] sm:$0xff] }
  0xd0   : > { %v766_v22 = vmul.f32 %v640_v3, %v8249_v49  ;;  %v8250_v4 = vcombine.low %v5671_v37, %v5714_v40  ;;  %v2452_v12 = vrot.slane %v2438_v1, %v5276_v14  ;;  %3686 = vmatpush1.msra.mxu0 %v3136_v42  ;;  %v1101_v18 = vcombine.high %v763_v48, %v763_v48 }
  0xd1   : > { %v6014_v36 = vrot.slane %v763_v48, %v5276_v14  ;;  %v1695_v37 = vrot.slane %v5886_v51, %v5276_v14  ;;  %v6022_v40 = vrot.slane %v1118_v60, %v5276_v14  ;;  %v1100_v3 = vcombine.high %v5977_v30, %v5977_v30  ;;  %3687 = vmatprep.subr.mxu0 %v8211_v0 }
  0xd2   : > { %v2445_v58 = vrot.slane %v8250_v4, %v5276_v14  ;;  %3312 = vmatmul.mubr.f32.gmra.mxu0 %v5716_v52  ;;  %v8252_v4 = vmax.f32 %v5364_v25, 0.0  ;;  %v6033_v48 = vrot.slane %v1739_v39, %v5276_v14  ;;  %v6036_v51 = vrot.slane %v1722_v8, %v5276_v14 }
  0xd3   : > { %8251 = vst [vmem:[#allocation31_spill] sm:$0xff] %v6014_v36  ;;  %v6041_v49 = vcombine.low %v1695_v37, %v5916_v41  ;;  %3688 = vmatpush1.msra.mxu0 %v3135_v16  ;;  %v6045_v25 = vcombine.high %v5999_v31, %v5999_v31  ;;  %v2120_v39 = vrot.slane %v5778_v21, %v5276_v14  ;;  %v3134_v41 = vld [vmem:[%s8055_s4 + $0x220] sm:$0xff]  ;;  %v3171_v16 = vld [vmem:[%s8055_s4 + $0x348] sm:$0xff] }
  0xd4   : > { %v765_v42 = vmul.f32 %v5877_v24, %v8252_v4  ;;  %v6029_v1 = vcombine.low %v2445_v58, %v2452_v12  ;;  %v1152_v58 = vcombine.high %v766_v22, %v766_v22  ;;  %v6048_v24 = vrot.slane %v766_v22, %v5276_v14  ;;  %v650_v12 = vpop.permute.xlu1 %649  ;;  %3689 = vmatprep.subr.mxu0 %v8211_v0 }
  0xd5   : > { %8254 = vst [vmem:[#allocation33_spill] sm:$0xff] %v6041_v49  ;;  %v6060_v8 = vrot.slane %v1101_v18, %v5276_v14  ;;  %v6064_v22 = vcombine.high %v6014_v36, %v6014_v36  ;;  %v8256_v21 = vcombine.low %v5699_v17, %v5688_v11  ;;  %v8257_v4 = vcombine.low %v5739_v26, %v5756_v38  ;;  %v6086_v11 = vpop.permute.xlu0 %664 }
  0xd6   : > { %8253 = vst [vmem:[#allocation32_spill] sm:$0xff] %v6029_v1  ;;  %8255 = vst [vmem:[#allocation34_spill] sm:$0xff] %v6048_v24  ;;  %3542 = vmatmul.mubr.f32.gmra.mxu1 %v6029_v1  ;;  %v6077_v18 = vcombine.high %v6022_v40, %v6022_v40  ;;  %v6080_v60 = vcombine.low %v1100_v3, %v6014_v36  ;;  %v1135_v1 = vcombine.high %v765_v42, %v765_v42 }
  0xd7   : > { %3546 = vmatprep.mubr.f32.mxu1 %v6041_v49  ;;  %v2462_v37 = vrot.slane %v8256_v21, %v5276_v14  ;;  %v2469_v46 = vrot.slane %v8257_v4, %v5276_v14  ;;  %v6083_v52 = vrot.slane %v765_v42, %v5276_v14  ;;  %v2224_v17 = vrot.slane %v2120_v39, 1  ;;  %3690 = vmatpush1.msra.mxu0 %v3134_v41 }
  0xd8   : > { %8258 = vst [vmem:[#allocation35_spill] sm:$0xff] %v6077_v18  ;;  %v8260_v38 = vcombine.low %v5893_v59, %v5863_v57  ;;  %v1719_v4 = vrot.slane %v1705_v55, %v5276_v14  ;;  %3905 = vmatpush1.msra.mxu1 %v3171_v16  ;;  %v6098_v42 = vrot.slane %v1152_v58, %v5276_v14  ;;  %v8264_v41 = vmax.f32 %v5390_v47, 0.0 }
  0xd9   : > { %v6088_v21 = vcombine.low %v2462_v37, %v2469_v46  ;;  %v6102_v39 = vcombine.high %v6048_v24, %v6048_v24  ;;  %v8263_v46 = vmax.f32 %v5374_v34, 0.0  ;;  %3691 = vmatprep.subr.mxu0 %v8211_v0  ;;  %v3133_v34 = vld [vmem:[%s8055_s4 + $0x218] sm:$0xff]  ;;  %v6156_v56 = vpop.permute.xlu0 %674  ;;  %3906 = vmatprep.subr.mxu1 %v8211_v0 }
  0xda   : > { %v1712_v26 = vrot.slane %v8260_v38, %v5276_v14  ;;  %8261 = vst [vmem:[#allocation37_spill] sm:$0xff] %v6098_v42  ;;  %v767_v16 = vmul.f32 %v5946_v5, %v8264_v41  ;;  %v8265_v38 = vrot.slane %v5830_v43, 1  ;;  %v6130_v5 = vrot.slane %v1135_v1, %v5276_v14  ;;  %3692 = vmatpush1.msra.mxu0 %v3133_v34 }
  0xdb   : > { %8259 = vst [vmem:[#allocation36_spill] sm:$0xff] %v6088_v21  ;;  %8262 = vst [vmem:[#allocation38_spill] sm:$0xff] %v6102_v39  ;;  %v768_v37 = vmul.f32 %v650_v12, %v8263_v46  ;;  %3547 = vmatmul.mubr.f32.gmra.mxu1 %v6088_v21  ;;  %v6125_v12 = vcombine.high %v6060_v8, %v6060_v8  ;;  %v2226_v46 = vrot.slane %v5879_v29, 1  ;;  %3693 = vmatprep.subr.mxu0 %v8211_v0 }
  0xdc   : > { %v6115_v58 = vsel %vm2205_vm0, %v8265_v38, %v2224_v17  ;;  %v6118_v3 = vcombine.low %v1712_v26, %v1719_v4  ;;  %v6134_v17 = vcombine.high %v6083_v52, %v6083_v52  ;;  %v660_v26 = vpop.permute.xlu1 %659  ;;  %v2471_v1 = vcombine.low %v5800_v10, %v5789_v15 }
  0xdd   : > { %8266 = vst [vmem:[#allocation39_spill] sm:$0xff] %v6115_v58  ;;  %3316 = vmatprep.mubr.f32.mxu0 %v6115_v58  ;;  %v6147_v38 = vcombine.high %v6098_v42, %v6098_v42  ;;  %v1806_v55 = vcombine.low %v6048_v24, %v6102_v39  ;;  %v1186_v47 = vcombine.high %v768_v37, %v768_v37  ;;  %v8269_v4 = vmax.f32 %v5427_v35, 0.0  ;;  %v8270_v58 = vld [vmem:[#allocation2_spill] sm:$0xff]  ;;  %v3132_v35 = vld [vmem:[%s8055_s4 + $0x210] sm:$0xff] }
  0xde   : > { %8267 = vst [vmem:[#allocation40_spill] sm:$0xff] %v6118_v3  ;;  %8268 = vst [vmem:[#allocation41_spill] sm:$0xff] %v6134_v17  ;;  %3551 = vmatprep.mubr.f32.mxu1 %v6118_v3  ;;  %3317 = vmatmul.mubr.f32.gmra.mxu0 %v5830_v43  ;;  %v1169_v43 = vcombine.high %v767_v16, %v767_v16  ;;  %v8271_v18 = vmax.f32 %v8270_v58, 0.0  ;;  %v8272_v15 = vrot.slane %v5970_v50, 1 }
  0xdf   : > { %v769_v21 = vmul.f32 %v6016_v19, %v8269_v4  ;;  %v2472_v39 = vcombine.low %v5825_v28, %v5753_v9  ;;  %v6175_v58 = vcombine.high %v6130_v5, %v6130_v5  ;;  %v1789_v34 = vcombine.low %v6083_v52, %v6134_v17  ;;  %3694 = vmatpush1.msra.mxu0 %v3132_v35 }
  0xe0   : > { %v770_v41 = vmul.f32 %v660_v26, %v8271_v18  ;;  %v6161_v10 = vsel %vm2205_vm0, %v2226_v46, %v8272_v15  ;;  %v6183_v26 = vrot.slane %v768_v37, %v5276_v14  ;;  %v2479_v4 = vrot.slane %v2471_v1, %v5276_v14  ;;  %v3131_v15 = vld [vmem:[%s8055_s4 + $0x208] sm:$0xff]  ;;  %3695 = vmatprep.subr.mxu0 %v8211_v0 }
  0xe1   : > { %8273 = vst [vmem:[#allocation2_spill] sm:$0xff] %v6161_v10  ;;  %3321 = vmatprep.mubr.f32.mxu0 %v6161_v10  ;;  %v2486_v46 = vrot.slane %v2472_v39, %v5276_v14  ;;  %v6194_v18 = vrot.slane %v1806_v55, %v5276_v14  ;;  %v6197_v28 = vrot.slane %v767_v16, %v5276_v14  ;;  %v670_v55 = vpop.permute.xlu1 %669 }
  0xe2   : > { %3322 = vmatmul.mubr.f32.gmra.mxu0 %v5879_v29  ;;  %v1203_v37 = vcombine.high %v769_v21, %v769_v21  ;;  %v6200_v1 = vrot.slane %v1186_v47, %v5276_v14  ;;  %v6203_v39 = vrot.slane %v1169_v43, %v5276_v14  ;;  %v1220_v19 = vcombine.high %v770_v41, %v770_v41 }
  0xe3   : > { %8274 = vst [vmem:[#allocation42_spill] sm:$0xff] %v6194_v18  ;;  %v6205_v29 = vcombine.low %v2479_v4, %v2486_v46  ;;  %v6209_v52 = vrot.slane %v770_v41, %v5276_v14  ;;  %v6213_v16 = vcombine.low %v5963_v54, %v6036_v51  ;;  %v2127_v47 = vrot.slane %v5753_v9, %v5276_v14  ;;  %v6229_v54 = vpop.permute.xlu0 %684  ;;  %v8280_v46 = vld [vmem:[#allocation4_spill] sm:$0xff] }
  0xe4   : > { %8275 = vst [vmem:[#allocation43_spill] sm:$0xff] %v6203_v39  ;;  %v2488_v43 = vcombine.low %v5763_v6, %v5806_v32  ;;  %3696 = vmatpush1.msra.mxu0 %v3131_v15  ;;  %v6222_v4 = vrot.slane %v1789_v34, %v5276_v14  ;;  %v6226_v41 = vcombine.high %v6183_v26, %v6183_v26  ;;  %v3130_v32 = vld [vmem:[%s8055_s4 + $0x200] sm:$0xff]  ;;  %v8281_v15 = vmax.f32 %v8280_v46, 0.0 }
  0xe5   : > { %8276 = vst [vmem:[#allocation44_spill] sm:$0xff] %v6205_v29  ;;  %8277 = vst [vmem:[#allocation45_spill] sm:$0xff] %v6209_v52  ;;  %3552 = vmatmul.mubr.f32.gmra.mxu1 %v6205_v29  ;;  %v8279_v9 = vcombine.low %v5819_v45, %v5893_v59  ;;  %v1184_v51 = vcombine.high %v6197_v28, %v6197_v28  ;;  %v6241_v34 = vrot.slane %v1203_v37, %v5276_v14 }
  0xe6   : > { %8278 = vst [vmem:[#allocation46_spill] sm:$0xff] %v6213_v16  ;;  %v771_v35 = vmul.f32 %v6086_v11, %v8281_v15  ;;  %3556 = vmatprep.mubr.f32.mxu1 %v6213_v16  ;;  %v8282_v59 = vcombine.low %v5940_v7, %v5991_v61  ;;  %v6256_v29 = vcombine.high %v6203_v39, %v6203_v39  ;;  %v2229_v46 = vrot.slane %v2127_v47, 1 }
  0xe7   : > { %v2503_v6 = vrot.slane %v8279_v9, %v5276_v14  ;;  %v3170_v9 = vld [vmem:[%s8055_s4 + $0x340] sm:$0xff]  ;;  %v6259_v37 = vrot.slane %v1220_v19, %v5276_v14  ;;  %v2496_v11 = vrot.slane %v2488_v43, %v5276_v14  ;;  %3697 = vmatprep.subr.mxu0 %v8211_v0  ;;  %v6266_v15 = vcombine.high %v6209_v52, %v6209_v52  ;;  %v8287_v19 = vld [vmem:[#allocation3_spill] sm:$0xff]  ;;  %v3169_v43 = vld [vmem:[%s8055_s4 + $0x338] sm:$0xff] }
  0xe8   : > { %v1746_v45 = vrot.slane %v8282_v59, %v5276_v14  ;;  %v6270_v59 = vcombine.high %v6200_v1, %v6200_v1  ;;  %v6273_v10 = vrot.slane %v769_v21, %v5276_v14  ;;  %v8288_v17 = vmax.f32 %v8287_v19, 0.0  ;;  %3698 = vmatpush1.msra.mxu0 %v3130_v32  ;;  %3907 = vmatpush1.msra.mxu1 %v3170_v9  ;;  %v680_v32 = vpop.permute.xlu1 %679 }
  0xe9   : > { %8283 = vst [vmem:[#allocation4_spill] sm:$0xff] %v6259_v37  ;;  %8284 = vst [vmem:[#allocation47_spill] sm:$0xff] %v6266_v15  ;;  %v8289_v18 = vrot.slane %v5970_v50, 1  ;;  %v6286_v36 = vcombine.low %v2496_v11, %v2503_v6  ;;  %v6305_v9 = vcombine.high %v6259_v37, %v6259_v37  ;;  %v6320_v21 = vrot.slane %v771_v35, %v5276_v14  ;;  %v8295_v11 = vld [vmem:[#allocation5_spill] sm:$0xff] }
  0xea   : > { %8285 = vst [vmem:[#allocation48_spill] sm:$0xff] %v6270_v59  ;;  %8286 = vst [vmem:[#allocation49_spill] sm:$0xff] %v6273_v10  ;;  %v772_v47 = vmul.f32 %v670_v55, %v8288_v17  ;;  %v6292_v17 = vcombine.high %v6241_v34, %v6241_v34  ;;  %v1237_v55 = vcombine.high %v771_v35, %v771_v35  ;;  %v8296_v6 = vmax.f32 %v8295_v11, 0.0 }
  0xeb   : > { %v6284_v42 = vsel %vm2205_vm0, %v8289_v18, %v2229_v46  ;;  %8291 = vst [vmem:[#allocation50_spill] sm:$0xff] %v6286_v36  ;;  %v6296_v19 = vcombine.low %v1746_v45, %v6033_v48  ;;  %v6299_v18 = vcombine.low %v1184_v51, %v6203_v39  ;;  %3557 = vmatmul.mubr.f32.gmra.mxu1 %v6286_v36  ;;  %v6309_v46 = vpop.permute.xlu0 %694  ;;  %v3161_v48 = vld [vmem:[%s8055_s4 + $0x2f8] sm:$0xff]  ;;  %8294 = vst [vmem:[#allocation53_spill] sm:$0xff] %v6320_v21 }
  0xec   : > { %8290 = vst [vmem:[#allocation3_spill] sm:$0xff] %v6284_v42  ;;  %8292 = vst [vmem:[#allocation51_spill] sm:$0xff] %v6292_v17  ;;  %3326 = vmatprep.mubr.f32.mxu0 %v6284_v42  ;;  %v1858_v51 = vcombine.low %v6209_v52, %v6266_v15  ;;  %v1841_v45 = vcombine.low %v6270_v59, %v6273_v10  ;;  %v1254_v24 = vcombine.high %v772_v47, %v772_v47 }
  0xed   : > { %8293 = vst [vmem:[#allocation52_spill] sm:$0xff] %v6296_v19  ;;  %3327 = vmatmul.mubr.f32.gmra.mxu0 %v5970_v50  ;;  %3561 = vmatprep.mubr.f32.mxu1 %v6296_v19  ;;  %v774_v36 = vmul.f32 %v680_v32, %v8296_v6  ;;  %v2231_v50 = vrot.slane %v6041_v49, 1  ;;  %v2232_v42 = vrot.slane %v6118_v3, 1  ;;  %v2505_v15 = vcombine.low %v5863_v57, %v5913_v62 }
  0xee   : > { %3699 = vmatprep.subr.mxu0 %v8211_v0  ;;  %3908 = vmatprep.subr.mxu1 %v8211_v0  ;;  %v6336_v35 = vcombine.high %v6273_v10, %v6273_v10  ;;  %v1857_v52 = vcombine.low %v6241_v34, %v6292_v17  ;;  %v6341_v32 = vrot.slane %v772_v47, %v5276_v14 }
  0xef   : > { %v6344_v6 = vrot.slane %v1237_v55, %v5276_v14  ;;  %3700 = vmatpush2.msra.mxu0 %v3161_v48  ;;  %v6347_v57 = vsel %vm2205_vm0, %v2231_v50, %v2232_v42  ;;  %v2513_v62 = vrot.slane %v2505_v15, %v5276_v14  ;;  %v8301_v11 = vcombine.low %v5816_v44, %v5860_v20  ;;  %v8303_v15 = vld [vmem:[#allocation6_spill] sm:$0xff] }
  0xf0   : > { %8297 = vst [vmem:[#allocation5_spill] sm:$0xff] %v6336_v35  ;;  %8298 = vst [vmem:[#allocation54_spill] sm:$0xff] %v6341_v32  ;;  %v8302_v34 = vcombine.low %v6064_v22, %v6060_v8  ;;  %3909 = vmatpush1.msra.mxu1 %v3169_v43  ;;  %v6359_v55 = vrot.slane %v1858_v51, %v5276_v14  ;;  %v6364_v48 = vrot.slane %v1841_v45, %v5276_v14  ;;  %v6380_v45 = vpop.permute.xlu0 %704 }
  0xf1   : > { %8299 = vst [vmem:[#allocation55_spill] sm:$0xff] %v6344_v6  ;;  %8300 = vst [vmem:[#allocation56_spill] sm:$0xff] %v6347_v57  ;;  %v2520_v59 = vrot.slane %v8301_v11, %v5276_v14  ;;  %v8304_v17 = vmax.f32 %v8303_v15, 0.0  ;;  %v690_v11 = vpop.permute.xlu1 %689  ;;  %3331 = vmatprep.mubr.f32.mxu0 %v6347_v57  ;;  %v6371_v39 = vrot.slane %v1254_v24, %v5276_v14  ;;  %3701 = vmatprep.subr.mxu0 %v8211_v0 }
  0xf2   : > { %v1770_v47 = vrot.slane %v8302_v34, %v5276_v14  ;;  %v6375_v43 = vcombine.high %v6320_v21, %v6320_v21  ;;  %v1288_v51 = vcombine.high %v774_v36, %v774_v36  ;;  %3332 = vmatmul.mubr.f32.gmra.mxu0 %v6041_v49  ;;  %v6383_v15 = vrot.slane %v774_v36, %v5276_v14 }
  0xf3   : > { %v773_v44 = vmul.f32 %v6156_v56, %v8304_v17  ;;  %v6377_v34 = vcombine.low %v2513_v62, %v2520_v59  ;;  %v8307_v56 = vrot.slane %v6080_v60, %v5276_v14  ;;  %v2134_v24 = vrot.slane %v5860_v20, %v5276_v14  ;;  %v3160_v59 = vld [vmem:[%s8055_s4 + $0x2f0] sm:$0xff]  ;;  %3910 = vmatprep.subr.mxu1 %v8211_v0 }
  0xf4   : > { %8305 = vst [vmem:[#allocation6_spill] sm:$0xff] %v6375_v43  ;;  %v2523_v50 = vcombine.low %v5944_v2, %v5940_v7  ;;  %v6399_v36 = vrot.slane %v1857_v52, %v5276_v14  ;;  %v6405_v62 = vcombine.high %v6341_v32, %v6341_v32  ;;  %v1253_v20 = vcombine.high %v6344_v6, %v6344_v6  ;;  %v3168_v7 = vld [vmem:[%s8055_s4 + $0x330] sm:$0xff] }
  0xf5   : > { %8306 = vst [vmem:[#allocation57_spill] sm:$0xff] %v6377_v34  ;;  %v6388_v17 = vcombine.low %v8307_v56, %v1770_v47  ;;  %3562 = vmatmul.mubr.f32.gmra.mxu1 %v6377_v34  ;;  %v1271_v2 = vcombine.high %v773_v44, %v773_v44  ;;  %v2234_v52 = vrot.slane %v2134_v24, 1  ;;  %v8308_v56 = vcombine.low %v6125_v12, %v5999_v31 }
  0xf6   : > { %v2537_v47 = vrot.slane %v2523_v50, %v5276_v14  ;;  %v1875_v34 = vcombine.low %v6320_v21, %v6375_v43  ;;  %v6424_v49 = vcombine.high %v6371_v39, %v6371_v39  ;;  %v6427_v57 = vrot.slane %v773_v44, %v5276_v14  ;;  %3702 = vmatpush2.msra.mxu0 %v3160_v59  ;;  %v700_v43 = vpop.permute.xlu1 %699 }
  0xf7   : > { %3566 = vmatprep.mubr.f32.mxu1 %v6388_v17  ;;  %v1780_v60 = vrot.slane %v8308_v56, %v5276_v14  ;;  %v8311_v50 = vcombine.low %v5875_v23, %v5901_v53  ;;  %v6434_v56 = vrot.slane %v1288_v51, %v5276_v14  ;;  %v6438_v6 = vcombine.high %v6383_v15, %v6383_v15  ;;  %v8315_v51 = vld [vmem:[#allocation7_spill] sm:$0xff] }
  0xf8   : > { %8309 = vst [vmem:[#allocation58_spill] sm:$0xff] %v6424_v49  ;;  %8310 = vst [vmem:[#allocation59_spill] sm:$0xff] %v6427_v57  ;;  %v6441_v10 = vsel %vm2205_vm0, %v2232_v42, %v2234_v52  ;;  %v8314_v44 = vcombine.low %v6045_v25, %v6022_v40  ;;  %3911 = vmatpush1.msra.mxu1 %v3168_v7  ;;  %v8316_v59 = vmax.f32 %v8315_v51, 0.0  ;;  %v6456_v42 = vpop.permute.xlu0 %714  ;;  %3703 = vmatprep.subr.mxu0 %v8211_v0 }
  0xf9   : > { %v2530_v24 = vrot.slane %v8311_v50, %v5276_v14  ;;  %8312 = vst [vmem:[#allocation60_spill] sm:$0xff] %v6438_v6  ;;  %8313 = vst [vmem:[#allocation61_spill] sm:$0xff] %v6441_v10  ;;  %3336 = vmatprep.mubr.f32.mxu0 %v6441_v10  ;;  %v6461_v7 = vrot.slane %v1271_v2, %v5276_v14  ;;  %v8319_v2 = vmax.f32 %v5594_v13, 0.0  ;;  %3912 = vmatprep.subr.mxu1 %v8211_v0 }
  0xfa   : > { %v1787_v35 = vrot.slane %v8314_v44, %v5276_v14  ;;  %v776_v50 = vmul.f32 %v690_v11, %v8316_v59  ;;  %v8318_v44 = vmax.f32 %v5585_v27, 0.0  ;;  %3337 = vmatmul.mubr.f32.gmra.mxu0 %v6118_v3  ;;  %v3159_v11 = vld [vmem:[%s8055_s4 + $0x2e8] sm:$0xff]  ;;  %v6494_v13 = vcombine.high %v6427_v57, %v6427_v57 }
  0xfb   : > { %v6454_v37 = vcombine.low %v2530_v24, %v2537_v47  ;;  %v6473_v47 = vrot.slane %v1875_v34, %v5276_v14  ;;  %v6476_v24 = vcombine.low %v1253_v20, %v6341_v32  ;;  %v778_v51 = vmul.f32 %v700_v43, %v8319_v2  ;;  %v8320_v27 = vld [vmem:[#allocation19_spill] sm:$0xff]  ;;  %3704 = vmatpush2.msra.mxu0 %v3159_v11  ;;  %v8323_v11 = vld [vmem:[#allocation26_spill] sm:$0xff] }
  0xfc   : > { %v775_v53 = vmul.f32 %v6229_v54, %v8318_v44  ;;  %v6466_v23 = vcombine.low %v1780_v60, %v1787_v35  ;;  %v496_v54 = vmax.f32 %v8320_v27, 0.0  ;;  %v3167_v35 = vld [vmem:[%s8055_s4 + $0x328] sm:$0xff]  ;;  %v6488_v34 = vcombine.high %v6434_v56, %v6434_v56  ;;  %v725_v21 = vpop.permute.xlu0 %724  ;;  %3705 = vmatprep.subr.mxu0 %v8211_v0 }
  0xfd   : > { %8317 = vst [vmem:[#allocation7_spill] sm:$0xff] %v6454_v37  ;;  %3567 = vmatmul.mubr.f32.gmra.mxu1 %v6454_v37  ;;  %v1908_v43 = vcombine.low %v6424_v49, %v6427_v57  ;;  %v1322_v59 = vcombine.high %v776_v50, %v776_v50  ;;  %v2236_v44 = vrot.slane %v6213_v16, 1  ;;  %v2237_v2 = vrot.slane %v6296_v19, 1 }
  0xfe   : > { %3571 = vmatprep.mubr.f32.mxu1 %v6466_v23  ;;  %v6506_v27 = vcombine.high %v6461_v7, %v6461_v7  ;;  %v6509_v52 = vrot.slane %v776_v50, %v5276_v14  ;;  %v1305_v60 = vcombine.high %v775_v53, %v775_v53  ;;  %v2539_v37 = vcombine.low %v5991_v61, %v5898_v63 }
  0xff   : > { %3913 = vmatpush1.msra.mxu1 %v3167_v35  ;;  %v6514_v20 = vrot.slane %v775_v53, %v5276_v14  ;;  %v1356_v3 = vcombine.high %v778_v51, %v778_v51  ;;  %v6517_v10 = vsel %vm2205_vm0, %v2236_v44, %v2237_v2  ;;  %v2540_v32 = vcombine.low %v8323_v11, %v5977_v30  ;;  %v3158_v35 = vld [vmem:[%s8055_s4 + $0x2e0] sm:$0xff]  ;;  %v8326_v11 = vld [vmem:[#allocation9_spill] sm:$0xff] }
 0x100   : > { %8321 = vst [vmem:[#allocation19_spill] sm:$0xff] %v6506_v27  ;;  %8322 = vst [vmem:[#allocation62_spill] sm:$0xff] %v6517_v10  ;;  %v6525_v27 = vrot.slane %v1908_v43, %v5276_v14  ;;  %3341 = vmatprep.mubr.f32.mxu0 %v6517_v10  ;;  %v8324_v61 = vcombine.low %v6130_v5, %v6175_v58  ;;  %v6538_v44 = vrot.slane %v1322_v59, %v5276_v14 }
 0x101   : > { %v8327_v43 = vmax.f32 %v8326_v11, 0.0  ;;  %v2547_v63 = vrot.slane %v2539_v37, %v5276_v14  ;;  %v2554_v10 = vrot.slane %v2540_v32, %v5276_v14  ;;  %3342 = vmatmul.mubr.f32.gmra.mxu0 %v6213_v16  ;;  %v1337_v57 = vcombine.high %v6509_v52, %v6509_v52  ;;  %3914 = vmatprep.subr.mxu1 %v8211_v0 }
 0x102   : > { %v1804_v53 = vrot.slane %v8324_v61, %v5276_v14  ;;  %8325 = vst [vmem:[#allocation26_spill] sm:$0xff] %v6538_v44  ;;  %v3166_v61 = vld [vmem:[%s8055_s4 + $0x320] sm:$0xff]  ;;  %v6552_v59 = vrot.slane %v1305_v60, %v5276_v14  ;;  %v783_v49 = vmul.f32 %v725_v21, %v496_v54  ;;  %v6559_v37 = vcombine.high %v6514_v20, %v6514_v20 }
 0x103   : > { %v777_v50 = vmul.f32 %v6309_v46, %v8327_v43  ;;  %v2141_v46 = vrot.slane %v5977_v30, %v5276_v14  ;;  %v6562_v32 = vrot.slane %v1356_v3, %v5276_v14  ;;  %v6564_v11 = vcombine.low %v2547_v63, %v2554_v10  ;;  %3706 = vmatpush2.msra.mxu0 %v3158_v35  ;;  %v8332_v10 = vld [vmem:[#allocation31_spill] sm:$0xff]  ;;  %v8334_v63 = vld [vmem:[#allocation37_spill] sm:$0xff] }
 0x104   : > { %8328 = vst [vmem:[#allocation9_spill] sm:$0xff] %v6559_v37  ;;  %v2557_v43 = vcombine.low %v6060_v8, %v6125_v12  ;;  %v6569_v21 = vcombine.low %v6222_v4, %v1804_v53  ;;  %v1441_v54 = vcombine.high %v783_v49, %v783_v49  ;;  %v6572_v30 = vrot.slane %v783_v49, %v5276_v14 }
 0x105   : > { %8329 = vst [vmem:[#allocation63_spill] sm:$0xff] %v6564_v11  ;;  %v2239_v60 = vrot.slane %v2141_v46, 1  ;;  %3915 = vmatpush1.msra.mxu1 %v3166_v61  ;;  %3707 = vmatprep.subr.mxu0 %v8211_v0  ;;  %v6576_v3 = vrot.slane %v778_v51, %v5276_v14  ;;  %v8333_v8 = vcombine.low %v8332_v10, %v6064_v22 }
 0x106   : > { %8330 = vst [vmem:[#allocation64_spill] sm:$0xff] %v6569_v21  ;;  %8331 = vst [vmem:[#allocation65_spill] sm:$0xff] %v6572_v30  ;;  %3572 = vmatmul.mubr.f32.gmra.mxu1 %v6564_v11  ;;  %v2571_v4 = vrot.slane %v2557_v43, %v5276_v14  ;;  %v8335_v49 = vcombine.low %v8334_v63, %v6147_v38  ;;  %v6590_v35 = vcombine.high %v6538_v44, %v6538_v44  ;;  %v8342_v11 = vld [vmem:[#allocation42_spill] sm:$0xff] }
 0x107   : > { %v2564_v12 = vrot.slane %v8333_v8, %v5276_v14  ;;  %3576 = vmatprep.mubr.f32.mxu1 %v6569_v21  ;;  %v6594_v51 = vrot.slane %v1441_v54, %v5276_v14  ;;  %v6598_v22 = vcombine.high %v6572_v30, %v6572_v30  ;;  %v6601_v61 = vsel %vm2205_vm0, %v2237_v2, %v2239_v60  ;;  %v3157_v54 = vld [vmem:[%s8055_s4 + $0x2d8] sm:$0xff] }
 0x108   : > { %v1821_v53 = vrot.slane %v8335_v49, %v5276_v14  ;;  %8336 = vst [vmem:[#allocation31_spill] sm:$0xff] %v6590_v35  ;;  %8339 = vst [vmem:[#allocation67_spill] sm:$0xff] %v6601_v61  ;;  %v6605_v46 = vcombine.high %v6562_v32, %v6562_v32  ;;  %v1339_v43 = vcombine.high %v777_v50, %v777_v50  ;;  %3346 = vmatprep.mubr.f32.mxu0 %v6601_v61 }
 0x109   : > { %8337 = vst [vmem:[#allocation37_spill] sm:$0xff] %v6594_v51  ;;  %8338 = vst [vmem:[#allocation66_spill] sm:$0xff] %v6598_v22  ;;  %v6608_v10 = vrot.slane %v777_v50, %v5276_v14  ;;  %v6611_v8 = vcombine.low %v2564_v12, %v2571_v4  ;;  %v8341_v60 = vcombine.low %v6383_v15, %v6438_v6  ;;  %3347 = vmatmul.mubr.f32.gmra.mxu0 %v6296_v19  ;;  %v3165_v12 = vld [vmem:[%s8055_s4 + $0x318] sm:$0xff]  ;;  %v8344_v50 = vld [vmem:[#allocation15_spill] sm:$0xff]  ;;  %v710_v22 = vpop.permute.xlu1 %709 }
 0x10a   : > { %v6627_v61 = vcombine.low %v8342_v11, %v1821_v53  ;;  %v6634_v4 = vcombine.low %v1337_v57, %v6538_v44  ;;  %v6638_v15 = vcombine.high %v6552_v59, %v6552_v59  ;;  %3916 = vmatprep.subr.mxu1 %v8211_v0  ;;  %v1942_v11 = vcombine.low %v6514_v20, %v6559_v37  ;;  %v8345_v19 = vld [vmem:[#allocation35_spill] sm:$0xff]  ;;  %v8350_v37 = vld [vmem:[#allocation10_spill] sm:$0xff] }
 0x10b   : > { %8340 = vst [vmem:[#allocation68_spill] sm:$0xff] %v6611_v8  ;;  %v6622_v49 = vrot.slane %v8341_v60, %v5276_v14  ;;  %3577 = vmatmul.mubr.f32.gmra.mxu1 %v6611_v8  ;;  %v2241_v57 = vrot.slane %v6388_v17, 1  ;;  %v2242_v53 = vrot.slane %v6466_v23, 1  ;;  %v2574_v16 = vcombine.low %v6022_v40, %v8345_v19  ;;  %3708 = vmatpush2.msra.mxu0 %v3157_v54 }
 0x10c   : > { %8343 = vst [vmem:[#allocation42_spill] sm:$0xff] %v6627_v61  ;;  %3581 = vmatprep.mubr.f32.mxu1 %v6627_v61  ;;  %v6654_v60 = vcombine.high %v6576_v3, %v6576_v3  ;;  %v1993_v2 = vcombine.low %v6562_v32, %v6605_v46  ;;  %v6659_v8 = vrot.slane %v1339_v43, %v5276_v14 }
 0x10d   : > { %v1960_v30 = vcombine.low %v6590_v35, %v6608_v10  ;;  %3917 = vmatpush1.msra.mxu1 %v3165_v12  ;;  %v6664_v44 = vsel %vm2205_vm0, %v2241_v57, %v2242_v53  ;;  %v8347_v40 = vcombine.low %v5999_v31, %v6045_v25  ;;  %v2588_v51 = vrot.slane %v2574_v16, %v5276_v14  ;;  %v3156_v12 = vld [vmem:[%s8055_s4 + $0x2d0] sm:$0xff]  ;;  %v8349_v16 = vld [vmem:[#allocation34_spill] sm:$0xff] }
 0x10e   : > { %8346 = vst [vmem:[#allocation15_spill] sm:$0xff] %v6664_v44  ;;  %v8348_v32 = vcombine.low %v6256_v29, %v6183_v26  ;;  %3709 = vmatprep.subr.mxu0 %v8211_v0  ;;  %3351 = vmatprep.mubr.f32.mxu0 %v6664_v44  ;;  %v1831_v31 = vrot.slane %v6299_v18, %v5276_v14  ;;  %v8351_v57 = vmax.f32 %v8350_v37, 0.0 }
 0x10f   : > { %v2581_v54 = vrot.slane %v8347_v40, %v5276_v14  ;;  %v2148_v25 = vrot.slane %v8345_v19, %v5276_v14  ;;  %v2591_v40 = vcombine.low %v6175_v58, %v8349_v16  ;;  %v6693_v35 = vcombine.high %v6608_v10, %v6608_v10  ;;  %3352 = vmatmul.mubr.f32.gmra.mxu0 %v6388_v17  ;;  %v3164_v19 = vld [vmem:[%s8055_s4 + $0x310] sm:$0xff] }
 0x110   : > { %v1838_v43 = vrot.slane %v8348_v32, %v5276_v14  ;;  %v6689_v32 = vrot.slane %v1942_v11, %v5276_v14  ;;  %v780_v6 = vmul.f32 %v710_v22, %v8351_v57  ;;  %3918 = vmatprep.subr.mxu1 %v8211_v0  ;;  %3710 = vmatpush2.msra.mxu0 %v3156_v12 }
 0x111   : > { %v6697_v44 = vcombine.low %v2581_v54, %v2588_v51  ;;  %v2244_v11 = vrot.slane %v2148_v25, 1  ;;  %v2605_v16 = vrot.slane %v2591_v40, %v5276_v14  ;;  %v6710_v37 = vrot.slane %v1993_v2, %v5276_v14  ;;  %v8354_v54 = vld [vmem:[#allocation41_spill] sm:$0xff]  ;;  %3919 = vmatpush1.msra.mxu1 %v3164_v19  ;;  %v8360_v19 = vld [vmem:[#allocation38_spill] sm:$0xff]  ;;  %3711 = vmatprep.subr.mxu0 %v8211_v0 }
 0x112   : > { %v6705_v18 = vcombine.low %v1831_v31, %v1838_v43  ;;  %v6714_v51 = vcombine.high %v6659_v8, %v6659_v8  ;;  %v6717_v22 = vrot.slane %v1960_v30, %v5276_v14  ;;  %v8355_v43 = vcombine.low %v8354_v54, %v6130_v5  ;;  %3920 = vmatprep.subr.mxu1 %v8211_v0 }
 0x113   : > { %8352 = vst [vmem:[#allocation35_spill] sm:$0xff] %v6697_v44  ;;  %3582 = vmatmul.mubr.f32.gmra.mxu1 %v6697_v44  ;;  %v8356_v31 = vmax.f32 %v5650_v33, 0.0  ;;  %v6729_v2 = vsel %vm2205_vm0, %v2242_v53, %v2244_v11  ;;  %v8357_v30 = vcombine.low %v6226_v41, %v6200_v1  ;;  %v2246_v40 = vrot.slane %v6569_v21, 1  ;;  %v8378_v44 = vld [vmem:[#allocation45_spill] sm:$0xff] }
 0x114   : > { %8353 = vst [vmem:[#allocation34_spill] sm:$0xff] %v6705_v18  ;;  %v2598_v57 = vrot.slane %v8355_v43, %v5276_v14  ;;  %3586 = vmatprep.mubr.f32.mxu1 %v6705_v18  ;;  %v1390_v54 = vcombine.high %v780_v6, %v780_v6  ;;  %3356 = vmatprep.mubr.f32.mxu0 %v6729_v2 }
 0x115   : > { %v779_v12 = vmul.f32 %v6380_v45, %v8356_v31  ;;  %v1848_v25 = vrot.slane %v8357_v30, %v5276_v14  ;;  %v2247_v45 = vrot.slane %v6627_v61, 1  ;;  %v6744_v53 = vrot.slane %v780_v6, %v5276_v14  ;;  %3357 = vmatmul.mubr.f32.gmra.mxu0 %v6466_v23  ;;  %v3163_v31 = vld [vmem:[%s8055_s4 + $0x308] sm:$0xff] }
 0x116   : > { %v6739_v33 = vcombine.low %v2598_v57, %v2605_v16  ;;  %v2607_v43 = vcombine.low %v8360_v19, %v8334_v63  ;;  %v8361_v16 = vcombine.low %v6147_v38, %v6197_v28  ;;  %v2155_v63 = vrot.slane %v6197_v28, %v5276_v14  ;;  %v8363_v30 = vld [vmem:[#allocation43_spill] sm:$0xff]  ;;  %3921 = vmatpush1.msra.mxu1 %v3163_v31 }
 0x117   : > { %v6747_v11 = vcombine.low %v1848_v25, %v6364_v48  ;;  %v6763_v48 = vsel %vm2205_vm0, %v2246_v40, %v2247_v45  ;;  %v2624_v25 = vcombine.low %v8363_v30, %v6256_v29  ;;  %v1373_v19 = vcombine.high %v779_v12, %v779_v12  ;;  %3922 = vmatprep.subr.mxu1 %v8211_v0 }
 0x118   : > { %8358 = vst [vmem:[#allocation10_spill] sm:$0xff] %v6739_v33  ;;  %v2622_v57 = vrot.slane %v8361_v16, %v5276_v14  ;;  %3587 = vmatmul.mubr.f32.gmra.mxu1 %v6739_v33  ;;  %8362 = vst [vmem:[#allocation38_spill] sm:$0xff] %v6763_v48  ;;  %v720_v16 = vpop.permute.xlu1 %719  ;;  %3361 = vmatprep.mubr.f32.mxu0 %v6763_v48  ;;  %v2615_v58 = vrot.slane %v2607_v43, %v5276_v14  ;;  %v2249_v28 = vrot.slane %v2155_v63, 1  ;;  %v8369_v33 = vld [vmem:[#allocation17_spill] sm:$0xff] }
 0x119   : > { %8359 = vst [vmem:[#allocation41_spill] sm:$0xff] %v6747_v11  ;;  %3591 = vmatprep.mubr.f32.mxu1 %v6747_v11  ;;  %v6775_v40 = vrot.slane %v1390_v54, %v5276_v14  ;;  %v6778_v6 = vrot.slane %v779_v12, %v5276_v14  ;;  %v2632_v29 = vrot.slane %v2624_v25, %v5276_v14  ;;  %v2251_v54 = vrot.slane %v6705_v18, 1 }
 0x11a   : > { %v6784_v30 = vcombine.high %v6744_v53, %v6744_v53  ;;  %v6786_v5 = vcombine.low %v2615_v58, %v2622_v57  ;;  %3362 = vmatmul.mubr.f32.gmra.mxu0 %v6569_v21  ;;  %v2252_v43 = vrot.slane %v6747_v11, 1  ;;  %v8365_v12 = vmax.f32 %v8344_v50, 0.0 }
 0x11b   : > { %v6795_v31 = vcombine.low %v6399_v36, %v6359_v55  ;;  %v6798_v25 = vsel %vm2205_vm0, %v2247_v45, %v2249_v28  ;;  %v8368_v58 = vcombine.low %v6183_v26, %v6226_v41  ;;  %v6806_v38 = vrot.slane %v1373_v19, %v5276_v14  ;;  %v8370_v55 = vld [vmem:[#allocation4_spill] sm:$0xff]  ;;  %v3155_v41 = vld [vmem:[%s8055_s4 + $0x2c8] sm:$0xff] }
 0x11c   : > { %8364 = vst [vmem:[#allocation43_spill] sm:$0xff] %v6786_v5  ;;  %v782_v63 = vmul.f32 %v720_v16, %v8365_v12  ;;  %8367 = vst [vmem:[#allocation70_spill] sm:$0xff] %v6798_v25  ;;  %v494_v50 = vmax.f32 %v8369_v33, 0.0  ;;  %3592 = vmatmul.mubr.f32.gmra.mxu1 %v6786_v5  ;;  %3366 = vmatprep.mubr.f32.mxu0 %v6798_v25  ;;  %v8371_v36 = vcombine.low %v8370_v55, %v6305_v9  ;;  %v8372_v16 = vld [vmem:[#allocation48_spill] sm:$0xff]  ;;  %v8374_v12 = vld [vmem:[#allocation5_spill] sm:$0xff] }
 0x11d   : > { %8366 = vst [vmem:[#allocation69_spill] sm:$0xff] %v6795_v31  ;;  %v2639_v57 = vrot.slane %v8368_v58, %v5276_v14  ;;  %v2641_v26 = vcombine.low %v6200_v1, %v8372_v16  ;;  %v6822_v19 = vcombine.high %v6778_v6, %v6778_v6  ;;  %3596 = vmatprep.mubr.f32.mxu1 %v6795_v31  ;;  %v8376_v16 = vld [vmem:[#allocation49_spill] sm:$0xff]  ;;  %v8379_v25 = vld [vmem:[#allocation51_spill] sm:$0xff] }
 0x11e   : > { %v1882_v45 = vrot.slane %v8371_v36, %v5276_v14  ;;  %v2162_v58 = vrot.slane %v8374_v12, %v5276_v14  ;;  %3367 = vmatmul.mubr.f32.gmra.mxu0 %v6627_v61  ;;  %v6836_v36 = vsel %vm2205_vm0, %v2251_v54, %v2252_v43  ;;  %v8377_v5 = vcombine.low %v8376_v16, %v8374_v12  ;;  %v8380_v12 = vld [vmem:[#allocation47_spill] sm:$0xff]  ;;  %v8387_v61 = vld [vmem:[#allocation18_spill] sm:$0xff] }
 0x11f   : > { %v6827_v28 = vcombine.low %v2632_v29, %v2639_v57  ;;  %8375 = vst [vmem:[#allocation4_spill] sm:$0xff] %v6836_v36  ;;  %v2658_v29 = vcombine.low %v8379_v25, %v8378_v44  ;;  %v2011_v57 = vcombine.low %v6744_v53, %v6784_v30  ;;  %v1424_v21 = vcombine.high %v782_v63, %v782_v63  ;;  %v3162_v25 = vld [vmem:[%s8055_s4 + $0x300] sm:$0xff] }
 0x120   : > { %v6832_v1 = vcombine.low %v1882_v45, %v6473_v47  ;;  %v2656_v33 = vrot.slane %v8377_v5, %v5276_v14  ;;  %3371 = vmatprep.mubr.f32.mxu0 %v6836_v36  ;;  %v1899_v47 = vrot.slane %v6476_v24, %v5276_v14  ;;  %3712 = vmatpush2.msra.mxu0 %v3155_v41  ;;  %v2254_v5 = vrot.slane %v2162_v58, 1  ;;  %v8384_v41 = vld [vmem:[#allocation6_spill] sm:$0xff] }
 0x121   : > { %8373 = vst [vmem:[#allocation17_spill] sm:$0xff] %v6827_v28  ;;  %v781_v54 = vmul.f32 %v6456_v42, %v494_v50  ;;  %3597 = vmatmul.mubr.f32.gmra.mxu1 %v6827_v28  ;;  %v2649_v45 = vrot.slane %v2641_v26, %v5276_v14  ;;  %v2659_v44 = vcombine.low %v8380_v12, %v8370_v55  ;;  %v8383_v55 = vld [vmem:[#allocation55_spill] sm:$0xff] }
 0x122   : > { %v6858_v16 = vrot.slane %v782_v63, %v5276_v14  ;;  %3601 = vmatprep.mubr.f32.mxu1 %v6832_v1  ;;  %v8381_v42 = vcombine.low %v6405_v62, %v6371_v39  ;;  %v8382_v50 = vcombine.low %v6494_v13, %v6461_v7  ;;  %v2676_v58 = vcombine.low %v8384_v41, %v8383_v55 }
 0x123   : > { %v6871_v12 = vcombine.low %v2649_v45, %v2656_v33  ;;  %3372 = vmatmul.mubr.f32.gmra.mxu0 %v6705_v18  ;;  %v6875_v63 = vsel %vm2205_vm0, %v2252_v43, %v2254_v5  ;;  %v2666_v28 = vrot.slane %v2658_v29, %v5276_v14  ;;  %v2257_v36 = vrot.slane %v6832_v1, 1  ;;  %3923 = vmatpush1.msra.mxu1 %v3162_v25  ;;  %v361_v25 = vld [vmem:[%s5232_s20 + $0x130] sm:$0xff] }
 0x124   : > { %v1906_v24 = vrot.slane %v8381_v42, %v5276_v14  ;;  %v1923_v26 = vrot.slane %v8382_v50, %v5276_v14  ;;  %8386 = vst [vmem:[#allocation5_spill] sm:$0xff] %v6875_v63  ;;  %v6881_v42 = vcombine.high %v6806_v38, %v6806_v38  ;;  %v1994_v50 = vcombine.low %v6778_v6, %v6822_v19 }
 0x125   : > { %8385 = vst [vmem:[#allocation48_spill] sm:$0xff] %v6871_v12  ;;  %v497_v33 = vmax.f32 %v8387_v61, 0.0  ;;  %3376 = vmatprep.mubr.f32.mxu0 %v6875_v63  ;;  %v1407_v43 = vcombine.high %v781_v54, %v781_v54  ;;  %3602 = vmatmul.mubr.f32.gmra.mxu1 %v6871_v12  ;;  %v2673_v29 = vrot.slane %v2659_v44, %v5276_v14  ;;  %v2256_v5 = vrot.slane %v6795_v31, 1  ;;  %v3193_v63 = vld [vmem:[%s8055_s4 + $0x3f8] sm:$0xff] }
 0x126   : > { %v6886_v45 = vcombine.low %v1899_v47, %v1906_v24  ;;  %v2169_v41 = vrot.slane %v8383_v55, %v5276_v14  ;;  %3924 = vmatprep.subr.mxu1 %v8211_v0  ;;  %v6896_v18 = vrot.slane %v2011_v57, %v5276_v14  ;;  %v6899_v61 = vrot.slane %v1424_v21, %v5276_v14  ;;  %v8390_v21 = vld [vmem:[#allocation58_spill] sm:$0xff] }
 0x127   : > { %v1406_v47 = vcombine.high %v6775_v40, %v6775_v40  ;;  %v2690_v44 = vrot.slane %v2676_v58, %v5276_v14  ;;  %v6906_v24 = vcombine.low %v2666_v28, %v2673_v29  ;;  %v6909_v55 = vcombine.low %v6525_v27, %v1923_v26  ;;  %3377 = vmatmul.mubr.f32.gmra.mxu0 %v6747_v11  ;;  %v8391_v27 = vld [vmem:[#allocation53_spill] sm:$0xff] }
 0x128   : > { %3606 = vmatprep.mubr.f32.mxu1 %v6886_v45  ;;  %v6913_v57 = vsel %vm2205_vm0, %v2256_v5, %v2257_v36  ;;  %v2693_v12 = vcombine.low %v6371_v39, %v8390_v21  ;;  %v6922_v58 = vcombine.high %v6858_v16, %v6858_v16  ;;  %v6925_v28 = vrot.slane %v781_v54, %v5276_v14 }
 0x129   : > { %8388 = vst [vmem:[#allocation49_spill] sm:$0xff] %v6906_v24  ;;  %8389 = vst [vmem:[#allocation45_spill] sm:$0xff] %v6913_v57  ;;  %3381 = vmatprep.mubr.f32.mxu0 %v6913_v57  ;;  %v8392_v26 = vcombine.low %v6305_v9, %v8391_v27  ;;  %v8393_v39 = vcombine.low %v6434_v56, %v6488_v34  ;;  %v6937_v21 = vrot.slane %v1994_v50, %v5276_v14  ;;  %v3154_v9 = vld [vmem:[%s8055_s4 + $0x2c0] sm:$0xff]  ;;  %v730_v27 = vpop.permute.xlu1 %729 }
 0x12a   : > { %v6942_v54 = vrot.slane %v1407_v43, %v5276_v14  ;;  %3607 = vmatmul.mubr.f32.gmra.mxu1 %v6906_v24  ;;  %v2259_v57 = vrot.slane %v2169_v41, 1  ;;  %3713 = vmatprep.subr.mxu0 %v8211_v0  ;;  %v6952_v50 = vld [vmem:[%s8052_s1] ss:$0 sm:$0xff]  ;;  %v8396_v41 = vcombine.low %v6552_v59, %v6638_v15  ;;  %v2707_v24 = vrot.slane %v2693_v12, %v5276_v14 }
 0x12b   : > { %v2683_v29 = vrot.slane %v8392_v26, %v5276_v14  ;;  %v1940_v5 = vrot.slane %v8393_v39, %v5276_v14  ;;  %8394 = vst [vmem:[#allocation51_spill] sm:$0xff] %v6952_v50  ;;  %v409_v26 = vmul.f32 %v6952_v50, %v361_v25  ;;  %3611 = vmatprep.mubr.f32.mxu1 %v6909_v55  ;;  %v2262_v48 = vrot.slane %v6909_v55, 1  ;;  %v8397_v25 = vld [vmem:[#allocation19_spill] sm:$0xff] }
 0x12c   : > { %v1957_v39 = vrot.slane %v8396_v41, %v5276_v14  ;;  %3925 = vmatpush2.msra.mxu1 %v3193_v63  ;;  %3382 = vmatmul.mubr.f32.gmra.mxu0 %v6795_v31  ;;  %v6964_v11 = vsel %vm2205_vm0, %v2257_v36, %v2259_v57  ;;  %v2710_v50 = vcombine.low %v6461_v7, %v8397_v25  ;;  %v8398_v57 = vld [vmem:[#allocation54_spill] sm:$0xff]  ;;  %v2261_v31 = vrot.slane %v6886_v45, 1 }
 0x12d   : > { %v6956_v43 = vcombine.low %v2683_v29, %v2690_v44  ;;  %3926 = vmatprep.subr.mxu1 %v8211_v0  ;;  %v3192_v44 = vld [vmem:[%s8055_s4 + $0x3f0] sm:$0xff]  ;;  %v6976_v63 = vcombine.high %v6925_v28, %v6925_v28  ;;  %v6979_v36 = vcombine.low %v1406_v47, %v6925_v28  ;;  %v6982_v12 = vcombine.low %v6622_v49, %v1940_v5  ;;  %v3191_v49 = vld [vmem:[%s8055_s4 + $0x3e8] sm:$0xff] }
 0x12e   : > { %3386 = vmatprep.mubr.f32.mxu0 %v6964_v11  ;;  %3714 = vmatpush2.msra.mxu0 %v3154_v9  ;;  %v6985_v7 = vmul.f32 %v730_v27, %v497_v33  ;;  %v8399_v29 = vcombine.low %v8398_v57, %v6405_v62  ;;  %v2176_v47 = vrot.slane %v8397_v25, %v5276_v14  ;;  %v7006_v62 = vld [vmem:[%s8053_s2] ss:$0 sm:$0xff] }
 0x12f   : > { %8395 = vst [vmem:[#allocation47_spill] sm:$0xff] %v6956_v43  ;;  %3612 = vmatmul.mubr.f32.gmra.mxu1 %v6956_v43  ;;  %3715 = vmatprep.subr.mxu0 %v8211_v0  ;;  %v7001_v33 = vcombine.high %v6899_v61, %v6899_v61  ;;  %8400 = vst [vmem:[#allocation55_spill] sm:$0xff] %v7006_v62  ;;  %v457_v5 = vadd.f32 %v7006_v62, %v409_v26  ;;  %v3153_v26 = vld [vmem:[%s8055_s4 + $0x2b8] sm:$0xff] }
 0x130   : > { %v2700_v41 = vrot.slane %v8399_v29, %v5276_v14  ;;  %3616 = vmatprep.mubr.f32.mxu1 %v6982_v12  ;;  %v7011_v9 = vcombine.low %v6689_v32, %v1957_v39  ;;  %3927 = vmatpush2.msra.mxu1 %v3192_v44  ;;  %v7017_v25 = vsel %vm2205_vm0, %v2261_v31, %v2262_v48  ;;  %v3190_v31 = vld [vmem:[%s8055_s4 + $0x3e0] sm:$0xff]  ;;  %v8402_v29 = vld [vmem:[#allocation59_spill] sm:$0xff]  ;;  %v2264_v39 = vrot.slane %v2176_v47, 1  ;;  %v735_v47 = vpop.permute.xlu0 %734 }
 0x131   : > { %3387 = vmatmul.mubr.f32.gmra.mxu0 %v6832_v1  ;;  %v2724_v57 = vrot.slane %v2710_v50, %v5276_v14  ;;  %3928 = vmatprep.subr.mxu1 %v8211_v0  ;;  %v1458_v44 = vcombine.high %v6985_v7, %v6985_v7  ;;  %v1967_v43 = vrot.slane %v6634_v4, %v5276_v14 }
 0x132   : > { %v7013_v27 = vcombine.low %v2700_v41, %v2707_v24  ;;  %v7028_v24 = vcombine.high %v6942_v54, %v6942_v54  ;;  %3391 = vmatprep.mubr.f32.mxu0 %v7017_v25  ;;  %3929 = vmatpush2.msra.mxu1 %v3191_v49  ;;  %v8403_v41 = vcombine.low %v8402_v29, %v6494_v13  ;;  %v498_v49 = vmax.f32 %v457_v5, 0.0 }
 0x133   : > { %3930 = vmatprep.subr.mxu1 %v8211_v0  ;;  %v8404_v50 = vcombine.low %v6488_v34, %v6514_v20  ;;  %3716 = vmatpush2.msra.mxu0 %v3153_v26  ;;  %v7061_v5 = vsel %vm2205_vm0, %v2262_v48, %v2264_v39  ;;  %v2267_v4 = vrot.slane %v7011_v9, 1  ;;  %v2744_v34 = vcombine.low %v6638_v15, %v6509_v52  ;;  %v3189_v20 = vld [vmem:[%s8055_s4 + $0x3d8] sm:$0xff]  ;;  %v8406_v48 = vld [vmem:[#allocation60_spill] sm:$0xff] }
 0x134   : > { %8401 = vst [vmem:[#allocation6_spill] sm:$0xff] %v7013_v27  ;;  %3617 = vmatmul.mubr.f32.gmra.mxu1 %v7013_v27  ;;  %v2717_v32 = vrot.slane %v8403_v41, %v5276_v14  ;;  %v8405_v27 = vcombine.low %v6714_v51, %v6576_v3  ;;  %v8407_v26 = vcombine.low %v8406_v48, %v6434_v56  ;;  %v3152_v56 = vld [vmem:[%s8055_s4 + $0x2b0] sm:$0xff] }
 0x135   : > { %3621 = vmatprep.mubr.f32.mxu1 %v7011_v9  ;;  %v2741_v62 = vrot.slane %v8404_v50, %v5276_v14  ;;  %3392 = vmatmul.mubr.f32.gmra.mxu0 %v6886_v45  ;;  %v8408_v15 = vcombine.low %v6693_v35, %v6659_v8  ;;  %v2183_v50 = vrot.slane %v6509_v52, %v5276_v14 }
 0x136   : > { %v1991_v13 = vrot.slane %v8405_v27, %v5276_v14  ;;  %v7057_v29 = vcombine.low %v2717_v32, %v2724_v57  ;;  %3931 = vmatpush2.msra.mxu1 %v3190_v31  ;;  %v7072_v57 = vcombine.low %v1967_v43, %v6717_v22  ;;  %3396 = vmatprep.mubr.f32.mxu0 %v7061_v5  ;;  %v2266_v31 = vrot.slane %v6982_v12, 1  ;;  %v8409_v22 = vld [vmem:[#allocation9_spill] sm:$0xff] }
 0x137   : > { %v2734_v32 = vrot.slane %v8407_v26, %v5276_v14  ;;  %3932 = vmatprep.subr.mxu1 %v8211_v0  ;;  %v1984_v39 = vrot.slane %v8408_v15, %v5276_v14  ;;  %v2743_v43 = vcombine.low %v8409_v22, %v6552_v59  ;;  %3717 = vmatprep.subr.mxu0 %v8211_v0 }
 0x138   : > { %3622 = vmatmul.mubr.f32.gmra.mxu1 %v7057_v29  ;;  %v7095_v41 = vrot.slane %v1458_v44, %v5276_v14  ;;  %v7097_v48 = vmul.f32 %v735_v47, %v498_v49  ;;  %v7106_v52 = vsel %vm2205_vm0, %v2266_v31, %v2267_v4  ;;  %v2758_v15 = vrot.slane %v2744_v34, %v5276_v14  ;;  %v3188_v44 = vld [vmem:[%s8055_s4 + $0x3d0] sm:$0xff]  ;;  %v8411_v49 = vld [vmem:[#allocation37_spill] sm:$0xff] }
 0x139   : > { %3626 = vmatprep.mubr.f32.mxu1 %v7072_v57  ;;  %v7100_v26 = vcombine.low %v2734_v32, %v2741_v62  ;;  %3933 = vmatpush2.msra.mxu1 %v3189_v20  ;;  %v7102_v59 = vcombine.low %v1984_v39, %v1991_v13  ;;  %v7115_v62 = vrot.slane %v6985_v7, %v5276_v14  ;;  %v2269_v20 = vrot.slane %v2183_v50, 1  ;;  %v8412_v32 = vld [vmem:[#allocation31_spill] sm:$0xff]  ;;  %v8413_v39 = vld [vmem:[#allocation26_spill] sm:$0xff] }
 0x13a   : > { %3397 = vmatmul.mubr.f32.gmra.mxu0 %v6909_v55  ;;  %3934 = vmatprep.subr.mxu1 %v8211_v0  ;;  %v7119_v13 = vcombine.high %v8411_v49, %v8411_v49  ;;  %v2777_v47 = vcombine.low %v6659_v8, %v6714_v51  ;;  %v2751_v34 = vrot.slane %v2743_v43, %v5276_v14 }
 0x13b   : > { %8410 = vst [vmem:[#allocation18_spill] sm:$0xff] %v7100_v26  ;;  %3401 = vmatprep.mubr.f32.mxu0 %v7106_v52  ;;  %3718 = vmatpush2.msra.mxu0 %v3152_v56  ;;  %v2760_v31 = vcombine.low %v8413_v39, %v8412_v32  ;;  %v8414_v7 = vcombine.low %v6806_v38, %v6881_v42  ;;  %v3187_v56 = vld [vmem:[%s8055_s4 + $0x3c8] sm:$0xff]  ;;  %v2272_v27 = vrot.slane %v7102_v59, 1 }
 0x13c   : > { %3627 = vmatmul.mubr.f32.gmra.mxu1 %v7100_v26  ;;  %3719 = vmatprep.subr.mxu0 %v8211_v0  ;;  %v7138_v8 = vcombine.high %v7095_v41, %v7095_v41  ;;  %v7142_v51 = vrot.slane %v7097_v48, %v5276_v14  ;;  %v7147_v43 = vcombine.low %v6710_v37, %v6937_v21  ;;  %v3151_v37 = vld [vmem:[%s8055_s4 + $0x2a8] sm:$0xff] }
 0x13d   : > { %v2018_v22 = vrot.slane %v8414_v7, %v5276_v14  ;;  %3631 = vmatprep.mubr.f32.mxu1 %v7102_v59  ;;  %3935 = vmatpush2.msra.mxu1 %v3188_v44  ;;  %v7149_v50 = vcombine.low %v2751_v34, %v2758_v15  ;;  %v7153_v32 = vsel %vm2205_vm0, %v2267_v4, %v2269_v20 }
 0x13e   : > { %3402 = vmatmul.mubr.f32.gmra.mxu0 %v6982_v12  ;;  %v8416_v39 = vcombine.low %v6608_v10, %v6693_v35  ;;  %3936 = vmatprep.subr.mxu1 %v8211_v0  ;;  %v2785_v21 = vrot.slane %v2777_v47, %v5276_v14  ;;  %v8417_v4 = vcombine.low %v6976_v63, %v6942_v54  ;;  %v3186_v35 = vld [vmem:[%s8055_s4 + $0x3c0] sm:$0xff]  ;;  %v2271_v47 = vrot.slane %v7072_v57, 1 }
 0x13f   : > { %8415 = vst [vmem:[#allocation58_spill] sm:$0xff] %v7149_v50  ;;  %3406 = vmatprep.mubr.f32.mxu0 %v7153_v32  ;;  %3937 = vmatpush2.msra.mxu1 %v3187_v56  ;;  %v2190_v10 = vrot.slane %v6654_v60, %v5276_v14  ;;  %v2768_v44 = vrot.slane %v2760_v31, %v5276_v14 }
 0x140   : > { %v2775_v7 = vrot.slane %v8416_v39, %v5276_v14  ;;  %v2042_v15 = vrot.slane %v8417_v4, %v5276_v14  ;;  %3632 = vmatmul.mubr.f32.gmra.mxu1 %v7149_v50  ;;  %v7178_v34 = vcombine.low %v2018_v22, %v6896_v18  ;;  %3938 = vmatprep.subr.mxu1 %v8211_v0  ;;  %v8418_v39 = vld [vmem:[#allocation66_spill] sm:$0xff]  ;;  %v8419_v4 = vld [vmem:[#allocation65_spill] sm:$0xff] }
 0x141   : > { %v2795_v20 = vcombine.low %v6822_v19, %v6806_v38  ;;  %v7186_v56 = vcombine.high %v7115_v62, %v7115_v62  ;;  %3636 = vmatprep.mubr.f32.mxu1 %v7147_v43  ;;  %v8420_v18 = vcombine.low %v6576_v3, %v6654_v60  ;;  %3720 = vmatpush2.msra.mxu0 %v3151_v37  ;;  %v3185_v19 = vld [vmem:[%s8055_s4 + $0x3b8] sm:$0xff] }
 0x142   : > { %v2962_v22 = vcombine.low %v7138_v8, %v7142_v51  ;;  %v7197_v50 = vcombine.low %v2768_v44, %v2775_v7  ;;  %3407 = vmatmul.mubr.f32.gmra.mxu0 %v7011_v9  ;;  %v7201_v38 = vsel %vm2205_vm0, %v2271_v47, %v2272_v27  ;;  %3939 = vmatpush2.msra.mxu1 %v3186_v35  ;;  %v2274_v7 = vrot.slane %v2190_v10, 1  ;;  %v3150_v10 = vld [vmem:[%s8055_s4 + $0x2a0] sm:$0xff] }
 0x143   : > { %v2792_v31 = vrot.slane %v8420_v18, %v5276_v14  ;;  %3411 = vmatprep.mubr.f32.mxu0 %v7201_v38  ;;  %v8421_v60 = vrot.slane %v6979_v36, %v5276_v14  ;;  %3940 = vmatprep.subr.mxu1 %v8211_v0  ;;  %v2945_v44 = vcombine.low %v7119_v13, %v7115_v62  ;;  %v2277_v18 = vrot.slane %v7178_v34, 1 }
 0x144   : > { %3637 = vmatmul.mubr.f32.gmra.mxu1 %v7197_v50  ;;  %v8422_v35 = vcombine.low %v6605_v46, %v6778_v6  ;;  %v8423_v36 = vcombine.low %v7028_v24, %v6858_v16  ;;  %3721 = vmatprep.subr.mxu0 %v8211_v0  ;;  %v7234_v46 = vsel %vm2205_vm0, %v2272_v27, %v2274_v7 }
 0x145   : > { %v7207_v3 = vcombine.low %v2785_v21, %v2792_v31  ;;  %v7212_v37 = vcombine.low %v8421_v60, %v2042_v15  ;;  %v2809_v21 = vrot.slane %v2795_v20, %v5276_v14  ;;  %3641 = vmatprep.mubr.f32.mxu1 %v7178_v34  ;;  %3941 = vmatpush2.msra.mxu1 %v3185_v19  ;;  %v3184_v31 = vld [vmem:[%s8055_s4 + $0x3b0] sm:$0xff]  ;;  %v2276_v60 = vrot.slane %v7147_v43, 1 }
 0x146   : > { %v2802_v47 = vrot.slane %v8422_v35, %v5276_v14  ;;  %v2052_v15 = vrot.slane %v8423_v36, %v5276_v14  ;;  %v2811_v6 = vcombine.low %v6881_v42, %v6744_v53  ;;  %v2812_v20 = vcombine.low %v6784_v30, %v6775_v40  ;;  %3412 = vmatmul.mubr.f32.gmra.mxu0 %v7072_v57 }
 0x147   : > { %3942 = vmatprep.subr.mxu1 %v8211_v0  ;;  %v8424_v27 = vcombine.low %v8418_v39, %v8411_v49  ;;  %v2959_v53 = vrot.slane %v2945_v44, %v5276_v14  ;;  %v2961_v30 = vcombine.low %v7186_v56, %v7095_v41  ;;  %3416 = vmatprep.mubr.f32.mxu0 %v7234_v46 }
 0x148   : > { %v8425_v42 = vcombine.low %v6922_v58, %v6899_v61  ;;  %3722 = vmatpush2.msra.mxu0 %v3150_v10  ;;  %v2895_v35 = vcombine.low %v8411_v49, %v7119_v13  ;;  %v2976_v36 = vrot.slane %v2962_v22, %v5276_v14  ;;  %3642 = vmatmul.mubr.f32.gmra.mxu1 %v7207_v3 }
 0x149   : > { %v2952_v19 = vrot.slane %v8424_v27, %v5276_v14  ;;  %v7263_v44 = vsel %vm2205_vm0, %v2276_v60, %v2277_v18  ;;  %v3183_v27 = vld [vmem:[%s8055_s4 + $0x3a8] sm:$0xff]  ;;  %3723 = vmatprep.subr.mxu0 %v8211_v0  ;;  %3646 = vmatprep.mubr.f32.mxu1 %v7212_v37  ;;  %v7274_v49 = vcombine.low %v2802_v47, %v2809_v21 }
 0x14a   : > { %v2059_v7 = vrot.slane %v8425_v42, %v5276_v14  ;;  %v2197_v42 = vrot.slane %v6775_v40, %v5276_v14  ;;  %3943 = vmatpush2.msra.mxu1 %v3184_v31  ;;  %v2819_v13 = vrot.slane %v2811_v6, %v5276_v14  ;;  %v2969_v22 = vrot.slane %v2961_v30, %v5276_v14  ;;  %v3149_v40 = vld [vmem:[%s8055_s4 + $0x298] sm:$0xff]  ;;  %v3180_v30 = vld [vmem:[%s8055_s4 + $0x390] sm:$0xff] }
 0x14b   : > { %v7271_v10 = vcombine.low %v2952_v19, %v2959_v53  ;;  %3417 = vmatmul.mubr.f32.gmra.mxu0 %v7102_v59  ;;  %v2826_v26 = vrot.slane %v2812_v20, %v5276_v14  ;;  %3944 = vmatprep.subr.mxu1 %v8211_v0  ;;  %v2829_v47 = vcombine.low %v6942_v54, %v7028_v24 }
 0x14c   : > { %v7278_v60 = vcombine.low %v2052_v15, %v2059_v7  ;;  %3421 = vmatprep.mubr.f32.mxu0 %v7263_v44  ;;  %v2909_v21 = vrot.slane %v2895_v35, %v5276_v14  ;;  %3945 = vmatpush2.msra.mxu1 %v3183_v27  ;;  %v3182_v15 = vld [vmem:[%s8055_s4 + $0x3a0] sm:$0xff]  ;;  %v2912_v6 = vcombine.low %v7095_v41, %v7138_v8  ;;  %v2279_v54 = vrot.slane %v2197_v42, 1  ;;  %v3179_v42 = vld [vmem:[%s8055_s4 + $0x388] sm:$0xff] }
 0x14d   : > { %v7295_v20 = vcombine.low %v2969_v22, %v2976_v36  ;;  %v2828_v31 = vcombine.low %v6925_v28, %v6976_v63  ;;  %3647 = vmatmul.mubr.f32.gmra.mxu1 %v7274_v49  ;;  %3946 = vmatprep.subr.mxu1 %v8211_v0  ;;  %v2911_v24 = vcombine.low %v7115_v62, %v7186_v56  ;;  %v3181_v62 = vld [vmem:[%s8055_s4 + $0x398] sm:$0xff] }
 0x14e   : > { %3651 = vmatprep.mubr.f32.mxu1 %v7278_v60  ;;  %v7304_v19 = vcombine.low %v2819_v13, %v2826_v26  ;;  %v8426_v41 = vcombine.low %v8419_v4, %v8418_v39  ;;  %3724 = vmatpush2.msra.mxu0 %v3149_v40  ;;  %v7312_v28 = vsel %vm2205_vm0, %v2277_v18, %v2279_v54  ;;  %v2282_v4 = vrot.slane %v7278_v60, 1  ;;  %v3147_v40 = vld [vmem:[%s8055_s4 + $0x288] sm:$0xff]  ;;  %v3146_v54 = vld [vmem:[%s8055_s4 + $0x280] sm:$0xff] }
 0x14f   : > { %3422 = vmatmul.mubr.f32.gmra.mxu0 %v7147_v43  ;;  %3947 = vmatpush2.msra.mxu1 %v3182_v15  ;;  %v2843_v63 = vrot.slane %v2829_v47, %v5276_v14  ;;  %v2846_v26 = vcombine.low %v6899_v61, %v7001_v33  ;;  %v2926_v39 = vrot.slane %v2912_v6, %v5276_v14  ;;  %v3148_v61 = vld [vmem:[%s8055_s4 + $0x290] sm:$0xff]  ;;  %v3209_v15 = vld [vmem:[%s8055_s4 + $0x478] sm:$0xff]  ;;  %v8427_v6 = vld [vmem:[#allocation23_spill] sm:$0xff] }
 0x150   : > { %v2902_v8 = vrot.slane %v8426_v41, %v5276_v14  ;;  %3426 = vmatprep.mubr.f32.mxu0 %v7312_v28  ;;  %3948 = vmatprep.subr.mxu1 %v8211_v0  ;;  %v2845_v18 = vcombine.low %v6858_v16, %v6922_v58  ;;  %v2836_v53 = vrot.slane %v2828_v31, %v5276_v14  ;;  %v2281_v16 = vrot.slane %v7212_v37, 1  ;;  %v3208_v41 = vld [vmem:[%s8055_s4 + $0x470] sm:$0xff] }
 0x151   : > { %3652 = vmatmul.mubr.f32.gmra.mxu1 %v7304_v19  ;;  %3725 = vmatprep.subr.mxu0 %v8211_v0  ;;  %v2919_v7 = vrot.slane %v2911_v24, %v5276_v14  ;;  %v2860_v35 = vrot.slane %v2846_v26, %v5276_v14  ;;  %v2204_v13 = vrot.slane %v7001_v33, %v5276_v14  ;;  %v3178_v33 = vld [vmem:[%s8055_s4 + $0x380] sm:$0xff]  ;;  %v8428_v24 = vld [vmem:[#allocation8_spill] sm:$0xff]  ;;  %v3207_v26 = vld [vmem:[%s8055_s4 + $0x468] sm:$0xff] }
 0x152   : > { %v7320_v56 = vcombine.low %v2902_v8, %v2909_v21  ;;  %3949 = vmatpush2.msra.mxu1 %v3181_v62  ;;  %v7340_v58 = vcombine.low %v2836_v53, %v2843_v63  ;;  %3726 = vmatpush2.msra.mxu0 %v3148_v61  ;;  %v7348_v27 = vsel %vm2205_vm0, %v2281_v16, %v2282_v4  ;;  %v8429_v8 = vld [vmem:[#allocation27_spill] sm:$0xff]  ;;  %v8431_v62 = vld [vmem:[#allocation13_spill] sm:$0xff]  ;;  %v8436_v53 = vld [vmem:[#allocation16_spill] sm:$0xff] }
 0x153   : > { %3950 = vmatprep.subr.mxu1 %v8211_v0  ;;  %3427 = vmatmul.mubr.f32.gmra.mxu0 %v7178_v34  ;;  %v7345_v36 = vcombine.low %v2919_v7, %v2926_v39  ;;  %v2853_v22 = vrot.slane %v2845_v18, %v5276_v14  ;;  %v2284_v21 = vrot.slane %v2204_v13, 1  ;;  %v8430_v63 = vld [vmem:[#allocation11_spill] sm:$0xff]  ;;  %v8433_v39 = vld [vmem:[#allocation30_spill] sm:$0xff]  ;;  %v8435_v18 = vld [vmem:[#allocation20_spill] sm:$0xff] }
 0x154   : > { %3656 = vmatprep.mubr.f32.mxu1 %v7320_v56  ;;  %3951 = vmatpush2.msra.mxu1 %v3180_v30  ;;  %v8437_v61 = vld [vmem:[#allocation21_spill] sm:$0xff]  ;;  %v3206_v30 = vld [vmem:[%s8055_s4 + $0x460] sm:$0xff]  ;;  %v8438_v7 = vld [vmem:[#allocation39_spill] sm:$0xff] }
 0x155   : > { %3657 = vmatmul.mubr.f32.gmra.mxu1 %v7340_v58  ;;  %3431 = vmatprep.mubr.f32.mxu0 %v7348_v27  ;;  %v7363_v47 = vcombine.low %v2853_v22, %v2860_v35  ;;  %v7377_v31 = vsel %vm2205_vm0, %v2282_v4, %v2284_v21  ;;  %v8434_v4 = vld [vmem:[#allocation14_spill] sm:$0xff]  ;;  %v8440_v35 = vld [vmem:[#allocation24_spill] sm:$0xff] }
 0x156   : > { %3661 = vmatprep.mubr.f32.mxu1 %v7345_v36  ;;  %3952 = vmatprep.subr.mxu1 %v8211_v0  ;;  %v8439_v16 = vld [vmem:[#allocation22_spill] sm:$0xff]  ;;  %v3204_v21 = vld [vmem:[%s8055_s4 + $0x450] sm:$0xff] }
 0x157   : > { %3953 = vmatpush2.msra.mxu1 %v3179_v42  ;;  %3727 = vmatprep.subr.mxu0 %v8211_v0  ;;  %v3205_v42 = vld [vmem:[%s8055_s4 + $0x458] sm:$0xff]  ;;  %v8441_v13 = vld [vmem:[#allocation2_spill] sm:$0xff] }
 0x158   : > { %3954 = vmatprep.subr.mxu1 %v8211_v0  ;;  %3432 = vmatmul.mubr.f32.gmra.mxu0 %v7212_v37 }
 0x159   : > { %3662 = vmatmul.mubr.f32.gmra.mxu1 %v7363_v47  ;;  %3728 = vmatpush2.msra.mxu0 %v3147_v40  ;;  %v8442_v40 = vld [vmem:[#allocation25_spill] sm:$0xff] }
 0x15a   : > { %3956 = vmatprep.mubr.f32.mxu1 %v8427_v6  ;;  %3955 = vmatpush2.msra.mxu1 %v3178_v33  ;;  %v8443_v33 = vld [vmem:[#allocation28_spill] sm:$0xff] }
 0x15b   : > { %3436 = vmatprep.mubr.f32.mxu0 %v7377_v31  ;;  %3729 = vmatprep.subr.mxu0 %v8211_v0  ;;  %v8432_v0 = vld [vmem:[#allocation12_spill] sm:$0xff] }
 0x15c   : > { %3437 = vmatmul.mubr.f32.gmra.mxu0 %v7278_v60  ;;  %4729 = vmatprep.subr.mxu1 %v3209_v15  ;;  %v3508_v22 = vpop.f32.mrf.mxu1 }
 0x15d   : > { %3957 = vmatmul.mubr.f32.vlgmr.msra.gmra.mxu1 %v8428_v24  ;;  %3730 = vmatpush2.msra.mxu0 %v3146_v54  ;;  %v8445_v54 = vld [vmem:[#allocation29_spill] sm:$0xff]  ;;  %v8446_v24 = vld [vmem:[#allocation32_spill] sm:$0xff] }
 0x15e   : > { %3961 = vmatprep.mubr.f32.mxu1 %v8429_v8  ;;  %3731 = vmatprep.mubr.f32.mxu0 %v8430_v63  ;;  %v8448_v63 = vld [vmem:[#allocation33_spill] sm:$0xff] }
 0x15f   : > { %4649 = vmatprep.subr.mxu0 %v3209_v15  ;;  %4745 = vmatpush3.msra.mxu1 %v3209_v15 }
 0x160   : > { %3732 = vmatmul.mubr.f32.vlgmr.msra.gmra.mxu0 %v8431_v62  ;;  %4730 = vmatprep.subr.mxu1 %v3208_v41  ;;  %v8449_v62 = vld [vmem:[#allocation36_spill] sm:$0xff] }
 0x161   : > { %3962 = vmatmul.mubr.f32.gmra.mxu1 %v8432_v0  ;;  %4650 = vmatpush3.msra.mxu0 %v3209_v15  ;;  %v3510_v15 = vpop.f32.mrf.mxu1  ;;  %v3202_v0 = vld [vmem:[%s8055_s4 + $0x440] sm:$0xff] }
 0x162   : > { %3966 = vmatprep.mubr.f32.mxu1 %v8433_v39  ;;  %3736 = vmatprep.mubr.f32.mxu0 %v8434_v4  ;;  %v7436_v4 = vld [vmem:[%s8056_s5] ss:$0 sm:$0xff] }
 0x163   : > { %4651 = vmatprep.subr.mxu0 %v3208_v41  ;;  %4746 = vmatpush3.msra.mxu1 %v3208_v41 }
 0x164   : > { %3737 = vmatmul.mubr.f32.gmra.mxu0 %v8435_v18  ;;  %4731 = vmatprep.subr.mxu1 %v3207_v26 }
 0x165   : > { %3967 = vmatmul.mubr.f32.gmra.mxu1 %v8436_v53  ;;  %3741 = vmatprep.mubr.f32.mxu0 %v8437_v61 }
 0x166   : > { %3971 = vmatprep.mubr.f32.mxu1 %v8438_v7  ;;  %4652 = vmatpush3.msra.mxu0 %v3208_v41  ;;  %v3203_v41 = vld [vmem:[%s8055_s4 + $0x448] sm:$0xff] }
 0x167   : > { %4653 = vmatprep.subr.mxu0 %v3207_v26  ;;  %4747 = vmatpush3.msra.mxu1 %v3207_v26 }
 0x168   : > { %3742 = vmatmul.mubr.f32.gmra.mxu0 %v8427_v6  ;;  %4732 = vmatprep.subr.mxu1 %v3206_v30  ;;  %v8444_v6 = vld [vmem:[#allocation3_spill] sm:$0xff] }
 0x169   : > { %3972 = vmatmul.mubr.f32.gmra.mxu1 %v8439_v16  ;;  %3746 = vmatprep.mubr.f32.mxu0 %v8440_v35  ;;  %v3283_v53 = vpop.f32.mrf.mxu0  ;;  %v3201_v16 = vld [vmem:[%s8055_s4 + $0x438] sm:$0xff] }
 0x16a   : > { %3976 = vmatprep.mubr.f32.mxu1 %v8441_v13  ;;  %4654 = vmatpush3.msra.mxu0 %v3207_v26  ;;  %v3513_v26 = vpop.f32.mrf.mxu1 }
 0x16b   : > { %4655 = vmatprep.subr.mxu0 %v3206_v30  ;;  %4748 = vmatpush3.msra.mxu1 %v3206_v30 }
 0x16c   : > { %3747 = vmatmul.mubr.f32.gmra.mxu0 %v8429_v8  ;;  %4733 = vmatprep.subr.mxu1 %v3205_v42  ;;  %v8447_v8 = vld [vmem:[#allocation56_spill] sm:$0xff]  ;;  %v3515_v18 = vpop.f32.mrf.mxu1 }
 0x16d   : > { %3977 = vmatmul.mubr.f32.gmra.mxu1 %v8442_v40  ;;  %3751 = vmatprep.mubr.f32.mxu0 %v8443_v33  ;;  %v8453_v40 = vld [vmem:[#allocation62_spill] sm:$0xff] }
 0x16e   : > { %3981 = vmatprep.mubr.f32.mxu1 %v8444_v6  ;;  %4656 = vmatpush3.msra.mxu0 %v3206_v30  ;;  %v8451_v30 = vld [vmem:[#allocation40_spill] sm:$0xff] }
 0x16f   : > { %4657 = vmatprep.subr.mxu0 %v3205_v42  ;;  %4749 = vmatpush3.msra.mxu1 %v3205_v42 }
 0x170   : > { %3752 = vmatmul.mubr.f32.gmra.mxu0 %v8433_v39  ;;  %4734 = vmatprep.subr.mxu1 %v3204_v21  ;;  %v8450_v39 = vld [vmem:[#allocation61_spill] sm:$0xff] }
 0x171   : > { %3982 = vmatmul.mubr.f32.gmra.mxu1 %v8445_v54  ;;  %3756 = vmatprep.mubr.f32.mxu0 %v8446_v24  ;;  %v8455_v54 = vld [vmem:[#allocation46_spill] sm:$0xff] }
 0x172   : > { %3986 = vmatprep.mubr.f32.mxu1 %v8447_v8  ;;  %4658 = vmatpush3.msra.mxu0 %v3205_v42  ;;  %v3284_v42 = vadd.f32 %v7436_v4, %v3283_v53  ;;  %v3200_v53 = vld [vmem:[%s8055_s4 + $0x430] sm:$0xff] }
 0x173   : > { %4659 = vmatprep.subr.mxu0 %v3204_v21  ;;  %4750 = vmatpush3.msra.mxu1 %v3204_v21 }
 0x174   : > { %3757 = vmatmul.mubr.f32.gmra.mxu0 %v8438_v7  ;;  %4735 = vmatprep.subr.mxu1 %v3203_v41  ;;  %v8452_v7 = vld [vmem:[#allocation44_spill] sm:$0xff]  ;;  %v7446_v15 = vadd.f32 %v3508_v22, %v3284_v42 }
 0x175   : > { %3987 = vmatmul.mubr.f32.gmra.mxu1 %v8448_v63  ;;  %3761 = vmatprep.mubr.f32.mxu0 %v8449_v62  ;;  %v8456_v63 = vld [vmem:[#allocation50_spill] sm:$0xff] }
 0x176   : > { %3991 = vmatprep.mubr.f32.mxu1 %v8450_v39  ;;  %4660 = vmatpush3.msra.mxu0 %v3204_v21  ;;  %v3285_v21 = vpop.f32.mrf.mxu0  ;;  %8454 = vst [vmem:[#allocation53_spill] sm:$0xff] %v7446_v15  ;;  %v3199_v15 = vld [vmem:[%s8055_s4 + $0x428] sm:$0xff] }
 0x177   : > { %4661 = vmatprep.subr.mxu0 %v3203_v41  ;;  %4751 = vmatpush3.msra.mxu1 %v3203_v41  ;;  %v8459_v21 = vld [vmem:[#allocation52_spill] sm:$0xff] }
 0x178   : > { %3762 = vmatmul.mubr.f32.gmra.mxu0 %v8441_v13  ;;  %4736 = vmatprep.subr.mxu1 %v3202_v0  ;;  %v3288_v13 = vpop.f32.mrf.mxu0 }
 0x179   : > { %3992 = vmatmul.mubr.f32.gmra.mxu1 %v8451_v30  ;;  %3766 = vmatprep.mubr.f32.mxu0 %v8452_v7  ;;  %v3289_v18 = vadd.f32 %v7436_v4, %v3288_v13  ;;  %v3518_v30 = vpop.f32.mrf.mxu1  ;;  %v8460_v13 = vld [vmem:[#allocation57_spill] sm:$0xff] }
 0x17a   : > { %3996 = vmatprep.mubr.f32.mxu1 %v8453_v40  ;;  %4662 = vmatpush3.msra.mxu0 %v3203_v41  ;;  %v8457_v41 = vld [vmem:[#allocation67_spill] sm:$0xff]  ;;  %v3290_v22 = vpop.f32.mrf.mxu0 }
 0x17b   : > { %4663 = vmatprep.subr.mxu0 %v3202_v0  ;;  %4752 = vmatpush3.msra.mxu1 %v3202_v0  ;;  %v3520_v42 = vpop.f32.mrf.mxu1 }
 0x17c   : > { %3767 = vmatmul.mubr.f32.gmra.mxu0 %v8444_v6  ;;  %4737 = vmatprep.subr.mxu1 %v3201_v16  ;;  %v7456_v6 = vadd.f32 %v3513_v26, %v3289_v18  ;;  %v8463_v42 = vld [vmem:[#allocation7_spill] sm:$0xff] }
 0x17d   : > { %3997 = vmatmul.mubr.f32.gmra.mxu1 %v8455_v54  ;;  %3771 = vmatprep.mubr.f32.mxu0 %v8456_v63  ;;  %v3293_v54 = vpop.f32.mrf.mxu0  ;;  %v3523_v26 = vpop.f32.mrf.mxu1 }
 0x17e   : > { %4001 = vmatprep.mubr.f32.mxu1 %v8457_v41  ;;  %4664 = vmatpush3.msra.mxu0 %v3202_v0  ;;  %8458 = vst [vmem:[#allocation19_spill] sm:$0xff] %v7456_v6  ;;  %v8461_v0 = vld [vmem:[#allocation15_spill] sm:$0xff]  ;;  %v3294_v22 = vadd.f32 %v7436_v4, %v3293_v54  ;;  %v8465_v54 = vld [vmem:[#allocation38_spill] sm:$0xff]  ;;  %v8472_v6 = vld [vmem:[#allocation4_spill] sm:$0xff] }
 0x17f   : > { %4665 = vmatprep.subr.mxu0 %v3201_v16  ;;  %4753 = vmatpush3.msra.mxu1 %v3201_v16  ;;  %v3295_v18 = vpop.f32.mrf.mxu0 }
 0x180   : > { %3772 = vmatmul.mubr.f32.gmra.mxu0 %v8447_v8  ;;  %4738 = vmatprep.subr.mxu1 %v3200_v53  ;;  %v7467_v8 = vadd.f32 %v3518_v30, %v3294_v22  ;;  %v3197_v30 = vld [vmem:[%s8055_s4 + $0x418] sm:$0xff]  ;;  %v8468_v18 = vld [vmem:[#allocation68_spill] sm:$0xff] }
 0x181   : > { %4002 = vmatmul.mubr.f32.gmra.mxu1 %v8459_v21  ;;  %3776 = vmatprep.mubr.f32.mxu0 %v8460_v13  ;;  %v3525_v21 = vpop.f32.mrf.mxu1 }
 0x182   : > { %4006 = vmatprep.mubr.f32.mxu1 %v8461_v0  ;;  %4666 = vmatpush3.msra.mxu0 %v3201_v16  ;;  %8462 = vst [vmem:[#allocation54_spill] sm:$0xff] %v7467_v8  ;;  %v3198_v16 = vld [vmem:[%s8055_s4 + $0x420] sm:$0xff]  ;;  %v3196_v21 = vld [vmem:[%s8055_s4 + $0x410] sm:$0xff] }
 0x183   : > { %4667 = vmatprep.subr.mxu0 %v3200_v53  ;;  %4754 = vmatpush3.msra.mxu1 %v3200_v53  ;;  %v8469_v8 = vld [vmem:[#allocation70_spill] sm:$0xff] }
 0x184   : > { %3777 = vmatmul.mubr.f32.gmra.mxu0 %v8450_v39  ;;  %4739 = vmatprep.subr.mxu1 %v3199_v15  ;;  %v8464_v39 = vld [vmem:[#allocation63_spill] sm:$0xff] }
 0x185   : > { %4007 = vmatmul.mubr.f32.gmra.mxu1 %v6388_v17  ;;  %3781 = vmatprep.mubr.f32.mxu0 %v8463_v42  ;;  %v3298_v17 = vpop.f32.mrf.mxu0 }
 0x186   : > { %4011 = vmatprep.mubr.f32.mxu1 %v6729_v2  ;;  %4668 = vmatpush3.msra.mxu0 %v3200_v53  ;;  %v3299_v22 = vadd.f32 %v7436_v4, %v3298_v17  ;;  %v3528_v17 = vpop.f32.mrf.mxu1 }
 0x187   : > { %4669 = vmatprep.subr.mxu0 %v3199_v15  ;;  %4755 = vmatpush3.msra.mxu1 %v3199_v15  ;;  %v3300_v53 = vpop.f32.mrf.mxu0 }
 0x188   : > { %3782 = vmatmul.mubr.f32.gmra.mxu0 %v8453_v40  ;;  %4740 = vmatprep.subr.mxu1 %v3198_v16  ;;  %v7484_v40 = vadd.f32 %v3523_v26, %v3299_v22  ;;  %v8470_v22 = vld [vmem:[#allocation42_spill] sm:$0xff]  ;;  %v8471_v53 = vld [vmem:[#allocation35_spill] sm:$0xff] }
 0x189   : > { %4012 = vmatmul.mubr.f32.gmra.mxu1 %v6466_v23  ;;  %3786 = vmatprep.mubr.f32.mxu0 %v8464_v39  ;;  %v8467_v23 = vld [vmem:[#allocation64_spill] sm:$0xff] }
 0x18a   : > { %4016 = vmatprep.mubr.f32.mxu1 %v8465_v54  ;;  %4670 = vmatpush3.msra.mxu0 %v3199_v15  ;;  %8466 = vst [vmem:[#allocation59_spill] sm:$0xff] %v7484_v40  ;;  %v3303_v15 = vpop.f32.mrf.mxu0  ;;  %v3195_v40 = vld [vmem:[%s8055_s4 + $0x408] sm:$0xff] }
 0x18b   : > { %4671 = vmatprep.subr.mxu0 %v3198_v16  ;;  %4756 = vmatpush3.msra.mxu1 %v3198_v16  ;;  %v3304_v26 = vadd.f32 %v7436_v4, %v3303_v15  ;;  %v8474_v15 = vld [vmem:[#allocation34_spill] sm:$0xff] }
 0x18c   : > { %3787 = vmatmul.mubr.f32.gmra.mxu0 %v8457_v41  ;;  %4741 = vmatprep.subr.mxu1 %v3197_v30  ;;  %v3530_v41 = vpop.f32.mrf.mxu1 }
 0x18d   : > { %4017 = vmatmul.mubr.f32.gmra.mxu1 %v8467_v23  ;;  %3791 = vmatprep.mubr.f32.mxu0 %v8468_v18  ;;  %v3305_v23 = vpop.f32.mrf.mxu0  ;;  %v7500_v18 = vadd.f32 %v3528_v17, %v3304_v26  ;;  %v8475_v41 = vld [vmem:[#allocation10_spill] sm:$0xff]  ;;  %v8479_v26 = vld [vmem:[#allocation45_spill] sm:$0xff] }
 0x18e   : > { %4021 = vmatprep.mubr.f32.mxu1 %v8469_v8  ;;  %4672 = vmatpush3.msra.mxu0 %v3198_v16  ;;  %v3533_v16 = vpop.f32.mrf.mxu1  ;;  %v8476_v23 = vld [vmem:[#allocation5_spill] sm:$0xff] }
 0x18f   : > { %4673 = vmatprep.subr.mxu0 %v3197_v30  ;;  %4757 = vmatpush3.msra.mxu1 %v3197_v30  ;;  %8473 = vst [vmem:[#allocation60_spill] sm:$0xff] %v7500_v18  ;;  %v3308_v17 = vpop.f32.mrf.mxu0 }
 0x190   : > { %3792 = vmatmul.mubr.f32.gmra.mxu0 %v8461_v0  ;;  %4742 = vmatprep.subr.mxu1 %v3196_v21  ;;  %v3535_v0 = vpop.f32.mrf.mxu1 }
 0x191   : > { %4022 = vmatmul.mubr.f32.gmra.mxu1 %v8470_v22  ;;  %3796 = vmatprep.mubr.f32.mxu0 %v8471_v53  ;;  %v3194_v22 = vld [vmem:[%s8055_s4 + $0x400] sm:$0xff]  ;;  %v3310_v18 = vpop.f32.mrf.mxu0 }
 0x192   : > { %4026 = vmatprep.mubr.f32.mxu1 %v8472_v6  ;;  %4674 = vmatpush3.msra.mxu0 %v3197_v30  ;;  %v8477_v30 = vld [vmem:[#allocation41_spill] sm:$0xff]  ;;  %v3538_v0 = vpop.f32.mrf.mxu1 }
 0x193   : > { %4675 = vmatprep.subr.mxu0 %v3196_v21  ;;  %4758 = vmatpush3.msra.mxu1 %v3196_v21 }
 0x194   : > { %3797 = vmatmul.mubr.f32.gmra.mxu0 %v6729_v2  ;;  %4743 = vmatprep.subr.mxu1 %v3195_v40  ;;  %v8478_v2 = vld [vmem:[#allocation43_spill] sm:$0xff] }
 0x195   : > { %4027 = vmatmul.mubr.f32.gmra.mxu1 %v8474_v15  ;;  %3801 = vmatprep.mubr.f32.mxu0 %v8475_v41  ;;  %v3309_v15 = vadd.f32 %v7436_v4, %v3308_v17  ;;  %v8481_v41 = vld [vmem:[#allocation69_spill] sm:$0xff] }
 0x196   : > { %4031 = vmatprep.mubr.f32.mxu1 %v8476_v23  ;;  %4676 = vmatpush3.msra.mxu0 %v3196_v21  ;;  %v3540_v21 = vpop.f32.mrf.mxu1 }
 0x197   : > { %4677 = vmatprep.subr.mxu0 %v3195_v40  ;;  %4759 = vmatpush3.msra.mxu1 %v3195_v40 }
 0x198   : > { %3802 = vmatmul.mubr.f32.gmra.mxu0 %v8465_v54  ;;  %4744 = vmatprep.subr.mxu1 %v3194_v22  ;;  %v7515_v54 = vadd.f32 %v3533_v16, %v3309_v15  ;;  %v3543_v18 = vpop.f32.mrf.mxu1  ;;  %v8484_v16 = vld [vmem:[#allocation48_spill] sm:$0xff]  ;;  %v8485_v15 = vld [vmem:[#allocation51_spill] sm:$0xff] }
 0x199   : > { %4032 = vmatmul.mubr.f32.gmra.mxu1 %v8477_v30  ;;  %3806 = vmatprep.mubr.f32.mxu0 %v8478_v2  ;;  %v8482_v30 = vld [vmem:[#allocation17_spill] sm:$0xff]  ;;  %v3313_v2 = vpop.f32.mrf.mxu0 }
 0x19a   : > { %4036 = vmatprep.mubr.f32.mxu1 %v8479_v26  ;;  %4678 = vmatpush3.msra.mxu0 %v3195_v40  ;;  %8480 = vst [vmem:[#allocation9_spill] sm:$0xff] %v7515_v54  ;;  %v3314_v53 = vadd.f32 %v7436_v4, %v3313_v2 }
 0x19b   : > { %4679 = vmatprep.subr.mxu0 %v3194_v22  ;;  %4760 = vmatpush3.msra.mxu1 %v3194_v22  ;;  %v3315_v40 = vpop.f32.mrf.mxu0 }
 0x19c   : > { %3807 = vmatmul.mubr.f32.gmra.mxu0 %v8469_v8  ;;  %v7522_v17 = vadd.f32 %v3538_v0, %v3314_v53  ;;  %v362_v8 = vld [vmem:[%s5232_s20 + $0x138] sm:$0xff]  ;;  %v8487_v0 = vld [vmem:[#allocation55_spill] sm:$0xff] }
 0x19d   : > { %4037 = vmatmul.mubr.f32.gmra.mxu1 %v8481_v41  ;;  %3811 = vmatprep.mubr.f32.mxu0 %v8482_v30  ;;  %v3545_v41 = vpop.f32.mrf.mxu1  ;;  %v410_v21 = vmul.f32 %v8485_v15, %v362_v8  ;;  %v8488_v8 = vld [vmem:[#allocation47_spill] sm:$0xff] }
 0x19e   : > { %4041 = vmatprep.mubr.f32.mxu1 %v6964_v11  ;;  %4680 = vmatpush3.msra.mxu0 %v3194_v22  ;;  %8483 = vst [vmem:[#allocation37_spill] sm:$0xff] %v7522_v17  ;;  %v8486_v22 = vld [vmem:[#allocation49_spill] sm:$0xff]  ;;  %v3318_v2 = vpop.f32.mrf.mxu0  ;;  %v363_v41 = vld [vmem:[%s5232_s20 + $0x140] sm:$0xf]  ;;  %s4600_s20 = sshll.u32 %s8516_s28, 8 }
 0x19f   : > { %v3319_v40 = vadd.f32 %v7436_v4, %v3318_v2  ;;  %v8489_v2 = vld [vmem:[#allocation6_spill] sm:$0xff]  ;;  %s7857_s22 = scalar_lea.vmem %s8057_s6, %s4600_s20 }
 0x1a0   : > { %3812 = vmatmul.mubr.f32.gmra.mxu0 %v8472_v6  ;;  %v3548_v6 = vpop.f32.mrf.mxu1 }
 0x1a1   : > { %4042 = vmatmul.mubr.f32.gmra.mxu1 %v6832_v1  ;;  %3816 = vmatprep.mubr.f32.mxu0 %v8484_v16  ;;  %v458_v1 = vadd.f32 %v8487_v0, %v410_v21  ;;  %v740_v21 = vpop.permute.xlu1 %739 }
 0x1a2   : > { %4046 = vmatprep.mubr.f32.mxu1 %v7017_v25  ;;  %v3550_v53 = vpop.f32.mrf.mxu1 }
 0x1a3   : > { %v499_v54 = vmax.f32 %v458_v1, 0.0  ;;  %v411_v53 = vmul.f32 %v8485_v15, %v363_v41 }
 0x1a4   : > { %3817 = vmatmul.mubr.f32.gmra.mxu0 %v8476_v23  ;;  %v3320_v23 = vpop.f32.mrf.mxu0 }
 0x1a5   : > { %4047 = vmatmul.mubr.f32.gmra.mxu1 %v6886_v45  ;;  %3821 = vmatprep.mubr.f32.mxu0 %v8486_v22  ;;  %v7540_v45 = vadd.f32 %v3543_v18, %v3319_v40  ;;  %v3553_v18 = vpop.f32.mrf.mxu1  ;;  %v786_v40 = vmul.f32 %v740_v21, %v499_v54  ;;  %v459_v1 = vadd.f32 %v8487_v0, %v411_v53  ;;  %v8490_v54 = vld [vmem:[#allocation18_spill] sm:$0xff] }
 0x1a6   : > { %4051 = vmatprep.mubr.f32.mxu1 %v7061_v5  ;;  %v3323_v17 = vpop.f32.mrf.mxu0 }
 0x1a7   : > { %v500_v15 = vmax.f32 %v459_v1, 0.0 }
 0x1a8   : > { %3822 = vmatmul.mubr.f32.gmra.mxu0 %v8479_v26  ;;  %v3324_v26 = vadd.f32 %v7436_v4, %v3323_v17  ;;  %v745_v17 = vpop.permute.xlu0 %744 }
 0x1a9   : > { %4052 = vmatmul.mubr.f32.gmra.mxu1 %v6909_v55  ;;  %3826 = vmatprep.mubr.f32.mxu0 %v8488_v8  ;;  %v3325_v55 = vpop.f32.mrf.mxu0  ;;  %v787_v21 = vmul.f32 %v745_v17, %v500_v15 }
 0x1aa   : > { %4056 = vmatprep.mubr.f32.mxu1 %v7106_v52  ;;  %v7548_v23 = vadd.f32 %v3548_v6, %v3324_v26  ;;  %v1475_v6 = vcombine.high %v7097_v48, %v7097_v48  ;;  %v8491_v48 = vld [vmem:[#allocation58_spill] sm:$0xff]  ;;  %v7575_v55 = vrot.slane %v786_v40, %v5276_v14 }
 0x1ac   : > { %3827 = vmatmul.mubr.f32.gmra.mxu0 %v6964_v11  ;;  %v3555_v11 = vpop.f32.mrf.mxu1  ;;  %v7597_v15 = vcombine.high %v7575_v55, %v7575_v55 }
 0x1ad   : > { %4057 = vmatmul.mubr.f32.gmra.mxu1 %v6982_v12  ;;  %3831 = vmatprep.mubr.f32.mxu0 %v8489_v2  ;;  %v1492_v12 = vcombine.high %v786_v40, %v786_v40  ;;  %v3328_v0 = vpop.f32.mrf.mxu0 }
 0x1ae   : > { %4061 = vmatprep.mubr.f32.mxu1 %v7153_v32 }
 0x1af   : > { %v3330_v53 = vpop.f32.mrf.mxu0  ;;  %v7563_v26 = vrot.slane %v1492_v12, %v5276_v14 }
 0x1b0   : > { %3832 = vmatmul.mubr.f32.gmra.mxu0 %v7017_v25  ;;  %v3558_v25 = vpop.f32.mrf.mxu1 }
 0x1b1   : > { %4062 = vmatmul.mubr.f32.gmra.mxu1 %v7011_v9  ;;  %3836 = vmatprep.mubr.f32.mxu0 %v7057_v29  ;;  %v3329_v9 = vadd.f32 %v7436_v4, %v3328_v0  ;;  %v7579_v11 = vcombine.high %v7563_v26, %v7563_v26 }
 0x1b2   : > { %4066 = vmatprep.mubr.f32.mxu1 %v7201_v38  ;;  %v3560_v41 = vpop.f32.mrf.mxu1  ;;  %v3333_v1 = vpop.f32.mrf.mxu0 }
 0x1b4   : > { %3837 = vmatmul.mubr.f32.gmra.mxu0 %v7061_v5  ;;  %v7566_v5 = vadd.f32 %v3553_v18, %v3329_v9  ;;  %v3334_v18 = vadd.f32 %v7436_v4, %v3333_v1  ;;  %v3335_v12 = vpop.f32.mrf.mxu0  ;;  %v2997_v9 = vcombine.low %v7597_v15, %v7563_v26 }
 0x1b5   : > { %4067 = vmatmul.mubr.f32.gmra.mxu1 %v7072_v57  ;;  %3841 = vmatprep.mubr.f32.mxu0 %v8490_v54  ;;  %v7569_v57 = vrot.slane %v1475_v6, %v5276_v14  ;;  %v3563_v40 = vpop.f32.mrf.mxu1 }
 0x1b6   : > { %4071 = vmatprep.mubr.f32.mxu1 %v7234_v46  ;;  %v7593_v17 = vadd.f32 %v3558_v25, %v3334_v18  ;;  %v2938_v18 = vrot.slane %v7345_v36, 1 }
 0x1b7   : > { %v3565_v6 = vpop.f32.mrf.mxu1 }
 0x1b8   : > { %3842 = vmatmul.mubr.f32.gmra.mxu0 %v7106_v52  ;;  %v7582_v52 = vrot.slane %v787_v21, %v5276_v14 }
 0x1b9   : > { %4072 = vmatmul.mubr.f32.gmra.mxu1 %v7102_v59  ;;  %3846 = vmatprep.mubr.f32.mxu0 %v8491_v48  ;;  %v7588_v59 = vcombine.high %v7569_v57, %v7569_v57 }
 0x1ba   : > { %4076 = vmatprep.mubr.f32.mxu1 %v7263_v44  ;;  %v2998_v0 = vcombine.low %v7579_v11, %v7582_v52  ;;  %v3338_v25 = vpop.f32.mrf.mxu0 }
 0x1bb   : > { %v3339_v21 = vadd.f32 %v7436_v4, %v3338_v25 }
 0x1bc   : > { %3847 = vmatmul.mubr.f32.gmra.mxu0 %v7153_v32  ;;  %v1490_v32 = vcombine.high %v7142_v51, %v7142_v51  ;;  %v3340_v1 = vpop.f32.mrf.mxu0 }
 0x1bd   : > { %4077 = vmatmul.mubr.f32.gmra.mxu1 %v7147_v43  ;;  %3851 = vmatprep.mubr.f32.mxu0 %v7197_v50  ;;  %v2981_v43 = vcombine.low %v7588_v59, %v7575_v55  ;;  %v3568_v53 = vpop.f32.mrf.mxu1 }
 0x1be   : > { %4081 = vmatprep.mubr.f32.mxu1 %v7312_v28  ;;  %v2980_v41 = vcombine.low %v1490_v32, %v7569_v57  ;;  %v7620_v32 = vadd.f32 %v3563_v40, %v3339_v21 }
 0x1bf   : > { %v3570_v12 = vpop.f32.mrf.mxu1  ;;  %v2995_v6 = vrot.slane %v2981_v43, %v5276_v14 }
 0x1c0   : > { %3852 = vmatmul.mubr.f32.gmra.mxu0 %v7201_v38  ;;  %v3012_v38 = vrot.slane %v2998_v0, %v5276_v14  ;;  %v2936_v0 = vrot.slane %v7142_v51, %v5276_v14  ;;  %v7634_v51 = vcombine.high %v7582_v52, %v7582_v52 }
 0x1c1   : > { %4082 = vmatmul.mubr.f32.gmra.mxu1 %v7178_v34  ;;  %3856 = vmatprep.mubr.f32.mxu0 %v7207_v3  ;;  %v2937_v34 = vrot.slane %v7320_v56, 1  ;;  %v3343_v21 = vpop.f32.mrf.mxu0 }
 0x1c2   : > { %4086 = vmatprep.mubr.f32.mxu1 %v7348_v27  ;;  %v3344_v1 = vadd.f32 %v7436_v4, %v3343_v21 }
 0x1c3   : > { %v2939_v25 = vsel %vm2205_vm0, %v2937_v34, %v2938_v18 }
 0x1c4   : > { %3857 = vmatmul.mubr.f32.gmra.mxu0 %v7234_v46  ;;  %v2988_v46 = vrot.slane %v2980_v41, %v5276_v14  ;;  %v2940_v41 = vrot.slane %v2936_v0, 1 }
 0x1c5   : > { %4087 = vmatmul.mubr.f32.gmra.mxu1 %v7212_v37  ;;  %3861 = vmatprep.mubr.f32.mxu0 %v7274_v49  ;;  %v3005_v37 = vrot.slane %v2997_v9, %v5276_v14  ;;  %v3345_v9 = vpop.f32.mrf.mxu0 }
 0x1c6   : > { %4091 = vmatprep.mubr.f32.mxu1 %v7377_v31  ;;  %v2996_v43 = vcombine.low %v2988_v46, %v2995_v6  ;;  %v3573_v34 = vpop.f32.mrf.mxu1  ;;  %v3022_v46 = vrot.slane %v7634_v51, %v5276_v14 }
 0x1c7   : > { %v3013_v40 = vcombine.low %v3005_v37, %v3012_v38 }
 0x1c8   : > { %3862 = vmatmul.mubr.f32.gmra.mxu0 %v7263_v44  ;;  %v7637_v44 = vadd.f32 %v3568_v53, %v3344_v1  ;;  %v3023_v38 = vrot.slane %v2996_v43, 1  ;;  %v3575_v6 = vpop.f32.mrf.mxu1  ;;  %v3026_v37 = vrot.slane %v3022_v46, 1 }
 0x1c9   : > { %4092 = vmatmul.mubr.f32.gmra.mxu1 %v7278_v60  ;;  %3866 = vmatprep.mubr.f32.mxu0 %v7304_v19  ;;  %v2941_v60 = vsel %vm2205_vm0, %v2938_v18, %v2940_v41  ;;  %v3024_v12 = vrot.slane %v3013_v40, 1  ;;  %v3348_v0 = vpop.f32.mrf.mxu0 }
 0x1ca   : > { %4096 = vmatprep.mubr.f32.mxu1 %v2939_v25  ;;  %v3349_v53 = vadd.f32 %v7436_v4, %v3348_v0 }
 0x1cb   : > { %v3350_v18 = vpop.f32.mrf.mxu0 }
 0x1cc   : > { %3867 = vmatmul.mubr.f32.gmra.mxu0 %v7312_v28  ;;  %v3025_v28 = vsel %vm2205_vm0, %v3023_v38, %v3024_v12  ;;  %v7649_v1 = vadd.f32 %v3573_v34, %v3349_v53 }
 0x1cd   : > { %4097 = vmatmul.mubr.f32.gmra.mxu1 %v7320_v56  ;;  %3871 = vmatprep.mubr.f32.mxu0 %v7340_v58  ;;  %v3578_v56 = vpop.f32.mrf.mxu1 }
 0x1ce   : > { %4101 = vmatprep.mubr.f32.mxu1 %v2941_v60 }
 0x1cf   : > { %v3580_v21 = vpop.f32.mrf.mxu1 }
 0x1d0   : > { %3872 = vmatmul.mubr.f32.gmra.mxu0 %v7348_v27  ;;  %v3027_v27 = vsel %vm2205_vm0, %v3024_v12, %v3026_v37 }
 0x1d1   : > { %4102 = vmatmul.mubr.f32.gmra.mxu1 %v7345_v36  ;;  %3876 = vmatprep.mubr.f32.mxu0 %v7363_v47  ;;  %v3353_v36 = vpop.f32.mrf.mxu0 }
 0x1d2   : > { %4106 = vmatprep.mubr.f32.mxu1 %v3025_v28  ;;  %v3354_v41 = vadd.f32 %v7436_v4, %v3353_v36  ;;  %v3048_v36 = vcombine.low %v7582_v52, %v7634_v51 }
 0x1d3   : > { %v3583_v9 = vpop.f32.mrf.mxu1  ;;  %v3355_v38 = vpop.f32.mrf.mxu0 }
 0x1d4   : > { %3877 = vmatmul.mubr.f32.gmra.mxu0 %v7377_v31  ;;  %v7656_v6 = vadd.f32 %v3578_v56, %v3354_v41  ;;  %v3062_v51 = vrot.slane %v3048_v36, %v5276_v14 }
 0x1d5   : > { %4107 = vmatmul.mubr.f32.gmra.mxu1 %v2996_v43  ;;  %3881 = vmatprep.mubr.f32.mxu0 %v7271_v10  ;;  %v3585_v31 = vpop.f32.mrf.mxu1  ;;  %v3358_v43 = vpop.f32.mrf.mxu0 }
 0x1d6   : > { %4111 = vmatprep.mubr.f32.mxu1 %v3027_v27  ;;  %v3359_v12 = vadd.f32 %v7436_v4, %v3358_v43  ;;  %v3030_v27 = vcombine.low %v7569_v57, %v7588_v59 }
 0x1d7   : > { %v3360_v46 = vpop.f32.mrf.mxu0 }
 0x1d8   : > { %3882 = vmatmul.mubr.f32.gmra.mxu0 %v2939_v25  ;;  %v3588_v34 = vpop.f32.mrf.mxu1 }
 0x1d9   : > { %4112 = vmatmul.mubr.f32.gmra.mxu1 %v3013_v40  ;;  %3886 = vmatprep.mubr.f32.mxu0 %v7295_v20  ;;  %v7663_v40 = vadd.f32 %v3583_v9, %v3359_v12 }
 0x1da   : > { %4705 = vmatprep.mubr.f32.mxu1 %v8486_v22  ;;  %v3590_v25 = vpop.f32.mrf.mxu1  ;;  %v3363_v0 = vpop.f32.mrf.mxu0 }
 0x1db   : > { %v3364_v28 = vadd.f32 %v7436_v4, %v3363_v0 }
 0x1dc   : > { %3887 = vmatmul.mubr.f32.gmra.mxu0 %v2941_v60  ;;  %v3593_v22 = vpop.f32.mrf.mxu1  ;;  %v3365_v60 = vpop.f32.mrf.mxu0 }
 0x1dd   : > { %4706 = vmatmul.mubr.f32.vlgmr.msra.gmra.mxu1 %v8488_v8  ;;  %4681 = vmatprep.mubr.f32.mxu0 %v8437_v61  ;;  %v7670_v61 = vadd.f32 %v3588_v34, %v3364_v28  ;;  %v8495_v28 = vld [vmem:[#allocation43_spill] sm:$0xff] }
 0x1de   : > { %4708 = vmatprep.mubr.f32.mxu1 %v8489_v2  ;;  %v3595_v8 = vpop.f32.mrf.mxu1  ;;  %v3368_v2 = vpop.f32.mrf.mxu0 }
 0x1df   : > { %v3369_v56 = vadd.f32 %v7436_v4, %v3368_v2 }
 0x1e0   : > { %4682 = vmatmul.mubr.f32.vlgmr.msra.gmra.mxu0 %v8440_v35  ;;  %v3370_v35 = vpop.f32.mrf.mxu0 }
 0x1e1   : > { %4709 = vmatmul.mubr.f32.gmra.mxu1 %v7057_v29  ;;  %4684 = vmatprep.mubr.f32.mxu0 %v8443_v33  ;;  %v3598_v53 = vpop.f32.mrf.mxu1  ;;  %v7677_v29 = vadd.f32 %v3593_v22, %v3369_v56 }
 0x1e2   : > { %4711 = vmatprep.mubr.f32.mxu1 %v8490_v54 }
 0x1e3   : > { %v3600_v33 = vpop.f32.mrf.mxu1  ;;  %v3373_v54 = vpop.f32.mrf.mxu0 }
 0x1e4   : > { %4685 = vmatmul.mubr.f32.gmra.mxu0 %v8446_v24  ;;  %v3374_v18 = vadd.f32 %v7436_v4, %v3373_v54 }
 0x1e5   : > { %4712 = vmatmul.mubr.f32.gmra.mxu1 %v8491_v48  ;;  %4687 = vmatprep.mubr.f32.mxu0 %v8449_v62  ;;  %v3603_v37 = vpop.f32.mrf.mxu1  ;;  %v3375_v24 = vpop.f32.mrf.mxu0 }
 0x1e6   : > { %4714 = vmatprep.mubr.f32.mxu1 %v7197_v50  ;;  %v7684_v62 = vadd.f32 %v3598_v53, %v3374_v18 }
 0x1e7   : > { %v3605_v48 = vpop.f32.mrf.mxu1  ;;  %v3378_v50 = vpop.f32.mrf.mxu0 }
 0x1e8   : > { %4688 = vmatmul.mubr.f32.gmra.mxu0 %v8452_v7  ;;  %v3379_v21 = vadd.f32 %v7436_v4, %v3378_v50 }
 0x1e9   : > { %4715 = vmatmul.mubr.f32.gmra.mxu1 %v7207_v3  ;;  %4690 = vmatprep.mubr.f32.mxu0 %v8456_v63  ;;  %v3380_v3 = vpop.f32.mrf.mxu0 }
 0x1ea   : > { %4717 = vmatprep.mubr.f32.mxu1 %v7274_v49  ;;  %v3608_v7 = vpop.f32.mrf.mxu1  ;;  %v3031_v49 = vcombine.low %v7575_v55, %v7597_v15  ;;  %v7695_v63 = vadd.f32 %v3603_v37, %v3379_v21 }
 0x1ec   : > { %4691 = vmatmul.mubr.f32.gmra.mxu0 %v8460_v13  ;;  %v3610_v13 = vpop.f32.mrf.mxu1  ;;  %v3383_v41 = vpop.f32.mrf.mxu0  ;;  %v3045_v52 = vrot.slane %v3031_v49, %v5276_v14 }
 0x1ed   : > { %4718 = vmatmul.mubr.f32.gmra.mxu1 %v7304_v19  ;;  %4693 = vmatprep.mubr.f32.mxu0 %v8463_v42  ;;  %v3384_v57 = vadd.f32 %v7436_v4, %v3383_v41  ;;  %v3038_v19 = vrot.slane %v3030_v27, %v5276_v14  ;;  %v3047_v42 = vcombine.low %v7563_v26, %v7579_v11  ;;  %v8493_v26 = vld [vmem:[#allocation35_spill] sm:$0xff] }
 0x1ee   : > { %4720 = vmatprep.mubr.f32.mxu1 %v7340_v58  ;;  %v8492_v58 = vld [vmem:[#allocation68_spill] sm:$0xff]  ;;  %v3385_v55 = vpop.f32.mrf.mxu0 }
 0x1ef   : > { %v3613_v59 = vpop.f32.mrf.mxu1  ;;  %v7708_v15 = vadd.f32 %v3608_v7, %v3384_v57  ;;  %v3046_v38 = vcombine.low %v3038_v19, %v3045_v52 }
 0x1f0   : > { %4694 = vmatmul.mubr.f32.gmra.mxu0 %v8464_v39 }
 0x1f1   : > { %4721 = vmatmul.mubr.f32.gmra.mxu1 %v7363_v47  ;;  %4696 = vmatprep.mubr.f32.mxu0 %v8492_v58  ;;  %v3615_v39 = vpop.f32.mrf.mxu1  ;;  %v3388_v9 = vpop.f32.mrf.mxu0  ;;  %v8494_v47 = vld [vmem:[#allocation10_spill] sm:$0xff] }
 0x1f2   : > { %4723 = vmatprep.mubr.f32.mxu1 %v7271_v10  ;;  %v3389_v31 = vadd.f32 %v7436_v4, %v3388_v9  ;;  %v3055_v10 = vrot.slane %v3047_v42, %v5276_v14 }
 0x1f3   : > { %v3390_v43 = vpop.f32.mrf.mxu0 }
 0x1f4   : > { %4697 = vmatmul.mubr.f32.gmra.mxu0 %v8493_v26  ;;  %v3618_v11 = vpop.f32.mrf.mxu1  ;;  %v7716_v34 = vadd.f32 %v3613_v59, %v3389_v31  ;;  %v3063_v46 = vcombine.low %v3055_v10, %v3062_v51 }
 0x1f5   : > { %4724 = vmatmul.mubr.f32.gmra.mxu1 %v7295_v20  ;;  %4699 = vmatprep.mubr.f32.mxu0 %v8494_v47  ;;  %v3393_v25 = vpop.f32.mrf.mxu0 }
 0x1f6   : > { %4726 = vmatprep.mubr.f32.mxu1 %v3046_v38  ;;  %v3620_v12 = vpop.f32.mrf.mxu1  ;;  %v3394_v0 = vadd.f32 %v7436_v4, %v3393_v25 }
 0x1f7   : > { %v3395_v20 = vpop.f32.mrf.mxu0 }
 0x1f8   : > { %4700 = vmatmul.mubr.f32.gmra.mxu0 %v8495_v28  ;;  %v3623_v22 = vpop.f32.mrf.mxu1  ;;  %v7721_v60 = vadd.f32 %v3618_v11, %v3394_v0 }
 0x1f9   : > { %4727 = vmatmul.mubr.f32.gmra.mxu1 %v3063_v46  ;;  %4702 = vmatprep.mubr.f32.mxu0 %v8482_v30 }
 0x1fa   : > { %v3625_v8 = vpop.f32.mrf.mxu1  ;;  %v3398_v14 = vpop.f32.mrf.mxu0 }
 0x1fb   : > { %v3399_v2 = vadd.f32 %v7436_v4, %v3398_v14 }
 0x1fc   : > { %4703 = vmatmul.mubr.f32.gmra.mxu0 %v8484_v16  ;;  %v3628_v56 = vpop.f32.mrf.mxu1  ;;  %v3400_v53 = vpop.f32.mrf.mxu0 }
 0x1fd   : > { %v7725_v35 = vadd.f32 %v3623_v22, %v3399_v2 }
 0x1fe   : > { %v3630_v33 = vpop.f32.mrf.mxu1  ;;  %v3403_v54 = vpop.f32.mrf.mxu0 }
 0x1ff   : > { %v3404_v18 = vadd.f32 %v7436_v4, %v3403_v54 }
 0x200   : > { %v3633_v37 = vpop.f32.mrf.mxu1  ;;  %v3405_v24 = vpop.f32.mrf.mxu0 }
 0x201   : > { %v7728_v30 = vadd.f32 %v3628_v56, %v3404_v18 }
 0x202   : > { %v3635_v48 = vpop.f32.mrf.mxu1  ;;  %v3408_v50 = vpop.f32.mrf.mxu0 }
 0x203   : > { %v3409_v21 = vadd.f32 %v7436_v4, %v3408_v50  ;;  %v8496_v48 = vld [vmem:[#allocation53_spill] sm:$0xff] }
 0x204   : > { %v3638_v27 = vpop.f32.mrf.mxu1  ;;  %v3410_v7 = vpop.f32.mrf.mxu0 }
 0x205   : > { %v7731_v3 = vadd.f32 %v3633_v37, %v3409_v21 }
 0x206   : > { %v3640_v16 = vpop.f32.mrf.mxu1  ;;  %v3413_v49 = vpop.f32.mrf.mxu0 }
 0x207   : > { %v3414_v36 = vadd.f32 %v7436_v4, %v3413_v49 }
 0x208   : > { %v3643_v13 = vpop.f32.mrf.mxu1  ;;  %v3415_v41 = vpop.f32.mrf.mxu0 }
 0x209   : > { %v7734_v57 = vadd.f32 %v3638_v27, %v3414_v36  ;;  %v8497_v36 = vld [vmem:[#allocation19_spill] sm:$0xff] }
 0x20a   : > { %v3645_v19 = vpop.f32.mrf.mxu1 }
 0x20b   : > { %v3418_v42 = vpop.f32.mrf.mxu0 }
 0x20c   : > { %v3419_v59 = vadd.f32 %v7436_v4, %v3418_v42 }
 0x20d   : > { %v3648_v58 = vpop.f32.mrf.mxu1  ;;  %v3420_v55 = vpop.f32.mrf.mxu0 }
 0x20e   : > { %v7737_v52 = vadd.f32 %v3643_v13, %v3419_v59 }
 0x20f   : > { %v3650_v51 = vpop.f32.mrf.mxu1  ;;  %v3423_v39 = vpop.f32.mrf.mxu0 }
 0x210   : > { %v3424_v9 = vadd.f32 %v7436_v4, %v3423_v39 }
 0x211   : > { %v3653_v38 = vpop.f32.mrf.mxu1  ;;  %v3425_v31 = vpop.f32.mrf.mxu0 }
 0x212   : > { %v7740_v26 = vadd.f32 %v3648_v58, %v3424_v9  ;;  %v8498_v58 = vld [vmem:[#allocation54_spill] sm:$0xff] }
 0x213   : > { %v3655_v11 = vpop.f32.mrf.mxu1  ;;  %v3428_v47 = vpop.f32.mrf.mxu0 }
 0x214   : > { %v3429_v10 = vadd.f32 %v7436_v4, %v3428_v47  ;;  %v8499_v11 = vld [vmem:[#allocation59_spill] sm:$0xff] }
 0x215   : > { %v3658_v43 = vpop.f32.mrf.mxu1  ;;  %v3430_v12 = vpop.f32.mrf.mxu0 }
 0x216   : > { %v7743_v46 = vadd.f32 %v3653_v38, %v3429_v10 }
 0x217   : > { %v3660_v25 = vpop.f32.mrf.mxu1 }
 0x218   : > { %v3433_v0 = vpop.f32.mrf.mxu0 }
 0x219   : > { %v3663_v28 = vpop.f32.mrf.mxu1  ;;  %v3434_v22 = vadd.f32 %v7436_v4, %v3433_v0 }
 0x21a   : > { %v3435_v20 = vpop.f32.mrf.mxu0 }
 0x21b   : > { %v3665_v8 = vpop.f32.mrf.mxu1  ;;  %v7746_v14 = vadd.f32 %v3658_v43, %v3434_v22 }
 0x21c   : > { %v3438_v2 = vpop.f32.mrf.mxu0 }
 0x21d   : > { %v3958_v56 = vpop.f32.mrf.mxu1  ;;  %v3439_v53 = vadd.f32 %v7436_v4, %v3438_v2 }
 0x21e   : > { %v3440_v33 = vpop.f32.mrf.mxu0 }
 0x21f   : > { %v3960_v54 = vpop.f32.mrf.mxu1  ;;  %v7749_v18 = vadd.f32 %v3663_v28, %v3439_v53  ;;  %v8500_v28 = vld [vmem:[#allocation60_spill] sm:$0xff]  ;;  %v8501_v33 = vld [vmem:[#allocation9_spill] sm:$0xff] }
 0x220   : > { %v3733_v37 = vpop.f32.mrf.mxu0 }
 0x221   : > { %v3963_v24 = vpop.f32.mrf.mxu1  ;;  %v3734_v50 = vadd.f32 %v3733_v37, %v8496_v48 }
 0x222   : > { %v3735_v21 = vpop.f32.mrf.mxu0 }
 0x223   : > { %v3965_v27 = vpop.f32.mrf.mxu1  ;;  %v7752_v7 = vadd.f32 %v3958_v56, %v3734_v50 }
 0x224   : > { %v3738_v16 = vpop.f32.mrf.mxu0  ;;  %v8502_v27 = vld [vmem:[#allocation37_spill] sm:$0xff] }
 0x225   : > { %v3968_v49 = vpop.f32.mrf.mxu1  ;;  %v3739_v13 = vadd.f32 %v3738_v16, %v8497_v36 }
 0x226   : > { %v3740_v41 = vpop.f32.mrf.mxu0 }
 0x227   : > { %v3970_v19 = vpop.f32.mrf.mxu1  ;;  %v7755_v42 = vadd.f32 %v3963_v24, %v3739_v13 }
 0x228   : > { %v3743_v4 = vpop.f32.mrf.mxu0 }
 0x229   : > { %v3973_v59 = vpop.f32.mrf.mxu1  ;;  %v3744_v55 = vadd.f32 %v3743_v4, %v8498_v58 }
 0x22a   : > { %v3745_v51 = vpop.f32.mrf.mxu0 }
 0x22b   : > { %v3975_v39 = vpop.f32.mrf.mxu1  ;;  %v7758_v9 = vadd.f32 %v3968_v49, %v3744_v55 }
 0x22c   : > { %v3748_v38 = vpop.f32.mrf.mxu0 }
 0x22d   : > { %v3978_v31 = vpop.f32.mrf.mxu1  ;;  %v3749_v47 = vadd.f32 %v3748_v38, %v8499_v11 }
 0x22e   : > { %v3750_v10 = vpop.f32.mrf.mxu0 }
 0x22f   : > { %v3980_v43 = vpop.f32.mrf.mxu1  ;;  %v7761_v12 = vadd.f32 %v3973_v59, %v3749_v47 }
 0x230   : > { %v3753_v25 = vpop.f32.mrf.mxu0 }
 0x231   : > { %v3983_v0 = vpop.f32.mrf.mxu1  ;;  %v3754_v22 = vadd.f32 %v3753_v25, %v8500_v28 }
 0x232   : > { %v3755_v20 = vpop.f32.mrf.mxu0 }
 0x233   : > { %v3985_v8 = vpop.f32.mrf.mxu1  ;;  %v7764_v2 = vadd.f32 %v3978_v31, %v3754_v22 }
 0x234   : > { %v3758_v56 = vpop.f32.mrf.mxu0 }
 0x235   : > { %v3988_v53 = vpop.f32.mrf.mxu1  ;;  %v3759_v54 = vadd.f32 %v3758_v56, %v8501_v33 }
 0x236   : > { %v3760_v37 = vpop.f32.mrf.mxu0 }
 0x237   : > { %v3990_v24 = vpop.f32.mrf.mxu1  ;;  %v7767_v48 = vadd.f32 %v3983_v0, %v3759_v54 }
 0x238   : > { %v3763_v50 = vpop.f32.mrf.mxu0 }
 0x239   : > { %v3993_v21 = vpop.f32.mrf.mxu1  ;;  %v3764_v16 = vadd.f32 %v3763_v50, %v8502_v27 }
 0x23a   : > { %v3765_v49 = vpop.f32.mrf.mxu0 }
 0x23b   : > { %v3995_v36 = vpop.f32.mrf.mxu1  ;;  %v7770_v13 = vadd.f32 %v3988_v53, %v3764_v16 }
 0x23c   : > { %v3768_v41 = vpop.f32.mrf.mxu0 }
 0x23d   : > { %v3998_v19 = vpop.f32.mrf.mxu1  ;;  %v3769_v4 = vadd.f32 %v3768_v41, %v7540_v45 }
 0x23e   : > { %v3770_v59 = vpop.f32.mrf.mxu0 }
 0x23f   : > { %v4000_v58 = vpop.f32.mrf.mxu1  ;;  %v7773_v55 = vadd.f32 %v3993_v21, %v3769_v4 }
 0x240   : > { %v3773_v51 = vpop.f32.mrf.mxu0 }
 0x241   : > { %v4003_v39 = vpop.f32.mrf.mxu1  ;;  %v3774_v38 = vadd.f32 %v3773_v51, %v7548_v23 }
 0x242   : > { %v3775_v31 = vpop.f32.mrf.mxu0 }
 0x243   : > { %v4005_v11 = vpop.f32.mrf.mxu1  ;;  %v7776_v47 = vadd.f32 %v3998_v19, %v3774_v38 }
 0x244   : > { %v3778_v10 = vpop.f32.mrf.mxu0 }
 0x245   : > { %v4008_v43 = vpop.f32.mrf.mxu1  ;;  %v3779_v25 = vadd.f32 %v3778_v10, %v7566_v5 }
 0x246   : > { %v3780_v0 = vpop.f32.mrf.mxu0 }
 0x247   : > { %v4010_v28 = vpop.f32.mrf.mxu1  ;;  %v7779_v22 = vadd.f32 %v4003_v39, %v3779_v25 }
 0x248   : > { %v3783_v45 = vpop.f32.mrf.mxu0 }
 0x249   : > { %v4013_v20 = vpop.f32.mrf.mxu1  ;;  %v3784_v8 = vadd.f32 %v3783_v45, %v7593_v17 }
 0x24a   : > { %v3785_v56 = vpop.f32.mrf.mxu0 }
 0x24b   : > { %v4015_v53 = vpop.f32.mrf.mxu1  ;;  %v7782_v33 = vadd.f32 %v4008_v43, %v3784_v8 }
 0x24c   : > { %v3788_v23 = vpop.f32.mrf.mxu0 }
 0x24d   : > { %8503 = vst [vmem:[#allocation31_spill] sm:$0xff] %v7782_v33  ;;  %v4018_v54 = vpop.f32.mrf.mxu1  ;;  %v3789_v37 = vadd.f32 %v3788_v23, %v7620_v32 }
 0x24e   : > { %v3790_v24 = vpop.f32.mrf.mxu0 }
 0x24f   : > { %v4020_v50 = vpop.f32.mrf.mxu1  ;;  %v7785_v21 = vadd.f32 %v4013_v20, %v3789_v37 }
 0x250   : > { %v3793_v5 = vpop.f32.mrf.mxu0 }
 0x251   : > { %v4023_v27 = vpop.f32.mrf.mxu1  ;;  %v3794_v16 = vadd.f32 %v3793_v5, %v7637_v44 }
 0x252   : > { %v3795_v49 = vpop.f32.mrf.mxu0 }
 0x253   : > { %v4025_v36 = vpop.f32.mrf.mxu1  ;;  %v7788_v41 = vadd.f32 %v4018_v54, %v3794_v16 }
 0x254   : > { %v3798_v17 = vpop.f32.mrf.mxu0 }
 0x255   : > { %8504 = vst [vmem:[#allocation26_spill] sm:$0xff] %v7788_v41  ;;  %v4028_v19 = vpop.f32.mrf.mxu1  ;;  %v3799_v4 = vadd.f32 %v3798_v17, %v7649_v1 }
 0x256   : > { %v3800_v59 = vpop.f32.mrf.mxu0 }
 0x257   : > { %v4030_v58 = vpop.f32.mrf.mxu1  ;;  %v7791_v51 = vadd.f32 %v4023_v27, %v3799_v4 }
 0x258   : > { %v3803_v32 = vpop.f32.mrf.mxu0 }
 0x259   : > { %8505 = vst [vmem:[#allocation66_spill] sm:$0xff] %v7791_v51  ;;  %v4033_v39 = vpop.f32.mrf.mxu1  ;;  %v3804_v38 = vadd.f32 %v3803_v32, %v7656_v6 }
 0x25a   : > { %v3805_v31 = vpop.f32.mrf.mxu0 }
 0x25b   : > { %v4035_v11 = vpop.f32.mrf.mxu1  ;;  %v7794_v10 = vadd.f32 %v4028_v19, %v3804_v38 }
 0x25c   : > { %v3808_v44 = vpop.f32.mrf.mxu0 }
 0x25d   : > { %8506 = vst [vmem:[#allocation65_spill] sm:$0xff] %v7794_v10  ;;  %v4038_v43 = vpop.f32.mrf.mxu1  ;;  %v3809_v25 = vadd.f32 %v3808_v44, %v7663_v40 }
 0x25e   : > { %v3810_v0 = vpop.f32.mrf.mxu0 }
 0x25f   : > { %v4040_v28 = vpop.f32.mrf.mxu1  ;;  %v7797_v45 = vadd.f32 %v4033_v39, %v3809_v25 }
 0x260   : > { %v3813_v1 = vpop.f32.mrf.mxu0 }
 0x261   : > { %8507 = vst [vmem:[#allocation23_spill] sm:$0xff] %v7797_v45  ;;  %v7799_v20 = vpop.f32.mrf.mxu1  ;;  %v3814_v8 = vadd.f32 %v3813_v1, %v7670_v61 }
 0x262   : > { %v3815_v56 = vpop.f32.mrf.mxu0 }
 0x263   : > { %v4045_v53 = vpop.f32.mrf.mxu1  ;;  %v7802_v6 = vadd.f32 %v4038_v43, %v3814_v8 }
 0x264   : > { %v3818_v23 = vpop.f32.mrf.mxu0 }
 0x265   : > { %v7804_v54 = vpop.f32.mrf.mxu1 }
 0x266   : > { %v3820_v37 = vpop.f32.mrf.mxu0 }
 0x267   : > { %v4050_v24 = vpop.f32.mrf.mxu1 }
 0x268   : > { %v3823_v50 = vpop.f32.mrf.mxu0 }
 0x269   : > { %v7806_v40 = vpop.f32.mrf.mxu1 }
 0x26a   : > { %v3825_v5 = vpop.f32.mrf.mxu0 }
 0x26b   : > { %v4055_v27 = vpop.f32.mrf.mxu1 }
 0x26c   : > { %v3828_v16 = vpop.f32.mrf.mxu0 }
 0x26d   : > { %v7808_v49 = vpop.f32.mrf.mxu1  ;;  %v3829_v33 = vadd.f32 %v3828_v16, %v7695_v63 }
 0x26e   : > { %v3830_v36 = vpop.f32.mrf.mxu0 }
 0x26f   : > { %v4060_v17 = vpop.f32.mrf.mxu1  ;;  %v4054_v16 = vadd.f32 %v7806_v40, %v3829_v33 }
 0x270   : > { %v3833_v61 = vpop.f32.mrf.mxu0 }
 0x271   : > { %v7810_v19 = vpop.f32.mrf.mxu1 }
 0x272   : > { %v3835_v4 = vpop.f32.mrf.mxu0 }
 0x273   : > { %v4065_v59 = vpop.f32.mrf.mxu1 }
 0x274   : > { %v3838_v58 = vpop.f32.mrf.mxu0 }
 0x275   : > { %v7812_v32 = vpop.f32.mrf.mxu1  ;;  %v3839_v63 = vadd.f32 %v3838_v58, %v7716_v34 }
 0x276   : > { %v3840_v39 = vpop.f32.mrf.mxu0 }
 0x277   : > { %v4070_v38 = vpop.f32.mrf.mxu1 }
 0x278   : > { %v7814_v31 = vpop.f32.mrf.mxu0 }
 0x279   : > { %v7816_v11 = vpop.f32.mrf.mxu1 }
 0x27a   : > { %v3845_v44 = vpop.f32.mrf.mxu0 }
 0x27b   : > { %v4075_v43 = vpop.f32.mrf.mxu1 }
 0x27c   : > { %v3848_v25 = vpop.f32.mrf.mxu0 }
 0x27d   : > { %v7818_v0 = vpop.f32.mrf.mxu1  ;;  %v3849_v33 = vadd.f32 %v3848_v25, %v7725_v35  ;;  %v3844_v35 = vadd.f32 %v7814_v31, %v7721_v60 }
 0x27e   : > { %v3850_v28 = vpop.f32.mrf.mxu0 }
 0x27f   : > { %v4080_v1 = vpop.f32.mrf.mxu1  ;;  %v4074_v60 = vadd.f32 %v7816_v11, %v3849_v33 }
 0x280   : > { %v7820_v8 = vpop.f32.mrf.mxu0 }
 0x281   : > { %v7822_v56 = vpop.f32.mrf.mxu1 }
 0x282   : > { %v3855_v53 = vpop.f32.mrf.mxu0 }
 0x283   : > { %v4085_v37 = vpop.f32.mrf.mxu1 }
 0x284   : > { %v7824_v24 = vpop.f32.mrf.mxu0 }
 0x285   : > { %v7826_v5 = vpop.f32.mrf.mxu1 }
 0x286   : > { %v3860_v27 = vpop.f32.mrf.mxu0 }
 0x287   : > { %v4090_v36 = vpop.f32.mrf.mxu1 }
 0x288   : > { %v7828_v17 = vpop.f32.mrf.mxu0 }
 0x289   : > { %v7830_v4 = vpop.f32.mrf.mxu1 }
 0x28a   : > { %v3865_v59 = vpop.f32.mrf.mxu0 }
 0x28b   : > { %v4095_v39 = vpop.f32.mrf.mxu1 }
 0x28c   : > { %v7832_v38 = vpop.f32.mrf.mxu0  ;;  %v3819_v39 = vadd.f32 %v3818_v23, %v7677_v29 }
 0x28d   : > { %v7834_v44 = vpop.f32.mrf.mxu1 }
 0x28e   : > { %v3870_v43 = vpop.f32.mrf.mxu0 }
 0x28f   : > { %v4100_v28 = vpop.f32.mrf.mxu1 }
 0x290   : > { %v7836_v1 = vpop.f32.mrf.mxu0 }
 0x291   : > { %v7838_v53 = vpop.f32.mrf.mxu1 }
 0x292   : > { %v3875_v37 = vpop.f32.mrf.mxu0 }
 0x293   : > { %v4105_v27 = vpop.f32.mrf.mxu1  ;;  %v4044_v37 = vadd.f32 %v7799_v20, %v3819_v39 }
 0x294   : > { %v7840_v36 = vpop.f32.mrf.mxu0 }
 0x295   : > { %v7842_v10 = vpop.f32.mrf.mxu1 }
 0x296   : > { %8508 = vst [vmem:[#allocation8_spill] sm:$0xff] %v7842_v10  ;;  %v3880_v45 = vpop.f32.mrf.mxu0 }
 0x297   : > { %v4110_v59 = vpop.f32.mrf.mxu1  ;;  %v3824_v45 = vadd.f32 %v3823_v50, %v7684_v62  ;;  %v3834_v62 = vadd.f32 %v3833_v61, %v7708_v15  ;;  %v4064_v15 = vadd.f32 %v7810_v19, %v3839_v63 }
 0x298   : > { %v7845_v41 = vpop.f32.mrf.mxu0 }
 0x299   : > { %v7847_v51 = vpop.f32.mrf.mxu1  ;;  %v4049_v34 = vadd.f32 %v7804_v54, %v3824_v45  ;;  %v4059_v25 = vadd.f32 %v7808_v49, %v3834_v62 }
 0x29a   : > { %v3885_v43 = vpop.f32.mrf.mxu0 }
 0x29b   : > { %v4115_v28 = vpop.f32.mrf.mxu1 }
 0x29c   : > { %v7852_v27 = vpop.f32.mrf.mxu0 }
 0x29d   : > { %v4707_v29 = vpop.f32.mrf.mxu1 }
 0x29e   : > { %v7860_v23 = vadd.f32 %v4707_v29, %v4044_v37  ;;  %v3890_v59 = vpop.f32.mrf.mxu0 }
 0x29f   : > { %v4263_v43 = vpop.f32.mrf.mxu1 }
 0x2a0   : > { %4359 = vst [vmem:[%s7857_s22 + $0x88] sm:$0xff] %v7860_v23  ;;  %v7866_v20 = vadd.f32 %v4263_v43, %v7802_v6  ;;  %v4683_v39 = vpop.f32.mrf.mxu0 }
 0x2a1   : > { %v4710_v28 = vpop.f32.mrf.mxu1  ;;  %v4189_v10 = vadd.f32 %v4683_v39, %v7755_v42 }
 0x2a2   : > { %4358 = vst [vmem:[%s7857_s22 + $0x80] sm:$0xff] %v7866_v20  ;;  %v7873_v50 = vadd.f32 %v4710_v28, %v4054_v16  ;;  %v4183_v58 = vpop.f32.mrf.mxu0 }
 0x2a3   : > { %v4273_v37 = vpop.f32.mrf.mxu1  ;;  %4343 = vst [vmem:[%s7857_s22 + $0x8] sm:$0xff] %v4189_v10  ;;  %v4184_v6 = vadd.f32 %v4183_v58, %v7752_v7  ;;  %v4413_v61 = vmul.f32 %v4189_v10, %v4189_v10 }
 0x2a4   : > { %4361 = vst [vmem:[%s7857_s22 + $0x98] sm:$0xff] %v7873_v50  ;;  %v7881_v42 = vadd.f32 %v4273_v37, %v4049_v34  ;;  %v4686_v40 = vpop.f32.mrf.mxu0 }
 0x2a5   : > { %v4713_v29 = vpop.f32.mrf.mxu1  ;;  %4342 = vst [vmem:[%s7857_s22] sm:$0xff] %v4184_v6  ;;  %v4374_v54 = vadd.f32 %v4189_v10, %v4184_v6  ;;  %v4412_v45 = vmul.f32 %v4184_v6, %v4184_v6  ;;  %v4199_v59 = vadd.f32 %v4686_v40, %v7761_v12  ;;  %v3859_v12 = vadd.f32 %v7824_v24, %v7731_v3 }
 0x2a6   : > { %4360 = vst [vmem:[%s7857_s22 + $0x90] sm:$0xff] %v7881_v42  ;;  %v7890_v7 = vadd.f32 %v4713_v29, %v4064_v15  ;;  %v4193_v19 = vpop.f32.mrf.mxu0  ;;  %v4069_v24 = vadd.f32 %v7812_v32, %v3844_v35 }
 0x2a7   : > { %v4444_v43 = vadd.f32 %v4413_v61, %v4412_v45  ;;  %v4283_v63 = vpop.f32.mrf.mxu1  ;;  %4345 = vst [vmem:[%s7857_s22 + $0x18] sm:$0xff] %v4199_v59  ;;  %v4194_v10 = vadd.f32 %v4193_v19, %v7758_v9  ;;  %v3854_v9 = vadd.f32 %v7820_v8, %v7728_v30  ;;  %v4415_v11 = vmul.f32 %v4199_v59, %v4199_v59 }
 0x2a8   : > { %4363 = vst [vmem:[%s7857_s22 + $0xa8] sm:$0xff] %v7890_v7  ;;  %v7899_v16 = vadd.f32 %v4283_v63, %v4059_v25  ;;  %v4689_v31 = vpop.f32.mrf.mxu0  ;;  %v4084_v8 = vadd.f32 %v7822_v56, %v3859_v12 }
 0x2a9   : > { %v4716_v39 = vpop.f32.mrf.mxu1  ;;  %4344 = vst [vmem:[%s7857_s22 + $0x10] sm:$0xff] %v4194_v10  ;;  %v4375_v49 = vadd.f32 %v4374_v54, %v4194_v10  ;;  %v4414_v28 = vmul.f32 %v4194_v10, %v4194_v10  ;;  %v4209_v62 = vadd.f32 %v4689_v31, %v7767_v48  ;;  %v3869_v48 = vadd.f32 %v7832_v38, %v7737_v52 }
 0x2aa   : > { %4362 = vst [vmem:[%s7857_s22 + $0xa0] sm:$0xff] %v7899_v16  ;;  %v7908_v3 = vadd.f32 %v4716_v39, %v4074_v60  ;;  %v4203_v34 = vpop.f32.mrf.mxu0  ;;  %v3864_v54 = vadd.f32 %v7828_v17, %v7734_v57  ;;  %v4079_v56 = vadd.f32 %v7818_v0, %v3854_v9  ;;  %v3874_v60 = vadd.f32 %v7836_v1, %v7740_v26 }
 0x2ab   : > { %v4445_v58 = vadd.f32 %v4444_v43, %v4414_v28  ;;  %v4293_v37 = vpop.f32.mrf.mxu1  ;;  %4347 = vst [vmem:[%s7857_s22 + $0x28] sm:$0xff] %v4209_v62  ;;  %v4204_v6 = vadd.f32 %v4203_v34, %v7764_v2  ;;  %v4376_v33 = vadd.f32 %v4375_v49, %v4199_v59  ;;  %v4417_v45 = vmul.f32 %v4209_v62, %v4209_v62 }
 0x2ac   : > { %4365 = vst [vmem:[%s7857_s22 + $0xb8] sm:$0xff] %v7908_v3  ;;  %v7917_v30 = vadd.f32 %v4293_v37, %v4069_v24  ;;  %v4692_v32 = vpop.f32.mrf.mxu0  ;;  %v4094_v17 = vadd.f32 %v7830_v4, %v3869_v48  ;;  %v4089_v4 = vadd.f32 %v7826_v5, %v3864_v54  ;;  %v8509_v48 = vld [vmem:[#allocation31_spill] sm:$0xff] }
 0x2ad   : > { %v4719_v15 = vpop.f32.mrf.mxu1  ;;  %4346 = vst [vmem:[%s7857_s22 + $0x20] sm:$0xff] %v4204_v6  ;;  %v4377_v40 = vadd.f32 %v4376_v33, %v4204_v6  ;;  %v4416_v61 = vmul.f32 %v4204_v6, %v4204_v6  ;;  %v4446_v29 = vadd.f32 %v4445_v58, %v4415_v11  ;;  %v4219_v2 = vadd.f32 %v4692_v32, %v7773_v55 }
 0x2ae   : > { %4364 = vst [vmem:[%s7857_s22 + $0xb0] sm:$0xff] %v7917_v30  ;;  %v7926_v52 = vadd.f32 %v4719_v15, %v4084_v8  ;;  %v4213_v38 = vpop.f32.mrf.mxu0  ;;  %v3879_v55 = vadd.f32 %v7840_v36, %v7743_v46  ;;  %v3884_v58 = vadd.f32 %v7845_v41, %v7746_v14 }
 0x2af   : > { %v4447_v59 = vadd.f32 %v4446_v29, %v4416_v61  ;;  %v4303_v35 = vpop.f32.mrf.mxu1  ;;  %4349 = vst [vmem:[%s7857_s22 + $0x38] sm:$0xff] %v4219_v2  ;;  %v4214_v25 = vadd.f32 %v4213_v38, %v7770_v13  ;;  %v4378_v19 = vadd.f32 %v4377_v40, %v4209_v62  ;;  %v4419_v31 = vmul.f32 %v4219_v2, %v4219_v2  ;;  %v8510_v29 = vld [vmem:[#allocation66_spill] sm:$0xff] }
 0x2b0   : > { %4367 = vst [vmem:[%s7857_s22 + $0xc8] sm:$0xff] %v7926_v52  ;;  %v7935_v57 = vadd.f32 %v4303_v35, %v4079_v56  ;;  %v4695_v0 = vpop.f32.mrf.mxu0  ;;  %v4104_v1 = vadd.f32 %v7838_v53, %v3879_v55  ;;  %v4099_v53 = vadd.f32 %v7834_v44, %v3874_v60  ;;  %v8511_v56 = vld [vmem:[#allocation8_spill] sm:$0xff] }
 0x2b1   : > { %v4722_v43 = vpop.f32.mrf.mxu1  ;;  %4348 = vst [vmem:[%s7857_s22 + $0x30] sm:$0xff] %v4214_v25  ;;  %v4379_v63 = vadd.f32 %v4378_v19, %v4214_v25  ;;  %v4418_v10 = vmul.f32 %v4214_v25, %v4214_v25  ;;  %v4448_v12 = vadd.f32 %v4447_v59, %v4417_v45  ;;  %v4229_v13 = vadd.f32 %v4695_v0, %v7779_v22  ;;  %v8512_v25 = vld [vmem:[#allocation26_spill] sm:$0xff] }
 0x2b2   : > { %4366 = vst [vmem:[%s7857_s22 + $0xc0] sm:$0xff] %v7935_v57  ;;  %v7944_v46 = vadd.f32 %v4722_v43, %v4094_v17  ;;  %v4223_v36 = vpop.f32.mrf.mxu0  ;;  %v3889_v22 = vadd.f32 %v7852_v27, %v7749_v18  ;;  %v4109_v38 = vadd.f32 %v8511_v56, %v3884_v58 }
 0x2b3   : > { %v4449_v39 = vadd.f32 %v4448_v12, %v4418_v10  ;;  %v4313_v49 = vpop.f32.mrf.mxu1  ;;  %4351 = vst [vmem:[%s7857_s22 + $0x48] sm:$0xff] %v4229_v13  ;;  %v4224_v28 = vadd.f32 %v4223_v36, %v7776_v47  ;;  %v4380_v62 = vadd.f32 %v4379_v63, %v4219_v2  ;;  %v4421_v37 = vmul.f32 %v4229_v13, %v4229_v13  ;;  %v8513_v12 = vld [vmem:[#allocation23_spill] sm:$0xff] }
 0x2b4   : > { %4369 = vst [vmem:[%s7857_s22 + $0xd8] sm:$0xff] %v7944_v46  ;;  %v7953_v26 = vadd.f32 %v4313_v49, %v4089_v4  ;;  %v4698_v5 = vpop.f32.mrf.mxu0  ;;  %v4114_v14 = vadd.f32 %v7847_v51, %v3889_v22 }
 0x2b5   : > { %v4725_v9 = vpop.f32.mrf.mxu1  ;;  %4350 = vst [vmem:[%s7857_s22 + $0x40] sm:$0xff] %v4224_v28  ;;  %v4381_v24 = vadd.f32 %v4380_v62, %v4224_v28  ;;  %v4420_v34 = vmul.f32 %v4224_v28, %v4224_v28  ;;  %v4450_v11 = vadd.f32 %v4449_v39, %v4419_v31  ;;  %v4239_v47 = vadd.f32 %v4698_v5, %v7785_v21  ;;  %v8514_v31 = vld [vmem:[#allocation65_spill] sm:$0xff] }
 0x2b6   : > { %4368 = vst [vmem:[%s7857_s22 + $0xd0] sm:$0xff] %v7953_v26  ;;  %v7962_v18 = vadd.f32 %v4725_v9, %v4104_v1  ;;  %v4233_v27 = vpop.f32.mrf.mxu0 }
 0x2b7   : > { %v4451_v6 = vadd.f32 %v4450_v11, %v4420_v34  ;;  %v4323_v33 = vpop.f32.mrf.mxu1  ;;  %4353 = vst [vmem:[%s7857_s22 + $0x58] sm:$0xff] %v4239_v47  ;;  %v4234_v8 = vadd.f32 %v4233_v27, %v8509_v48  ;;  %v4382_v32 = vadd.f32 %v4381_v24, %v4229_v13  ;;  %v4423_v59 = vmul.f32 %v4239_v47, %v4239_v47 }
 0x2b8   : > { %4371 = vst [vmem:[%s7857_s22 + $0xe8] sm:$0xff] %v7962_v18  ;;  %v7969_v21 = vadd.f32 %v4323_v33, %v4099_v53  ;;  %v4701_v41 = vpop.f32.mrf.mxu0  ;;  %v4428_v24 = vmul.f32 %v7866_v20, %v7866_v20  ;;  %v4430_v27 = vmul.f32 %v7881_v42, %v7881_v42  ;;  %v4431_v33 = vmul.f32 %v7873_v50, %v7873_v50 }
 0x2b9   : > { %v4728_v15 = vpop.f32.mrf.mxu1  ;;  %4352 = vst [vmem:[%s7857_s22 + $0x50] sm:$0xff] %v4234_v8  ;;  %v4383_v44 = vadd.f32 %v4382_v32, %v4234_v8  ;;  %v4422_v40 = vmul.f32 %v4234_v8, %v4234_v8  ;;  %v4452_v61 = vadd.f32 %v4451_v6, %v4421_v37  ;;  %v4249_v2 = vadd.f32 %v4701_v41, %v8510_v29 }
 0x2ba   : > { %4370 = vst [vmem:[%s7857_s22 + $0xe0] sm:$0xff] %v7969_v21  ;;  %v7976_v54 = vadd.f32 %v4728_v15, %v4114_v14  ;;  %v4243_v45 = vpop.f32.mrf.mxu0 }
 0x2bb   : > { %v4453_v51 = vadd.f32 %v4452_v61, %v4422_v40  ;;  %v4333_v35 = vpop.f32.mrf.mxu1  ;;  %4355 = vst [vmem:[%s7857_s22 + $0x68] sm:$0xff] %v4249_v2  ;;  %v4244_v19 = vadd.f32 %v4243_v45, %v8512_v25  ;;  %v4384_v55 = vadd.f32 %v4383_v44, %v4239_v47  ;;  %v4425_v4 = vmul.f32 %v4249_v2, %v4249_v2 }
 0x2bc   : > { %4373 = vst [vmem:[%s7857_s22 + $0xf8] sm:$0xff] %v7976_v54  ;;  %v7983_v17 = vadd.f32 %v4333_v35, %v4109_v38  ;;  %v4704_v0 = vpop.f32.mrf.mxu0  ;;  %v4429_v47 = vmul.f32 %v7860_v23, %v7860_v23 }
 0x2bd   : > { %4354 = vst [vmem:[%s7857_s22 + $0x60] sm:$0xff] %v4244_v19  ;;  %v4385_v43 = vadd.f32 %v4384_v55, %v4244_v19  ;;  %v4424_v63 = vmul.f32 %v4244_v19, %v4244_v19  ;;  %v4454_v10 = vadd.f32 %v4453_v51, %v4423_v59  ;;  %v4259_v13 = vadd.f32 %v4704_v0, %v8513_v12 }
 0x2be   : > { %4372 = vst [vmem:[%s7857_s22 + $0xf0] sm:$0xff] %v7983_v17  ;;  %v4253_v60 = vpop.f32.mrf.mxu0 }
 0x2bf   : > { %v4455_v36 = vadd.f32 %v4454_v10, %v4424_v63  ;;  %4357 = vst [vmem:[%s7857_s22 + $0x78] sm:$0xff] %v4259_v13  ;;  %v4254_v39 = vadd.f32 %v4253_v60, %v8514_v31  ;;  %v4386_v49 = vadd.f32 %v4385_v43, %v4249_v2  ;;  %v4427_v1 = vmul.f32 %v4259_v13, %v4259_v13 }
 0x2c0   : > { %v4443_v10 = vmul.f32 %v7976_v54, %v7976_v54 }
 0x2c1   : > { %4356 = vst [vmem:[%s7857_s22 + $0x70] sm:$0xff] %v4254_v39  ;;  %v4387_v28 = vadd.f32 %v4386_v49, %v4254_v39  ;;  %v4426_v62 = vmul.f32 %v4254_v39, %v4254_v39  ;;  %v4456_v22 = vadd.f32 %v4455_v36, %v4425_v4 }
 0x2c3   : > { %v4388_v5 = vadd.f32 %v4387_v28, %v4259_v13  ;;  %v4457_v9 = vadd.f32 %v4456_v22, %v4426_v62 }
 0x2c5   : > { %v4389_v34 = vadd.f32 %v4388_v5, %v7866_v20  ;;  %v4458_v11 = vadd.f32 %v4457_v9, %v4427_v1  ;;  %v4432_v20 = vmul.f32 %v7899_v16, %v7899_v16 }
 0x2c7   : > { %v4390_v58 = vadd.f32 %v4389_v34, %v7860_v23  ;;  %v4459_v53 = vadd.f32 %v4458_v11, %v4428_v24  ;;  %v4433_v23 = vmul.f32 %v7890_v7, %v7890_v7 }
 0x2c9   : > { %v4391_v37 = vadd.f32 %v4390_v58, %v7881_v42  ;;  %v4460_v6 = vadd.f32 %v4459_v53, %v4429_v47  ;;  %v4434_v42 = vmul.f32 %v7917_v30, %v7917_v30 }
 0x2cb   : > { %v4392_v48 = vadd.f32 %v4391_v37, %v7873_v50  ;;  %v4461_v8 = vadd.f32 %v4460_v6, %v4430_v27  ;;  %v4435_v50 = vmul.f32 %v7908_v3, %v7908_v3 }
 0x2cd   : > { %v4393_v32 = vadd.f32 %v4392_v48, %v7899_v16  ;;  %v4462_v14 = vadd.f32 %v4461_v8, %v4431_v33  ;;  %v4436_v16 = vmul.f32 %v7935_v57, %v7935_v57 }
 0x2cf   : > { %v4394_v41 = vadd.f32 %v4393_v32, %v7890_v7  ;;  %v4463_v15 = vadd.f32 %v4462_v14, %v4432_v20  ;;  %v4437_v7 = vmul.f32 %v7926_v52, %v7926_v52 }
 0x2d1   : > { %v4395_v44 = vadd.f32 %v4394_v41, %v7917_v30  ;;  %v4464_v40 = vadd.f32 %v4463_v15, %v4433_v23  ;;  %v4438_v30 = vmul.f32 %v7953_v26, %v7953_v26 }
 0x2d3   : > { %v4396_v61 = vadd.f32 %v4395_v44, %v7908_v3  ;;  %v4465_v29 = vadd.f32 %v4464_v40, %v4434_v42  ;;  %v4439_v3 = vmul.f32 %v7944_v46, %v7944_v46 }
 0x2d5   : > { %v4397_v2 = vadd.f32 %v4396_v61, %v7935_v57  ;;  %v4466_v56 = vadd.f32 %v4465_v29, %v4435_v50  ;;  %v4440_v57 = vmul.f32 %v7969_v21, %v7969_v21 }
 0x2d7   : > { %v4398_v38 = vadd.f32 %v4397_v2, %v7926_v52  ;;  %v4467_v45 = vadd.f32 %v4466_v56, %v4436_v16  ;;  %v4441_v52 = vmul.f32 %v7962_v18, %v7962_v18 }
 0x2d9   : > { %v4399_v59 = vadd.f32 %v4398_v38, %v7953_v26  ;;  %v4468_v51 = vadd.f32 %v4467_v45, %v4437_v7  ;;  %v4442_v26 = vmul.f32 %v7983_v17, %v7983_v17 }
 0x2db   : > { %v4400_v35 = vadd.f32 %v4399_v59, %v7944_v46  ;;  %v4469_v25 = vadd.f32 %v4468_v51, %v4438_v30 }
 0x2dd   : > { %v4401_v19 = vadd.f32 %v4400_v35, %v7969_v21  ;;  %v4470_v55 = vadd.f32 %v4469_v25, %v4439_v3 }
 0x2df   : > { %v4402_v0 = vadd.f32 %v4401_v19, %v7962_v18  ;;  %v4471_v43 = vadd.f32 %v4470_v55, %v4440_v57 }
 0x2e1   : > { %v4403_v63 = vadd.f32 %v4402_v0, %v7983_v17  ;;  %v4472_v46 = vadd.f32 %v4471_v43, %v4441_v52 }
 0x2e3   : > { %v4404_v21 = vadd.f32 %v4403_v63, %v7976_v54  ;;  %v4473_v12 = vadd.f32 %v4472_v46, %v4442_v26 }
 0x2e5   : > { %v4405_v13 = vrot.slane %v4404_v21, 4  ;;  %v4474_v60 = vadd.f32 %v4473_v12, %v4443_v10 }
 0x2e7   : > { %v4406_v4 = vadd.f32 %v4405_v13, %v4404_v21  ;;  %v4475_v36 = vrot.slane %v4474_v60, 4 }
 0x2e9   : > { %v4407_v18 = vrot.slane %v4406_v4, 2  ;;  %v4476_v31 = vadd.f32 %v4475_v36, %v4474_v60 }
 0x2eb   : > { %v4408_v39 = vadd.f32 %v4407_v18, %v4406_v4  ;;  %v4477_v49 = vrot.slane %v4476_v31, 2 }
 0x2ed   : > { %v4409_v28 = vrot.slane %v4408_v39, 1  ;;  %v4478_v62 = vadd.f32 %v4477_v49, %v4476_v31 }
 0x2ef   : > { %v4410_v17 = vadd.f32 %v4409_v28, %v4408_v39  ;;  %v4479_v22 = vrot.slane %v4478_v62, 1 }
 0x2f1   : > { %4411 = vst [vmem:[%s319_s25] sm:$0x1] %v4410_v17  ;;  %v4480_v54 = vadd.f32 %v4479_v22, %v4478_v62 }
 0x2f3   : > { %4481 = vst [vmem:[%s322_s30] sm:$0x1] %v4480_v54 }
 0x2f4 PF: > { %s19_s27 = sadd.s32 1, %s4783_s27  }
 0x2f5   : > { %p16_p4 = scmp.ge.s32.totalorder %s19_s27, 4  }
 0x2f7   :  { %18 = sbr.rel (!%p16_p4) target bundleno = 1 (0x1), region = 98 }

</bundles_post_ra>
